<compile_context>
chip_gen: v5e
topology: v5e:2x2
jax: 0.10.0
libtpu: 0.0.40
codegen_flags: <defaults>
</compile_context>

<pallas_src>
import functools

import jax
import jax.numpy as jnp
from jax.experimental import pallas as pl
from jax.experimental.pallas import tpu as pltpu

_CompilerParams = getattr(pltpu, "CompilerParams", None) or getattr(
    pltpu, "TPUCompilerParams")

# Static layer table for the 28x28x1 input the module implies
# (fc1 expects 20 * 2 * 2 = 80 flattened features).
#   (H, W, Cin, Cout, pooled_rows) ; pooled_rows = next layer's flat row count
#   (+1 zero pad row so the next conv's shifted slices stay in bounds).
_LAYERS = (
    (28, 28, 1, 10, 13 * 13 + 1),   # conv1 -> pool -> 13x13x10
    (13, 13, 10, 10, 6 * 6 + 1),    # conv2 -> pool -> 6x6x10
    (6, 6, 10, 20, 2 * 2),          # conv3 -> pool -> 2x2x20
)
_H0, _W0 = _LAYERS[0][0], _LAYERS[0][1]
_PIN1 = _H0 * _W0 + 8               # flat input rows (>= H*W + 1), zero padded


# ------------------------------- fused kernel --------------------------------

def _fused_forward_kernel(x_ref,
                          w1_ref, b1_ref, g1_ref,
                          w2_ref, b2_ref, g2_ref,
                          w3_ref, b3_ref, g3_ref,
                          fw1_ref, fb1_ref, fw2_ref, fb2_ref,
                          o_ref, *, layer_hw):
    """Entire forward pass for one image; all activations stay in VMEM."""

    def conv_pool_relu(x, w_ref, b_ref, g_ref, H, W):
        # x: (P, Cin) flat activation, row = h*W + w (rows >= H*W are zero).
        cin = w_ref.shape[0] // 4
        R = (H - 1) * W                                 # conv rows (h < H-1, all w)
        # 2x2 conv as 4 accumulated matmuls over row-shifted views.
        acc = None
        for t, (kh, kw) in enumerate(((0, 0), (0, 1), (1, 0), (1, 1))):
            off = kh * W + kw
            patch = x[off:off + R, :]                   # (R, Cin)
            term = jnp.dot(patch, w_ref[t * cin:(t + 1) * cin, :],
                           preferred_element_type=jnp.float32)
            acc = term if acc is None else acc + term
        acc = acc + b_ref[...]                          # + conv bias (1, Cout)
        # 2x2 max-pool + ReLU via 4 one-hot selection matmuls; the selection
        # matrices only pick valid conv cells and emit trailing zero pad rows.
        pooled = None
        for t in range(4):
            sel = jnp.dot(g_ref[t], acc, preferred_element_type=jnp.float32)
            pooled = sel if pooled is None else jnp.maximum(pooled, sel)
        return jnp.maximum(pooled, 0.0)

    x = x_ref[0]                                        # (_PIN1, 1)
    for (w_ref, b_ref, g_ref), (H, W) in zip(
            ((w1_ref, b1_ref, g1_ref),
             (w2_ref, b2_ref, g2_ref),
             (w3_ref, b3_ref, g3_ref)), layer_hw):
        x = conv_pool_relu(x, w_ref, b_ref, g_ref, H, W)

    # x: (4, 20) with row r = h*2 + w.  fc1 weight rows were pre-permuted to
    # (r, c) order, so fc1 is 4 accumulated (1,20)@(20,hidden) matmuls (no
    # in-kernel flatten/transpose needed).
    c3 = x.shape[1]
    h = None
    for r in range(x.shape[0]):
        term = jnp.dot(x[r:r + 1, :], fw1_ref[r * c3:(r + 1) * c3, :],
                       preferred_element_type=jnp.float32)
        h = term if h is None else h + term
    h = jnp.maximum(h + fb1_ref[...], 0.0)              # fc1 + ReLU
    # TODO(synk): nn.Dropout2d(p=0.5) is identity in eval mode; training-mode RNG mask not implemented.
    o_ref[0] = jnp.dot(h, fw2_ref[...],
                       preferred_element_type=jnp.float32) + fb2_ref[...]


# ------------------------- one-time constant preparation ---------------------

def _pool_select_matrices(H, W, pout):
    """(4, pout, (H-1)*W) one-hot gather matrices implementing 2x2 max-pool taps."""
    Ho, Wo = H - 1, W - 1
    Hp, Wp = Ho // 2, Wo // 2
    R = Ho * W
    p = jnp.arange(pout)
    hp, wp = p // Wp, p % Wp
    valid = (p < Hp * Wp)[:, None]
    cols = jnp.arange(R)[None, :]
    mats = []
    for dh in (0, 1):
        for dw in (0, 1):
            r = (2 * hp + dh) * W + (2 * wp + dw)
            mats.append(((cols == r[:, None]) & valid).astype(jnp.float32))
    return jnp.stack(mats, axis=0)


def prepare_constants(params, hidden_size):
    """Weight re-layout + pooling selection matrices, done once at setup."""
    def conv_mat(w):   # (Cout, Cin, 2, 2) -> (4*Cin, Cout), row = (2kh+kw)*Cin + ci
        cout, cin = w.shape[0], w.shape[1]
        return jnp.transpose(w, (2, 3, 1, 0)).reshape(4 * cin, cout)

    consts = []
    for (H, W, _cin, _cout, pout), wk, bk in zip(
            _LAYERS,
            (params["w1"], params["w2"], params["w3"]),
            (params["b1"], params["b2"], params["b3"])):
        consts += [conv_mat(wk), bk.reshape(1, -1), _pool_select_matrices(H, W, pout)]

    # fc1: PyTorch flattens NCHW -> feature f = c*4 + (h*2 + w).  The kernel
    # holds a (4, 20) activation with row r = h*2 + w, so permute fc1 rows to
    # (r, c) order:  w1fc[r*20 + c, j] = fw1[j, c*4 + r].
    c3 = _LAYERS[-1][3]            # 20 channels
    sp = _LAYERS[-1][4]            # 4 spatial positions
    fw1 = params["fw1"]            # (hidden, 80)
    w1fc = jnp.transpose(fw1.reshape(hidden_size, c3, sp),
                         (2, 1, 0)).reshape(sp * c3, hidden_size)
    consts += [w1fc, params["fb1"].reshape(1, -1),
               params["fw2"].T, params["fb2"].reshape(1, -1)]
    return tuple(consts)


# ------------------------------ model forward ---------------------------------

def _cost_estimate(batch, consts, n_classes):
    flops = 0
    for (H, W, cin, cout, pout) in _LAYERS:
        R = (H - 1) * W
        flops += 4 * 2 * R * cin * cout          # conv tap matmuls
        flops += 4 * 2 * pout * R * cout         # pool selection matmuls
    hidden = consts[-2].shape[0]                 # fw2.T is (hidden, n_classes)
    flops += 2 * _LAYERS[-1][3] * _LAYERS[-1][4] * hidden + 2 * hidden * n_classes
    flops *= batch
    bytes_accessed = 4 * (batch * _PIN1
                          + sum(int(c.size) for c in consts)
                          + batch * n_classes)
    if hasattr(pl, "CostEstimate"):
        return pl.CostEstimate(flops=flops, transcendentals=0,
                               bytes_accessed=bytes_accessed)
    return None


def image_classifier_forward(x_nchw, consts):
    """Pallas implementation of ImageClassifier.forward (eval mode)."""
    B = x_nchw.shape[0]
    n_classes = consts[-1].shape[-1]
    # NCHW (B,1,28,28) -> flat (B, H*W, 1), row = h*W + w, plus zero pad rows.
    x_flat = x_nchw.reshape(B, _H0 * _W0, 1)
    x_flat = jnp.pad(x_flat, ((0, 0), (0, _PIN1 - _H0 * _W0), (0, 0)))

    def _const_spec(c):
        nd = c.ndim
        return pl.BlockSpec(c.shape, lambda b, _nd=nd: (0,) * _nd)

    kernel = functools.partial(
        _fused_forward_kernel,
        layer_hw=tuple((H, W) for (H, W, *_r) in _LAYERS))

    out = pl.pallas_call(
        kernel,
        out_shape=jax.ShapeDtypeStruct((B, 1, n_classes), jnp.float32),
        grid=(B,),
        in_specs=[pl.BlockSpec((1, _PIN1, 1), lambda b: (b, 0, 0))]
                 + [_const_spec(c) for c in consts],
        out_specs=pl.BlockSpec((1, 1, n_classes), lambda b: (b, 0, 0)),
        compiler_params=_CompilerParams(
            dimension_semantics=("parallel",),    # shard batch across TCs (v7x)
            vmem_limit_bytes=32 * 1024 * 1024),
        cost_estimate=_cost_estimate(B, consts, n_classes),
    )(x_flat, *consts)
    return out[:, 0, :]


# ------------------------------ reference (JAX) -------------------------------

def reference_forward(x_nchw, params):
    def conv(x, w, b):
        y = jax.lax.conv_general_dilated(
            x, w, (1, 1), "VALID",
            dimension_numbers=("NCHW", "OIHW", "NCHW"))
        return y + b[None, :, None, None]

    def pool(x):
        N, C, H, W = x.shape
        x = x[:, :, : H // 2 * 2, : W // 2 * 2]
        x = x.reshape(N, C, H // 2, 2, W // 2, 2)
        return x.max(axis=(3, 5))

    relu = lambda v: jnp.maximum(v, 0.0)
    x = relu(pool(conv(x_nchw, params["w1"], params["b1"])))
    x = relu(pool(conv(x, params["w2"], params["b2"])))
    x = relu(pool(conv(x, params["w3"], params["b3"])))
    x = x.reshape(x.shape[0], -1)
    x = relu(x @ params["fw1"].T + params["fb1"])
    x = x @ params["fw2"].T + params["fb2"]
    return x


# ---------------------------------- main ---------------------------------------

def init_params(key, n_classes, hidden_size):
    ks = jax.random.split(key, 10)
    u = lambda k, shape, bound: jax.random.uniform(
        k, shape, jnp.float32, -bound, bound)
    return {
        "w1": u(ks[0], (10, 1, 2, 2), 0.5),   "b1": u(ks[1], (10,), 0.5),
        "w2": u(ks[2], (10, 10, 2, 2), 0.15), "b2": u(ks[3], (10,), 0.15),
        "w3": u(ks[4], (20, 10, 2, 2), 0.15), "b3": u(ks[5], (20,), 0.15),
        "fw1": u(ks[6], (hidden_size, 80), 0.1), "fb1": u(ks[7], (hidden_size,), 0.1),
        "fw2": u(ks[8], (n_classes, hidden_size), 0.15),
        "fb2": u(ks[9], (n_classes,), 0.15),
    }


if __name__ == "__main__":
    n_classes, hidden_size = 10, 32
    key = jax.random.PRNGKey(0)
    k_x, k_p = jax.random.split(key)
    # MNIST-like input: 28x28 single channel so the flattened conv output is 80.
    x = jax.random.normal(k_x, (2, 1, 28, 28), dtype=jnp.float32)
    params = init_params(k_p, n_classes, hidden_size)
    consts = prepare_constants(params, hidden_size)

    out = jax.block_until_ready(image_classifier_forward(x, consts))
    ref = jax.block_until_ready(reference_forward(x, params))

    assert out.shape == (2, n_classes), out.shape
    err = float(jnp.max(jnp.abs(out - ref)))
    assert jnp.allclose(out, ref, rtol=1e-3, atol=1e-3), (
        f"mismatch vs reference: max abs err {err}")

    print("KERNEL_OK")
</pallas_src>

<mosaic_0001>
module attributes {stable_mosaic.version = 11 : i64} {
  func.func @_fused_forward_kernel(%arg0: i32, %arg1: memref<1x792x1xf32, #tpu.memory_space<vmem>>, %arg2: memref<4x10xf32, #tpu.memory_space<vmem>>, %arg3: memref<1x10xf32, #tpu.memory_space<vmem>>, %arg4: memref<4x170x756xf32, #tpu.memory_space<vmem>>, %arg5: memref<40x10xf32, #tpu.memory_space<vmem>>, %arg6: memref<1x10xf32, #tpu.memory_space<vmem>>, %arg7: memref<4x37x156xf32, #tpu.memory_space<vmem>>, %arg8: memref<40x20xf32, #tpu.memory_space<vmem>>, %arg9: memref<1x20xf32, #tpu.memory_space<vmem>>, %arg10: memref<4x4x30xf32, #tpu.memory_space<vmem>>, %arg11: memref<80x32xf32, #tpu.memory_space<vmem>>, %arg12: memref<1x32xf32, #tpu.memory_space<vmem>>, %arg13: memref<32x10xf32, #tpu.memory_space<vmem>>, %arg14: memref<1x10xf32, #tpu.memory_space<vmem>>, %arg15: memref<1x1x10xf32, #tpu.memory_space<vmem>>) attributes {dimension_semantics = [#tpu.dimension_semantics<parallel>], iteration_bounds = array<i64: 2>, scalar_prefetch = 0 : i64, scratch_operands = 0 : i64, tpu.core_type = #tpu.core_type<tc>, window_params = [{transform_indices = @transform_0, window_bounds = array<i64: 1, 792, 1>}, {pipeline_mode = #tpu.pipeline_mode<synchronous>, transform_indices = @transform_1, window_bounds = array<i64: 4, 10>}, {pipeline_mode = #tpu.pipeline_mode<synchronous>, transform_indices = @transform_2, window_bounds = array<i64: 1, 10>}, {pipeline_mode = #tpu.pipeline_mode<synchronous>, transform_indices = @transform_3, window_bounds = array<i64: 4, 170, 756>}, {pipeline_mode = #tpu.pipeline_mode<synchronous>, transform_indices = @transform_4, window_bounds = array<i64: 40, 10>}, {pipeline_mode = #tpu.pipeline_mode<synchronous>, transform_indices = @transform_5, window_bounds = array<i64: 1, 10>}, {pipeline_mode = #tpu.pipeline_mode<synchronous>, transform_indices = @transform_6, window_bounds = array<i64: 4, 37, 156>}, {pipeline_mode = #tpu.pipeline_mode<synchronous>, transform_indices = @transform_7, window_bounds = array<i64: 40, 20>}, {pipeline_mode = #tpu.pipeline_mode<synchronous>, transform_indices = @transform_8, window_bounds = array<i64: 1, 20>}, {pipeline_mode = #tpu.pipeline_mode<synchronous>, transform_indices = @transform_9, window_bounds = array<i64: 4, 4, 30>}, {pipeline_mode = #tpu.pipeline_mode<synchronous>, transform_indices = @transform_10, window_bounds = array<i64: 80, 32>}, {pipeline_mode = #tpu.pipeline_mode<synchronous>, transform_indices = @transform_11, window_bounds = array<i64: 1, 32>}, {pipeline_mode = #tpu.pipeline_mode<synchronous>, transform_indices = @transform_12, window_bounds = array<i64: 32, 10>}, {pipeline_mode = #tpu.pipeline_mode<synchronous>, transform_indices = @transform_13, window_bounds = array<i64: 1, 10>}, {transform_indices = @transform_14, window_bounds = array<i64: 1, 1, 10>}]} {
    %c0 = arith.constant 0 : index
    %c0_0 = arith.constant 0 : index
    %c0_1 = arith.constant 0 : index
    %0 = vector.load %arg1[%c0, %c0_0, %c0_1] : memref<1x792x1xf32, #tpu.memory_space<vmem>>, vector<1x792x1xf32>
    %1 = vector.shape_cast %0 : vector<1x792x1xf32> to vector<792x1xf32>
    %2 = vector.extract_strided_slice %1 {offsets = [0, 0], sizes = [756, 1], strides = [1, 1]} : vector<792x1xf32> to vector<756x1xf32>
    %c0_2 = arith.constant 0 : index
    %c0_3 = arith.constant 0 : index
    %3 = vector.load %arg2[%c0_2, %c0_3] : memref<4x10xf32, #tpu.memory_space<vmem>>, vector<1x10xf32>
    %cst = arith.constant dense<0.000000e+00> : vector<756x10xf32>
    %4 = tpu.matmul %2, %3, %cst {dimension_numbers = #tpu.dot_dimension_numbers<[1], [0], [0], [1], [0, 0, 1, 1], [], []>} : vector<756x1xf32>, vector<1x10xf32>, vector<756x10xf32> -> vector<756x10xf32>
    %5 = vector.extract_strided_slice %1 {offsets = [1, 0], sizes = [756, 1], strides = [1, 1]} : vector<792x1xf32> to vector<756x1xf32>
    %c1 = arith.constant 1 : index
    %c0_4 = arith.constant 0 : index
    %6 = vector.load %arg2[%c1, %c0_4] : memref<4x10xf32, #tpu.memory_space<vmem>>, vector<1x10xf32>
    %cst_5 = arith.constant dense<0.000000e+00> : vector<756x10xf32>
    %7 = tpu.matmul %5, %6, %cst_5 {dimension_numbers = #tpu.dot_dimension_numbers<[1], [0], [0], [1], [0, 0, 1, 1], [], []>} : vector<756x1xf32>, vector<1x10xf32>, vector<756x10xf32> -> vector<756x10xf32>
    %8 = arith.addf %4, %7 : vector<756x10xf32>
    %9 = vector.extract_strided_slice %1 {offsets = [28, 0], sizes = [756, 1], strides = [1, 1]} : vector<792x1xf32> to vector<756x1xf32>
    %c2 = arith.constant 2 : index
    %c0_6 = arith.constant 0 : index
    %10 = vector.load %arg2[%c2, %c0_6] : memref<4x10xf32, #tpu.memory_space<vmem>>, vector<1x10xf32>
    %cst_7 = arith.constant dense<0.000000e+00> : vector<756x10xf32>
    %11 = tpu.matmul %9, %10, %cst_7 {dimension_numbers = #tpu.dot_dimension_numbers<[1], [0], [0], [1], [0, 0, 1, 1], [], []>} : vector<756x1xf32>, vector<1x10xf32>, vector<756x10xf32> -> vector<756x10xf32>
    %12 = arith.addf %8, %11 : vector<756x10xf32>
    %13 = vector.extract_strided_slice %1 {offsets = [29, 0], sizes = [756, 1], strides = [1, 1]} : vector<792x1xf32> to vector<756x1xf32>
    %c3 = arith.constant 3 : index
    %c0_8 = arith.constant 0 : index
    %14 = vector.load %arg2[%c3, %c0_8] : memref<4x10xf32, #tpu.memory_space<vmem>>, vector<1x10xf32>
    %cst_9 = arith.constant dense<0.000000e+00> : vector<756x10xf32>
    %15 = tpu.matmul %13, %14, %cst_9 {dimension_numbers = #tpu.dot_dimension_numbers<[1], [0], [0], [1], [0, 0, 1, 1], [], []>} : vector<756x1xf32>, vector<1x10xf32>, vector<756x10xf32> -> vector<756x10xf32>
    %16 = arith.addf %12, %15 : vector<756x10xf32>
    %c0_10 = arith.constant 0 : index
    %c0_11 = arith.constant 0 : index
    %17 = vector.load %arg3[%c0_10, %c0_11] : memref<1x10xf32, #tpu.memory_space<vmem>>, vector<1x10xf32>
    %18 = vector.broadcast %17 : vector<1x10xf32> to vector<756x10xf32>
    %19 = arith.addf %16, %18 : vector<756x10xf32>
    %c0_12 = arith.constant 0 : index
    %c0_13 = arith.constant 0 : index
    %c0_14 = arith.constant 0 : index
    %20 = vector.load %arg4[%c0_12, %c0_13, %c0_14] : memref<4x170x756xf32, #tpu.memory_space<vmem>>, vector<1x170x756xf32>
    %21 = vector.shape_cast %20 : vector<1x170x756xf32> to vector<170x756xf32>
    %cst_15 = arith.constant dense<0.000000e+00> : vector<170x10xf32>
    %22 = tpu.matmul %21, %19, %cst_15 {dimension_numbers = #tpu.dot_dimension_numbers<[1], [0], [0], [1], [0, 0, 1, 1], [], []>} : vector<170x756xf32>, vector<756x10xf32>, vector<170x10xf32> -> vector<170x10xf32>
    %c1_16 = arith.constant 1 : index
    %c0_17 = arith.constant 0 : index
    %c0_18 = arith.constant 0 : index
    %23 = vector.load %arg4[%c1_16, %c0_17, %c0_18] : memref<4x170x756xf32, #tpu.memory_space<vmem>>, vector<1x170x756xf32>
    %24 = vector.shape_cast %23 : vector<1x170x756xf32> to vector<170x756xf32>
    %cst_19 = arith.constant dense<0.000000e+00> : vector<170x10xf32>
    %25 = tpu.matmul %24, %19, %cst_19 {dimension_numbers = #tpu.dot_dimension_numbers<[1], [0], [0], [1], [0, 0, 1, 1], [], []>} : vector<170x756xf32>, vector<756x10xf32>, vector<170x10xf32> -> vector<170x10xf32>
    %26 = arith.maximumf %22, %25 : vector<170x10xf32>
    %c2_20 = arith.constant 2 : index
    %c0_21 = arith.constant 0 : index
    %c0_22 = arith.constant 0 : index
    %27 = vector.load %arg4[%c2_20, %c0_21, %c0_22] : memref<4x170x756xf32, #tpu.memory_space<vmem>>, vector<1x170x756xf32>
    %28 = vector.shape_cast %27 : vector<1x170x756xf32> to vector<170x756xf32>
    %cst_23 = arith.constant dense<0.000000e+00> : vector<170x10xf32>
    %29 = tpu.matmul %28, %19, %cst_23 {dimension_numbers = #tpu.dot_dimension_numbers<[1], [0], [0], [1], [0, 0, 1, 1], [], []>} : vector<170x756xf32>, vector<756x10xf32>, vector<170x10xf32> -> vector<170x10xf32>
    %30 = arith.maximumf %26, %29 : vector<170x10xf32>
    %c3_24 = arith.constant 3 : index
    %c0_25 = arith.constant 0 : index
    %c0_26 = arith.constant 0 : index
    %31 = vector.load %arg4[%c3_24, %c0_25, %c0_26] : memref<4x170x756xf32, #tpu.memory_space<vmem>>, vector<1x170x756xf32>
    %32 = vector.shape_cast %31 : vector<1x170x756xf32> to vector<170x756xf32>
    %cst_27 = arith.constant dense<0.000000e+00> : vector<170x10xf32>
    %33 = tpu.matmul %32, %19, %cst_27 {dimension_numbers = #tpu.dot_dimension_numbers<[1], [0], [0], [1], [0, 0, 1, 1], [], []>} : vector<170x756xf32>, vector<756x10xf32>, vector<170x10xf32> -> vector<170x10xf32>
    %34 = arith.maximumf %30, %33 : vector<170x10xf32>
    %cst_28 = arith.constant 0.000000e+00 : f32
    %35 = vector.broadcast %cst_28 : f32 to vector<170x10xf32>
    %36 = arith.maximumf %34, %35 : vector<170x10xf32>
    %37 = vector.extract_strided_slice %36 {offsets = [0, 0], sizes = [156, 10], strides = [1, 1]} : vector<170x10xf32> to vector<156x10xf32>
    %c0_29 = arith.constant 0 : index
    %c0_30 = arith.constant 0 : index
    %38 = vector.load %arg5[%c0_29, %c0_30] : memref<40x10xf32, #tpu.memory_space<vmem>>, vector<10x10xf32>
    %cst_31 = arith.constant dense<0.000000e+00> : vector<156x10xf32>
    %39 = tpu.matmul %37, %38, %cst_31 {dimension_numbers = #tpu.dot_dimension_numbers<[1], [0], [0], [1], [0, 0, 1, 1], [], []>} : vector<156x10xf32>, vector<10x10xf32>, vector<156x10xf32> -> vector<156x10xf32>
    %40 = vector.extract_strided_slice %36 {offsets = [1, 0], sizes = [156, 10], strides = [1, 1]} : vector<170x10xf32> to vector<156x10xf32>
    %c10 = arith.constant 10 : index
    %c0_32 = arith.constant 0 : index
    %41 = vector.load %arg5[%c10, %c0_32] : memref<40x10xf32, #tpu.memory_space<vmem>>, vector<10x10xf32>
    %cst_33 = arith.constant dense<0.000000e+00> : vector<156x10xf32>
    %42 = tpu.matmul %40, %41, %cst_33 {dimension_numbers = #tpu.dot_dimension_numbers<[1], [0], [0], [1], [0, 0, 1, 1], [], []>} : vector<156x10xf32>, vector<10x10xf32>, vector<156x10xf32> -> vector<156x10xf32>
    %43 = arith.addf %39, %42 : vector<156x10xf32>
    %44 = vector.extract_strided_slice %36 {offsets = [13, 0], sizes = [156, 10], strides = [1, 1]} : vector<170x10xf32> to vector<156x10xf32>
    %c20 = arith.constant 20 : index
    %c0_34 = arith.constant 0 : index
    %45 = vector.load %arg5[%c20, %c0_34] : memref<40x10xf32, #tpu.memory_space<vmem>>, vector<10x10xf32>
    %cst_35 = arith.constant dense<0.000000e+00> : vector<156x10xf32>
    %46 = tpu.matmul %44, %45, %cst_35 {dimension_numbers = #tpu.dot_dimension_numbers<[1], [0], [0], [1], [0, 0, 1, 1], [], []>} : vector<156x10xf32>, vector<10x10xf32>, vector<156x10xf32> -> vector<156x10xf32>
    %47 = arith.addf %43, %46 : vector<156x10xf32>
    %48 = vector.extract_strided_slice %36 {offsets = [14, 0], sizes = [156, 10], strides = [1, 1]} : vector<170x10xf32> to vector<156x10xf32>
    %c30 = arith.constant 30 : index
    %c0_36 = arith.constant 0 : index
    %49 = vector.load %arg5[%c30, %c0_36] : memref<40x10xf32, #tpu.memory_space<vmem>>, vector<10x10xf32>
    %cst_37 = arith.constant dense<0.000000e+00> : vector<156x10xf32>
    %50 = tpu.matmul %48, %49, %cst_37 {dimension_numbers = #tpu.dot_dimension_numbers<[1], [0], [0], [1], [0, 0, 1, 1], [], []>} : vector<156x10xf32>, vector<10x10xf32>, vector<156x10xf32> -> vector<156x10xf32>
    %51 = arith.addf %47, %50 : vector<156x10xf32>
    %c0_38 = arith.constant 0 : index
    %c0_39 = arith.constant 0 : index
    %52 = vector.load %arg6[%c0_38, %c0_39] : memref<1x10xf32, #tpu.memory_space<vmem>>, vector<1x10xf32>
    %53 = vector.broadcast %52 : vector<1x10xf32> to vector<156x10xf32>
    %54 = arith.addf %51, %53 : vector<156x10xf32>
    %c0_40 = arith.constant 0 : index
    %c0_41 = arith.constant 0 : index
    %c0_42 = arith.constant 0 : index
    %55 = vector.load %arg7[%c0_40, %c0_41, %c0_42] : memref<4x37x156xf32, #tpu.memory_space<vmem>>, vector<1x37x156xf32>
    %56 = vector.shape_cast %55 : vector<1x37x156xf32> to vector<37x156xf32>
    %cst_43 = arith.constant dense<0.000000e+00> : vector<37x10xf32>
    %57 = tpu.matmul %56, %54, %cst_43 {dimension_numbers = #tpu.dot_dimension_numbers<[1], [0], [0], [1], [0, 0, 1, 1], [], []>} : vector<37x156xf32>, vector<156x10xf32>, vector<37x10xf32> -> vector<37x10xf32>
    %c1_44 = arith.constant 1 : index
    %c0_45 = arith.constant 0 : index
    %c0_46 = arith.constant 0 : index
    %58 = vector.load %arg7[%c1_44, %c0_45, %c0_46] : memref<4x37x156xf32, #tpu.memory_space<vmem>>, vector<1x37x156xf32>
    %59 = vector.shape_cast %58 : vector<1x37x156xf32> to vector<37x156xf32>
    %cst_47 = arith.constant dense<0.000000e+00> : vector<37x10xf32>
    %60 = tpu.matmul %59, %54, %cst_47 {dimension_numbers = #tpu.dot_dimension_numbers<[1], [0], [0], [1], [0, 0, 1, 1], [], []>} : vector<37x156xf32>, vector<156x10xf32>, vector<37x10xf32> -> vector<37x10xf32>
    %61 = arith.maximumf %57, %60 : vector<37x10xf32>
    %c2_48 = arith.constant 2 : index
    %c0_49 = arith.constant 0 : index
    %c0_50 = arith.constant 0 : index
    %62 = vector.load %arg7[%c2_48, %c0_49, %c0_50] : memref<4x37x156xf32, #tpu.memory_space<vmem>>, vector<1x37x156xf32>
    %63 = vector.shape_cast %62 : vector<1x37x156xf32> to vector<37x156xf32>
    %cst_51 = arith.constant dense<0.000000e+00> : vector<37x10xf32>
    %64 = tpu.matmul %63, %54, %cst_51 {dimension_numbers = #tpu.dot_dimension_numbers<[1], [0], [0], [1], [0, 0, 1, 1], [], []>} : vector<37x156xf32>, vector<156x10xf32>, vector<37x10xf32> -> vector<37x10xf32>
    %65 = arith.maximumf %61, %64 : vector<37x10xf32>
    %c3_52 = arith.constant 3 : index
    %c0_53 = arith.constant 0 : index
    %c0_54 = arith.constant 0 : index
    %66 = vector.load %arg7[%c3_52, %c0_53, %c0_54] : memref<4x37x156xf32, #tpu.memory_space<vmem>>, vector<1x37x156xf32>
    %67 = vector.shape_cast %66 : vector<1x37x156xf32> to vector<37x156xf32>
    %cst_55 = arith.constant dense<0.000000e+00> : vector<37x10xf32>
    %68 = tpu.matmul %67, %54, %cst_55 {dimension_numbers = #tpu.dot_dimension_numbers<[1], [0], [0], [1], [0, 0, 1, 1], [], []>} : vector<37x156xf32>, vector<156x10xf32>, vector<37x10xf32> -> vector<37x10xf32>
    %69 = arith.maximumf %65, %68 : vector<37x10xf32>
    %cst_56 = arith.constant 0.000000e+00 : f32
    %70 = vector.broadcast %cst_56 : f32 to vector<37x10xf32>
    %71 = arith.maximumf %69, %70 : vector<37x10xf32>
    %72 = vector.extract_strided_slice %71 {offsets = [0, 0], sizes = [30, 10], strides = [1, 1]} : vector<37x10xf32> to vector<30x10xf32>
    %c0_57 = arith.constant 0 : index
    %c0_58 = arith.constant 0 : index
    %73 = vector.load %arg8[%c0_57, %c0_58] : memref<40x20xf32, #tpu.memory_space<vmem>>, vector<10x20xf32>
    %cst_59 = arith.constant dense<0.000000e+00> : vector<30x20xf32>
    %74 = tpu.matmul %72, %73, %cst_59 {dimension_numbers = #tpu.dot_dimension_numbers<[1], [0], [0], [1], [0, 0, 1, 1], [], []>} : vector<30x10xf32>, vector<10x20xf32>, vector<30x20xf32> -> vector<30x20xf32>
    %75 = vector.extract_strided_slice %71 {offsets = [1, 0], sizes = [30, 10], strides = [1, 1]} : vector<37x10xf32> to vector<30x10xf32>
    %c10_60 = arith.constant 10 : index
    %c0_61 = arith.constant 0 : index
    %76 = vector.load %arg8[%c10_60, %c0_61] : memref<40x20xf32, #tpu.memory_space<vmem>>, vector<10x20xf32>
    %cst_62 = arith.constant dense<0.000000e+00> : vector<30x20xf32>
    %77 = tpu.matmul %75, %76, %cst_62 {dimension_numbers = #tpu.dot_dimension_numbers<[1], [0], [0], [1], [0, 0, 1, 1], [], []>} : vector<30x10xf32>, vector<10x20xf32>, vector<30x20xf32> -> vector<30x20xf32>
    %78 = arith.addf %74, %77 : vector<30x20xf32>
    %79 = vector.extract_strided_slice %71 {offsets = [6, 0], sizes = [30, 10], strides = [1, 1]} : vector<37x10xf32> to vector<30x10xf32>
    %c20_63 = arith.constant 20 : index
    %c0_64 = arith.constant 0 : index
    %80 = vector.load %arg8[%c20_63, %c0_64] : memref<40x20xf32, #tpu.memory_space<vmem>>, vector<10x20xf32>
    %cst_65 = arith.constant dense<0.000000e+00> : vector<30x20xf32>
    %81 = tpu.matmul %79, %80, %cst_65 {dimension_numbers = #tpu.dot_dimension_numbers<[1], [0], [0], [1], [0, 0, 1, 1], [], []>} : vector<30x10xf32>, vector<10x20xf32>, vector<30x20xf32> -> vector<30x20xf32>
    %82 = arith.addf %78, %81 : vector<30x20xf32>
    %83 = vector.extract_strided_slice %71 {offsets = [7, 0], sizes = [30, 10], strides = [1, 1]} : vector<37x10xf32> to vector<30x10xf32>
    %c30_66 = arith.constant 30 : index
    %c0_67 = arith.constant 0 : index
    %84 = vector.load %arg8[%c30_66, %c0_67] : memref<40x20xf32, #tpu.memory_space<vmem>>, vector<10x20xf32>
    %cst_68 = arith.constant dense<0.000000e+00> : vector<30x20xf32>
    %85 = tpu.matmul %83, %84, %cst_68 {dimension_numbers = #tpu.dot_dimension_numbers<[1], [0], [0], [1], [0, 0, 1, 1], [], []>} : vector<30x10xf32>, vector<10x20xf32>, vector<30x20xf32> -> vector<30x20xf32>
    %86 = arith.addf %82, %85 : vector<30x20xf32>
    %c0_69 = arith.constant 0 : index
    %c0_70 = arith.constant 0 : index
    %87 = vector.load %arg9[%c0_69, %c0_70] : memref<1x20xf32, #tpu.memory_space<vmem>>, vector<1x20xf32>
    %88 = vector.broadcast %87 : vector<1x20xf32> to vector<30x20xf32>
    %89 = arith.addf %86, %88 : vector<30x20xf32>
    %c0_71 = arith.constant 0 : index
    %c0_72 = arith.constant 0 : index
    %c0_73 = arith.constant 0 : index
    %90 = vector.load %arg10[%c0_71, %c0_72, %c0_73] : memref<4x4x30xf32, #tpu.memory_space<vmem>>, vector<1x4x30xf32>
    %91 = vector.shape_cast %90 : vector<1x4x30xf32> to vector<4x30xf32>
    %cst_74 = arith.constant dense<0.000000e+00> : vector<4x20xf32>
    %92 = tpu.matmul %91, %89, %cst_74 {dimension_numbers = #tpu.dot_dimension_numbers<[1], [0], [0], [1], [0, 0, 1, 1], [], []>} : vector<4x30xf32>, vector<30x20xf32>, vector<4x20xf32> -> vector<4x20xf32>
    %c1_75 = arith.constant 1 : index
    %c0_76 = arith.constant 0 : index
    %c0_77 = arith.constant 0 : index
    %93 = vector.load %arg10[%c1_75, %c0_76, %c0_77] : memref<4x4x30xf32, #tpu.memory_space<vmem>>, vector<1x4x30xf32>
    %94 = vector.shape_cast %93 : vector<1x4x30xf32> to vector<4x30xf32>
    %cst_78 = arith.constant dense<0.000000e+00> : vector<4x20xf32>
    %95 = tpu.matmul %94, %89, %cst_78 {dimension_numbers = #tpu.dot_dimension_numbers<[1], [0], [0], [1], [0, 0, 1, 1], [], []>} : vector<4x30xf32>, vector<30x20xf32>, vector<4x20xf32> -> vector<4x20xf32>
    %96 = arith.maximumf %92, %95 : vector<4x20xf32>
    %c2_79 = arith.constant 2 : index
    %c0_80 = arith.constant 0 : index
    %c0_81 = arith.constant 0 : index
    %97 = vector.load %arg10[%c2_79, %c0_80, %c0_81] : memref<4x4x30xf32, #tpu.memory_space<vmem>>, vector<1x4x30xf32>
    %98 = vector.shape_cast %97 : vector<1x4x30xf32> to vector<4x30xf32>
    %cst_82 = arith.constant dense<0.000000e+00> : vector<4x20xf32>
    %99 = tpu.matmul %98, %89, %cst_82 {dimension_numbers = #tpu.dot_dimension_numbers<[1], [0], [0], [1], [0, 0, 1, 1], [], []>} : vector<4x30xf32>, vector<30x20xf32>, vector<4x20xf32> -> vector<4x20xf32>
    %100 = arith.maximumf %96, %99 : vector<4x20xf32>
    %c3_83 = arith.constant 3 : index
    %c0_84 = arith.constant 0 : index
    %c0_85 = arith.constant 0 : index
    %101 = vector.load %arg10[%c3_83, %c0_84, %c0_85] : memref<4x4x30xf32, #tpu.memory_space<vmem>>, vector<1x4x30xf32>
    %102 = vector.shape_cast %101 : vector<1x4x30xf32> to vector<4x30xf32>
    %cst_86 = arith.constant dense<0.000000e+00> : vector<4x20xf32>
    %103 = tpu.matmul %102, %89, %cst_86 {dimension_numbers = #tpu.dot_dimension_numbers<[1], [0], [0], [1], [0, 0, 1, 1], [], []>} : vector<4x30xf32>, vector<30x20xf32>, vector<4x20xf32> -> vector<4x20xf32>
    %104 = arith.maximumf %100, %103 : vector<4x20xf32>
    %cst_87 = arith.constant 0.000000e+00 : f32
    %105 = vector.broadcast %cst_87 : f32 to vector<4x20xf32>
    %106 = arith.maximumf %104, %105 : vector<4x20xf32>
    %107 = vector.extract_strided_slice %106 {offsets = [0, 0], sizes = [1, 20], strides = [1, 1]} : vector<4x20xf32> to vector<1x20xf32>
    %c0_88 = arith.constant 0 : index
    %c0_89 = arith.constant 0 : index
    %108 = vector.load %arg11[%c0_88, %c0_89] : memref<80x32xf32, #tpu.memory_space<vmem>>, vector<20x32xf32>
    %cst_90 = arith.constant dense<0.000000e+00> : vector<1x32xf32>
    %109 = tpu.matmul %107, %108, %cst_90 {dimension_numbers = #tpu.dot_dimension_numbers<[1], [0], [0], [1], [0, 0, 1, 1], [], []>} : vector<1x20xf32>, vector<20x32xf32>, vector<1x32xf32> -> vector<1x32xf32>
    %110 = vector.extract_strided_slice %106 {offsets = [1, 0], sizes = [1, 20], strides = [1, 1]} : vector<4x20xf32> to vector<1x20xf32>
    %c20_91 = arith.constant 20 : index
    %c0_92 = arith.constant 0 : index
    %111 = vector.load %arg11[%c20_91, %c0_92] : memref<80x32xf32, #tpu.memory_space<vmem>>, vector<20x32xf32>
    %cst_93 = arith.constant dense<0.000000e+00> : vector<1x32xf32>
    %112 = tpu.matmul %110, %111, %cst_93 {dimension_numbers = #tpu.dot_dimension_numbers<[1], [0], [0], [1], [0, 0, 1, 1], [], []>} : vector<1x20xf32>, vector<20x32xf32>, vector<1x32xf32> -> vector<1x32xf32>
    %113 = arith.addf %109, %112 : vector<1x32xf32>
    %114 = vector.extract_strided_slice %106 {offsets = [2, 0], sizes = [1, 20], strides = [1, 1]} : vector<4x20xf32> to vector<1x20xf32>
    %c40 = arith.constant 40 : index
    %c0_94 = arith.constant 0 : index
    %115 = vector.load %arg11[%c40, %c0_94] : memref<80x32xf32, #tpu.memory_space<vmem>>, vector<20x32xf32>
    %cst_95 = arith.constant dense<0.000000e+00> : vector<1x32xf32>
    %116 = tpu.matmul %114, %115, %cst_95 {dimension_numbers = #tpu.dot_dimension_numbers<[1], [0], [0], [1], [0, 0, 1, 1], [], []>} : vector<1x20xf32>, vector<20x32xf32>, vector<1x32xf32> -> vector<1x32xf32>
    %117 = arith.addf %113, %116 : vector<1x32xf32>
    %118 = vector.extract_strided_slice %106 {offsets = [3, 0], sizes = [1, 20], strides = [1, 1]} : vector<4x20xf32> to vector<1x20xf32>
    %c60 = arith.constant 60 : index
    %c0_96 = arith.constant 0 : index
    %119 = vector.load %arg11[%c60, %c0_96] : memref<80x32xf32, #tpu.memory_space<vmem>>, vector<20x32xf32>
    %cst_97 = arith.constant dense<0.000000e+00> : vector<1x32xf32>
    %120 = tpu.matmul %118, %119, %cst_97 {dimension_numbers = #tpu.dot_dimension_numbers<[1], [0], [0], [1], [0, 0, 1, 1], [], []>} : vector<1x20xf32>, vector<20x32xf32>, vector<1x32xf32> -> vector<1x32xf32>
    %121 = arith.addf %117, %120 : vector<1x32xf32>
    %c0_98 = arith.constant 0 : index
    %c0_99 = arith.constant 0 : index
    %122 = vector.load %arg12[%c0_98, %c0_99] : memref<1x32xf32, #tpu.memory_space<vmem>>, vector<1x32xf32>
    %123 = arith.addf %121, %122 : vector<1x32xf32>
    %cst_100 = arith.constant 0.000000e+00 : f32
    %124 = vector.broadcast %cst_100 : f32 to vector<1x32xf32>
    %125 = arith.maximumf %123, %124 : vector<1x32xf32>
    %c0_101 = arith.constant 0 : index
    %c0_102 = arith.constant 0 : index
    %126 = vector.load %arg13[%c0_101, %c0_102] : memref<32x10xf32, #tpu.memory_space<vmem>>, vector<32x10xf32>
    %cst_103 = arith.constant dense<0.000000e+00> : vector<1x10xf32>
    %127 = tpu.matmul %125, %126, %cst_103 {dimension_numbers = #tpu.dot_dimension_numbers<[1], [0], [0], [1], [0, 0, 1, 1], [], []>} : vector<1x32xf32>, vector<32x10xf32>, vector<1x10xf32> -> vector<1x10xf32>
    %c0_104 = arith.constant 0 : index
    %c0_105 = arith.constant 0 : index
    %128 = vector.load %arg14[%c0_104, %c0_105] : memref<1x10xf32, #tpu.memory_space<vmem>>, vector<1x10xf32>
    %129 = arith.addf %127, %128 : vector<1x10xf32>
    %c0_106 = arith.constant 0 : index
    %c0_107 = arith.constant 0 : index
    %c0_108 = arith.constant 0 : index
    %130 = vector.load %arg15[%c0_106, %c0_107, %c0_108] : memref<1x1x10xf32, #tpu.memory_space<vmem>>, vector<1x1x10xf32>
    %131 = vector.shape_cast %130 : vector<1x1x10xf32> to vector<1x10xf32>
    %132 = vector.shape_cast %129 : vector<1x10xf32> to vector<1x1x10xf32>
    tpu.vector_store %arg15[%c0_106, %c0_107, %c0_108], %132 {strides = array<i32>} : memref<1x1x10xf32, #tpu.memory_space<vmem>>, vector<1x1x10xf32>,
    return
  }
  func.func @transform_0(%arg0: i32) -> (i32, i32, i32) {
    %c0_i32 = arith.constant 0 : i32
    %c0_i32_0 = arith.constant 0 : i32
    %c0_i32_1 = arith.constant 0 : i32
    return %arg0, %c0_i32, %c0_i32_0 : i32, i32, i32
  }
  func.func @transform_1(%arg0: i32) -> (i32, i32) {
    %c0_i32 = arith.constant 0 : i32
    %c0_i32_0 = arith.constant 0 : i32
    %c0_i32_1 = arith.constant 0 : i32
    return %c0_i32, %c0_i32_0 : i32, i32
  }
  func.func @transform_2(%arg0: i32) -> (i32, i32) {
    %c0_i32 = arith.constant 0 : i32
    %c0_i32_0 = arith.constant 0 : i32
    %c0_i32_1 = arith.constant 0 : i32
    return %c0_i32, %c0_i32_0 : i32, i32
  }
  func.func @transform_3(%arg0: i32) -> (i32, i32, i32) {
    %c0_i32 = arith.constant 0 : i32
    %c0_i32_0 = arith.constant 0 : i32
    %c0_i32_1 = arith.constant 0 : i32
    %c0_i32_2 = arith.constant 0 : i32
    return %c0_i32, %c0_i32_0, %c0_i32_1 : i32, i32, i32
  }
  func.func @transform_4(%arg0: i32) -> (i32, i32) {
    %c0_i32 = arith.constant 0 : i32
    %c0_i32_0 = arith.constant 0 : i32
    %c0_i32_1 = arith.constant 0 : i32
    return %c0_i32, %c0_i32_0 : i32, i32
  }
  func.func @transform_5(%arg0: i32) -> (i32, i32) {
    %c0_i32 = arith.constant 0 : i32
    %c0_i32_0 = arith.constant 0 : i32
    %c0_i32_1 = arith.constant 0 : i32
    return %c0_i32, %c0_i32_0 : i32, i32
  }
  func.func @transform_6(%arg0: i32) -> (i32, i32, i32) {
    %c0_i32 = arith.constant 0 : i32
    %c0_i32_0 = arith.constant 0 : i32
    %c0_i32_1 = arith.constant 0 : i32
    %c0_i32_2 = arith.constant 0 : i32
    return %c0_i32, %c0_i32_0, %c0_i32_1 : i32, i32, i32
  }
  func.func @transform_7(%arg0: i32) -> (i32, i32) {
    %c0_i32 = arith.constant 0 : i32
    %c0_i32_0 = arith.constant 0 : i32
    %c0_i32_1 = arith.constant 0 : i32
    return %c0_i32, %c0_i32_0 : i32, i32
  }
  func.func @transform_8(%arg0: i32) -> (i32, i32) {
    %c0_i32 = arith.constant 0 : i32
    %c0_i32_0 = arith.constant 0 : i32
    %c0_i32_1 = arith.constant 0 : i32
    return %c0_i32, %c0_i32_0 : i32, i32
  }
  func.func @transform_9(%arg0: i32) -> (i32, i32, i32) {
    %c0_i32 = arith.constant 0 : i32
    %c0_i32_0 = arith.constant 0 : i32
    %c0_i32_1 = arith.constant 0 : i32
    %c0_i32_2 = arith.constant 0 : i32
    return %c0_i32, %c0_i32_0, %c0_i32_1 : i32, i32, i32
  }
  func.func @transform_10(%arg0: i32) -> (i32, i32) {
    %c0_i32 = arith.constant 0 : i32
    %c0_i32_0 = arith.constant 0 : i32
    %c0_i32_1 = arith.constant 0 : i32
    return %c0_i32, %c0_i32_0 : i32, i32
  }
  func.func @transform_11(%arg0: i32) -> (i32, i32) {
    %c0_i32 = arith.constant 0 : i32
    %c0_i32_0 = arith.constant 0 : i32
    %c0_i32_1 = arith.constant 0 : i32
    return %c0_i32, %c0_i32_0 : i32, i32
  }
  func.func @transform_12(%arg0: i32) -> (i32, i32) {
    %c0_i32 = arith.constant 0 : i32
    %c0_i32_0 = arith.constant 0 : i32
    %c0_i32_1 = arith.constant 0 : i32
    return %c0_i32, %c0_i32_0 : i32, i32
  }
  func.func @transform_13(%arg0: i32) -> (i32, i32) {
    %c0_i32 = arith.constant 0 : i32
    %c0_i32_0 = arith.constant 0 : i32
    %c0_i32_1 = arith.constant 0 : i32
    return %c0_i32, %c0_i32_0 : i32, i32
  }
  func.func @transform_14(%arg0: i32) -> (i32, i32, i32) {
    %c0_i32 = arith.constant 0 : i32
    %c0_i32_0 = arith.constant 0 : i32
    %c0_i32_1 = arith.constant 0 : i32
    return %arg0, %c0_i32, %c0_i32_0 : i32, i32, i32
  }
}

</mosaic_0001>

<bundles_post_ra>
// kernel: tpu_custom_call.1
= control target key start
LH: loop header
LB: loop body
LE: loop exit
PB: predicated region body
PF: predicated region fallthrough
CT: control target
= control target key end

     0   :  { %s15144_s0 = inlined_call_operand.vmem [shape: f32[2,792,1], index: 0, kind: input, shape index: {}]   ;;  %s15145_s1 = inlined_call_operand.vmem [shape: f32[4,10], index: 1, kind: input, shape index: {}]   ;;  %s15146_s2 = inlined_call_operand.vmem [shape: f32[1,10], index: 2, kind: input, shape index: {}]   ;;  %s15147_s3 = inlined_call_operand.vmem [shape: f32[4,170,756], index: 3, kind: input, shape index: {}]   ;;  %s15148_s4 = inlined_call_operand.vmem [shape: f32[40,10], index: 4, kind: input, shape index: {}]   ;;  %s15149_s5 = inlined_call_operand.vmem [shape: f32[1,10], index: 5, kind: input, shape index: {}]   ;;  %s15150_s6 = inlined_call_operand.vmem [shape: f32[4,37,156], index: 6, kind: input, shape index: {}]   ;;  %s15151_s7 = inlined_call_operand.vmem [shape: f32[40,20], index: 7, kind: input, shape index: {}]   ;;  %s15152_s8 = inlined_call_operand.vmem [shape: f32[1,20], index: 8, kind: input, shape index: {}]   ;;  %s15153_s9 = inlined_call_operand.vmem [shape: f32[4,4,30], index: 9, kind: input, shape index: {}]   ;;  %s15154_s10 = inlined_call_operand.vmem [shape: f32[80,32], index: 10, kind: input, shape index: {}]   ;;  %s15155_s11 = inlined_call_operand.vmem [shape: f32[1,32], index: 11, kind: input, shape index: {}]   ;;  %s15156_s12 = inlined_call_operand.vmem [shape: f32[32,10], index: 12, kind: input, shape index: {}]   ;;  %s15157_s13 = inlined_call_operand.vmem [shape: f32[1,10], index: 13, kind: input, shape index: {}]   ;;  %s15158_s14 = inlined_call_operand.hbm [shape: f32[2,1,10], index: 14, kind: output, shape index: {}]  }
   0x1   :  { %15312 = sst [smem:[#allocation235_spill]] %s15144_s0 }
   0x2   :  { %15313 = sst [smem:[#allocation236_spill]] %s15145_s1 }
   0x3   :  { %15314 = sst [smem:[#allocation237_spill]] %s15146_s2 }
   0x4   :  { %19 = vsyncpa [#allocation3], 0 }
   0x5   :  { %21 = vsyncpa [#allocation3 + $0x1], 0  ;;  %s9253_s29 = smov 0   ;;  %s9255_s30 = smov 0  }
   0x6   :  { %s9257_s15 = smov 0   ;;  %s9259_s16 = smov 0  }
   0x7 LB: > { %15315 = sst [smem:[#allocation5_spill]] %s9172_s15  ;;  %s9274_s17 = sadd.s32 4294967295, %s9176_s16   ;;  %s9176_s16 = sphi %s9259_s16, %s16012_s16   ;;  %s9172_s15 = sphi %s9257_s15, %s16009_s15   ;;  %s9168_s30 = sphi %s9255_s30, %s16011_s30   ;;  %s9164_s29 = sphi %s9253_s29, %s16010_s29  }
   0x8   : > { %s8012_s18 = sadd.s32 4294967294, %s9176_s16   ;;  %s9278_s19 = sadd.s32 1, %s9176_s16  }
   0x9   : > { %s333_s20 = sadd.s32 1, %s9172_s15  ;;  %s330_s21 = ssub.s32 %s9176_s16, %s9278_s19 }
   0xa   : > { %p343_p0 = scmp.ne.s32.totalorder %s9172_s15, %s9168_s30  ;;  %p331_p1 = scmp.eq.s32.totalorder %s330_s21, 0 }
   0xb   : > { %p344_p2 = scmp.eq.s32.totalorder %s9274_s17, 1  ;;  %p349_p3 = scmp.ne.s32.totalorder %s9168_s30, %s9164_s29 }
   0xc   : > { %p350_p4 = scmp.eq.s32.totalorder %s8012_s18, 1  ;;  %p8015_p7 = scmp.ge.s32.totalorder %s9176_s16, 1 }
   0xd   : > { %s9289_s22 = scalar_select %p331_p1, %s9172_s15, %s333_s20  }
   0xe   : > { %p9291_p5 = por %p344_p2, %p343_p0  ;;  %p9295_p6 = por %p350_p4, %p349_p3 }
   0xf   : > { %15316 = sst [smem:[#allocation6_spill]] %s9289_s22  ;;  %p415_p8 = scmp.lt.s32.totalorder %s9176_s16, 3 }
  0x11   : > { %p416_p9 = pnand %p8015_p7, %p415_p8 }
  0x13   : > { %419 = sbr.rel (%p416_p9) target bundleno = 2951 (0xb87), region = 76 }
  0x18   : > { %s15319_s1 = sld [smem:[#allocation236_spill]]  ;;  %vm1042_vm0 = vcmask 1040384   ;;  %p460_p10 = scmp.lt.s32.totalorder %s9274_s17, 1  ;;  %vm851_vm1 = vcmask 7168   ;;  %vm661_vm2 = vcmask 1046528   ;;  %vm1847_vm3 = vcmask 1043456  }
  0x19   : > { %s15320_s0 = sld [smem:[#allocation235_spill]]  ;;  %vm2629_vm4 = vcmask 1042432   ;;  %vm3642_vm5 = vcmask 949248   ;;  %vm6493_vm6 = vcmask 1041408   ;;  %vm6452_vm7 = vcmask 80896   ;;  %s458_s18 = sand.u32 1, %s9168_s30  }
  0x1a   : > { %s461_s25 = scalar_select %p460_p10, %s9274_s17, 1  ;;  %vm7096_vm8 = vcmask 228352   ;;  %vm7688_vm9 = vcmask 1045504   ;;  %vm7684_vm10 = vcmask 244736   ;;  %vm7799_vm11 = vcmask 162816  }
  0x1b   : > { %s15321_s2 = sld [smem:[#allocation237_spill]]  ;;  %vm7918_vm12 = vcmask 261120   ;;  %vm7942_vm13 = vcmask 73728   ;;  %s7945_s15 = scalar_lea.sflag [#allocation3], %s458_s18 }
  0x1c   : > { %s9069_s26 = smul.u32 792, %s461_s25  ;;  %s7953_s25 = scalar_lea.hbm %s15158_s14, %s9274_s17 }
  0x1d   : > { %s9134_s21 = scalar_lea.hbm %s15158_s14, 2 }
  0x1e   : > { %v564_v0 = vld [vmem:[%s15319_s1] sm:$0x1]  ;;  %v565_v1 = vld [vmem:[%s15319_s1 + $0x1] sm:$0x1]  ;;  %v1843_v2 = vld [vmem:[%s15319_s1 + $0x2] sm:$0x1] }
  0x1f   : > { %8113 = vmatpush.msk.msra.mxu1 %vm1042_vm0, %v564_v0  ;;  %v2627_v3 = vld [vmem:[%s15319_s1 + $0x3] sm:$0x1]  ;;  %8017 = vmatpush.msk.msra.mxu0 %vm1042_vm0, %v565_v1  ;;  %s9322_s28 = scalar_lea.vmem %s15320_s0, %s9069_s26  ;;  %s459_s0 = scalar_lea.vmem [#allocation2], %s458_s18 }
  0x20   : > { %8209 = vmatpush.msk.msra.mxu2 %vm1042_vm0, %v1843_v2  ;;  %8305 = vmatpush.msk.msra.mxu3 %vm1042_vm0, %v2627_v3  ;;  %v465_v4 = vld [vmem:[%s9322_s28] sm:$0xff]  ;;  %v466_v5 = vld [vmem:[%s9322_s28 + $0x8] sm:$0xff]  ;;  %v468_v6 = vld [vmem:[%s9322_s28 + $0x18] sm:$0xff]  ;;  %s7957_s1 = sshll.u32 %s7953_s25, 4  ;;  %s7958_s1 = int_to_ptr.hbm [resolvable:$true] %s7957_s1 }
  0x21   : > { %v662_v7 = vrot.slane %v465_v4, 1  ;;  %8114 = vmatmul.msk.f32.vlgmr.msra.gmra.mxu1 %vm851_vm1, %v465_v4  ;;  %v663_v8 = vrot.slane %v466_v5, 1  ;;  %v469_v9 = vld [vmem:[%s9322_s28 + $0x20] sm:$0xff]  ;;  %v1848_v10 = vrot.slane %v468_v6, 4  ;;  %v2630_v11 = vrot.slane %v468_v6, 5  ;;  %v467_v14 = vld [vmem:[%s9322_s28 + $0x10] sm:$0xff] }
  0x22   : > { %v1849_v12 = vrot.slane %v469_v9, 4  ;;  %v2631_v13 = vrot.slane %v469_v9, 5  ;;  %v470_v16 = vld [vmem:[%s9322_s28 + $0x28] sm:$0xff]  ;;  %v665_v19 = vrot.slane %v467_v14, 1  ;;  %v471_v25 = vld [vmem:[%s9322_s28 + $0x30] sm:$0xff]  ;;  %v667_v26 = vrot.slane %v468_v6, 1 }
  0x23   : > { %v664_v15 = vsel %vm661_vm2, %v662_v7, %v663_v8  ;;  %v1851_v20 = vrot.slane %v470_v16, 4  ;;  %v2633_v21 = vrot.slane %v470_v16, 5  ;;  %v1853_v27 = vrot.slane %v471_v25, 4  ;;  %v472_v32 = vld [vmem:[%s9322_s28 + $0x38] sm:$0xff]  ;;  %v473_v39 = vld [vmem:[%s9322_s28 + $0x40] sm:$0xff]  ;;  %v474_v46 = vld [vmem:[%s9322_s28 + $0x48] sm:$0xff] }
  0x24   : > { %8018 = vmatmul.msk.f32.vlgmr.msra.gmra.mxu0 %vm851_vm1, %v664_v15  ;;  %v1850_v17 = vsel %vm1847_vm3, %v1848_v10, %v1849_v12  ;;  %v2632_v18 = vsel %vm2629_vm4, %v2630_v11, %v2631_v13  ;;  %v666_v22 = vsel %vm661_vm2, %v663_v8, %v665_v19  ;;  %v2635_v28 = vrot.slane %v471_v25, 5  ;;  %v475_v53 = vld [vmem:[%s9322_s28 + $0x50] sm:$0xff]  ;;  %v476_v60 = vld [vmem:[%s9322_s28 + $0x58] sm:$0xff]  ;;  %v477_v3 = vld [vmem:[%s9322_s28 + $0x60] sm:$0xff]  ;;  %s9128_s22 = sshra.s32 %s7958_s1, 4  ;;  %s9129_s22 = int_to_ptr.hbm [resolvable:$true] %s9128_s22 }
  0x25   : > { %8210 = vmatmul.msk.f32.vlgmr.msra.gmra.mxu2 %vm851_vm1, %v1850_v17  ;;  %8306 = vmatmul.msk.f32.vlgmr.msra.gmra.mxu3 %vm851_vm1, %v2632_v18  ;;  %v1852_v23 = vsel %vm1847_vm3, %v1849_v12, %v1851_v20  ;;  %v2634_v24 = vsel %vm2629_vm4, %v2631_v13, %v2633_v21  ;;  %v668_v29 = vsel %vm661_vm2, %v665_v19, %v667_v26  ;;  %v669_v33 = vrot.slane %v469_v9, 1  ;;  %v478_v10 = vld [vmem:[%s9322_s28 + $0x68] sm:$0xff]  ;;  %v479_v17 = vld [vmem:[%s9322_s28 + $0x70] sm:$0xff]  ;;  %p9135_p0 = scmp.lt.s32.totalorder %s9129_s22, %s15158_s14 }
  0x26   : > { %v1854_v30 = vsel %vm1847_vm3, %v1851_v20, %v1853_v27  ;;  %v2636_v31 = vsel %vm2629_vm4, %v2633_v21, %v2635_v28  ;;  %v1855_v34 = vrot.slane %v472_v32, 4  ;;  %v2637_v35 = vrot.slane %v472_v32, 5 }
  0x27   : > { %v670_v36 = vsel %vm661_vm2, %v667_v26, %v669_v33  ;;  %v671_v40 = vrot.slane %v470_v16, 1  ;;  %v1857_v41 = vrot.slane %v473_v39, 4  ;;  %v2639_v42 = vrot.slane %v473_v39, 5 }
  0x28   : > { %v1856_v37 = vsel %vm1847_vm3, %v1853_v27, %v1855_v34  ;;  %v2638_v38 = vsel %vm2629_vm4, %v2635_v28, %v2637_v35  ;;  %v673_v47 = vrot.slane %v471_v25, 1  ;;  %v1859_v48 = vrot.slane %v474_v46, 4 }
  0x29   : > { %8115 = vmatmul.msk.f32.gmra.mxu1 %vm851_vm1, %v466_v5  ;;  %v672_v43 = vsel %vm661_vm2, %v669_v33, %v671_v40  ;;  %v1858_v44 = vsel %vm1847_vm3, %v1855_v34, %v1857_v41  ;;  %v2640_v45 = vsel %vm2629_vm4, %v2637_v35, %v2639_v42  ;;  %v2641_v49 = vrot.slane %v474_v46, 5 }
  0x2a   : > { %v674_v50 = vsel %vm661_vm2, %v671_v40, %v673_v47  ;;  %v1860_v51 = vsel %vm1847_vm3, %v1857_v41, %v1859_v48  ;;  %v675_v54 = vrot.slane %v472_v32, 1  ;;  %v1861_v55 = vrot.slane %v475_v53, 4 }
  0x2b   : > { %v2642_v52 = vsel %vm2629_vm4, %v2639_v42, %v2641_v49  ;;  %v2643_v56 = vrot.slane %v475_v53, 5  ;;  %v677_v61 = vrot.slane %v473_v39, 1  ;;  %v1863_v62 = vrot.slane %v476_v60, 4 }
  0x2c   : > { %8019 = vmatmul.msk.f32.gmra.mxu0 %vm851_vm1, %v666_v22  ;;  %v676_v57 = vsel %vm661_vm2, %v673_v47, %v675_v54  ;;  %v1862_v58 = vsel %vm1847_vm3, %v1859_v48, %v1861_v55  ;;  %v2645_v63 = vrot.slane %v476_v60, 5  ;;  %v679_v4 = vrot.slane %v474_v46, 1 }
  0x2d   : > { %8211 = vmatmul.msk.f32.gmra.mxu2 %vm851_vm1, %v1852_v23  ;;  %8307 = vmatmul.msk.f32.gmra.mxu3 %vm851_vm1, %v2634_v24  ;;  %v2644_v59 = vsel %vm2629_vm4, %v2641_v49, %v2643_v56  ;;  %v678_v0 = vsel %vm661_vm2, %v675_v54, %v677_v61  ;;  %v1864_v1 = vsel %vm1847_vm3, %v1861_v55, %v1863_v62  ;;  %v1865_v5 = vrot.slane %v477_v3, 4  ;;  %v480_v24 = vld [vmem:[%s9322_s28 + $0x78] sm:$0xff] }
  0x2e   : > { %v2646_v2 = vsel %vm2629_vm4, %v2643_v56, %v2645_v63  ;;  %v680_v7 = vsel %vm661_vm2, %v677_v61, %v679_v4  ;;  %v681_v11 = vrot.slane %v475_v53, 1  ;;  %v1867_v12 = vrot.slane %v478_v10, 4 }
  0x2f   : > { %v1866_v8 = vsel %vm1847_vm3, %v1863_v62, %v1865_v5  ;;  %v2649_v13 = vrot.slane %v478_v10, 5  ;;  %v683_v18 = vrot.slane %v476_v60, 1  ;;  %v1869_v19 = vrot.slane %v479_v17, 4 }
  0x30   : > { %v1868_v15 = vsel %vm1847_vm3, %v1865_v5, %v1867_v12  ;;  %v2651_v20 = vrot.slane %v479_v17, 5  ;;  %v1871_v26 = vrot.slane %v480_v24, 4  ;;  %v2653_v27 = vrot.slane %v480_v24, 5 }
  0x31   : > { %8116 = vmatmul.msk.f32.gmra.mxu1 %vm851_vm1, %v467_v14  ;;  %v682_v14 = vsel %vm661_vm2, %v679_v4, %v681_v11  ;;  %v684_v21 = vsel %vm661_vm2, %v681_v11, %v683_v18  ;;  %v1870_v22 = vsel %vm1847_vm3, %v1867_v12, %v1869_v19  ;;  %v9474_v4 = vld [vmem:[%s9322_s28 + $0xa8] sm:$0xff] }
  0x32   : > { %v2652_v23 = vsel %vm2629_vm4, %v2649_v13, %v2651_v20 }
  0x34   : > { %8020 = vmatmul.msk.f32.gmra.mxu0 %vm851_vm1, %v668_v29  ;;  %v1872_v29 = vsel %vm1847_vm3, %v1869_v19, %v1871_v26 }
  0x35   : > { %8212 = vmatmul.msk.f32.gmra.mxu2 %vm851_vm1, %v1854_v30  ;;  %8308 = vmatmul.msk.f32.gmra.mxu3 %vm851_vm1, %v2636_v31  ;;  %v2654_v30 = vsel %vm2629_vm4, %v2651_v20, %v2653_v27  ;;  %v481_v31 = vld [vmem:[%s9322_s28 + $0x80] sm:$0xff] }
  0x36   : > { %v1873_v33 = vrot.slane %v481_v31, 4  ;;  %v2655_v34 = vrot.slane %v481_v31, 5 }
  0x39   : > { %8117 = vmatmul.msk.f32.gmra.mxu1 %vm851_vm1, %v468_v6  ;;  %v2647_v6 = vrot.slane %v477_v3, 5 }
  0x3c   : > { %8021 = vmatmul.msk.f32.gmra.mxu0 %vm851_vm1, %v670_v36  ;;  %v1874_v36 = vsel %vm1847_vm3, %v1871_v26, %v1873_v33 }
  0x3d   : > { %8213 = vmatmul.msk.f32.gmra.mxu2 %vm851_vm1, %v1856_v37  ;;  %8309 = vmatmul.msk.f32.gmra.mxu3 %vm851_vm1, %v2638_v38  ;;  %v2656_v37 = vsel %vm2629_vm4, %v2653_v27, %v2655_v34  ;;  %v482_v38 = vld [vmem:[%s9322_s28 + $0x88] sm:$0xff] }
  0x3e   : > { %v1875_v40 = vrot.slane %v482_v38, 4  ;;  %v2657_v41 = vrot.slane %v482_v38, 5 }
  0x41   : > { %8118 = vmatmul.msk.f32.gmra.mxu1 %vm851_vm1, %v469_v9  ;;  %v2648_v9 = vsel %vm2629_vm4, %v2645_v63, %v2647_v6 }
  0x44   : > { %8022 = vmatmul.msk.f32.gmra.mxu0 %vm851_vm1, %v672_v43  ;;  %v1876_v43 = vsel %vm1847_vm3, %v1873_v33, %v1875_v40 }
  0x45   : > { %8214 = vmatmul.msk.f32.gmra.mxu2 %vm851_vm1, %v1858_v44  ;;  %8310 = vmatmul.msk.f32.gmra.mxu3 %vm851_vm1, %v2640_v45  ;;  %v2658_v44 = vsel %vm2629_vm4, %v2655_v34, %v2657_v41  ;;  %v9438_v45 = vld [vmem:[%s9322_s28 + $0x90] sm:$0xff] }
  0x46   : > { %v1877_v47 = vrot.slane %v9438_v45, 4  ;;  %v2659_v48 = vrot.slane %v9438_v45, 5 }
  0x49   : > { %8119 = vmatmul.msk.f32.gmra.mxu1 %vm851_vm1, %v470_v16  ;;  %v2650_v16 = vsel %vm2629_vm4, %v2647_v6, %v2649_v13  ;;  %v697_v6 = vrot.slane %v9438_v45, 1 }
  0x4c   : > { %8023 = vmatmul.msk.f32.gmra.mxu0 %vm851_vm1, %v674_v50  ;;  %v1878_v50 = vsel %vm1847_vm3, %v1875_v40, %v1877_v47 }
  0x4d   : > { %8215 = vmatmul.msk.f32.gmra.mxu2 %vm851_vm1, %v1860_v51  ;;  %8311 = vmatmul.msk.f32.gmra.mxu3 %vm851_vm1, %v2642_v52  ;;  %v2660_v51 = vsel %vm2629_vm4, %v2657_v41, %v2659_v48  ;;  %v9450_v52 = vld [vmem:[%s9322_s28 + $0x98] sm:$0xff] }
  0x4e   : > { %v1879_v54 = vrot.slane %v9450_v52, 4  ;;  %v2661_v55 = vrot.slane %v9450_v52, 5  ;;  %v699_v20 = vrot.slane %v9450_v52, 1 }
  0x51   : > { %8120 = vmatmul.msk.f32.gmra.mxu1 %vm851_vm1, %v471_v25  ;;  %v685_v25 = vrot.slane %v477_v3, 1 }
  0x53   : > { %v686_v28 = vsel %vm661_vm2, %v683_v18, %v685_v25  ;;  %v9489_v18 = vld [vmem:[%s9322_s28 + $0xb0] sm:$0xff] }
  0x54   : > { %8024 = vmatmul.msk.f32.gmra.mxu0 %vm851_vm1, %v676_v57  ;;  %v1880_v57 = vsel %vm1847_vm3, %v1877_v47, %v1879_v54 }
  0x55   : > { %8216 = vmatmul.msk.f32.gmra.mxu2 %vm851_vm1, %v1862_v58  ;;  %8312 = vmatmul.msk.f32.gmra.mxu3 %vm851_vm1, %v2644_v59  ;;  %v2662_v58 = vsel %vm2629_vm4, %v2659_v48, %v2661_v55  ;;  %v9462_v59 = vld [vmem:[%s9322_s28 + $0xa0] sm:$0xff]  ;;  %v703_v48 = vrot.slane %v9474_v4, 1 }
  0x56   : > { %v1881_v62 = vrot.slane %v9462_v59, 4  ;;  %v2663_v63 = vrot.slane %v9462_v59, 5  ;;  %v701_v34 = vrot.slane %v9462_v59, 1 }
  0x59   : > { %8121 = vmatmul.msk.f32.gmra.mxu1 %vm851_vm1, %v472_v32  ;;  %v687_v32 = vrot.slane %v478_v10, 1 }
  0x5b   : > { %v688_v35 = vsel %vm661_vm2, %v685_v25, %v687_v32 }
  0x5c   : > { %8025 = vmatmul.msk.f32.gmra.mxu0 %vm851_vm1, %v678_v0 }
  0x5d   : > { %8217 = vmatmul.msk.f32.gmra.mxu2 %vm851_vm1, %v1864_v1  ;;  %8313 = vmatmul.msk.f32.gmra.mxu3 %vm851_vm1, %v2646_v2  ;;  %v1882_v2 = vsel %vm1847_vm3, %v1879_v54, %v1881_v62 }
  0x61   : > { %8122 = vmatmul.msk.f32.gmra.mxu1 %vm851_vm1, %v473_v39  ;;  %v689_v39 = vrot.slane %v479_v17, 1 }
  0x63   : > { %v690_v42 = vsel %vm661_vm2, %v687_v32, %v689_v39  ;;  %v9505_v32 = vld [vmem:[%s9322_s28 + $0xb8] sm:$0xff] }
  0x64   : > { %8026 = vmatmul.msk.f32.gmra.mxu0 %vm851_vm1, %v680_v7 }
  0x65   : > { %8218 = vmatmul.msk.f32.gmra.mxu2 %vm851_vm1, %v1866_v8  ;;  %8314 = vmatmul.msk.f32.gmra.mxu3 %vm851_vm1, %v2648_v9  ;;  %v1883_v8 = vrot.slane %v9474_v4, 4  ;;  %v2665_v9 = vrot.slane %v9474_v4, 5 }
  0x69   : > { %8123 = vmatmul.msk.f32.gmra.mxu1 %vm851_vm1, %v474_v46  ;;  %v691_v46 = vrot.slane %v480_v24, 1 }
  0x6b   : > { %v692_v49 = vsel %vm661_vm2, %v689_v39, %v691_v46 }
  0x6c   : > { %8027 = vmatmul.msk.f32.gmra.mxu0 %vm851_vm1, %v682_v14 }
  0x6d   : > { %8219 = vmatmul.msk.f32.gmra.mxu2 %vm851_vm1, %v1868_v15  ;;  %8315 = vmatmul.msk.f32.gmra.mxu3 %vm851_vm1, %v2650_v16  ;;  %v1884_v15 = vsel %vm1847_vm3, %v1881_v62, %v1883_v8  ;;  %v2666_v16 = vsel %vm2629_vm4, %v2663_v63, %v2665_v9 }
  0x71   : > { %8124 = vmatmul.msk.f32.gmra.mxu1 %vm851_vm1, %v475_v53  ;;  %v693_v53 = vrot.slane %v481_v31, 1 }
  0x73   : > { %v694_v56 = vsel %vm661_vm2, %v691_v46, %v693_v53  ;;  %v9521_v46 = vld [vmem:[%s9322_s28 + $0xc0] sm:$0xff] }
  0x74   : > { %8028 = vmatmul.msk.f32.gmra.mxu0 %vm851_vm1, %v684_v21 }
  0x75   : > { %8220 = vmatmul.msk.f32.gmra.mxu2 %vm851_vm1, %v1870_v22  ;;  %8316 = vmatmul.msk.f32.gmra.mxu3 %vm851_vm1, %v2652_v23  ;;  %v1885_v22 = vrot.slane %v9489_v18, 4  ;;  %v2667_v23 = vrot.slane %v9489_v18, 5 }
  0x79   : > { %8125 = vmatmul.msk.f32.gmra.mxu1 %vm851_vm1, %v476_v60  ;;  %v695_v60 = vrot.slane %v482_v38, 1 }
  0x7b   : > { %v696_v1 = vsel %vm661_vm2, %v693_v53, %v695_v60  ;;  %v698_v14 = vsel %vm661_vm2, %v695_v60, %v697_v6 }
  0x7c   : > { %8029 = vmatmul.msk.f32.gmra.mxu0 %vm851_vm1, %v686_v28  ;;  %v700_v28 = vsel %vm661_vm2, %v697_v6, %v699_v20 }
  0x7d   : > { %8221 = vmatmul.msk.f32.gmra.mxu2 %vm851_vm1, %v1872_v29  ;;  %8317 = vmatmul.msk.f32.gmra.mxu3 %vm851_vm1, %v2654_v30  ;;  %v1886_v29 = vsel %vm1847_vm3, %v1883_v8, %v1885_v22  ;;  %v2668_v30 = vsel %vm2629_vm4, %v2665_v9, %v2667_v23 }
  0x81   : > { %8126 = vmatmul.msk.f32.gmra.mxu1 %vm851_vm1, %v477_v3  ;;  %v2664_v3 = vsel %vm2629_vm4, %v2661_v55, %v2663_v63 }
  0x84   : > { %8030 = vmatmul.msk.f32.gmra.mxu0 %vm851_vm1, %v688_v35 }
  0x85   : > { %8222 = vmatmul.msk.f32.gmra.mxu2 %vm851_vm1, %v1874_v36  ;;  %8318 = vmatmul.msk.f32.gmra.mxu3 %vm851_vm1, %v2656_v37  ;;  %v1887_v36 = vrot.slane %v9505_v32, 4  ;;  %v2669_v37 = vrot.slane %v9505_v32, 5 }
  0x89   : > { %8127 = vmatmul.msk.f32.gmra.mxu1 %vm851_vm1, %v478_v10 }
  0x8c   : > { %8031 = vmatmul.msk.f32.gmra.mxu0 %vm851_vm1, %v690_v42  ;;  %v702_v42 = vsel %vm661_vm2, %v699_v20, %v701_v34 }
  0x8d   : > { %8223 = vmatmul.msk.f32.gmra.mxu2 %vm851_vm1, %v1876_v43  ;;  %8319 = vmatmul.msk.f32.gmra.mxu3 %vm851_vm1, %v2658_v44  ;;  %v1888_v43 = vsel %vm1847_vm3, %v1885_v22, %v1887_v36  ;;  %v2670_v44 = vsel %vm2629_vm4, %v2667_v23, %v2669_v37 }
  0x91   : > { %8128 = vmatmul.msk.f32.gmra.mxu1 %vm851_vm1, %v479_v17 }
  0x94   : > { %8032 = vmatmul.msk.f32.gmra.mxu0 %vm851_vm1, %v692_v49 }
  0x95   : > { %8224 = vmatmul.msk.f32.gmra.mxu2 %vm851_vm1, %v1878_v50  ;;  %8320 = vmatmul.msk.f32.gmra.mxu3 %vm851_vm1, %v2660_v51  ;;  %v1889_v50 = vrot.slane %v9521_v46, 4  ;;  %v2671_v51 = vrot.slane %v9521_v46, 5 }
  0x99   : > { %8129 = vmatmul.msk.f32.gmra.mxu1 %vm851_vm1, %v480_v24 }
  0x9c   : > { %8033 = vmatmul.msk.f32.gmra.mxu0 %vm851_vm1, %v694_v56  ;;  %v704_v56 = vsel %vm661_vm2, %v701_v34, %v703_v48 }
  0x9d   : > { %8225 = vmatmul.msk.f32.gmra.mxu2 %vm851_vm1, %v1880_v57  ;;  %8321 = vmatmul.msk.f32.gmra.mxu3 %vm851_vm1, %v2662_v58  ;;  %v1890_v57 = vsel %vm1847_vm3, %v1887_v36, %v1889_v50  ;;  %v2672_v58 = vsel %vm2629_vm4, %v2669_v37, %v2671_v51 }
  0x9e   : > { %v1558_v61 = vpop.f32.mrf.mxu1 }
  0xa1   : > { %v1063_v0 = vpop.f32.mrf.mxu0  ;;  %8130 = vmatmul.msk.f32.gmra.mxu1 %vm851_vm1, %v481_v31 }
  0xa2   : > { %v1559_v5 = vadd.f32 %v1558_v61, %v1063_v0  ;;  %v9537_v61 = vld [vmem:[%s9322_s28 + $0xc8] sm:$0xff] }
  0xa3   : > { %v1891_v0 = vrot.slane %v9537_v61, 4 }
  0xa4   : > { %8034 = vmatmul.msk.f32.gmra.mxu0 %vm851_vm1, %v696_v1  ;;  %v2673_v1 = vrot.slane %v9537_v61, 5 }
  0xa5   : > { %8226 = vmatmul.msk.f32.gmra.mxu2 %vm851_vm1, %v1882_v2  ;;  %8322 = vmatmul.msk.f32.gmra.mxu3 %vm851_vm1, %v2664_v3  ;;  %v1892_v8 = vsel %vm1847_vm3, %v1889_v50, %v1891_v0 }
  0xa6   : > { %v1561_v7 = vpop.f32.mrf.mxu1  ;;  %v2674_v9 = vsel %vm2629_vm4, %v2671_v51, %v2673_v1 }
  0xa8   : > { %v2247_v10 = vpop.f32.mrf.mxu2  ;;  %v3031_v11 = vpop.f32.mrf.mxu3 }
  0xa9   : > { %v2532_v12 = vadd.f32 %v2247_v10, %v1559_v5  ;;  %v1066_v13 = vpop.f32.mrf.mxu0  ;;  %8131 = vmatmul.msk.f32.gmra.mxu1 %vm851_vm1, %v482_v38 }
  0xaa   : > { %v1562_v19 = vadd.f32 %v1561_v7, %v1066_v13 }
  0xab   : > { %v9486_v17 = vadd.f32 %v3031_v11, %v2532_v12  ;;  %v9553_v11 = vld [vmem:[%s9322_s28 + $0xd0] sm:$0xff] }
  0xac   : > { %8035 = vmatmul.msk.f32.gmra.mxu0 %vm851_vm1, %v698_v14  ;;  %v1893_v14 = vrot.slane %v9553_v11, 4 }
  0xad   : > { %8227 = vmatmul.msk.f32.gmra.mxu2 %vm851_vm1, %v1884_v15  ;;  %8323 = vmatmul.msk.f32.gmra.mxu3 %vm851_vm1, %v2666_v16  ;;  %v2675_v15 = vrot.slane %v9553_v11, 5 }
  0xae   : > { %v1564_v21 = vpop.f32.mrf.mxu1  ;;  %v1894_v23 = vsel %vm1847_vm3, %v1891_v0, %v1893_v14 }
  0xb0   : > { %v2250_v24 = vpop.f32.mrf.mxu2  ;;  %v3034_v25 = vpop.f32.mrf.mxu3 }
  0xb1   : > { %v2533_v26 = vadd.f32 %v2250_v24, %v1562_v19  ;;  %v1069_v27 = vpop.f32.mrf.mxu0  ;;  %8132 = vmatmul.msk.f32.gmra.mxu1 %vm851_vm1, %v9438_v45  ;;  %v2676_v24 = vsel %vm2629_vm4, %v2673_v1, %v2675_v15 }
  0xb2   : > { %v1565_v33 = vadd.f32 %v1564_v21, %v1069_v27 }
  0xb3   : > { %v9502_v31 = vadd.f32 %v3034_v25, %v2533_v26  ;;  %v9569_v26 = vld [vmem:[%s9322_s28 + $0xd8] sm:$0xff] }
  0xb4   : > { %8036 = vmatmul.msk.f32.gmra.mxu0 %vm851_vm1, %v700_v28 }
  0xb5   : > { %8228 = vmatmul.msk.f32.gmra.mxu2 %vm851_vm1, %v1886_v29  ;;  %8324 = vmatmul.msk.f32.gmra.mxu3 %vm851_vm1, %v2668_v30  ;;  %v1895_v29 = vrot.slane %v9569_v26, 4  ;;  %v2677_v30 = vrot.slane %v9569_v26, 5 }
  0xb6   : > { %v1567_v35 = vpop.f32.mrf.mxu1 }
  0xb8   : > { %v2253_v38 = vpop.f32.mrf.mxu2  ;;  %v3037_v39 = vpop.f32.mrf.mxu3 }
  0xb9   : > { %v2534_v40 = vadd.f32 %v2253_v38, %v1565_v33  ;;  %v1072_v41 = vpop.f32.mrf.mxu0  ;;  %8133 = vmatmul.msk.f32.gmra.mxu1 %vm851_vm1, %v9450_v52  ;;  %v1896_v38 = vsel %vm1847_vm3, %v1893_v14, %v1895_v29 }
  0xba   : > { %v1568_v47 = vadd.f32 %v1567_v35, %v1072_v41  ;;  %v9585_v41 = vld [vmem:[%s9322_s28 + $0xe0] sm:$0xff] }
  0xbb   : > { %v9518_v45 = vadd.f32 %v3037_v39, %v2534_v40  ;;  %v2678_v39 = vsel %vm2629_vm4, %v2675_v15, %v2677_v30 }
  0xbc   : > { %8037 = vmatmul.msk.f32.gmra.mxu0 %vm851_vm1, %v702_v42 }
  0xbd   : > { %8229 = vmatmul.msk.f32.gmra.mxu2 %vm851_vm1, %v1888_v43  ;;  %8325 = vmatmul.msk.f32.gmra.mxu3 %vm851_vm1, %v2670_v44  ;;  %v1897_v44 = vrot.slane %v9585_v41, 4 }
  0xbe   : > { %v1570_v49 = vpop.f32.mrf.mxu1 }
  0xc0   : > { %v2256_v52 = vpop.f32.mrf.mxu2  ;;  %v3040_v53 = vpop.f32.mrf.mxu3 }
  0xc1   : > { %v2535_v54 = vadd.f32 %v2256_v52, %v1568_v47  ;;  %v1075_v55 = vpop.f32.mrf.mxu0  ;;  %8134 = vmatmul.msk.f32.gmra.mxu1 %vm851_vm1, %v9462_v59  ;;  %v705_v59 = vrot.slane %v9489_v18, 1  ;;  %v2679_v47 = vrot.slane %v9585_v41, 5 }
  0xc2   : > { %v1571_v62 = vadd.f32 %v1570_v49, %v1075_v55 }
  0xc3   : > { %v9534_v60 = vadd.f32 %v3040_v53, %v2535_v54  ;;  %v706_v7 = vsel %vm661_vm2, %v703_v48, %v705_v59  ;;  %v1898_v54 = vsel %vm1847_vm3, %v1895_v29, %v1897_v44  ;;  %v2680_v55 = vsel %vm2629_vm4, %v2677_v30, %v2679_v47 }
  0xc4   : > { %8038 = vmatmul.msk.f32.gmra.mxu0 %vm851_vm1, %v704_v56 }
  0xc5   : > { %8230 = vmatmul.msk.f32.gmra.mxu2 %vm851_vm1, %v1890_v57  ;;  %8326 = vmatmul.msk.f32.gmra.mxu3 %vm851_vm1, %v2672_v58  ;;  %v9601_v57 = vld [vmem:[%s9322_s28 + $0xe8] sm:$0xff] }
  0xc6   : > { %v1573_v63 = vpop.f32.mrf.mxu1 }
  0xc8   : > { %v2259_v2 = vpop.f32.mrf.mxu2  ;;  %v3043_v3 = vpop.f32.mrf.mxu3 }
  0xc9   : > { %v2536_v5 = vadd.f32 %v2259_v2, %v1571_v62  ;;  %v1078_v6 = vpop.f32.mrf.mxu0  ;;  %8135 = vmatmul.msk.f32.gmra.mxu1 %vm851_vm1, %v9474_v4  ;;  %v707_v4 = vrot.slane %v9505_v32, 1  ;;  %v1899_v62 = vrot.slane %v9601_v57, 4 }
  0xca   : > { %v1574_v12 = vadd.f32 %v1573_v63, %v1078_v6 }
  0xcb   : > { %v9550_v10 = vadd.f32 %v3043_v3, %v2536_v5  ;;  %v708_v22 = vsel %vm661_vm2, %v705_v59, %v707_v4  ;;  %v2681_v59 = vrot.slane %v9601_v57, 5  ;;  %v1900_v5 = vsel %vm1847_vm3, %v1897_v44, %v1899_v62 }
  0xcc   : > { %8039 = vmatmul.msk.f32.gmra.mxu0 %vm851_vm1, %v706_v7 }
  0xcd   : > { %8231 = vmatmul.msk.f32.gmra.mxu2 %vm851_vm1, %v1892_v8  ;;  %8327 = vmatmul.msk.f32.gmra.mxu3 %vm851_vm1, %v2674_v9  ;;  %v2682_v6 = vsel %vm2629_vm4, %v2679_v47, %v2681_v59  ;;  %v9621_v8 = vld [vmem:[%s9322_s28 + $0xf0] sm:$0xff]  ;;  %v715_v9 = vrot.slane %v9569_v26, 1  ;;  %v9685_v47 = vld [vmem:[%s9322_s28 + $0x108] sm:$0xff] }
  0xce   : > { %v1576_v13 = vpop.f32.mrf.mxu1 }
  0xd0   : > { %v2262_v16 = vpop.f32.mrf.mxu2  ;;  %v3046_v19 = vpop.f32.mrf.mxu3 }
  0xd1   : > { %v2537_v20 = vadd.f32 %v2262_v16, %v1574_v12  ;;  %v1081_v21 = vpop.f32.mrf.mxu0  ;;  %8136 = vmatmul.msk.f32.gmra.mxu1 %vm851_vm1, %v9489_v18  ;;  %v709_v18 = vrot.slane %v9521_v46, 1  ;;  %v1901_v12 = vrot.slane %v9621_v8, 4 }
  0xd2   : > { %v1577_v27 = vadd.f32 %v1576_v13, %v1081_v21  ;;  %v9643_v21 = vld [vmem:[%s9322_s28 + $0xf8] sm:$0xff] }
  0xd3   : > { %v9566_v25 = vadd.f32 %v3046_v19, %v2537_v20  ;;  %v710_v37 = vsel %vm661_vm2, %v707_v4, %v709_v18  ;;  %v2683_v4 = vrot.slane %v9621_v8, 5  ;;  %v1902_v19 = vsel %vm1847_vm3, %v1899_v62, %v1901_v12  ;;  %v9703_v62 = vld [vmem:[%s9322_s28 + $0x110] sm:$0xff] }
  0xd4   : > { %8040 = vmatmul.msk.f32.gmra.mxu0 %vm851_vm1, %v708_v22  ;;  %v717_v22 = vrot.slane %v9585_v41, 1 }
  0xd5   : > { %8232 = vmatmul.msk.f32.gmra.mxu2 %vm851_vm1, %v1894_v23  ;;  %8328 = vmatmul.msk.f32.gmra.mxu3 %vm851_vm1, %v2676_v24  ;;  %v2684_v20 = vsel %vm2629_vm4, %v2681_v59, %v2683_v4  ;;  %v2685_v24 = vrot.slane %v9643_v21, 5  ;;  %v723_v59 = vrot.slane %v9643_v21, 1 }
  0xd6   : > { %v1579_v28 = vpop.f32.mrf.mxu1  ;;  %v718_v29 = vsel %vm661_vm2, %v715_v9, %v717_v22 }
  0xd8   : > { %v2265_v33 = vpop.f32.mrf.mxu2  ;;  %v3049_v34 = vpop.f32.mrf.mxu3 }
  0xd9   : > { %v2538_v35 = vadd.f32 %v2265_v33, %v1577_v27  ;;  %v1084_v36 = vpop.f32.mrf.mxu0  ;;  %8137 = vmatmul.msk.f32.gmra.mxu1 %vm851_vm1, %v9505_v32  ;;  %v711_v32 = vrot.slane %v9537_v61, 1  ;;  %v2686_v33 = vsel %vm2629_vm4, %v2683_v4, %v2685_v24  ;;  %v9717_v4 = vld [vmem:[%s9322_s28 + $0x118] sm:$0xff] }
  0xda   : > { %v1580_v42 = vadd.f32 %v1579_v28, %v1084_v36 }
  0xdb   : > { %v9582_v40 = vadd.f32 %v3049_v34, %v2538_v35  ;;  %v712_v52 = vsel %vm661_vm2, %v709_v18, %v711_v32  ;;  %v9665_v34 = vld [vmem:[%s9322_s28 + $0x100] sm:$0xff]  ;;  %v719_v35 = vrot.slane %v9601_v57, 1 }
  0xdc   : > { %8041 = vmatmul.msk.f32.gmra.mxu0 %vm851_vm1, %v710_v37  ;;  %v2687_v37 = vrot.slane %v9665_v34, 5 }
  0xdd   : > { %8233 = vmatmul.msk.f32.gmra.mxu2 %vm851_vm1, %v1896_v38  ;;  %8329 = vmatmul.msk.f32.gmra.mxu3 %vm851_vm1, %v2678_v39 }
  0xde   : > { %v1582_v43 = vpop.f32.mrf.mxu1  ;;  %v2688_v44 = vsel %vm2629_vm4, %v2685_v24, %v2687_v37 }
  0xe0   : > { %v2268_v48 = vpop.f32.mrf.mxu2  ;;  %v3052_v49 = vpop.f32.mrf.mxu3 }
  0xe1   : > { %v2539_v50 = vadd.f32 %v2268_v48, %v1580_v42  ;;  %v1087_v51 = vpop.f32.mrf.mxu0  ;;  %8138 = vmatmul.msk.f32.gmra.mxu1 %vm851_vm1, %v9521_v46  ;;  %v713_v46 = vrot.slane %v9553_v11, 1  ;;  %v721_v48 = vrot.slane %v9621_v8, 1 }
  0xe2   : > { %v1583_v53 = vadd.f32 %v1582_v43, %v1087_v51 }
  0xe3   : > { %v9598_v56 = vadd.f32 %v3052_v49, %v2539_v50  ;;  %v714_v3 = vsel %vm661_vm2, %v711_v32, %v713_v46  ;;  %v716_v16 = vsel %vm661_vm2, %v713_v46, %v715_v9  ;;  %v720_v32 = vsel %vm661_vm2, %v717_v22, %v719_v35 }
  0xe4   : > { %8042 = vmatmul.msk.f32.gmra.mxu0 %vm851_vm1, %v712_v52  ;;  %v2689_v50 = vrot.slane %v9685_v47, 5 }
  0xe5   : > { %8234 = vmatmul.msk.f32.gmra.mxu2 %vm851_vm1, %v1898_v54  ;;  %8330 = vmatmul.msk.f32.gmra.mxu3 %vm851_vm1, %v2680_v55  ;;  %v722_v54 = vsel %vm661_vm2, %v719_v35, %v721_v48 }
  0xe6   : > { %v9607_v58 = vpop.f32.mrf.mxu1  ;;  %v2690_v46 = vsel %vm2629_vm4, %v2687_v37, %v2689_v50 }
  0xe8   : > { %v2271_v63 = vpop.f32.mrf.mxu2  ;;  %v3055_v0 = vpop.f32.mrf.mxu3 }
  0xe9   : > { %v2540_v1 = vadd.f32 %v2271_v63, %v1583_v53  ;;  %v9611_v2 = vpop.f32.mrf.mxu0  ;;  %8139 = vmatmul.msk.f32.gmra.mxu1 %vm851_vm1, %v9537_v61 }
  0xeb   : > { %v9618_v7 = vadd.f32 %v3055_v0, %v2540_v1  ;;  %v2691_v0 = vrot.slane %v9703_v62, 5 }
  0xec   : > { %8043 = vmatmul.msk.f32.gmra.mxu0 %vm851_vm1, %v714_v3 }
  0xed   : > { %8235 = vmatmul.msk.f32.gmra.mxu2 %vm851_vm1, %v1900_v5  ;;  %8331 = vmatmul.msk.f32.gmra.mxu3 %vm851_vm1, %v2682_v6  ;;  %v724_v6 = vsel %vm661_vm2, %v721_v48, %v723_v59 }
  0xee   : > { %v9627_v61 = vpop.f32.mrf.mxu1 }
  0xf0   : > { %v9631_v13 = vpop.f32.mrf.mxu2  ;;  %v9633_v14 = vpop.f32.mrf.mxu3 }
  0xf1   : > { %v9635_v15 = vpop.f32.mrf.mxu0  ;;  %8140 = vmatmul.msk.f32.gmra.mxu1 %vm851_vm1, %v9553_v11  ;;  %v1903_v11 = vrot.slane %v9643_v21, 4 }
  0xf3   : > { %v1904_v30 = vsel %vm1847_vm3, %v1901_v12, %v1903_v11  ;;  %v2692_v12 = vsel %vm2629_vm4, %v2689_v50, %v2691_v0 }
  0xf4   : > { %8044 = vmatmul.msk.f32.gmra.mxu0 %vm851_vm1, %v716_v16  ;;  %v725_v16 = vrot.slane %v9665_v34, 1 }
  0xf5   : > { %8236 = vmatmul.msk.f32.gmra.mxu2 %vm851_vm1, %v1902_v19  ;;  %8332 = vmatmul.msk.f32.gmra.mxu3 %vm851_vm1, %v2684_v20  ;;  %v2693_v20 = vrot.slane %v9717_v4, 5 }
  0xf6   : > { %v9649_v23 = vpop.f32.mrf.mxu1 }
  0xf8   : > { %v9653_v27 = vpop.f32.mrf.mxu2  ;;  %v9655_v18 = vpop.f32.mrf.mxu3 }
  0xf9   : > { %v9657_v28 = vpop.f32.mrf.mxu0  ;;  %8141 = vmatmul.msk.f32.gmra.mxu1 %vm851_vm1, %v9569_v26  ;;  %v1905_v26 = vrot.slane %v9665_v34, 4 }
  0xfb   : > { %v1906_v43 = vsel %vm1847_vm3, %v1903_v11, %v1905_v26 }
  0xfc   : > { %8045 = vmatmul.msk.f32.gmra.mxu0 %vm851_vm1, %v718_v29  ;;  %v726_v29 = vsel %vm661_vm2, %v723_v59, %v725_v16 }
  0xfd   : > { %8237 = vmatmul.msk.f32.gmra.mxu2 %vm851_vm1, %v1904_v30  ;;  %8333 = vmatmul.msk.f32.gmra.mxu3 %vm851_vm1, %v2686_v33  ;;  %v2694_v33 = vsel %vm2629_vm4, %v2691_v0, %v2693_v20 }
  0xfe   : > { %v9671_v36 = vpop.f32.mrf.mxu1 }
 0x100   : > { %v9675_v38 = vpop.f32.mrf.mxu2  ;;  %v9677_v39 = vpop.f32.mrf.mxu3 }
 0x101   : > { %v1099_v42 = vpop.f32.mrf.mxu0  ;;  %8142 = vmatmul.msk.f32.gmra.mxu1 %vm851_vm1, %v9585_v41  ;;  %v1907_v41 = vrot.slane %v9685_v47, 4 }
 0x102   : > { %v1595_v50 = vadd.f32 %v9671_v36, %v1099_v42  ;;  %v9750_v36 = vld [vmem:[%s15321_s2] ss:$0 sm:$0xff] }
 0x103   : > { %v1908_v55 = vsel %vm1847_vm3, %v1905_v26, %v1907_v41  ;;  %v9731_v26 = vld [vmem:[%s9322_s28 + $0x120] sm:$0xff] }
 0x104   : > { %8046 = vmatmul.msk.f32.gmra.mxu0 %vm851_vm1, %v720_v32  ;;  %v2695_v48 = vrot.slane %v9731_v26, 5 }
 0x105   : > { %8238 = vmatmul.msk.f32.gmra.mxu2 %vm851_vm1, %v1906_v43  ;;  %8334 = vmatmul.msk.f32.gmra.mxu3 %vm851_vm1, %v2688_v44  ;;  %v727_v43 = vrot.slane %v9685_v47, 1  ;;  %v1913_v44 = vrot.slane %v9731_v26, 4 }
 0x106   : > { %v1597_v49 = vpop.f32.mrf.mxu1  ;;  %v2696_v0 = vsel %vm2629_vm4, %v2693_v20, %v2695_v48 }
 0x107   : > { %v728_v59 = vsel %vm661_vm2, %v725_v16, %v727_v43  ;;  %v1586_v16 = vadd.f32 %v9607_v58, %v9611_v2 }
 0x108   : > { %v9693_v51 = vpop.f32.mrf.mxu2  ;;  %v9695_v52 = vpop.f32.mrf.mxu3 }
 0x109   : > { %v1102_v53 = vpop.f32.mrf.mxu0  ;;  %8143 = vmatmul.msk.f32.gmra.mxu1 %vm851_vm1, %v9601_v57  ;;  %v1909_v57 = vrot.slane %v9703_v62, 4 }
 0x10a   : > { %v1598_v37 = vadd.f32 %v1597_v49, %v1102_v53 }
 0x10b   : > { %v1910_v9 = vsel %vm1847_vm3, %v1907_v41, %v1909_v57 }
 0x10c   : > { %8047 = vmatmul.msk.f32.gmra.mxu0 %vm851_vm1, %v722_v54 }
 0x10d   : > { %8239 = vmatmul.msk.f32.gmra.mxu2 %vm851_vm1, %v1908_v55  ;;  %8335 = vmatmul.msk.f32.gmra.mxu3 %vm851_vm1, %v2690_v46 }
 0x10e   : > { %v1600_v63 = vpop.f32.mrf.mxu1 }
 0x110   : > { %v2286_v1 = vpop.f32.mrf.mxu2  ;;  %v3070_v3 = vpop.f32.mrf.mxu3 }
 0x111   : > { %v1105_v5 = vpop.f32.mrf.mxu0  ;;  %8144 = vmatmul.msk.f32.gmra.mxu1 %vm851_vm1, %v9621_v8  ;;  %v1911_v8 = vrot.slane %v9717_v4, 4  ;;  %v2545_v46 = vadd.f32 %v2286_v1, %v1598_v37 }
 0x112   : > { %v1601_v35 = vadd.f32 %v1600_v63, %v1105_v5  ;;  %v1592_v63 = vadd.f32 %v9649_v23, %v9657_v28  ;;  %v9753_v5 = vld [vmem:[%s9322_s28 + $0x128] sm:$0xff] }
 0x113   : > { %v1912_v30 = vsel %vm1847_vm3, %v1909_v57, %v1911_v8  ;;  %v1914_v57 = vsel %vm1847_vm3, %v1911_v8, %v1913_v44  ;;  %v3329_v23 = vadd.f32 %v3070_v3, %v2545_v46  ;;  %v2697_v3 = vrot.slane %v9753_v5, 5 }
 0x114   : > { %8048 = vmatmul.msk.f32.gmra.mxu0 %vm851_vm1, %v724_v6  ;;  %v2544_v6 = vadd.f32 %v9693_v51, %v1595_v50  ;;  %v1915_v51 = vrot.slane %v9753_v5, 4 }
 0x115   : > { %8240 = vmatmul.msk.f32.gmra.mxu2 %vm851_vm1, %v1910_v9  ;;  %8336 = vmatmul.msk.f32.gmra.mxu3 %vm851_vm1, %v2692_v12  ;;  %v729_v12 = vrot.slane %v9703_v62, 1  ;;  %v9777_v58 = vadd.f32 %v9750_v36, %v3329_v23 }
 0x116   : > { %v1603_v19 = vpop.f32.mrf.mxu1  ;;  %v3328_v20 = vadd.f32 %v9695_v52, %v2544_v6  ;;  %v1916_v52 = vsel %vm1847_vm3, %v1913_v44, %v1915_v51  ;;  %v9844_v6 = vadd.f32 %v9750_v36, %v9582_v40 }
 0x117   : > { %15324 = vst [vmem:[#allocation9_spill] sm:$0xff] %v9777_v58 }
 0x118   : > { %v2289_v22 = vpop.f32.mrf.mxu2  ;;  %v3073_v11 = vpop.f32.mrf.mxu3  ;;  %15331 = vst [vmem:[#allocation16_spill] sm:$0xff] %v9844_v6 }
 0x119   : > { %v1108_v24 = vpop.f32.mrf.mxu0  ;;  %8145 = vmatmul.msk.f32.gmra.mxu1 %vm851_vm1, %v9643_v21  ;;  %v2546_v41 = vadd.f32 %v2289_v22, %v1601_v35  ;;  %v9791_v35 = vld [vmem:[%s9322_s28 + $0x130] sm:$0xff] }
 0x11a   : > { %v1604_v32 = vadd.f32 %v1603_v19, %v1108_v24  ;;  %v730_v24 = vsel %vm661_vm2, %v727_v43, %v729_v12  ;;  %v2699_v44 = vrot.slane %v9791_v35, 5 }
 0x11b   : > { %v3330_v42 = vadd.f32 %v3073_v11, %v2546_v41 }
 0x11c   : > { %8049 = vmatmul.msk.f32.gmra.mxu0 %vm851_vm1, %v726_v29  ;;  %v2541_v29 = vadd.f32 %v9631_v13, %v1586_v16  ;;  %v9851_v16 = vadd.f32 %v9750_v36, %v9566_v25 }
 0x11d   : > { %8241 = vmatmul.msk.f32.gmra.mxu2 %vm851_vm1, %v1912_v30  ;;  %8337 = vmatmul.msk.f32.gmra.mxu3 %vm851_vm1, %v2694_v33  ;;  %v9771_v19 = vadd.f32 %v9750_v36, %v3330_v42  ;;  %v2698_v30 = vsel %vm2629_vm4, %v2695_v48, %v2697_v3 }
 0x11e   : > { %v1606_v21 = vpop.f32.mrf.mxu1  ;;  %15332 = vst [vmem:[#allocation17_spill] sm:$0xff] %v9851_v16 }
 0x11f   : > { %15323 = vst [vmem:[#allocation8_spill] sm:$0xff] %v9771_v19 }
 0x120   : > { %v2292_v54 = vpop.f32.mrf.mxu2  ;;  %v3076_v55 = vpop.f32.mrf.mxu3 }
 0x121   : > { %v2547_v49 = vadd.f32 %v2292_v54, %v1604_v32  ;;  %v1111_v53 = vpop.f32.mrf.mxu0  ;;  %8146 = vmatmul.msk.f32.gmra.mxu1 %vm851_vm1, %v9665_v34  ;;  %v1589_v34 = vadd.f32 %v9627_v61, %v9635_v15  ;;  %v2543_v61 = vadd.f32 %v9675_v38, %v1592_v63  ;;  %v9824_v63 = vld [vmem:[%s9322_s28 + $0x138] sm:$0xff] }
 0x122   : > { %v1607_v9 = vadd.f32 %v1606_v21, %v1111_v53  ;;  %v1917_v21 = vrot.slane %v9791_v35, 4 }
 0x123   : > { %v3331_v1 = vadd.f32 %v3076_v55, %v2547_v49  ;;  %v2542_v8 = vadd.f32 %v9653_v27, %v1589_v34  ;;  %v3327_v27 = vadd.f32 %v9677_v39, %v2543_v61  ;;  %v3325_v39 = vadd.f32 %v9633_v14, %v2541_v29 }
 0x124   : > { %8050 = vmatmul.msk.f32.gmra.mxu0 %vm851_vm1, %v728_v59  ;;  %v1918_v49 = vsel %vm1847_vm3, %v1915_v51, %v1917_v21  ;;  %v2700_v59 = vsel %vm2629_vm4, %v2697_v3, %v2699_v44  ;;  %v2701_v34 = vrot.slane %v9824_v63, 5  ;;  %v9860_v3 = vld [vmem:[%s9322_s28 + $0x140] sm:$0xff] }
 0x125   : > { %v9760_v28 = vadd.f32 %v9750_v36, %v3331_v1  ;;  %8242 = vmatmul.msk.f32.gmra.mxu2 %vm851_vm1, %v1914_v57  ;;  %8338 = vmatmul.msk.f32.gmra.mxu3 %vm851_vm1, %v2696_v0  ;;  %v3326_v37 = vadd.f32 %v9655_v18, %v2542_v8  ;;  %v9802_v32 = vadd.f32 %v9750_v36, %v3327_v27  ;;  %v731_v18 = vrot.slane %v9717_v4, 1 }
 0x126   : > { %v1609_v15 = vpop.f32.mrf.mxu1  ;;  %v9815_v55 = vadd.f32 %v9750_v36, %v3325_v39  ;;  %v9828_v57 = vadd.f32 %v9750_v36, %v9618_v7  ;;  %v9835_v0 = vadd.f32 %v9750_v36, %v9598_v56  ;;  %v733_v1 = vrot.slane %v9731_v26, 1 }
 0x127   : > { %15322 = vst [vmem:[#allocation7_spill] sm:$0xff] %v9760_v28  ;;  %3712 = vmatpush.msrb.mxu0 %v9760_v28  ;;  %v9809_v48 = vadd.f32 %v9750_v36, %v3326_v37  ;;  %v732_v46 = vsel %vm661_vm2, %v729_v12, %v731_v18  ;;  %v1919_v7 = vrot.slane %v9824_v63, 4  ;;  %v2702_v51 = vsel %vm2629_vm4, %v2699_v44, %v2701_v34 }
 0x128   : > { %v2295_v22 = vpop.f32.mrf.mxu2  ;;  %v3079_v11 = vpop.f32.mrf.mxu3  ;;  %15326 = vst [vmem:[#allocation11_spill] sm:$0xff] %v9802_v32  ;;  %v734_v61 = vsel %vm661_vm2, %v731_v18, %v733_v1  ;;  %v9864_v8 = vadd.f32 %v9750_v36, %v9550_v10  ;;  %v1921_v10 = vrot.slane %v9860_v3, 4  ;;  %v9887_v27 = vadd.f32 %v9750_v36, %v9502_v31 }
 0x129   : > { %v2548_v2 = vadd.f32 %v2295_v22, %v1607_v9  ;;  %3713 = vmatpush.msrb.mxu0 %v9771_v19  ;;  %v1114_v38 = vpop.f32.mrf.mxu0  ;;  %8147 = vmatmul.msk.f32.gmra.mxu1 %vm851_vm1, %v9685_v47  ;;  %v9795_v47 = vadd.f32 %v9750_v36, %v3328_v20  ;;  %15327 = vst [vmem:[#allocation12_spill] sm:$0xff] %v9809_v48  ;;  %v735_v22 = vrot.slane %v9753_v5, 1 }
 0x12a   : > { %v1610_v13 = vadd.f32 %v1609_v15, %v1114_v38  ;;  %15328 = vst [vmem:[#allocation13_spill] sm:$0xff] %v9815_v55  ;;  %v1920_v40 = vsel %vm1847_vm3, %v1917_v21, %v1919_v7  ;;  %v9900_v39 = vadd.f32 %v9750_v36, %v9486_v17 }
 0x12b   : > { %v9787_v33 = vadd.f32 %v3079_v11, %v2548_v2  ;;  %3714 = vmatpush.msrb.mxu0 %v9777_v58  ;;  %15325 = vst [vmem:[#allocation10_spill] sm:$0xff] %v9795_v47  ;;  %v2703_v11 = vrot.slane %v9860_v3, 5  ;;  %v9880_v2 = vadd.f32 %v9750_v36, %v9518_v45  ;;  %v1922_v45 = vsel %vm1847_vm3, %v1919_v7, %v1921_v10 }
 0x12c   : > { %8051 = vmatmul.msk.f32.gmra.mxu0 %vm851_vm1, %v730_v24  ;;  %15329 = vst [vmem:[#allocation14_spill] sm:$0xff] %v9828_v57 }
 0x12d   : > { %8243 = vmatmul.msk.f32.gmra.mxu2 %vm851_vm1, %v1916_v52  ;;  %8339 = vmatmul.msk.f32.gmra.mxu3 %vm851_vm1, %v2698_v30  ;;  %15330 = vst [vmem:[#allocation15_spill] sm:$0xff] %v9835_v0  ;;  %v736_v52 = vsel %vm661_vm2, %v733_v1, %v735_v22  ;;  %v2704_v37 = vsel %vm2629_vm4, %v2701_v34, %v2703_v11 }
 0x12e   : > { %3715 = vmatpush.msrb.mxu0 %v9795_v47  ;;  %v1612_v43 = vpop.f32.mrf.mxu1  ;;  %15333 = vst [vmem:[#allocation18_spill] sm:$0xff] %v9864_v8 }
 0x12f   : > { %15335 = vst [vmem:[#allocation20_spill] sm:$0xff] %v9880_v2 }
 0x130   : > { %3716 = vmatpush.msrb.mxu0 %v9802_v32  ;;  %v2298_v41 = vpop.f32.mrf.mxu2  ;;  %v3082_v14 = vpop.f32.mrf.mxu3  ;;  %15336 = vst [vmem:[#allocation21_spill] sm:$0xff] %v9887_v27 }
 0x131   : > { %v2549_v50 = vadd.f32 %v2298_v41, %v1610_v13  ;;  %v1117_v54 = vpop.f32.mrf.mxu0  ;;  %8148 = vmatmul.msk.f32.gmra.mxu1 %vm851_vm1, %v9703_v62  ;;  %v9896_v13 = vld [vmem:[%s9322_s28 + $0x148] sm:$0xff]  ;;  %15337 = vst [vmem:[#allocation22_spill] sm:$0xff] %v9900_v39 }
 0x132   : > { %3717 = vmatpush.msrb.mxu0 %v9809_v48  ;;  %v1613_v62 = vadd.f32 %v1612_v43, %v1117_v54  ;;  %v737_v43 = vrot.slane %v9791_v35, 1  ;;  %v1923_v18 = vrot.slane %v9896_v13, 4  ;;  %v2705_v17 = vrot.slane %v9896_v13, 5 }
 0x133   : > { %v9820_v53 = vadd.f32 %v3082_v14, %v2549_v50 }
 0x134   : > { %3718 = vmatpush.msrb.mxu0 %v9815_v55  ;;  %v738_v50 = vsel %vm661_vm2, %v735_v22, %v737_v43  ;;  %v1924_v54 = vsel %vm1847_vm3, %v1921_v10, %v1923_v18 }
 0x135   : > { %8052 = vmatmul.msk.f32.gmra.mxu0 %vm851_vm1, %v732_v46  ;;  %8244 = vmatmul.msk.f32.gmra.mxu2 %vm851_vm1, %v1918_v49  ;;  %v2706_v49 = vsel %vm2629_vm4, %v2703_v11, %v2705_v17 }
 0x136   : > { %8340 = vmatmul.msk.f32.gmra.mxu3 %vm851_vm1, %v2700_v59  ;;  %3719 = vmatpush.msrb.mxu0 %v9828_v57  ;;  %v1615_v42 = vpop.f32.mrf.mxu1  ;;  %v9918_v59 = vld [vmem:[%s9322_s28 + $0x150] sm:$0xff] }
 0x137   : > { %v1925_v1 = vrot.slane %v9918_v59, 4  ;;  %v2707_v7 = vrot.slane %v9918_v59, 5 }
 0x138   : > { %3720 = vmatpush.msrb.mxu0 %v9835_v0  ;;  %v2301_v56 = vpop.f32.mrf.mxu2  ;;  %v3085_v23 = vpop.f32.mrf.mxu3 }
 0x139   : > { %v2550_v9 = vadd.f32 %v2301_v56, %v1613_v62  ;;  %v1120_v12 = vpop.f32.mrf.mxu0  ;;  %8149 = vmatmul.msk.f32.gmra.mxu1 %vm851_vm1, %v9717_v4  ;;  %v9871_v4 = vadd.f32 %v9750_v36, %v9534_v60 }
 0x13a   : > { %3721 = vmatpush.msrb.mxu0 %v9844_v6  ;;  %v1616_v25 = vadd.f32 %v1615_v42, %v1120_v12 }
 0x13b   : > { %v9856_v15 = vadd.f32 %v3085_v23, %v2550_v9  ;;  %15334 = vst [vmem:[#allocation19_spill] sm:$0xff] %v9871_v4 }
 0x13c   : > { %3722 = vmatpush.msrb.mxu0 %v9851_v16 }
 0x13d   : > { %8053 = vmatmul.msk.f32.gmra.mxu0 %vm851_vm1, %v734_v61  ;;  %8245 = vmatmul.msk.f32.gmra.mxu2 %vm851_vm1, %v1920_v40  ;;  %v1926_v61 = vsel %vm1847_vm3, %v1923_v18, %v1925_v1 }
 0x13e   : > { %8341 = vmatmul.msk.f32.gmra.mxu3 %vm851_vm1, %v2702_v51  ;;  %3723 = vmatpush.msrb.mxu0 %v9864_v8  ;;  %v1618_v20 = vpop.f32.mrf.mxu1  ;;  %v2708_v51 = vsel %vm2629_vm4, %v2705_v17, %v2707_v7 }
 0x140   : > { %3724 = vmatpush.msrb.mxu0 %v9871_v4  ;;  %v2304_v60 = vpop.f32.mrf.mxu2  ;;  %v3088_v38 = vpop.f32.mrf.mxu3  ;;  %v10096_v4 = vld [vmem:[%s9322_s28 + $0x1a0] sm:$0xff] }
 0x141   : > { %v2551_v24 = vadd.f32 %v2304_v60, %v1616_v25  ;;  %v1123_v29 = vpop.f32.mrf.mxu0  ;;  %8150 = vmatmul.msk.f32.gmra.mxu1 %vm851_vm1, %v9731_v26  ;;  %v9934_v25 = vld [vmem:[%s9322_s28 + $0x158] sm:$0xff] }
 0x142   : > { %3725 = vmatpush.msrb.mxu0 %v9880_v2  ;;  %v1619_v31 = vadd.f32 %v1618_v20, %v1123_v29  ;;  %v1927_v10 = vrot.slane %v9934_v25, 4  ;;  %v2709_v11 = vrot.slane %v9934_v25, 5 }
 0x143   : > { %v9892_v30 = vadd.f32 %v3088_v38, %v2551_v24 }
 0x144   : > { %3726 = vmatpush.msrb.mxu0 %v9887_v27 }
 0x145   : > { %8054 = vmatmul.msk.f32.gmra.mxu0 %vm851_vm1, %v736_v52  ;;  %8246 = vmatmul.msk.f32.gmra.mxu2 %vm851_vm1, %v1922_v45  ;;  %v1928_v45 = vsel %vm1847_vm3, %v1925_v1, %v1927_v10  ;;  %v9966_v1 = vld [vmem:[%s9322_s28 + $0x168] sm:$0xff] }
 0x146   : > { %8342 = vmatmul.msk.f32.gmra.mxu3 %vm851_vm1, %v2704_v37  ;;  %3727 = vmatpush.msrb.mxu0 %v9900_v39  ;;  %v1621_v26 = vpop.f32.mrf.mxu1 }
 0x148   : > { %v2307_v21 = vpop.f32.mrf.mxu2  ;;  %v3091_v44 = vpop.f32.mrf.mxu3 }
 0x149   : > { %v2552_v41 = vadd.f32 %v2307_v21, %v1619_v31  ;;  %v1126_v14 = vpop.f32.mrf.mxu0  ;;  %8151 = vmatmul.msk.f32.gmra.mxu1 %vm851_vm1, %v9753_v5  ;;  %v739_v5 = vrot.slane %v9824_v63, 1  ;;  %v2710_v31 = vsel %vm2629_vm4, %v2707_v7, %v2709_v11 }
 0x14a   : > { %v1622_v62 = vadd.f32 %v1621_v26, %v1126_v14  ;;  %v9950_v26 = vld [vmem:[%s9322_s28 + $0x160] sm:$0xff] }
 0x14b   : > { %v9914_v46 = vadd.f32 %v3091_v44, %v2552_v41  ;;  %v740_v12 = vsel %vm661_vm2, %v737_v43, %v739_v5  ;;  %v1929_v17 = vrot.slane %v9950_v26, 4  ;;  %v2711_v21 = vrot.slane %v9950_v26, 5 }
 0x14d   : > { %8055 = vmatmul.msk.f32.gmra.mxu0 %vm851_vm1, %v738_v50  ;;  %8247 = vmatmul.msk.f32.gmra.mxu2 %vm851_vm1, %v1924_v54 }
 0x14e   : > { %8343 = vmatmul.msk.f32.gmra.mxu3 %vm851_vm1, %v2706_v49  ;;  %v1624_v42 = vpop.f32.mrf.mxu1 }
 0x150   : > { %v2310_v34 = vpop.f32.mrf.mxu2  ;;  %v3094_v56 = vpop.f32.mrf.mxu3 }
 0x151   : > { %v2553_v23 = vadd.f32 %v2310_v34, %v1622_v62  ;;  %v1129_v9 = vpop.f32.mrf.mxu0  ;;  %8152 = vmatmul.msk.f32.gmra.mxu1 %vm851_vm1, %v9791_v35  ;;  %v741_v35 = vrot.slane %v9860_v3, 1  ;;  %v1930_v62 = vsel %vm1847_vm3, %v1927_v10, %v1929_v17  ;;  %v1931_v34 = vrot.slane %v9966_v1, 4  ;;  %v9986_v10 = vld [vmem:[%s9322_s28 + $0x170] sm:$0xff] }
 0x152   : > { %v1625_v20 = vadd.f32 %v1624_v42, %v1129_v9 }
 0x153   : > { %v9930_v40 = vadd.f32 %v3094_v56, %v2553_v23  ;;  %v742_v52 = vsel %vm661_vm2, %v739_v5, %v741_v35  ;;  %v2712_v5 = vsel %vm2629_vm4, %v2709_v11, %v2711_v21  ;;  %v2713_v56 = vrot.slane %v9966_v1, 5 }
 0x155   : > { %8056 = vmatmul.msk.f32.gmra.mxu0 %vm851_vm1, %v740_v12  ;;  %8248 = vmatmul.msk.f32.gmra.mxu2 %vm851_vm1, %v1926_v61 }
 0x156   : > { %8344 = vmatmul.msk.f32.gmra.mxu3 %vm851_vm1, %v2708_v51  ;;  %v1627_v22 = vpop.f32.mrf.mxu1 }
 0x158   : > { %v2313_v60 = vpop.f32.mrf.mxu2  ;;  %v3097_v38 = vpop.f32.mrf.mxu3 }
 0x159   : > { %v2554_v24 = vadd.f32 %v2313_v60, %v1625_v20  ;;  %v1132_v29 = vpop.f32.mrf.mxu0  ;;  %8153 = vmatmul.msk.f32.gmra.mxu1 %vm851_vm1, %v9824_v63  ;;  %v743_v63 = vrot.slane %v9896_v13, 1  ;;  %v1932_v20 = vsel %vm1847_vm3, %v1929_v17, %v1931_v34  ;;  %v1933_v60 = vrot.slane %v9986_v10, 4 }
 0x15a   : > { %v1628_v43 = vadd.f32 %v1627_v22, %v1132_v29  ;;  %v749_v17 = vrot.slane %v9950_v26, 1 }
 0x15b   : > { %v9946_v37 = vadd.f32 %v3097_v38, %v2554_v24  ;;  %v744_v49 = vsel %vm661_vm2, %v741_v35, %v743_v63  ;;  %v2714_v35 = vsel %vm2629_vm4, %v2711_v21, %v2713_v56  ;;  %v2715_v38 = vrot.slane %v9986_v10, 5 }
 0x15d   : > { %8057 = vmatmul.msk.f32.gmra.mxu0 %vm851_vm1, %v742_v52  ;;  %8249 = vmatmul.msk.f32.gmra.mxu2 %vm851_vm1, %v1928_v45 }
 0x15e   : > { %8345 = vmatmul.msk.f32.gmra.mxu3 %vm851_vm1, %v2710_v31  ;;  %v1630_v18 = vpop.f32.mrf.mxu1  ;;  %v1934_v31 = vsel %vm1847_vm3, %v1931_v34, %v1933_v60 }
 0x160   : > { %v2316_v44 = vpop.f32.mrf.mxu2  ;;  %v3100_v41 = vpop.f32.mrf.mxu3 }
 0x161   : > { %v2555_v14 = vadd.f32 %v2316_v44, %v1628_v43  ;;  %v1135_v50 = vpop.f32.mrf.mxu0  ;;  %8154 = vmatmul.msk.f32.gmra.mxu1 %vm851_vm1, %v9860_v3  ;;  %v745_v3 = vrot.slane %v9918_v59, 1  ;;  %v2716_v43 = vsel %vm2629_vm4, %v2713_v56, %v2715_v38 }
 0x162   : > { %v1631_v54 = vadd.f32 %v1630_v18, %v1135_v50  ;;  %v10008_v18 = vld [vmem:[%s9322_s28 + $0x178] sm:$0xff] }
 0x163   : > { %v9962_v42 = vadd.f32 %v3100_v41, %v2555_v14  ;;  %v746_v51 = vsel %vm661_vm2, %v743_v63, %v745_v3  ;;  %v2717_v21 = vrot.slane %v10008_v18, 5 }
 0x165   : > { %8058 = vmatmul.msk.f32.gmra.mxu0 %vm851_vm1, %v744_v49  ;;  %8250 = vmatmul.msk.f32.gmra.mxu2 %vm851_vm1, %v1930_v62  ;;  %v2718_v49 = vsel %vm2629_vm4, %v2715_v38, %v2717_v21  ;;  %v10030_v62 = vld [vmem:[%s9322_s28 + $0x180] sm:$0xff] }
 0x166   : > { %8346 = vmatmul.msk.f32.gmra.mxu3 %vm851_vm1, %v2712_v5  ;;  %v9971_v7 = vpop.f32.mrf.mxu1  ;;  %v2719_v34 = vrot.slane %v10030_v62, 5  ;;  %v757_v39 = vrot.slane %v10030_v62, 1 }
 0x168   : > { %v2319_v23 = vpop.f32.mrf.mxu2  ;;  %v3103_v9 = vpop.f32.mrf.mxu3 }
 0x169   : > { %v2556_v12 = vadd.f32 %v2319_v23, %v1631_v54  ;;  %v9976_v61 = vpop.f32.mrf.mxu0  ;;  %8155 = vmatmul.msk.f32.gmra.mxu1 %vm851_vm1, %v9896_v13  ;;  %v747_v13 = vrot.slane %v9934_v25, 1 }
 0x16b   : > { %v9982_v22 = vadd.f32 %v3103_v9, %v2556_v12  ;;  %v748_v45 = vsel %vm661_vm2, %v745_v3, %v747_v13  ;;  %v750_v50 = vsel %vm661_vm2, %v747_v13, %v749_v17  ;;  %v751_v3 = vrot.slane %v9966_v1, 1 }
 0x16d   : > { %8059 = vmatmul.msk.f32.gmra.mxu0 %vm851_vm1, %v746_v51  ;;  %8251 = vmatmul.msk.f32.gmra.mxu2 %vm851_vm1, %v1932_v20  ;;  %v752_v12 = vsel %vm661_vm2, %v749_v17, %v751_v3  ;;  %v2720_v20 = vsel %vm2629_vm4, %v2717_v21, %v2719_v34 }
 0x16e   : > { %8347 = vmatmul.msk.f32.gmra.mxu3 %vm851_vm1, %v2714_v35  ;;  %v9991_v11 = vpop.f32.mrf.mxu1  ;;  %v10050_v35 = vld [vmem:[%s9322_s28 + $0x188] sm:$0xff] }
 0x16f   : > { %v2721_v38 = vrot.slane %v10050_v35, 5 }
 0x170   : > { %v9996_v24 = vpop.f32.mrf.mxu2  ;;  %v9998_v29 = vpop.f32.mrf.mxu3 }
 0x171   : > { %v10000_v52 = vpop.f32.mrf.mxu0  ;;  %8156 = vmatmul.msk.f32.gmra.mxu1 %vm851_vm1, %v9918_v59  ;;  %v1935_v59 = vrot.slane %v10008_v18, 4  ;;  %v2722_v21 = vsel %vm2629_vm4, %v2719_v34, %v2721_v38 }
 0x173   : > { %v1936_v54 = vsel %vm1847_vm3, %v1933_v60, %v1935_v59  ;;  %v753_v60 = vrot.slane %v9986_v10, 1 }
 0x175   : > { %8060 = vmatmul.msk.f32.gmra.mxu0 %vm851_vm1, %v748_v45  ;;  %8252 = vmatmul.msk.f32.gmra.mxu2 %vm851_vm1, %v1934_v31  ;;  %v754_v17 = vsel %vm661_vm2, %v751_v3, %v753_v60 }
 0x176   : > { %8348 = vmatmul.msk.f32.gmra.mxu3 %vm851_vm1, %v2716_v43  ;;  %v10013_v63 = vpop.f32.mrf.mxu1 }
 0x178   : > { %v10018_v44 = vpop.f32.mrf.mxu2  ;;  %v10020_v41 = vpop.f32.mrf.mxu3 }
 0x179   : > { %v10022_v14 = vpop.f32.mrf.mxu0  ;;  %8157 = vmatmul.msk.f32.gmra.mxu1 %vm851_vm1, %v9934_v25  ;;  %v1937_v25 = vrot.slane %v10030_v62, 4 }
 0x17b   : > { %v1938_v51 = vsel %vm1847_vm3, %v1935_v59, %v1937_v25 }
 0x17d   : > { %8061 = vmatmul.msk.f32.gmra.mxu0 %vm851_vm1, %v750_v50  ;;  %8253 = vmatmul.msk.f32.gmra.mxu2 %vm851_vm1, %v1936_v54  ;;  %v10068_v50 = vld [vmem:[%s9322_s28 + $0x190] sm:$0xff] }
 0x17e   : > { %8349 = vmatmul.msk.f32.gmra.mxu3 %vm851_vm1, %v2718_v49  ;;  %v10035_v5 = vpop.f32.mrf.mxu1  ;;  %v755_v49 = vrot.slane %v10008_v18, 1  ;;  %v2723_v3 = vrot.slane %v10068_v50, 5 }
 0x180   : > { %v10040_v56 = vpop.f32.mrf.mxu2  ;;  %v10042_v23 = vpop.f32.mrf.mxu3  ;;  %v756_v34 = vsel %vm661_vm2, %v753_v60, %v755_v49 }
 0x181   : > { %v1147_v9 = vpop.f32.mrf.mxu0  ;;  %8158 = vmatmul.msk.f32.gmra.mxu1 %vm851_vm1, %v9950_v26  ;;  %v1939_v26 = vrot.slane %v10050_v35, 4 }
 0x183   : > { %v1940_v59 = vsel %vm1847_vm3, %v1937_v25, %v1939_v26 }
 0x185   : > { %8062 = vmatmul.msk.f32.gmra.mxu0 %vm851_vm1, %v752_v12  ;;  %8254 = vmatmul.msk.f32.gmra.mxu2 %vm851_vm1, %v1938_v51 }
 0x186   : > { %8350 = vmatmul.msk.f32.gmra.mxu3 %vm851_vm1, %v2720_v20  ;;  %v1645_v13 = vpop.f32.mrf.mxu1 }
 0x188   : > { %v10058_v45 = vpop.f32.mrf.mxu2  ;;  %v10060_v31 = vpop.f32.mrf.mxu3 }
 0x189   : > { %v1150_v43 = vpop.f32.mrf.mxu0  ;;  %8159 = vmatmul.msk.f32.gmra.mxu1 %vm851_vm1, %v9966_v1  ;;  %v1941_v1 = vrot.slane %v10068_v50, 4 }
 0x18a   : > { %v1646_v8 = vadd.f32 %v1645_v13, %v1150_v43 }
 0x18b   : > { %v1942_v20 = vsel %vm1847_vm3, %v1939_v26, %v1941_v1 }
 0x18d   : > { %8063 = vmatmul.msk.f32.gmra.mxu0 %vm851_vm1, %v754_v17  ;;  %8255 = vmatmul.msk.f32.gmra.mxu2 %vm851_vm1, %v1940_v59  ;;  %v2724_v17 = vsel %vm2629_vm4, %v2721_v38, %v2723_v3  ;;  %v10082_v59 = vld [vmem:[%s9322_s28 + $0x198] sm:$0xff]  ;;  %v758_v38 = vsel %vm661_vm2, %v755_v49, %v757_v39  ;;  %v1945_v49 = vrot.slane %v10096_v4, 4 }
 0x18e   : > { %8351 = vmatmul.msk.f32.gmra.mxu3 %vm851_vm1, %v2722_v21  ;;  %v1648_v54 = vpop.f32.mrf.mxu1  ;;  %v2725_v60 = vrot.slane %v10082_v59, 5 }
 0x190   : > { %v2334_v12 = vpop.f32.mrf.mxu2  ;;  %v3118_v25 = vpop.f32.mrf.mxu3 }
 0x191   : > { %v1153_v51 = vpop.f32.mrf.mxu0  ;;  %8160 = vmatmul.msk.f32.gmra.mxu1 %vm851_vm1, %v9986_v10  ;;  %v1943_v10 = vrot.slane %v10082_v59, 4 }
 0x195   : > { %8064 = vmatmul.msk.f32.gmra.mxu0 %vm851_vm1, %v756_v34  ;;  %8256 = vmatmul.msk.f32.gmra.mxu2 %vm851_vm1, %v1942_v20  ;;  %v1944_v34 = vsel %vm1847_vm3, %v1941_v1, %v1943_v10  ;;  %v1649_v20 = vadd.f32 %v1648_v54, %v1153_v51  ;;  %v2727_v54 = vrot.slane %v10096_v4, 5 }
 0x196   : > { %8352 = vmatmul.msk.f32.gmra.mxu3 %vm851_vm1, %v2724_v17  ;;  %v1651_v21 = vpop.f32.mrf.mxu1  ;;  %v2726_v17 = vsel %vm2629_vm4, %v2723_v3, %v2725_v60  ;;  %v1643_v3 = vadd.f32 %v10035_v5, %v1147_v9  ;;  %v10113_v5 = vld [vmem:[%s9322_s28 + $0x1a8] sm:$0xff] }
 0x197   : > { %v2728_v0 = vsel %vm2629_vm4, %v2725_v60, %v2727_v54 }
 0x198   : > { %v2337_v27 = vpop.f32.mrf.mxu2  ;;  %v3121_v26 = vpop.f32.mrf.mxu3 }
 0x199   : > { %v1156_v2 = vpop.f32.mrf.mxu0  ;;  %8161 = vmatmul.msk.f32.gmra.mxu1 %vm851_vm1, %v10008_v18  ;;  %v759_v18 = vrot.slane %v10050_v35, 1  ;;  %v2562_v1 = vadd.f32 %v2337_v27, %v1649_v20 }
 0x19a   : > { %v1652_v16 = vadd.f32 %v1651_v21, %v1156_v2  ;;  %v2561_v2 = vadd.f32 %v2334_v12, %v1646_v8  ;;  %v2560_v8 = vadd.f32 %v10058_v45, %v1643_v3 }
 0x19b   : > { %v3346_v27 = vadd.f32 %v3121_v26, %v2562_v1 }
 0x19c   : > { %v3345_v9 = vadd.f32 %v3118_v25, %v2561_v2 }
 0x19d   : > { %8065 = vmatmul.msk.f32.gmra.mxu0 %vm851_vm1, %v758_v38  ;;  %8257 = vmatmul.msk.f32.gmra.mxu2 %vm851_vm1, %v1944_v34  ;;  %v1640_v38 = vadd.f32 %v10013_v63, %v10022_v14  ;;  %v760_v34 = vsel %vm661_vm2, %v757_v39, %v759_v18  ;;  %v1634_v39 = vadd.f32 %v9971_v7, %v9976_v61 }
 0x19e   : > { %8353 = vmatmul.msk.f32.gmra.mxu3 %vm851_vm1, %v2726_v17  ;;  %v1654_v6 = vpop.f32.mrf.mxu1  ;;  %v1946_v17 = vsel %vm1847_vm3, %v1943_v10, %v1945_v49  ;;  %v10130_v45 = vadd.f32 %v9750_v36, %v3346_v27  ;;  %v3344_v7 = vadd.f32 %v10060_v31, %v2560_v8 }
 0x19f   : > { %v2559_v14 = vadd.f32 %v10040_v56, %v1640_v38  ;;  %v2557_v26 = vadd.f32 %v9996_v24, %v1634_v39  ;;  %v10188_v39 = vadd.f32 %v9750_v36, %v9982_v22 }
 0x1a0   : > { %v2340_v51 = vpop.f32.mrf.mxu2  ;;  %v3124_v13 = vpop.f32.mrf.mxu3  ;;  %15339 = vst [vmem:[#allocation24_spill] sm:$0xff] %v10130_v45  ;;  %v10155_v24 = vadd.f32 %v9750_v36, %v3344_v7 }
 0x1a1   : > { %v2563_v43 = vadd.f32 %v2340_v51, %v1652_v16  ;;  %v1159_v21 = vpop.f32.mrf.mxu0  ;;  %8162 = vmatmul.msk.f32.gmra.mxu1 %vm851_vm1, %v10030_v62  ;;  %v1637_v16 = vadd.f32 %v9991_v11, %v10000_v52  ;;  %v761_v11 = vrot.slane %v10068_v50, 1  ;;  %v1947_v52 = vrot.slane %v10113_v5, 4  ;;  %15345 = vst [vmem:[#allocation30_spill] sm:$0xff] %v10188_v39 }
 0x1a2   : > { %v1655_v63 = vadd.f32 %v1654_v6, %v1159_v21  ;;  %v2729_v6 = vrot.slane %v10113_v5, 5  ;;  %v3343_v1 = vadd.f32 %v10042_v23, %v2559_v14  ;;  %15341 = vst [vmem:[#allocation26_spill] sm:$0xff] %v10155_v24 }
 0x1a3   : > { %v3347_v20 = vadd.f32 %v3124_v13, %v2563_v43  ;;  %v2558_v25 = vadd.f32 %v10018_v44, %v1637_v16  ;;  %v762_v44 = vsel %vm661_vm2, %v759_v18, %v761_v11  ;;  %v1948_v31 = vsel %vm1847_vm3, %v1945_v49, %v1947_v52  ;;  %v10151_v13 = vld [vmem:[%s9322_s28 + $0x1b0] sm:$0xff] }
 0x1a4   : > { %v2730_v51 = vsel %vm2629_vm4, %v2727_v54, %v2729_v6  ;;  %v10161_v18 = vadd.f32 %v9750_v36, %v3343_v1  ;;  %v1949_v54 = vrot.slane %v10151_v13, 4  ;;  %v2731_v43 = vrot.slane %v10151_v13, 5  ;;  %v10220_v1 = vld [vmem:[%s9322_s28 + $0x1c0] sm:$0xff] }
 0x1a5   : > { %v10119_v62 = vadd.f32 %v9750_v36, %v3347_v20  ;;  %8066 = vmatmul.msk.f32.gmra.mxu0 %vm851_vm1, %v760_v34  ;;  %8258 = vmatmul.msk.f32.gmra.mxu2 %vm851_vm1, %v1946_v17  ;;  %v3342_v2 = vadd.f32 %v10020_v41, %v2558_v25  ;;  %v763_v41 = vrot.slane %v10082_v59, 1 }
 0x1a6   : > { %8354 = vmatmul.msk.f32.gmra.mxu3 %vm851_vm1, %v2728_v0  ;;  %v1657_v12 = vpop.f32.mrf.mxu1  ;;  %v10137_v0 = vadd.f32 %v9750_v36, %v3345_v9  ;;  %15342 = vst [vmem:[#allocation27_spill] sm:$0xff] %v10161_v18  ;;  %v1950_v16 = vsel %vm1847_vm3, %v1947_v52, %v1949_v54  ;;  %v2732_v9 = vsel %vm2629_vm4, %v2729_v6, %v2731_v43 }
 0x1a7   : > { %15338 = vst [vmem:[#allocation23_spill] sm:$0xff] %v10119_v62  ;;  %3795 = vmatpush.msrb.mxu1 %v10119_v62  ;;  %v10169_v21 = vadd.f32 %v9750_v36, %v3342_v2  ;;  %v764_v20 = vsel %vm661_vm2, %v761_v11, %v763_v41  ;;  %v765_v11 = vrot.slane %v10096_v4, 1  ;;  %v10204_v6 = vadd.f32 %v9750_v36, %v9946_v37 }
 0x1a8   : > { %v2343_v61 = vpop.f32.mrf.mxu2  ;;  %v3127_v56 = vpop.f32.mrf.mxu3  ;;  %15340 = vst [vmem:[#allocation25_spill] sm:$0xff] %v10137_v0  ;;  %v2735_v2 = vrot.slane %v10220_v1, 5 }
 0x1a9   : > { %v2564_v10 = vadd.f32 %v2343_v61, %v1655_v63  ;;  %3796 = vmatpush.msrb.mxu1 %v10130_v45  ;;  %v1162_v60 = vpop.f32.mrf.mxu0  ;;  %15343 = vst [vmem:[#allocation28_spill] sm:$0xff] %v10169_v21  ;;  %v10184_v63 = vld [vmem:[%s9322_s28 + $0x1b8] sm:$0xff]  ;;  %v10209_v61 = vadd.f32 %v9750_v36, %v9930_v40  ;;  %v10224_v40 = vadd.f32 %v9750_v36, %v9914_v46  ;;  %v1953_v46 = vrot.slane %v10220_v1, 4 }
 0x1aa   : > { %8163 = vmatmul.msk.f32.gmra.mxu1 %vm851_vm1, %v10050_v35  ;;  %v1658_v23 = vadd.f32 %v1657_v12, %v1162_v60  ;;  %v3341_v35 = vadd.f32 %v9998_v29, %v2557_v26  ;;  %v10195_v12 = vadd.f32 %v9750_v36, %v9962_v42  ;;  %v1951_v22 = vrot.slane %v10184_v63, 4  ;;  %15347 = vst [vmem:[#allocation32_spill] sm:$0xff] %v10204_v6 }
 0x1ab   : > { %v10146_v3 = vadd.f32 %v3127_v56, %v2564_v10  ;;  %3797 = vmatpush.msrb.mxu1 %v10137_v0  ;;  %v2733_v52 = vrot.slane %v10184_v63, 5  ;;  %15348 = vst [vmem:[#allocation33_spill] sm:$0xff] %v10209_v61  ;;  %v766_v10 = vsel %vm661_vm2, %v763_v41, %v765_v11  ;;  %v10245_v41 = vadd.f32 %v9750_v36, %v9820_v53 }
 0x1ac   : > { %v10173_v17 = vadd.f32 %v9750_v36, %v3341_v35  ;;  %15346 = vst [vmem:[#allocation31_spill] sm:$0xff] %v10195_v12  ;;  %v1952_v60 = vsel %vm1847_vm3, %v1949_v54, %v1951_v22  ;;  %v10260_v53 = vadd.f32 %v9750_v36, %v9787_v33 }
 0x1ad   : > { %8067 = vmatmul.msk.f32.gmra.mxu0 %vm851_vm1, %v762_v44  ;;  %8259 = vmatmul.msk.f32.gmra.mxu2 %vm851_vm1, %v1948_v31  ;;  %v2734_v37 = vsel %vm2629_vm4, %v2731_v43, %v2733_v52  ;;  %15349 = vst [vmem:[#allocation34_spill] sm:$0xff] %v10224_v40  ;;  %v10231_v31 = vadd.f32 %v9750_v36, %v9892_v30 }
 0x1ae   : > { %8355 = vmatmul.msk.f32.gmra.mxu3 %vm851_vm1, %v2730_v51  ;;  %3798 = vmatpush.msrb.mxu1 %v10155_v24  ;;  %v1660_v49 = vpop.f32.mrf.mxu1  ;;  %15344 = vst [vmem:[#allocation29_spill] sm:$0xff] %v10173_v17  ;;  %v767_v51 = vrot.slane %v10113_v5, 1 }
 0x1af   : > { %15350 = vst [vmem:[#allocation35_spill] sm:$0xff] %v10231_v31 }
 0x1b0   : > { %3799 = vmatpush.msrb.mxu1 %v10161_v18  ;;  %v2346_v29 = vpop.f32.mrf.mxu2  ;;  %v3130_v38 = vpop.f32.mrf.mxu3  ;;  %15352 = vst [vmem:[#allocation37_spill] sm:$0xff] %v10245_v41  ;;  %v768_v43 = vsel %vm661_vm2, %v765_v11, %v767_v51 }
 0x1b1   : > { %v2565_v34 = vadd.f32 %v2346_v29, %v1658_v23  ;;  %v10240_v23 = vadd.f32 %v9750_v36, %v9856_v15  ;;  %v1954_v29 = vsel %vm1847_vm3, %v1951_v22, %v1953_v46  ;;  %v2736_v15 = vsel %vm2629_vm4, %v2733_v52, %v2735_v2  ;;  %15353 = vst [vmem:[#allocation38_spill] sm:$0xff] %v10260_v53 }
 0x1b2   : > { %3800 = vmatpush.msrb.mxu1 %v10169_v21  ;;  %v1165_v27 = vpop.f32.mrf.mxu0 }
 0x1b3   : > { %v10178_v8 = vadd.f32 %v3130_v38, %v2565_v34  ;;  %8164 = vmatmul.msk.f32.gmra.mxu1 %vm851_vm1, %v10068_v50  ;;  %v1661_v14 = vadd.f32 %v1660_v49, %v1165_v27  ;;  %15351 = vst [vmem:[#allocation36_spill] sm:$0xff] %v10240_v23  ;;  %v10256_v34 = vld [vmem:[%s9322_s28 + $0x1c8] sm:$0xff] }
 0x1b4   : > { %3801 = vmatpush.msrb.mxu1 %v10173_v17  ;;  %v2737_v36 = vrot.slane %v10256_v34, 5 }
 0x1b5   : > { %8068 = vmatmul.msk.f32.gmra.mxu0 %vm851_vm1, %v764_v20  ;;  %8260 = vmatmul.msk.f32.gmra.mxu2 %vm851_vm1, %v1950_v16  ;;  %v769_v20 = vrot.slane %v10151_v13, 1  ;;  %v1955_v16 = vrot.slane %v10256_v34, 4 }
 0x1b6   : > { %8356 = vmatmul.msk.f32.gmra.mxu3 %vm851_vm1, %v2732_v9  ;;  %3802 = vmatpush.msrb.mxu1 %v10188_v39  ;;  %v1663_v50 = vpop.f32.mrf.mxu1 }
 0x1b7   : > { %v770_v11 = vsel %vm661_vm2, %v767_v51, %v769_v20  ;;  %v1956_v22 = vsel %vm1847_vm3, %v1953_v46, %v1955_v16 }
 0x1b8   : > { %3803 = vmatpush.msrb.mxu1 %v10195_v12  ;;  %v2349_v42 = vpop.f32.mrf.mxu2 }
 0x1b9   : > { %v2566_v25 = vadd.f32 %v2349_v42, %v1661_v14  ;;  %v3133_v7 = vpop.f32.mrf.mxu3  ;;  %v2738_v42 = vsel %vm2629_vm4, %v2735_v2, %v2737_v36 }
 0x1ba   : > { %3804 = vmatpush.msrb.mxu1 %v10204_v6  ;;  %v1168_v56 = vpop.f32.mrf.mxu0 }
 0x1bb   : > { %v10214_v26 = vadd.f32 %v3133_v7, %v2566_v25  ;;  %8165 = vmatmul.msk.f32.gmra.mxu1 %vm851_vm1, %v10082_v59  ;;  %v1664_v44 = vadd.f32 %v1663_v50, %v1168_v56  ;;  %v10278_v25 = vld [vmem:[%s9322_s28 + $0x1d0] sm:$0xff] }
 0x1bc   : > { %3805 = vmatpush.msrb.mxu1 %v10209_v61 }
 0x1bd   : > { %8069 = vmatmul.msk.f32.gmra.mxu0 %vm851_vm1, %v766_v10  ;;  %8261 = vmatmul.msk.f32.gmra.mxu2 %vm851_vm1, %v1952_v60  ;;  %v771_v10 = vrot.slane %v10184_v63, 1  ;;  %v1957_v60 = vrot.slane %v10278_v25, 4 }
 0x1be   : > { %8357 = vmatmul.msk.f32.gmra.mxu3 %vm851_vm1, %v2734_v37  ;;  %3806 = vmatpush.msrb.mxu1 %v10224_v40  ;;  %v1666_v59 = vpop.f32.mrf.mxu1  ;;  %v2739_v37 = vrot.slane %v10278_v25, 5 }
 0x1bf   : > { %v772_v46 = vsel %vm661_vm2, %v769_v20, %v771_v10  ;;  %v1958_v2 = vsel %vm1847_vm3, %v1955_v16, %v1957_v60 }
 0x1c0   : > { %3807 = vmatpush.msrb.mxu1 %v10231_v31  ;;  %v2352_v30 = vpop.f32.mrf.mxu2 }
 0x1c1   : > { %v2567_v35 = vadd.f32 %v2352_v30, %v1664_v44  ;;  %v3136_v49 = vpop.f32.mrf.mxu3 }
 0x1c2   : > { %3808 = vmatpush.msrb.mxu1 %v10240_v23  ;;  %v1171_v54 = vpop.f32.mrf.mxu0 }
 0x1c3   : > { %v10250_v38 = vadd.f32 %v3136_v49, %v2567_v35  ;;  %8166 = vmatmul.msk.f32.gmra.mxu1 %vm851_vm1, %v10096_v4  ;;  %v1667_v27 = vadd.f32 %v1666_v59, %v1171_v54  ;;  %v2740_v35 = vsel %vm2629_vm4, %v2737_v36, %v2739_v37  ;;  %v10294_v49 = vld [vmem:[%s9322_s28 + $0x1d8] sm:$0xff] }
 0x1c4   : > { %3809 = vmatpush.msrb.mxu1 %v10245_v41 }
 0x1c5   : > { %8070 = vmatmul.msk.f32.gmra.mxu0 %vm851_vm1, %v768_v43  ;;  %8262 = vmatmul.msk.f32.gmra.mxu2 %vm851_vm1, %v1954_v29  ;;  %v773_v29 = vrot.slane %v10220_v1, 1 }
 0x1c6   : > { %8358 = vmatmul.msk.f32.gmra.mxu3 %vm851_vm1, %v2736_v15  ;;  %3810 = vmatpush.msrb.mxu1 %v10260_v53  ;;  %v1669_v4 = vpop.f32.mrf.mxu1  ;;  %v1959_v15 = vrot.slane %v10294_v49, 4 }
 0x1c7   : > { %v774_v36 = vsel %vm661_vm2, %v771_v10, %v773_v29 }
 0x1c8   : > { %v2355_v33 = vpop.f32.mrf.mxu2 }
 0x1c9   : > { %v2568_v9 = vadd.f32 %v2355_v33, %v1667_v27  ;;  %v3139_v14 = vpop.f32.mrf.mxu3  ;;  %v2741_v27 = vrot.slane %v10294_v49, 5  ;;  %v1960_v33 = vsel %vm1847_vm3, %v1957_v60, %v1959_v15 }
 0x1ca   : > { %v1174_v50 = vpop.f32.mrf.mxu0 }
 0x1cb   : > { %v10272_v52 = vadd.f32 %v3139_v14, %v2568_v9  ;;  %8167 = vmatmul.msk.f32.gmra.mxu1 %vm851_vm1, %v10113_v5  ;;  %v1670_v7 = vadd.f32 %v1669_v4, %v1174_v50  ;;  %v2742_v14 = vsel %vm2629_vm4, %v2739_v37, %v2741_v27  ;;  %v10310_v50 = vld [vmem:[%s9322_s28 + $0x1e0] sm:$0xff] }
 0x1cd   : > { %8071 = vmatmul.msk.f32.gmra.mxu0 %vm851_vm1, %v770_v11  ;;  %8263 = vmatmul.msk.f32.gmra.mxu2 %vm851_vm1, %v1956_v22 }
 0x1ce   : > { %8359 = vmatmul.msk.f32.gmra.mxu3 %vm851_vm1, %v2738_v42  ;;  %v1672_v56 = vpop.f32.mrf.mxu1  ;;  %v775_v42 = vrot.slane %v10256_v34, 1 }
 0x1d0   : > { %v2358_v5 = vpop.f32.mrf.mxu2 }
 0x1d1   : > { %v2569_v44 = vadd.f32 %v2358_v5, %v1670_v7  ;;  %v3142_v59 = vpop.f32.mrf.mxu3  ;;  %v1961_v7 = vrot.slane %v10310_v50, 4  ;;  %v776_v5 = vsel %vm661_vm2, %v773_v29, %v775_v42 }
 0x1d2   : > { %v1177_v51 = vpop.f32.mrf.mxu0 }
 0x1d3   : > { %v10288_v30 = vadd.f32 %v3142_v59, %v2569_v44  ;;  %8168 = vmatmul.msk.f32.gmra.mxu1 %vm851_vm1, %v10151_v13  ;;  %v1673_v54 = vadd.f32 %v1672_v56, %v1177_v51  ;;  %v2743_v56 = vrot.slane %v10310_v50, 5  ;;  %v1962_v44 = vsel %vm1847_vm3, %v1959_v15, %v1961_v7 }
 0x1d5   : > { %8072 = vmatmul.msk.f32.gmra.mxu0 %vm851_vm1, %v772_v46  ;;  %8264 = vmatmul.msk.f32.gmra.mxu2 %vm851_vm1, %v1958_v2  ;;  %v2744_v46 = vsel %vm2629_vm4, %v2741_v27, %v2743_v56  ;;  %v10326_v2 = vld [vmem:[%s9322_s28 + $0x1e8] sm:$0xff] }
 0x1d6   : > { %8360 = vmatmul.msk.f32.gmra.mxu3 %vm851_vm1, %v2740_v35  ;;  %v1675_v43 = vpop.f32.mrf.mxu1  ;;  %v2745_v29 = vrot.slane %v10326_v2, 5 }
 0x1d8   : > { %v2361_v13 = vpop.f32.mrf.mxu2 }
 0x1d9   : > { %v2570_v4 = vadd.f32 %v2361_v13, %v1673_v54  ;;  %v3145_v20 = vpop.f32.mrf.mxu3  ;;  %v777_v54 = vrot.slane %v10278_v25, 1 }
 0x1da   : > { %v1180_v16 = vpop.f32.mrf.mxu0 }
 0x1db   : > { %v10304_v9 = vadd.f32 %v3145_v20, %v2570_v4  ;;  %8169 = vmatmul.msk.f32.gmra.mxu1 %vm851_vm1, %v10184_v63  ;;  %v1676_v11 = vadd.f32 %v1675_v43, %v1180_v16  ;;  %v1963_v43 = vrot.slane %v10326_v2, 4  ;;  %v778_v4 = vsel %vm661_vm2, %v775_v42, %v777_v54 }
 0x1dd   : > { %8073 = vmatmul.msk.f32.gmra.mxu0 %vm851_vm1, %v774_v36  ;;  %8265 = vmatmul.msk.f32.gmra.mxu2 %vm851_vm1, %v1960_v33  ;;  %v1964_v20 = vsel %vm1847_vm3, %v1961_v7, %v1963_v43  ;;  %v2746_v36 = vsel %vm2629_vm4, %v2743_v56, %v2745_v29  ;;  %v10346_v33 = vld [vmem:[%s9322_s28 + $0x1f0] sm:$0xff] }
 0x1de   : > { %8361 = vmatmul.msk.f32.gmra.mxu3 %vm851_vm1, %v2742_v14  ;;  %v1678_v22 = vpop.f32.mrf.mxu1  ;;  %v2747_v42 = vrot.slane %v10346_v33, 5 }
 0x1e0   : > { %v2364_v63 = vpop.f32.mrf.mxu2 }
 0x1e1   : > { %v2571_v10 = vadd.f32 %v2364_v63, %v1676_v11  ;;  %v3148_v60 = vpop.f32.mrf.mxu3  ;;  %v779_v11 = vrot.slane %v10294_v49, 1 }
 0x1e2   : > { %v1183_v37 = vpop.f32.mrf.mxu0 }
 0x1e3   : > { %v10320_v59 = vadd.f32 %v3148_v60, %v2571_v10  ;;  %v1679_v51 = vadd.f32 %v1678_v22, %v1183_v37  ;;  %8170 = vmatmul.msk.f32.gmra.mxu1 %vm851_vm1, %v10220_v1  ;;  %v1965_v22 = vrot.slane %v10346_v33, 4  ;;  %v780_v63 = vsel %vm661_vm2, %v777_v54, %v779_v11  ;;  %v10368_v37 = vld [vmem:[%s9322_s28 + $0x1f8] sm:$0xff] }
 0x1e4   : > { %v2748_v60 = vsel %vm2629_vm4, %v2745_v29, %v2747_v42  ;;  %v787_v31 = vrot.slane %v10368_v37, 1 }
 0x1e5   : > { %8074 = vmatmul.msk.f32.gmra.mxu0 %vm851_vm1, %v776_v5  ;;  %8266 = vmatmul.msk.f32.gmra.mxu2 %vm851_vm1, %v1962_v44  ;;  %v1966_v10 = vsel %vm1847_vm3, %v1963_v43, %v1965_v22  ;;  %v781_v44 = vrot.slane %v10310_v50, 1 }
 0x1e6   : > { %8362 = vmatmul.msk.f32.gmra.mxu3 %vm851_vm1, %v2744_v46  ;;  %v10331_v35 = vpop.f32.mrf.mxu1  ;;  %v2749_v46 = vrot.slane %v10368_v37, 5 }
 0x1e7   : > { %v782_v29 = vsel %vm661_vm2, %v779_v11, %v781_v44 }
 0x1e8   : > { %v2367_v1 = vpop.f32.mrf.mxu2 }
 0x1e9   : > { %v2572_v15 = vadd.f32 %v2367_v1, %v1679_v51  ;;  %v3151_v27 = vpop.f32.mrf.mxu3  ;;  %v1967_v51 = vrot.slane %v10368_v37, 4 }
 0x1ea   : > { %v10336_v13 = vpop.f32.mrf.mxu0 }
 0x1eb   : > { %v10340_v16 = vadd.f32 %v3151_v27, %v2572_v15  ;;  %8171 = vmatmul.msk.f32.gmra.mxu1 %vm851_vm1, %v10256_v34  ;;  %v1968_v1 = vsel %vm1847_vm3, %v1965_v22, %v1967_v51  ;;  %v2750_v15 = vsel %vm2629_vm4, %v2747_v42, %v2749_v46  ;;  %v10390_v27 = vld [vmem:[%s9322_s28 + $0x200] sm:$0xff] }
 0x1ec   : > { %v2751_v11 = vrot.slane %v10390_v27, 5  ;;  %v789_v12 = vrot.slane %v10390_v27, 1 }
 0x1ed   : > { %8075 = vmatmul.msk.f32.gmra.mxu0 %vm851_vm1, %v778_v4  ;;  %8267 = vmatmul.msk.f32.gmra.mxu2 %vm851_vm1, %v1964_v20  ;;  %v783_v20 = vrot.slane %v10326_v2, 1 }
 0x1ee   : > { %8363 = vmatmul.msk.f32.gmra.mxu3 %vm851_vm1, %v2746_v36  ;;  %v10351_v14 = vpop.f32.mrf.mxu1  ;;  %v1969_v36 = vrot.slane %v10390_v27, 4 }
 0x1f0   : > { %v10356_v34 = vpop.f32.mrf.mxu2 }
 0x1f1   : > { %v10358_v7 = vpop.f32.mrf.mxu3 }
 0x1f2   : > { %v10360_v56 = vpop.f32.mrf.mxu0 }
 0x1f3   : > { %8172 = vmatmul.msk.f32.gmra.mxu1 %vm851_vm1, %v10278_v25 }
 0x1f5   : > { %8076 = vmatmul.msk.f32.gmra.mxu0 %vm851_vm1, %v780_v63  ;;  %8268 = vmatmul.msk.f32.gmra.mxu2 %vm851_vm1, %v1966_v10  ;;  %v784_v63 = vsel %vm661_vm2, %v781_v44, %v783_v20  ;;  %v1970_v10 = vsel %vm1847_vm3, %v1967_v51, %v1969_v36 }
 0x1f6   : > { %8364 = vmatmul.msk.f32.gmra.mxu3 %vm851_vm1, %v2748_v60  ;;  %v10373_v5 = vpop.f32.mrf.mxu1  ;;  %v2752_v60 = vsel %vm2629_vm4, %v2749_v46, %v2751_v11 }
 0x1f8   : > { %v10378_v25 = vpop.f32.mrf.mxu2 }
 0x1f9   : > { %v10380_v54 = vpop.f32.mrf.mxu3 }
 0x1fa   : > { %v10382_v43 = vpop.f32.mrf.mxu0 }
 0x1fb   : > { %8173 = vmatmul.msk.f32.gmra.mxu1 %vm851_vm1, %v10294_v49 }
 0x1fd   : > { %8077 = vmatmul.msk.f32.gmra.mxu0 %vm851_vm1, %v782_v29  ;;  %8269 = vmatmul.msk.f32.gmra.mxu2 %vm851_vm1, %v1968_v1  ;;  %v10410_v29 = vld [vmem:[%s9322_s28 + $0x208] sm:$0xff] }
 0x1fe   : > { %8365 = vmatmul.msk.f32.gmra.mxu3 %vm851_vm1, %v2750_v15  ;;  %v10395_v4 = vpop.f32.mrf.mxu1  ;;  %v785_v15 = vrot.slane %v10346_v33, 1  ;;  %v1971_v44 = vrot.slane %v10410_v29, 4  ;;  %v2753_v51 = vrot.slane %v10410_v29, 5 }
 0x200   : > { %v10400_v49 = vpop.f32.mrf.mxu2  ;;  %v786_v41 = vsel %vm661_vm2, %v783_v20, %v785_v15 }
 0x201   : > { %v10402_v22 = vpop.f32.mrf.mxu3 }
 0x202   : > { %v1195_v42 = vpop.f32.mrf.mxu0 }
 0x203   : > { %8174 = vmatmul.msk.f32.gmra.mxu1 %vm851_vm1, %v10310_v50 }
 0x205   : > { %8078 = vmatmul.msk.f32.gmra.mxu0 %vm851_vm1, %v784_v63  ;;  %8270 = vmatmul.msk.f32.gmra.mxu2 %vm851_vm1, %v1970_v10  ;;  %v1972_v63 = vsel %vm1847_vm3, %v1969_v36, %v1971_v44  ;;  %v2754_v10 = vsel %vm2629_vm4, %v2751_v11, %v2753_v51  ;;  %v788_v11 = vsel %vm661_vm2, %v785_v15, %v787_v31 }
 0x206   : > { %8366 = vmatmul.msk.f32.gmra.mxu3 %vm851_vm1, %v2752_v60  ;;  %v1693_v1 = vpop.f32.mrf.mxu1  ;;  %v10428_v60 = vld [vmem:[%s9322_s28 + $0x210] sm:$0xff] }
 0x207   : > { %v1973_v20 = vrot.slane %v10428_v60, 4  ;;  %v2755_v36 = vrot.slane %v10428_v60, 5 }
 0x208   : > { %v10418_v53 = vpop.f32.mrf.mxu2 }
 0x209   : > { %v10420_v50 = vpop.f32.mrf.mxu3  ;;  %v1974_v6 = vsel %vm1847_vm3, %v1971_v44, %v1973_v20 }
 0x20a   : > { %v1198_v46 = vpop.f32.mrf.mxu0 }
 0x20b   : > { %8175 = vmatmul.msk.f32.gmra.mxu1 %vm851_vm1, %v10326_v2 }
 0x20d   : > { %8079 = vmatmul.msk.f32.gmra.mxu0 %vm851_vm1, %v786_v41  ;;  %8271 = vmatmul.msk.f32.gmra.mxu2 %vm851_vm1, %v1972_v63  ;;  %v2756_v41 = vsel %vm2629_vm4, %v2753_v51, %v2755_v36  ;;  %v10442_v63 = vld [vmem:[%s9322_s28 + $0x218] sm:$0xff]  ;;  %v790_v51 = vsel %vm661_vm2, %v787_v31, %v789_v12  ;;  %v791_v31 = vrot.slane %v10410_v29, 1 }
 0x20e   : > { %8367 = vmatmul.msk.f32.gmra.mxu3 %vm851_vm1, %v2754_v10  ;;  %v1696_v23 = vpop.f32.mrf.mxu1  ;;  %v1975_v15 = vrot.slane %v10442_v63, 4  ;;  %v2757_v44 = vrot.slane %v10442_v63, 5 }
 0x210   : > { %v2382_v40 = vpop.f32.mrf.mxu2  ;;  %v1976_v21 = vsel %vm1847_vm3, %v1973_v20, %v1975_v15  ;;  %v1691_v20 = vadd.f32 %v10395_v4, %v1195_v42 }
 0x211   : > { %v3166_v2 = vpop.f32.mrf.mxu3 }
 0x212   : > { %v1201_v61 = vpop.f32.mrf.mxu0 }
 0x213   : > { %8176 = vmatmul.msk.f32.gmra.mxu1 %vm851_vm1, %v10346_v33  ;;  %v1697_v18 = vadd.f32 %v1696_v23, %v1201_v61 }
 0x215   : > { %8080 = vmatmul.msk.f32.gmra.mxu0 %vm851_vm1, %v788_v11  ;;  %8272 = vmatmul.msk.f32.gmra.mxu2 %vm851_vm1, %v1974_v6  ;;  %v2758_v6 = vsel %vm2629_vm4, %v2755_v36, %v2757_v44  ;;  %v10456_v11 = vld [vmem:[%s9322_s28 + $0x220] sm:$0xff] }
 0x216   : > { %8368 = vmatmul.msk.f32.gmra.mxu3 %vm851_vm1, %v2756_v41  ;;  %v1699_v10 = vpop.f32.mrf.mxu1  ;;  %v1694_v41 = vadd.f32 %v1693_v1, %v1198_v46  ;;  %v1977_v61 = vrot.slane %v10456_v11, 4 }
 0x218   : > { %v2385_v39 = vpop.f32.mrf.mxu2  ;;  %v2577_v1 = vadd.f32 %v2382_v40, %v1694_v41  ;;  %v2576_v40 = vadd.f32 %v10418_v53, %v1691_v20  ;;  %v793_v53 = vrot.slane %v10428_v60, 1 }
 0x219   : > { %v3169_v33 = vpop.f32.mrf.mxu3  ;;  %v2578_v23 = vadd.f32 %v2385_v39, %v1697_v18  ;;  %v10473_v39 = vld [vmem:[%s9322_s28 + $0x228] sm:$0xff] }
 0x21a   : > { %v1204_v17 = vpop.f32.mrf.mxu0 }
 0x21b   : > { %8177 = vmatmul.msk.f32.gmra.mxu1 %vm851_vm1, %v10368_v37  ;;  %v1700_v24 = vadd.f32 %v1699_v10, %v1204_v17  ;;  %v2759_v37 = vrot.slane %v10456_v11, 5  ;;  %v3362_v45 = vadd.f32 %v3169_v33, %v2578_v23  ;;  %v794_v23 = vsel %vm661_vm2, %v791_v31, %v793_v53 }
 0x21d   : > { %8081 = vmatmul.msk.f32.gmra.mxu0 %vm851_vm1, %v790_v51  ;;  %8273 = vmatmul.msk.f32.gmra.mxu2 %vm851_vm1, %v1976_v21  ;;  %v1688_v21 = vadd.f32 %v10373_v5, %v10382_v43  ;;  %v792_v51 = vsel %vm661_vm2, %v789_v12, %v791_v31  ;;  %v2760_v18 = vsel %vm2629_vm4, %v2757_v44, %v2759_v37  ;;  %v10481_v12 = vld [vmem:[%s15321_s2] ss:$0 sm:$0xff] }
 0x21e   : > { %8369 = vmatmul.msk.f32.gmra.mxu3 %vm851_vm1, %v2758_v6  ;;  %v1702_v0 = vpop.f32.mrf.mxu1  ;;  %v1978_v6 = vsel %vm1847_vm3, %v1975_v15, %v1977_v61  ;;  %v3361_v5 = vadd.f32 %v3166_v2, %v2577_v1  ;;  %v10495_v42 = vadd.f32 %v10481_v12, %v3362_v45 }
 0x220   : > { %v2388_v36 = vpop.f32.mrf.mxu2 }
 0x221   : > { %v2579_v17 = vadd.f32 %v2388_v36, %v1700_v24  ;;  %v3172_v46 = vpop.f32.mrf.mxu3  ;;  %v1685_v24 = vadd.f32 %v10351_v14, %v10360_v56  ;;  %v2575_v14 = vadd.f32 %v10400_v49, %v1688_v21  ;;  %v1979_v56 = vrot.slane %v10473_v39, 4  ;;  %v10516_v36 = vld [vmem:[%s9322_s28 + $0x230] sm:$0xff] }
 0x222   : > { %v1207_v10 = vpop.f32.mrf.mxu0  ;;  %v10502_v49 = vadd.f32 %v10481_v12, %v3361_v5 }
 0x223   : > { %v3363_v62 = vadd.f32 %v3172_v46, %v2579_v17  ;;  %8178 = vmatmul.msk.f32.gmra.mxu1 %vm851_vm1, %v10390_v27  ;;  %v1703_v4 = vadd.f32 %v1702_v0, %v1207_v10  ;;  %v1682_v27 = vadd.f32 %v10331_v35, %v10336_v13  ;;  %v2761_v0 = vrot.slane %v10473_v39, 5 }
 0x224   : > { %v2574_v2 = vadd.f32 %v10378_v25, %v1685_v24  ;;  %v3360_v35 = vadd.f32 %v10420_v50, %v2576_v40  ;;  %15354 = vst [vmem:[#allocation39_spill] sm:$0xff] %v10502_v49  ;;  %v3359_v33 = vadd.f32 %v10402_v22, %v2575_v14  ;;  %v1980_v25 = vsel %vm1847_vm3, %v1977_v61, %v1979_v56 }
 0x225   : > { %v10484_v43 = vadd.f32 %v10481_v12, %v3363_v62  ;;  %8082 = vmatmul.msk.f32.gmra.mxu0 %vm851_vm1, %v792_v51  ;;  %8274 = vmatmul.msk.f32.gmra.mxu2 %vm851_vm1, %v1978_v6  ;;  %v2573_v45 = vadd.f32 %v10356_v34, %v1682_v27  ;;  %v2762_v50 = vsel %vm2629_vm4, %v2759_v37, %v2761_v0  ;;  %v795_v61 = vrot.slane %v10442_v63, 1 }
 0x226   : > { %8370 = vmatmul.msk.f32.gmra.mxu3 %vm851_vm1, %v2760_v18  ;;  %v3358_v34 = vadd.f32 %v10380_v54, %v2574_v2  ;;  %v10520_v22 = vadd.f32 %v10481_v12, %v3360_v35  ;;  %v1981_v54 = vrot.slane %v10516_v36, 4  ;;  %v2763_v37 = vrot.slane %v10516_v36, 5 }
 0x227   : > { %v1705_v62 = vpop.f32.mrf.mxu1  ;;  %3878 = vmatpush.msrb.mxu2 %v10484_v43  ;;  %v3357_v31 = vadd.f32 %v10358_v7, %v2573_v45  ;;  %v796_v18 = vsel %vm661_vm2, %v793_v53, %v795_v61  ;;  %v10553_v27 = vadd.f32 %v10481_v12, %v10340_v16  ;;  %v10560_v53 = vadd.f32 %v10481_v12, %v10320_v59 }
 0x228   : > { %v2391_v13 = vpop.f32.mrf.mxu2  ;;  %15355 = vst [vmem:[#allocation40_spill] sm:$0xff] %v10520_v22  ;;  %v10534_v17 = vadd.f32 %v10481_v12, %v3358_v34  ;;  %v1982_v24 = vsel %vm1847_vm3, %v1979_v56, %v1981_v54  ;;  %v2764_v5 = vsel %vm2629_vm4, %v2761_v0, %v2763_v37  ;;  %v10605_v34 = vadd.f32 %v10481_v12, %v10214_v26 }
 0x229   : > { %v2580_v15 = vadd.f32 %v2391_v13, %v1703_v4  ;;  %v3175_v44 = vpop.f32.mrf.mxu3  ;;  %3879 = vmatpush.msrb.mxu2 %v10495_v42  ;;  %v10538_v51 = vadd.f32 %v10481_v12, %v3357_v31  ;;  %v10549_v4 = vld [vmem:[%s9322_s28 + $0x238] sm:$0xff]  ;;  %15359 = vst [vmem:[#allocation44_spill] sm:$0xff] %v10553_v27  ;;  %v10574_v13 = vadd.f32 %v10481_v12, %v10288_v30 }
 0x22a   : > { %v1210_v41 = vpop.f32.mrf.mxu0  ;;  %15357 = vst [vmem:[#allocation42_spill] sm:$0xff] %v10534_v17  ;;  %v1983_v16 = vrot.slane %v10549_v4, 4  ;;  %v2765_v56 = vrot.slane %v10549_v4, 5  ;;  %v10589_v30 = vadd.f32 %v10481_v12, %v10272_v52 }
 0x22b   : > { %v10509_v20 = vadd.f32 %v3175_v44, %v2580_v15  ;;  %8179 = vmatmul.msk.f32.gmra.mxu1 %vm851_vm1, %v10410_v29  ;;  %3880 = vmatpush.msrb.mxu2 %v10502_v49  ;;  %v1706_v1 = vadd.f32 %v1705_v62, %v1210_v41  ;;  %v10526_v29 = vadd.f32 %v10481_v12, %v3359_v33  ;;  %v10585_v41 = vld [vmem:[%s9322_s28 + $0x240] sm:$0xff] }
 0x22c   : > { %15358 = vst [vmem:[#allocation43_spill] sm:$0xff] %v10538_v51  ;;  %v10569_v62 = vadd.f32 %v10481_v12, %v10304_v9  ;;  %v1984_v45 = vsel %vm1847_vm3, %v1981_v54, %v1983_v16  ;;  %v2766_v9 = vsel %vm2629_vm4, %v2763_v37, %v2765_v56  ;;  %v1985_v52 = vrot.slane %v10585_v41, 4 }
 0x22d   : > { %8083 = vmatmul.msk.f32.gmra.mxu0 %vm851_vm1, %v794_v23  ;;  %8275 = vmatmul.msk.f32.gmra.mxu2 %vm851_vm1, %v1980_v25  ;;  %15356 = vst [vmem:[#allocation41_spill] sm:$0xff] %v10526_v29  ;;  %v10596_v25 = vadd.f32 %v10481_v12, %v10250_v38  ;;  %v10610_v54 = vadd.f32 %v10481_v12, %v10178_v8  ;;  %v10626_v8 = vld [vmem:[%s9322_s28 + $0x248] sm:$0xff] }
 0x22e   : > { %8371 = vmatmul.msk.f32.gmra.mxu3 %vm851_vm1, %v2762_v50  ;;  %3881 = vmatpush.msrb.mxu2 %v10520_v22  ;;  %15360 = vst [vmem:[#allocation45_spill] sm:$0xff] %v10560_v53  ;;  %v2767_v50 = vrot.slane %v10585_v41, 5 }
 0x22f   : > { %15361 = vst [vmem:[#allocation46_spill] sm:$0xff] %v10569_v62 }
 0x230   : > { %v1708_v46 = vpop.f32.mrf.mxu1  ;;  %3882 = vmatpush.msrb.mxu2 %v10526_v29  ;;  %v2394_v7 = vpop.f32.mrf.mxu2  ;;  %15362 = vst [vmem:[#allocation47_spill] sm:$0xff] %v10574_v13 }
 0x231   : > { %v2581_v21 = vadd.f32 %v2394_v7, %v1706_v1  ;;  %v3178_v10 = vpop.f32.mrf.mxu3  ;;  %15363 = vst [vmem:[#allocation48_spill] sm:$0xff] %v10589_v30  ;;  %v1986_v7 = vsel %vm1847_vm3, %v1983_v16, %v1985_v52 }
 0x232   : > { %3883 = vmatpush.msrb.mxu2 %v10534_v17  ;;  %v1213_v6 = vpop.f32.mrf.mxu0  ;;  %15364 = vst [vmem:[#allocation49_spill] sm:$0xff] %v10596_v25 }
 0x233   : > { %v10543_v40 = vadd.f32 %v3178_v10, %v2581_v21  ;;  %8180 = vmatmul.msk.f32.gmra.mxu1 %vm851_vm1, %v10428_v60  ;;  %v1709_v14 = vadd.f32 %v1708_v46, %v1213_v6  ;;  %v797_v60 = vrot.slane %v10456_v11, 1  ;;  %15365 = vst [vmem:[#allocation50_spill] sm:$0xff] %v10605_v34  ;;  %v2768_v21 = vsel %vm2629_vm4, %v2765_v56, %v2767_v50 }
 0x234   : > { %3884 = vmatpush.msrb.mxu2 %v10538_v51  ;;  %15366 = vst [vmem:[#allocation51_spill] sm:$0xff] %v10610_v54  ;;  %v10622_v10 = vadd.f32 %v10481_v12, %v10146_v3  ;;  %v1987_v3 = vrot.slane %v10626_v8, 4 }
 0x235   : > { %8084 = vmatmul.msk.f32.gmra.mxu0 %vm851_vm1, %v796_v18  ;;  %8276 = vmatmul.msk.f32.gmra.mxu2 %vm851_vm1, %v1982_v24  ;;  %v798_v44 = vsel %vm661_vm2, %v795_v61, %v797_v60  ;;  %v2769_v18 = vrot.slane %v10626_v8, 5 }
 0x236   : > { %8372 = vmatmul.msk.f32.gmra.mxu3 %vm851_vm1, %v2764_v5  ;;  %3885 = vmatpush.msrb.mxu2 %v10553_v27  ;;  %15367 = vst [vmem:[#allocation52_spill] sm:$0xff] %v10622_v10 }
 0x238   : > { %v1711_v0 = vpop.f32.mrf.mxu1  ;;  %3886 = vmatpush.msrb.mxu2 %v10560_v53  ;;  %v2397_v59 = vpop.f32.mrf.mxu2 }
 0x239   : > { %v2582_v2 = vadd.f32 %v2397_v59, %v1709_v14  ;;  %v3181_v35 = vpop.f32.mrf.mxu3  ;;  %v1988_v59 = vsel %vm1847_vm3, %v1985_v52, %v1987_v3 }
 0x23a   : > { %3887 = vmatpush.msrb.mxu2 %v10569_v62  ;;  %v1216_v15 = vpop.f32.mrf.mxu0 }
 0x23b   : > { %v10579_v33 = vadd.f32 %v3181_v35, %v2582_v2  ;;  %8181 = vmatmul.msk.f32.gmra.mxu1 %vm851_vm1, %v10442_v63  ;;  %v1712_v23 = vadd.f32 %v1711_v0, %v1216_v15  ;;  %v799_v63 = vrot.slane %v10473_v39, 1  ;;  %v2770_v2 = vsel %vm2629_vm4, %v2767_v50, %v2769_v18  ;;  %v10646_v35 = vld [vmem:[%s9322_s28 + $0x250] sm:$0xff] }
 0x23c   : > { %3888 = vmatpush.msrb.mxu2 %v10574_v13 }
 0x23d   : > { %8085 = vmatmul.msk.f32.gmra.mxu0 %vm851_vm1, %v798_v44  ;;  %8277 = vmatmul.msk.f32.gmra.mxu2 %vm851_vm1, %v1984_v45  ;;  %v800_v46 = vsel %vm661_vm2, %v797_v60, %v799_v63  ;;  %v803_v44 = vrot.slane %v10549_v4, 1  ;;  %v2771_v45 = vrot.slane %v10646_v35, 5 }
 0x23e   : > { %8373 = vmatmul.msk.f32.gmra.mxu3 %vm851_vm1, %v2766_v9  ;;  %3889 = vmatpush.msrb.mxu2 %v10589_v30 }
 0x240   : > { %v1714_v1 = vpop.f32.mrf.mxu1  ;;  %3890 = vmatpush.msrb.mxu2 %v10596_v25  ;;  %v2400_v38 = vpop.f32.mrf.mxu2 }
 0x241   : > { %v2583_v31 = vadd.f32 %v2400_v38, %v1712_v23  ;;  %v3184_v61 = vpop.f32.mrf.mxu3 }
 0x242   : > { %3891 = vmatpush.msrb.mxu2 %v10605_v34  ;;  %v1219_v37 = vpop.f32.mrf.mxu0 }
 0x243   : > { %v10615_v26 = vadd.f32 %v3184_v61, %v2583_v31  ;;  %8182 = vmatmul.msk.f32.gmra.mxu1 %vm851_vm1, %v10456_v11  ;;  %v1715_v6 = vadd.f32 %v1714_v1, %v1219_v37  ;;  %v801_v11 = vrot.slane %v10516_v36, 1  ;;  %v2772_v61 = vsel %vm2629_vm4, %v2769_v18, %v2771_v45  ;;  %v10666_v37 = vld [vmem:[%s9322_s28 + $0x258] sm:$0xff] }
 0x244   : > { %3892 = vmatpush.msrb.mxu2 %v10610_v54 }
 0x245   : > { %8086 = vmatmul.msk.f32.gmra.mxu0 %vm851_vm1, %v800_v46  ;;  %8278 = vmatmul.msk.f32.gmra.mxu2 %vm851_vm1, %v1986_v7  ;;  %v802_v56 = vsel %vm661_vm2, %v799_v63, %v801_v11  ;;  %v804_v1 = vsel %vm661_vm2, %v801_v11, %v803_v44  ;;  %v805_v7 = vrot.slane %v10585_v41, 1 }
 0x246   : > { %8374 = vmatmul.msk.f32.gmra.mxu3 %vm851_vm1, %v2768_v21  ;;  %3893 = vmatpush.msrb.mxu2 %v10622_v10  ;;  %v1991_v21 = vrot.slane %v10666_v37, 4 }
 0x248   : > { %4409 = vmatpush.msra.mxu2 %v9760_v28  ;;  %v1717_v24 = vpop.f32.mrf.mxu1  ;;  %v2403_v5 = vpop.f32.mrf.mxu2 }
 0x249   : > { %v2584_v14 = vadd.f32 %v2403_v5, %v1715_v6  ;;  %v3187_v60 = vpop.f32.mrf.mxu3  ;;  %v2773_v6 = vrot.slane %v10666_v37, 5  ;;  %v15369_v5 = vld [vmem:[#allocation16_spill] sm:$0xff] }
 0x24a   : > { %4410 = vmatpush.msra.mxu2 %v9771_v19  ;;  %v1222_v16 = vpop.f32.mrf.mxu0 }
 0x24b   : > { %v10638_v0 = vadd.f32 %v3187_v60, %v2584_v14  ;;  %8183 = vmatmul.msk.f32.gmra.mxu1 %vm851_vm1, %v10473_v39  ;;  %v1718_v15 = vadd.f32 %v1717_v24, %v1222_v16  ;;  %v1989_v39 = vrot.slane %v10646_v35, 4  ;;  %v806_v60 = vsel %vm661_vm2, %v803_v44, %v805_v7 }
 0x24c   : > { %4411 = vmatpush.msra.mxu2 %v9777_v58  ;;  %v807_v44 = vrot.slane %v10626_v8, 1 }
 0x24d   : > { %8087 = vmatmul.msk.f32.gmra.mxu0 %vm851_vm1, %v802_v56  ;;  %8279 = vmatmul.msk.f32.gmra.mxu2 %vm851_vm1, %v1988_v59  ;;  %v1990_v31 = vsel %vm1847_vm3, %v1987_v3, %v1989_v39  ;;  %v15370_v56 = vld [vmem:[#allocation17_spill] sm:$0xff]  ;;  %v1992_v59 = vsel %vm1847_vm3, %v1989_v39, %v1991_v21 }
 0x24e   : > { %4412 = vmatpush.msra.mxu2 %v9795_v47  ;;  %8375 = vmatmul.msk.f32.gmra.mxu3 %vm851_vm1, %v2770_v2  ;;  %v2774_v2 = vsel %vm2629_vm4, %v2771_v45, %v2773_v6 }
 0x250   : > { %4413 = vmatpush.msra.mxu2 %v9802_v32  ;;  %v1720_v9 = vpop.f32.mrf.mxu1  ;;  %v2406_v23 = vpop.f32.mrf.mxu2 }
 0x251   : > { %v2585_v63 = vadd.f32 %v2406_v23, %v1718_v15  ;;  %v3190_v52 = vpop.f32.mrf.mxu3  ;;  %v10686_v15 = vld [vmem:[%s9322_s28 + $0x260] sm:$0xff] }
 0x252   : > { %4414 = vmatpush.msra.mxu2 %v9809_v48  ;;  %v1225_v50 = vpop.f32.mrf.mxu0  ;;  %v15371_v23 = vld [vmem:[#allocation18_spill] sm:$0xff]  ;;  %v2775_v39 = vrot.slane %v10686_v15, 5 }
 0x253   : > { %v10658_v38 = vadd.f32 %v3190_v52, %v2585_v63  ;;  %8184 = vmatmul.msk.f32.gmra.mxu1 %vm851_vm1, %v10516_v36  ;;  %v1721_v46 = vadd.f32 %v1720_v9, %v1225_v50  ;;  %v15368_v36 = vld [vmem:[#allocation15_spill] sm:$0xff] }
 0x254   : > { %4415 = vmatpush.msra.mxu2 %v9815_v55  ;;  %v15372_v63 = vld [vmem:[#allocation19_spill] sm:$0xff] }
 0x255   : > { %8088 = vmatmul.msk.f32.gmra.mxu0 %vm851_vm1, %v804_v1  ;;  %8280 = vmatmul.msk.f32.gmra.mxu2 %vm851_vm1, %v1990_v31  ;;  %v15373_v31 = vld [vmem:[#allocation20_spill] sm:$0xff] }
 0x256   : > { %4416 = vmatpush.msra.mxu2 %v9828_v57  ;;  %8376 = vmatmul.msk.f32.gmra.mxu3 %vm851_vm1, %v2772_v61 }
 0x258   : > { %4417 = vmatpush.msra.mxu2 %v15368_v36  ;;  %v1723_v11 = vpop.f32.mrf.mxu1  ;;  %v2409_v3 = vpop.f32.mrf.mxu2 }
 0x259   : > { %v2586_v18 = vadd.f32 %v2409_v3, %v1721_v46  ;;  %v3193_v24 = vpop.f32.mrf.mxu3  ;;  %v808_v46 = vsel %vm661_vm2, %v805_v7, %v807_v44  ;;  %v809_v7 = vrot.slane %v10646_v35, 1 }
 0x25a   : > { %4418 = vmatpush.msra.mxu2 %v15369_v5  ;;  %v1228_v14 = vpop.f32.mrf.mxu0 }
 0x25b   : > { %v10678_v16 = vadd.f32 %v3193_v24, %v2586_v18  ;;  %8185 = vmatmul.msk.f32.gmra.mxu1 %vm851_vm1, %v10549_v4  ;;  %v1724_v9 = vadd.f32 %v1723_v11, %v1228_v14  ;;  %v1993_v4 = vrot.slane %v10686_v15, 4  ;;  %v15374_v24 = vld [vmem:[#allocation21_spill] sm:$0xff]  ;;  %v2776_v14 = vsel %vm2629_vm4, %v2773_v6, %v2775_v39 }
 0x25c   : > { %4419 = vmatpush.msra.mxu2 %v15370_v56 }
 0x25d   : > { %8089 = vmatmul.msk.f32.gmra.mxu0 %vm851_vm1, %v806_v60  ;;  %8281 = vmatmul.msk.f32.gmra.mxu2 %vm851_vm1, %v1992_v59  ;;  %v1994_v11 = vsel %vm1847_vm3, %v1991_v21, %v1993_v4  ;;  %v10706_v60 = vld [vmem:[%s9322_s28 + $0x268] sm:$0xff]  ;;  %v15375_v59 = vld [vmem:[#allocation22_spill] sm:$0xff] }
 0x25e   : > { %4420 = vmatpush.msra.mxu2 %v15371_v23  ;;  %8377 = vmatmul.msk.f32.gmra.mxu3 %vm851_vm1, %v2774_v2  ;;  %v1995_v21 = vrot.slane %v10706_v60, 4 }
 0x260   : > { %4421 = vmatpush.msra.mxu2 %v15372_v63  ;;  %v1726_v45 = vpop.f32.mrf.mxu1  ;;  %v2412_v52 = vpop.f32.mrf.mxu2  ;;  %v815_v63 = vrot.slane %v10706_v60, 1 }
 0x261   : > { %v2587_v50 = vadd.f32 %v2412_v52, %v1724_v9  ;;  %v3196_v1 = vpop.f32.mrf.mxu3 }
 0x262   : > { %4422 = vmatpush.msra.mxu2 %v15373_v31  ;;  %v1231_v61 = vpop.f32.mrf.mxu0  ;;  %v10771_v31 = vld [vmem:[%s9322_s28 + $0x280] sm:$0xff] }
 0x263   : > { %v10699_v3 = vadd.f32 %v3196_v1, %v2587_v50  ;;  %v1727_v18 = vadd.f32 %v1726_v45, %v1231_v61  ;;  %8186 = vmatmul.msk.f32.gmra.mxu1 %vm851_vm1, %v10585_v41  ;;  %v2777_v41 = vrot.slane %v10706_v60, 5  ;;  %v810_v50 = vsel %vm661_vm2, %v807_v44, %v809_v7 }
 0x264   : > { %4423 = vmatpush.msra.mxu2 %v15374_v24  ;;  %v1996_v61 = vsel %vm1847_vm3, %v1993_v4, %v1995_v21  ;;  %v811_v44 = vrot.slane %v10666_v37, 1  ;;  %v2783_v23 = vrot.slane %v10771_v31, 5  ;;  %v821_v28 = vrot.slane %v10771_v31, 1 }
 0x265   : > { %8090 = vmatmul.msk.f32.gmra.mxu0 %vm851_vm1, %v808_v46  ;;  %8282 = vmatmul.msk.f32.gmra.mxu2 %vm851_vm1, %v1994_v11  ;;  %v2778_v46 = vsel %vm2629_vm4, %v2775_v39, %v2777_v41  ;;  %v10727_v11 = vld [vmem:[%s9322_s28 + $0x270] sm:$0xff] }
 0x266   : > { %4424 = vmatpush.msra.mxu2 %v15375_v59  ;;  %8378 = vmatmul.msk.f32.gmra.mxu3 %vm851_vm1, %v2776_v14  ;;  %v2779_v14 = vrot.slane %v10727_v11, 5  ;;  %v817_v36 = vrot.slane %v10727_v11, 1 }
 0x268   : > { %v10715_v2 = vpop.f32.mrf.mxu1  ;;  %v2415_v6 = vpop.f32.mrf.mxu2  ;;  %v818_v48 = vsel %vm661_vm2, %v815_v63, %v817_v36 }
 0x269   : > { %v2588_v9 = vadd.f32 %v2415_v6, %v1727_v18  ;;  %v3199_v45 = vpop.f32.mrf.mxu3  ;;  %v1997_v18 = vrot.slane %v10727_v11, 4 }
 0x26a   : > { %v10717_v52 = vpop.f32.mrf.mxu0 }
 0x26b   : > { %v10720_v1 = vadd.f32 %v3199_v45, %v2588_v9  ;;  %8187 = vmatmul.msk.f32.gmra.mxu1 %vm851_vm1, %v10626_v8  ;;  %v812_v9 = vsel %vm661_vm2, %v809_v7, %v811_v44  ;;  %v1998_v45 = vsel %vm1847_vm3, %v1995_v21, %v1997_v18 }
 0x26d   : > { %8091 = vmatmul.msk.f32.gmra.mxu0 %vm851_vm1, %v810_v50  ;;  %8283 = vmatmul.msk.f32.gmra.mxu2 %vm851_vm1, %v1996_v61  ;;  %v2780_v50 = vsel %vm2629_vm4, %v2777_v41, %v2779_v14  ;;  %v10749_v61 = vld [vmem:[%s9322_s28 + $0x278] sm:$0xff] }
 0x26e   : > { %8379 = vmatmul.msk.f32.gmra.mxu3 %vm851_vm1, %v2778_v46  ;;  %v813_v46 = vrot.slane %v10686_v15, 1  ;;  %v1999_v7 = vrot.slane %v10749_v61, 4  ;;  %v2781_v59 = vrot.slane %v10749_v61, 5  ;;  %v819_v32 = vrot.slane %v10749_v61, 1 }
 0x270   : > { %v10735_v8 = vpop.f32.mrf.mxu1  ;;  %v10737_v4 = vpop.f32.mrf.mxu2  ;;  %v816_v5 = vsel %vm661_vm2, %v813_v46, %v815_v63 }
 0x271   : > { %v10739_v39 = vpop.f32.mrf.mxu3 }
 0x272   : > { %v10741_v6 = vpop.f32.mrf.mxu0 }
 0x273   : > { %8188 = vmatmul.msk.f32.gmra.mxu1 %vm851_vm1, %v10646_v35 }
 0x275   : > { %8092 = vmatmul.msk.f32.gmra.mxu0 %vm851_vm1, %v812_v9  ;;  %8284 = vmatmul.msk.f32.gmra.mxu2 %vm851_vm1, %v1998_v45  ;;  %v814_v9 = vsel %vm661_vm2, %v811_v44, %v813_v46  ;;  %v2000_v45 = vsel %vm1847_vm3, %v1997_v18, %v1999_v7  ;;  %v2001_v44 = vrot.slane %v10771_v31, 4 }
 0x276   : > { %8380 = vmatmul.msk.f32.gmra.mxu3 %vm851_vm1, %v2780_v50  ;;  %v2782_v50 = vsel %vm2629_vm4, %v2779_v14, %v2781_v59 }
 0x278   : > { %v10757_v35 = vpop.f32.mrf.mxu1  ;;  %v10759_v21 = vpop.f32.mrf.mxu2 }
 0x279   : > { %v10761_v41 = vpop.f32.mrf.mxu3 }
 0x27a   : > { %v10763_v24 = vpop.f32.mrf.mxu0 }
 0x27b   : > { %8189 = vmatmul.msk.f32.gmra.mxu1 %vm851_vm1, %v10666_v37 }
 0x27d   : > { %8093 = vmatmul.msk.f32.gmra.mxu0 %vm851_vm1, %v814_v9  ;;  %8285 = vmatmul.msk.f32.gmra.mxu2 %vm851_vm1, %v2000_v45  ;;  %v2002_v9 = vsel %vm1847_vm3, %v1999_v7, %v2001_v44  ;;  %v2784_v45 = vsel %vm2629_vm4, %v2781_v59, %v2783_v23 }
 0x27e   : > { %8381 = vmatmul.msk.f32.gmra.mxu3 %vm851_vm1, %v2782_v50  ;;  %v10789_v50 = vld [vmem:[%s9322_s28 + $0x288] sm:$0xff] }
 0x27f   : > { %v2003_v46 = vrot.slane %v10789_v50, 4  ;;  %v2785_v57 = vrot.slane %v10789_v50, 5 }
 0x280   : > { %v1738_v37 = vpop.f32.mrf.mxu1  ;;  %v10779_v56 = vpop.f32.mrf.mxu2 }
 0x281   : > { %v10781_v18 = vpop.f32.mrf.mxu3 }
 0x282   : > { %v1243_v14 = vpop.f32.mrf.mxu0 }
 0x283   : > { %8190 = vmatmul.msk.f32.gmra.mxu1 %vm851_vm1, %v10686_v15  ;;  %v1739_v62 = vadd.f32 %v1738_v37, %v1243_v14  ;;  %v1733_v14 = vadd.f32 %v10735_v8, %v10741_v6 }
 0x285   : > { %8094 = vmatmul.msk.f32.gmra.mxu0 %vm851_vm1, %v816_v5  ;;  %8286 = vmatmul.msk.f32.gmra.mxu2 %vm851_vm1, %v2002_v9  ;;  %v2004_v5 = vsel %vm1847_vm3, %v2001_v44, %v2003_v46  ;;  %v2786_v9 = vsel %vm2629_vm4, %v2783_v23, %v2785_v57  ;;  %v820_v23 = vsel %vm661_vm2, %v817_v36, %v819_v32 }
 0x286   : > { %8382 = vmatmul.msk.f32.gmra.mxu3 %vm851_vm1, %v2784_v45  ;;  %v10805_v45 = vld [vmem:[%s9322_s28 + $0x290] sm:$0xff] }
 0x287   : > { %v2005_v63 = vrot.slane %v10805_v45, 4  ;;  %v2787_v47 = vrot.slane %v10805_v45, 5 }
 0x288   : > { %v1741_v15 = vpop.f32.mrf.mxu1  ;;  %v2427_v55 = vpop.f32.mrf.mxu2 }
 0x289   : > { %v10797_v7 = vpop.f32.mrf.mxu3 }
 0x28a   : > { %v1246_v59 = vpop.f32.mrf.mxu0 }
 0x28b   : > { %8191 = vmatmul.msk.f32.gmra.mxu1 %vm851_vm1, %v10706_v60  ;;  %v1742_v30 = vadd.f32 %v1741_v15, %v1246_v59 }
 0x28d   : > { %8095 = vmatmul.msk.f32.gmra.mxu0 %vm851_vm1, %v818_v48  ;;  %8287 = vmatmul.msk.f32.gmra.mxu2 %vm851_vm1, %v2004_v5  ;;  %v2006_v48 = vsel %vm1847_vm3, %v2003_v46, %v2005_v63  ;;  %v2788_v5 = vsel %vm2629_vm4, %v2785_v57, %v2787_v47  ;;  %v822_v57 = vsel %vm661_vm2, %v819_v32, %v821_v28 }
 0x28e   : > { %8383 = vmatmul.msk.f32.gmra.mxu3 %vm851_vm1, %v2786_v9  ;;  %v10819_v9 = vld [vmem:[%s9322_s28 + $0x298] sm:$0xff] }
 0x28f   : > { %v2007_v36 = vrot.slane %v10819_v9, 4  ;;  %v2789_v10 = vrot.slane %v10819_v9, 5 }
 0x290   : > { %v1744_v60 = vpop.f32.mrf.mxu1  ;;  %v2430_v58 = vpop.f32.mrf.mxu2 }
 0x291   : > { %v3214_v44 = vpop.f32.mrf.mxu3  ;;  %v2593_v15 = vadd.f32 %v2430_v58, %v1742_v30  ;;  %v1730_v58 = vadd.f32 %v10715_v2, %v10717_v52 }
 0x292   : > { %v1249_v19 = vpop.f32.mrf.mxu0 }
 0x293   : > { %8192 = vmatmul.msk.f32.gmra.mxu1 %vm851_vm1, %v10727_v11  ;;  %v1745_v25 = vadd.f32 %v1744_v60, %v1249_v19  ;;  %v823_v19 = vrot.slane %v10789_v50, 1 }
 0x295   : > { %8096 = vmatmul.msk.f32.gmra.mxu0 %vm851_vm1, %v820_v23  ;;  %8288 = vmatmul.msk.f32.gmra.mxu2 %vm851_vm1, %v2006_v48  ;;  %v2008_v23 = vsel %vm1847_vm3, %v2005_v63, %v2007_v36  ;;  %v2790_v48 = vsel %vm2629_vm4, %v2787_v47, %v2789_v10 }
 0x296   : > { %8384 = vmatmul.msk.f32.gmra.mxu3 %vm851_vm1, %v2788_v5  ;;  %v10833_v5 = vld [vmem:[%s9322_s28 + $0x2a0] sm:$0xff] }
 0x297   : > { %v2791_v63 = vrot.slane %v10833_v5, 5 }
 0x298   : > { %v1747_v11 = vpop.f32.mrf.mxu1  ;;  %v2433_v54 = vpop.f32.mrf.mxu2 }
 0x299   : > { %v3217_v46 = vpop.f32.mrf.mxu3  ;;  %v2594_v32 = vadd.f32 %v2433_v54, %v1745_v25  ;;  %v824_v25 = vsel %vm661_vm2, %v821_v28, %v823_v19  ;;  %v2792_v53 = vsel %vm2629_vm4, %v2789_v10, %v2791_v63  ;;  %v825_v10 = vrot.slane %v10805_v45, 1 }
 0x29a   : > { %v1252_v34 = vpop.f32.mrf.mxu0 }
 0x29b   : > { %8193 = vmatmul.msk.f32.gmra.mxu1 %vm851_vm1, %v10749_v61  ;;  %v1748_v13 = vadd.f32 %v1747_v11, %v1252_v34  ;;  %v2009_v61 = vrot.slane %v10833_v5, 4  ;;  %v1736_v34 = vadd.f32 %v10757_v35, %v10763_v24  ;;  %v2592_v11 = vadd.f32 %v2427_v55, %v1739_v62 }
 0x29c   : > { %v3378_v54 = vadd.f32 %v3217_v46, %v2594_v32  ;;  %v3377_v55 = vadd.f32 %v3214_v44, %v2593_v15  ;;  %v2589_v35 = vadd.f32 %v10737_v4, %v1730_v58 }
 0x29d   : > { %8097 = vmatmul.msk.f32.gmra.mxu0 %vm851_vm1, %v822_v57  ;;  %8289 = vmatmul.msk.f32.gmra.mxu2 %vm851_vm1, %v2008_v23  ;;  %v2591_v30 = vadd.f32 %v10779_v56, %v1736_v34  ;;  %v3376_v24 = vadd.f32 %v10797_v7, %v2592_v11  ;;  %v10890_v34 = vld [vmem:[%s9322_s28 + $0x2b0] sm:$0xff] }
 0x29e   : > { %8385 = vmatmul.msk.f32.gmra.mxu3 %vm851_vm1, %v2790_v48  ;;  %v2010_v48 = vsel %vm1847_vm3, %v2007_v36, %v2009_v61  ;;  %v10866_v2 = vadd.f32 %v10481_v12, %v3378_v54 }
 0x29f   : > { %v10879_v46 = vadd.f32 %v10481_v12, %v3376_v24 }
 0x2a0   : > { %v1750_v60 = vpop.f32.mrf.mxu1  ;;  %v2436_v47 = vpop.f32.mrf.mxu2 }
 0x2a1   : > { %v2595_v59 = vadd.f32 %v2436_v47, %v1748_v13  ;;  %v3220_v37 = vpop.f32.mrf.mxu3  ;;  %v10853_v13 = vld [vmem:[%s9322_s28 + $0x2a8] sm:$0xff] }
 0x2a2   : > { %v1255_v57 = vpop.f32.mrf.mxu0  ;;  %v2011_v56 = vrot.slane %v10853_v13, 4  ;;  %v2793_v52 = vrot.slane %v10853_v13, 5 }
 0x2a3   : > { %v3379_v23 = vadd.f32 %v3220_v37, %v2595_v59  ;;  %8194 = vmatmul.msk.f32.gmra.mxu1 %vm851_vm1, %v10771_v31  ;;  %v1751_v28 = vadd.f32 %v1750_v60, %v1255_v57  ;;  %v2590_v31 = vadd.f32 %v10759_v21, %v1733_v14  ;;  %v3375_v21 = vadd.f32 %v10781_v18, %v2591_v30 }
 0x2a4   : > { %v826_v60 = vsel %vm661_vm2, %v823_v19, %v825_v10  ;;  %v2012_v4 = vsel %vm1847_vm3, %v2009_v61, %v2011_v56  ;;  %v2794_v18 = vsel %vm2629_vm4, %v2791_v63, %v2793_v52  ;;  %v2795_v61 = vrot.slane %v10890_v34, 5 }
 0x2a5   : > { %v10857_v62 = vadd.f32 %v10481_v12, %v3379_v23  ;;  %8098 = vmatmul.msk.f32.gmra.mxu0 %vm851_vm1, %v824_v25  ;;  %8290 = vmatmul.msk.f32.gmra.mxu2 %vm851_vm1, %v2010_v48  ;;  %v3374_v36 = vadd.f32 %v10761_v41, %v2590_v31  ;;  %v3373_v41 = vadd.f32 %v10739_v39, %v2589_v35  ;;  %v2013_v39 = vrot.slane %v10890_v34, 4 }
 0x2a6   : > { %8386 = vmatmul.msk.f32.gmra.mxu3 %vm851_vm1, %v2792_v53  ;;  %v10874_v53 = vadd.f32 %v10481_v12, %v3377_v55  ;;  %v10894_v15 = vadd.f32 %v10481_v12, %v3375_v21  ;;  %v10913_v25 = vadd.f32 %v10481_v12, %v10720_v1  ;;  %v2796_v30 = vsel %vm2629_vm4, %v2793_v52, %v2795_v61  ;;  %v10924_v55 = vld [vmem:[%s9322_s28 + $0x2b8] sm:$0xff] }
 0x2a7   : > { %3961 = vmatpush.msrb.mxu3 %v10857_v62  ;;  %v10902_v19 = vadd.f32 %v10481_v12, %v3374_v36  ;;  %v10908_v14 = vadd.f32 %v10481_v12, %v3373_v41  ;;  %v2014_v58 = vsel %vm1847_vm3, %v2011_v56, %v2013_v39  ;;  %v10928_v1 = vadd.f32 %v10481_v12, %v10699_v3  ;;  %v10960_v36 = vld [vmem:[%s9322_s28 + $0x2c0] sm:$0xff] }
 0x2a8   : > { %v1753_v8 = vpop.f32.mrf.mxu1  ;;  %v2439_v6 = vpop.f32.mrf.mxu2  ;;  %15376 = vst [vmem:[#allocation53_spill] sm:$0xff] %v10894_v15  ;;  %v10937_v31 = vadd.f32 %v10481_v12, %v10678_v16  ;;  %v2015_v3 = vrot.slane %v10924_v55, 4  ;;  %v2797_v24 = vrot.slane %v10924_v55, 5  ;;  %v10944_v52 = vadd.f32 %v10481_v12, %v10658_v38 }
 0x2a9   : > { %v2596_v7 = vadd.f32 %v2439_v6, %v1751_v28  ;;  %v3223_v44 = vpop.f32.mrf.mxu3  ;;  %3962 = vmatpush.msrb.mxu3 %v10866_v2  ;;  %15377 = vst [vmem:[#allocation54_spill] sm:$0xff] %v10902_v19  ;;  %v10949_v16 = vadd.f32 %v10481_v12, %v10638_v0  ;;  %v10964_v0 = vadd.f32 %v10481_v12, %v10615_v26  ;;  %v2017_v26 = vrot.slane %v10960_v36, 4 }
 0x2aa   : > { %v1258_v32 = vpop.f32.mrf.mxu0  ;;  %15378 = vst [vmem:[#allocation55_spill] sm:$0xff] %v10908_v14  ;;  %v2016_v38 = vsel %vm1847_vm3, %v2013_v39, %v2015_v3 }
 0x2ab   : > { %v10882_v47 = vadd.f32 %v3223_v44, %v2596_v7  ;;  %8195 = vmatmul.msk.f32.gmra.mxu1 %vm851_vm1, %v10789_v50  ;;  %3963 = vmatpush.msrb.mxu3 %v10874_v53  ;;  %v1754_v59 = vadd.f32 %v1753_v8, %v1258_v32  ;;  %v827_v50 = vrot.slane %v10819_v9, 1  ;;  %15379 = vst [vmem:[#allocation56_spill] sm:$0xff] %v10913_v25 }
 0x2ac   : > { %15380 = vst [vmem:[#allocation57_spill] sm:$0xff] %v10928_v1  ;;  %v2798_v44 = vsel %vm2629_vm4, %v2795_v61, %v2797_v24 }
 0x2ad   : > { %8099 = vmatmul.msk.f32.gmra.mxu0 %vm851_vm1, %v826_v60  ;;  %3964 = vmatpush.msrb.mxu3 %v10879_v46  ;;  %v828_v23 = vsel %vm661_vm2, %v825_v10, %v827_v50  ;;  %15381 = vst [vmem:[#allocation58_spill] sm:$0xff] %v10937_v31  ;;  %v10973_v60 = vadd.f32 %v10481_v12, %v10579_v33 }
 0x2ae   : > { %8291 = vmatmul.msk.f32.gmra.mxu2 %vm851_vm1, %v2012_v4  ;;  %8387 = vmatmul.msk.f32.gmra.mxu3 %vm851_vm1, %v2794_v18  ;;  %15382 = vst [vmem:[#allocation59_spill] sm:$0xff] %v10944_v52  ;;  %v2799_v4 = vrot.slane %v10960_v36, 5  ;;  %v10985_v33 = vadd.f32 %v10481_v12, %v10509_v20  ;;  %v15388_v20 = vld [vmem:[#allocation23_spill] sm:$0xff] }
 0x2af   : > { %3965 = vmatpush.msrb.mxu3 %v10894_v15  ;;  %15383 = vst [vmem:[#allocation60_spill] sm:$0xff] %v10949_v16 }
 0x2b0   : > { %v1756_v63 = vpop.f32.mrf.mxu1  ;;  %v2442_v37 = vpop.f32.mrf.mxu2  ;;  %15384 = vst [vmem:[#allocation61_spill] sm:$0xff] %v10964_v0 }
 0x2b1   : > { %v2597_v11 = vadd.f32 %v2442_v37, %v1754_v59  ;;  %v3226_v57 = vpop.f32.mrf.mxu3  ;;  %3966 = vmatpush.msrb.mxu3 %v10902_v19  ;;  %15385 = vst [vmem:[#allocation62_spill] sm:$0xff] %v10973_v60  ;;  %v10980_v59 = vadd.f32 %v10481_v12, %v10543_v40  ;;  %v2018_v40 = vsel %vm1847_vm3, %v2015_v3, %v2017_v26  ;;  %v833_v12 = vrot.slane %v10890_v34, 1  ;;  %v15389_v3 = vld [vmem:[#allocation24_spill] sm:$0xff] }
 0x2b2   : > { %v1261_v54 = vpop.f32.mrf.mxu0  ;;  %15387 = vst [vmem:[#allocation64_spill] sm:$0xff] %v10985_v33 }
 0x2b3   : > { %v10916_v48 = vadd.f32 %v3226_v57, %v2597_v11  ;;  %8196 = vmatmul.msk.f32.gmra.mxu1 %vm851_vm1, %v10805_v45  ;;  %3967 = vmatpush.msrb.mxu3 %v10908_v14  ;;  %v1757_v28 = vadd.f32 %v1756_v63, %v1261_v54  ;;  %v829_v45 = vrot.slane %v10833_v5, 1  ;;  %15386 = vst [vmem:[#allocation63_spill] sm:$0xff] %v10980_v59  ;;  %v10996_v57 = vld [vmem:[%s9322_s28 + $0x2c8] sm:$0xff] }
 0x2b4   : > { %v2800_v11 = vsel %vm2629_vm4, %v2797_v24, %v2799_v4 }
 0x2b5   : > { %8100 = vmatmul.msk.f32.gmra.mxu0 %vm851_vm1, %v828_v23  ;;  %3968 = vmatpush.msrb.mxu3 %v10913_v25  ;;  %v830_v21 = vsel %vm661_vm2, %v827_v50, %v829_v45  ;;  %v2801_v23 = vrot.slane %v10996_v57, 5 }
 0x2b6   : > { %8292 = vmatmul.msk.f32.gmra.mxu2 %vm851_vm1, %v2014_v58  ;;  %8388 = vmatmul.msk.f32.gmra.mxu3 %vm851_vm1, %v2796_v30 }
 0x2b7   : > { %3969 = vmatpush.msrb.mxu3 %v10928_v1 }
 0x2b8   : > { %v1759_v10 = vpop.f32.mrf.mxu1  ;;  %v2445_v56 = vpop.f32.mrf.mxu2 }
 0x2b9   : > { %v2598_v8 = vadd.f32 %v2445_v56, %v1757_v28  ;;  %v3229_v6 = vpop.f32.mrf.mxu3  ;;  %3970 = vmatpush.msrb.mxu3 %v10937_v31 }
 0x2ba   : > { %v1264_v35 = vpop.f32.mrf.mxu0 }
 0x2bb   : > { %v10952_v7 = vadd.f32 %v3229_v6, %v2598_v8  ;;  %8197 = vmatmul.msk.f32.gmra.mxu1 %vm851_vm1, %v10819_v9  ;;  %3971 = vmatpush.msrb.mxu3 %v10944_v52  ;;  %v1760_v32 = vadd.f32 %v1759_v10, %v1264_v35  ;;  %v831_v9 = vrot.slane %v10853_v13, 1  ;;  %v15390_v8 = vld [vmem:[#allocation25_spill] sm:$0xff]  ;;  %v2802_v35 = vsel %vm2629_vm4, %v2799_v4, %v2801_v23 }
 0x2bd   : > { %8101 = vmatmul.msk.f32.gmra.mxu0 %vm851_vm1, %v830_v21  ;;  %3972 = vmatpush.msrb.mxu3 %v10949_v16  ;;  %v832_v63 = vsel %vm661_vm2, %v829_v45, %v831_v9  ;;  %v834_v10 = vsel %vm661_vm2, %v831_v9, %v833_v12  ;;  %v11016_v21 = vld [vmem:[%s9322_s28 + $0x2d0] sm:$0xff] }
 0x2be   : > { %8293 = vmatmul.msk.f32.gmra.mxu2 %vm851_vm1, %v2016_v38  ;;  %8389 = vmatmul.msk.f32.gmra.mxu3 %vm851_vm1, %v2798_v44  ;;  %v15391_v38 = vld [vmem:[#allocation26_spill] sm:$0xff]  ;;  %v2021_v9 = vrot.slane %v11016_v21, 4 }
 0x2bf   : > { %3973 = vmatpush.msrb.mxu3 %v10964_v0 }
 0x2c0   : > { %v1762_v18 = vpop.f32.mrf.mxu1  ;;  %v2448_v41 = vpop.f32.mrf.mxu2 }
 0x2c1   : > { %v2599_v50 = vadd.f32 %v2448_v41, %v1760_v32  ;;  %v3232_v39 = vpop.f32.mrf.mxu3  ;;  %3974 = vmatpush.msrb.mxu3 %v10973_v60  ;;  %v835_v32 = vrot.slane %v10924_v55, 1 }
 0x2c2   : > { %v1267_v61 = vpop.f32.mrf.mxu0 }
 0x2c3   : > { %v10988_v37 = vadd.f32 %v3232_v39, %v2599_v50  ;;  %8198 = vmatmul.msk.f32.gmra.mxu1 %vm851_vm1, %v10833_v5  ;;  %3975 = vmatpush.msrb.mxu3 %v10980_v59  ;;  %v1763_v54 = vadd.f32 %v1762_v18, %v1267_v61  ;;  %v2019_v5 = vrot.slane %v10996_v57, 4  ;;  %v15393_v50 = vld [vmem:[#allocation28_spill] sm:$0xff] }
 0x2c5   : > { %8102 = vmatmul.msk.f32.gmra.mxu0 %vm851_vm1, %v832_v63  ;;  %3976 = vmatpush.msrb.mxu3 %v10985_v33  ;;  %v2020_v6 = vsel %vm1847_vm3, %v2017_v26, %v2019_v5  ;;  %v2803_v26 = vrot.slane %v11016_v21, 5  ;;  %v836_v63 = vsel %vm661_vm2, %v833_v12, %v835_v32  ;;  %v15396_v12 = vld [vmem:[#allocation31_spill] sm:$0xff] }
 0x2c6   : > { %8294 = vmatmul.msk.f32.gmra.mxu2 %vm851_vm1, %v2018_v40  ;;  %8390 = vmatmul.msk.f32.gmra.mxu3 %vm851_vm1, %v2800_v11  ;;  %v15394_v40 = vld [vmem:[#allocation29_spill] sm:$0xff]  ;;  %v2022_v11 = vsel %vm1847_vm3, %v2019_v5, %v2021_v9 }
 0x2c7   : > { %4492 = vmatpush.msra.mxu3 %v15388_v20 }
 0x2c8   : > { %v1765_v58 = vpop.f32.mrf.mxu1  ;;  %v2451_v30 = vpop.f32.mrf.mxu2 }
 0x2c9   : > { %v2600_v28 = vadd.f32 %v2451_v30, %v1763_v54  ;;  %v3235_v45 = vpop.f32.mrf.mxu3  ;;  %4493 = vmatpush.msra.mxu3 %v15389_v3  ;;  %v2804_v54 = vsel %vm2629_vm4, %v2801_v23, %v2803_v26  ;;  %v11036_v30 = vld [vmem:[%s9322_s28 + $0x2d8] sm:$0xff] }
 0x2ca   : > { %v1270_v24 = vpop.f32.mrf.mxu0  ;;  %v2023_v5 = vrot.slane %v11036_v30, 4  ;;  %v2805_v23 = vrot.slane %v11036_v30, 5 }
 0x2cb   : > { %v11008_v56 = vadd.f32 %v3235_v45, %v2600_v28  ;;  %8199 = vmatmul.msk.f32.gmra.mxu1 %vm851_vm1, %v10853_v13  ;;  %4494 = vmatpush.msra.mxu3 %v15390_v8  ;;  %v1766_v44 = vadd.f32 %v1765_v58, %v1270_v24  ;;  %v15392_v13 = vld [vmem:[#allocation27_spill] sm:$0xff]  ;;  %v15395_v28 = vld [vmem:[#allocation30_spill] sm:$0xff] }
 0x2cd   : > { %4495 = vmatpush.msra.mxu3 %v15391_v38  ;;  %8103 = vmatmul.msk.f32.gmra.mxu0 %vm851_vm1, %v834_v10 }
 0x2ce   : > { %8295 = vmatmul.msk.f32.gmra.mxu2 %vm851_vm1, %v2020_v6  ;;  %8391 = vmatmul.msk.f32.gmra.mxu3 %vm851_vm1, %v2802_v35  ;;  %v15397_v35 = vld [vmem:[#allocation32_spill] sm:$0xff] }
 0x2cf   : > { %4496 = vmatpush.msra.mxu3 %v15392_v13 }
 0x2d0   : > { %v1768_v4 = vpop.f32.mrf.mxu1  ;;  %v2454_v18 = vpop.f32.mrf.mxu2 }
 0x2d1   : > { %v3238_v41 = vpop.f32.mrf.mxu3  ;;  %4497 = vmatpush.msra.mxu3 %v15393_v50  ;;  %v2601_v39 = vadd.f32 %v2454_v18, %v1766_v44 }
 0x2d2   : > { %v1273_v61 = vpop.f32.mrf.mxu0 }
 0x2d3   : > { %8200 = vmatmul.msk.f32.gmra.mxu1 %vm851_vm1, %v10890_v34  ;;  %4498 = vmatpush.msra.mxu3 %v15394_v40  ;;  %v11033_v58 = vadd.f32 %v3238_v41, %v2601_v39  ;;  %v1769_v45 = vadd.f32 %v1768_v4, %v1273_v61  ;;  %v837_v34 = vrot.slane %v10960_v36, 1  ;;  %v15398_v41 = vld [vmem:[#allocation33_spill] sm:$0xff]  ;;  %v2024_v39 = vsel %vm1847_vm3, %v2021_v9, %v2023_v5 }
 0x2d4   : > { %v2806_v61 = vsel %vm2629_vm4, %v2803_v26, %v2805_v23 }
 0x2d5   : > { %4499 = vmatpush.msra.mxu3 %v15395_v28  ;;  %8104 = vmatmul.msk.f32.gmra.mxu0 %vm851_vm1, %v836_v63  ;;  %v838_v18 = vsel %vm661_vm2, %v835_v32, %v837_v34  ;;  %v15400_v32 = vld [vmem:[#allocation35_spill] sm:$0xff]  ;;  %v15403_v28 = vld [vmem:[#allocation38_spill] sm:$0xff] }
 0x2d6   : > { %8296 = vmatmul.msk.f32.gmra.mxu2 %vm851_vm1, %v2022_v11  ;;  %8392 = vmatmul.msk.f32.gmra.mxu3 %vm851_vm1, %v2804_v54  ;;  %v11056_v11 = vld [vmem:[%s9322_s28 + $0x2e0] sm:$0xff] }
 0x2d7   : > { %4500 = vmatpush.msra.mxu3 %v15396_v12  ;;  %v15399_v54 = vld [vmem:[#allocation34_spill] sm:$0xff]  ;;  %v2025_v9 = vrot.slane %v11056_v11, 4  ;;  %v2807_v26 = vrot.slane %v11056_v11, 5  ;;  %v11076_v12 = vld [vmem:[%s9322_s28 + $0x2e8] sm:$0xff] }
 0x2d8   : > { %v1771_v24 = vpop.f32.mrf.mxu1  ;;  %v2457_v10 = vpop.f32.mrf.mxu2 }
 0x2d9   : > { %v3241_v6 = vpop.f32.mrf.mxu3  ;;  %4501 = vmatpush.msra.mxu3 %v15397_v35  ;;  %v2602_v44 = vadd.f32 %v2457_v10, %v1769_v45 }
 0x2da   : > { %v1276_v4 = vpop.f32.mrf.mxu0 }
 0x2db   : > { %8201 = vmatmul.msk.f32.gmra.mxu1 %vm851_vm1, %v10924_v55  ;;  %4502 = vmatpush.msra.mxu3 %v15398_v41  ;;  %v11053_v63 = vadd.f32 %v3241_v6, %v2602_v44  ;;  %v1772_v45 = vadd.f32 %v1771_v24, %v1276_v4  ;;  %v839_v55 = vrot.slane %v10996_v57, 1  ;;  %v2808_v41 = vsel %vm2629_vm4, %v2805_v23, %v2807_v26 }
 0x2dd   : > { %4503 = vmatpush.msra.mxu3 %v15399_v54  ;;  %8105 = vmatmul.msk.f32.gmra.mxu0 %vm851_vm1, %v838_v18  ;;  %v15401_v54 = vld [vmem:[#allocation36_spill] sm:$0xff]  ;;  %v840_v4 = vsel %vm661_vm2, %v837_v34, %v839_v55  ;;  %v2027_v34 = vrot.slane %v11076_v12, 4 }
 0x2de   : > { %8297 = vmatmul.msk.f32.gmra.mxu2 %vm851_vm1, %v2024_v39  ;;  %8393 = vmatmul.msk.f32.gmra.mxu3 %vm851_vm1, %v2806_v61  ;;  %v15402_v61 = vld [vmem:[#allocation37_spill] sm:$0xff] }
 0x2df   : > { %4504 = vmatpush.msra.mxu3 %v15400_v32  ;;  %v2026_v32 = vsel %vm1847_vm3, %v2023_v5, %v2025_v9  ;;  %v2809_v5 = vrot.slane %v11076_v12, 5 }
 0x2e0   : > { %v1774_v10 = vpop.f32.mrf.mxu1  ;;  %v2460_v6 = vpop.f32.mrf.mxu2 }
 0x2e1   : > { %v3244_v44 = vpop.f32.mrf.mxu3  ;;  %4505 = vmatpush.msra.mxu3 %v15401_v54  ;;  %v2603_v18 = vadd.f32 %v2460_v6, %v1772_v45 }
 0x2e2   : > { %v1279_v24 = vpop.f32.mrf.mxu0 }
 0x2e3   : > { %v1775_v39 = vadd.f32 %v1774_v10, %v1279_v24  ;;  %8202 = vmatmul.msk.f32.gmra.mxu1 %vm851_vm1, %v10960_v36  ;;  %4506 = vmatpush.msra.mxu3 %v15402_v61  ;;  %v11073_v35 = vadd.f32 %v3244_v44, %v2603_v18  ;;  %v841_v36 = vrot.slane %v11016_v21, 1 }
 0x2e5   : > { %4507 = vmatpush.msra.mxu3 %v15403_v28  ;;  %8106 = vmatmul.msk.f32.gmra.mxu0 %vm851_vm1, %v840_v4  ;;  %v842_v18 = vsel %vm661_vm2, %v839_v55, %v841_v36  ;;  %v11097_v4 = vld [vmem:[%s9322_s28 + $0x2f0] sm:$0xff]  ;;  %v843_v55 = vrot.slane %v11036_v30, 1  ;;  %v845_v28 = vrot.slane %v11056_v11, 1 }
 0x2e6   : > { %8298 = vmatmul.msk.f32.gmra.mxu2 %vm851_vm1, %v2026_v32  ;;  %8394 = vmatmul.msk.f32.gmra.mxu3 %vm851_vm1, %v2808_v41  ;;  %v2028_v41 = vsel %vm1847_vm3, %v2025_v9, %v2027_v34  ;;  %v2810_v32 = vsel %vm2629_vm4, %v2807_v26, %v2809_v5 }
 0x2e8   : > { %v11085_v23 = vpop.f32.mrf.mxu1  ;;  %v2463_v45 = vpop.f32.mrf.mxu2 }
 0x2e9   : > { %v3247_v10 = vpop.f32.mrf.mxu3  ;;  %v2604_v6 = vadd.f32 %v2463_v45, %v1775_v39  ;;  %v2029_v39 = vrot.slane %v11097_v4, 4 }
 0x2ea   : > { %v11087_v44 = vpop.f32.mrf.mxu0 }
 0x2eb   : > { %8203 = vmatmul.msk.f32.gmra.mxu1 %vm851_vm1, %v10996_v57  ;;  %v11094_v24 = vadd.f32 %v3247_v10, %v2604_v6  ;;  %v2811_v57 = vrot.slane %v11097_v4, 5  ;;  %v844_v6 = vsel %vm661_vm2, %v841_v36, %v843_v55 }
 0x2ed   : > { %8107 = vmatmul.msk.f32.gmra.mxu0 %vm851_vm1, %v842_v18  ;;  %v2030_v18 = vsel %vm1847_vm3, %v2027_v34, %v2029_v39 }
 0x2ee   : > { %8299 = vmatmul.msk.f32.gmra.mxu2 %vm851_vm1, %v2028_v41  ;;  %8395 = vmatmul.msk.f32.gmra.mxu3 %vm851_vm1, %v2810_v32  ;;  %v2812_v41 = vsel %vm2629_vm4, %v2809_v5, %v2811_v57  ;;  %v560_v32 = vld [vmem:[%s9322_s28 + $0x2f8] sm:$0xff]  ;;  %v846_v5 = vsel %vm661_vm2, %v843_v55, %v845_v28 }
 0x2ef   : > { %v2031_v61 = vrot.slane %v560_v32, 4  ;;  %v2813_v54 = vrot.slane %v560_v32, 5  ;;  %v847_v32 = vrot.slane %v11076_v12, 1 }
 0x2f0   : > { %v11105_v9 = vpop.f32.mrf.mxu1  ;;  %v11107_v26 = vpop.f32.mrf.mxu2 }
 0x2f1   : > { %v11109_v45 = vpop.f32.mrf.mxu3 }
 0x2f2   : > { %v11111_v10 = vpop.f32.mrf.mxu0 }
 0x2f3   : > { %8204 = vmatmul.msk.f32.gmra.mxu1 %vm851_vm1, %v11016_v21 }
 0x2f5   : > { %8108 = vmatmul.msk.f32.gmra.mxu0 %vm851_vm1, %v844_v6  ;;  %v2032_v6 = vsel %vm1847_vm3, %v2029_v39, %v2031_v61 }
 0x2f6   : > { %8300 = vmatmul.msk.f32.gmra.mxu2 %vm851_vm1, %v2030_v18  ;;  %8396 = vmatmul.msk.f32.gmra.mxu3 %vm851_vm1, %v2812_v41  ;;  %v2814_v18 = vsel %vm2629_vm4, %v2811_v57, %v2813_v54  ;;  %v561_v41 = vld [vmem:[%s9322_s28 + $0x300] sm:$0xff]  ;;  %v848_v57 = vsel %vm661_vm2, %v845_v28, %v847_v32 }
 0x2f7   : > { %v2033_v50 = vrot.slane %v561_v41, 4  ;;  %v2815_v13 = vrot.slane %v561_v41, 5  ;;  %v849_v41 = vrot.slane %v11097_v4, 1 }
 0x2f8   : > { %v11123_v36 = vpop.f32.mrf.mxu1  ;;  %v11125_v40 = vpop.f32.mrf.mxu2 }
 0x2f9   : > { %v11127_v21 = vpop.f32.mrf.mxu3 }
 0x2fa   : > { %v11129_v34 = vpop.f32.mrf.mxu0 }
 0x2fb   : > { %8205 = vmatmul.msk.f32.gmra.mxu1 %vm851_vm1, %v11036_v30 }
 0x2fd   : > { %8109 = vmatmul.msk.f32.gmra.mxu0 %vm851_vm1, %v846_v5  ;;  %v2034_v5 = vsel %vm1847_vm3, %v2031_v61, %v2033_v50  ;;  %v850_v61 = vsel %vm661_vm2, %v847_v32, %v849_v41 }
 0x2fe   : > { %8301 = vmatmul.msk.f32.gmra.mxu2 %vm851_vm1, %v2032_v6  ;;  %8397 = vmatmul.msk.f32.gmra.mxu3 %vm851_vm1, %v2814_v18  ;;  %v2816_v6 = vsel %vm2629_vm4, %v2813_v54, %v2815_v13  ;;  %v562_v18 = vld [vmem:[%s9322_s28 + $0x308] sm:$0xff] }
 0x2ff   : > { %v2035_v8 = vrot.slane %v562_v18, 4  ;;  %v2817_v3 = vrot.slane %v562_v18, 5 }
 0x300   : > { %v1786_v55 = vpop.f32.mrf.mxu1  ;;  %v11141_v38 = vpop.f32.mrf.mxu2 }
 0x301   : > { %v11143_v30 = vpop.f32.mrf.mxu3  ;;  %v2036_v54 = vsel %vm1847_vm3, %v2033_v50, %v2035_v8  ;;  %v3511_v50 = vld [vmem:[%s15147_s3 + $0x8] sm:$0xff] }
 0x302   : > { %v1291_v39 = vpop.f32.mrf.mxu0 }
 0x303   : > { %8206 = vmatmul.msk.f32.gmra.mxu1 %vm851_vm1, %v11056_v11  ;;  %v1787_v16 = vadd.f32 %v1786_v55, %v1291_v39  ;;  %v3519_v55 = vld [vmem:[%s15147_s3 + $0x48] sm:$0xff] }
 0x305   : > { %8110 = vmatmul.msk.f32.gmra.mxu0 %vm851_vm1, %v848_v57  ;;  %v2818_v57 = vsel %vm2629_vm4, %v2815_v13, %v2817_v3 }
 0x306   : > { %8302 = vmatmul.msk.f32.gmra.mxu2 %vm851_vm1, %v2034_v5  ;;  %8398 = vmatmul.msk.f32.gmra.mxu3 %vm851_vm1, %v2816_v6  ;;  %v563_v5 = vld [vmem:[%s9322_s28 + $0x310] sm:$0xff]  ;;  %s7955_s28 = sshll.u32 %s459_s0, 4  ;;  %s7956_s28 = int_to_ptr.vmem [resolvable:$true] %s7955_s28 }
 0x307   : > { %v2819_v6 = vrot.slane %v563_v5, 5 }
 0x308   : > { %v1789_v28 = vpop.f32.mrf.mxu1  ;;  %v2475_v20 = vpop.f32.mrf.mxu2 }
 0x309   : > { %v11155_v33 = vpop.f32.mrf.mxu3 }
 0x30a   : > { %v1294_v11 = vpop.f32.mrf.mxu0 }
 0x30b   : > { %8207 = vmatmul.msk.f32.gmra.mxu1 %vm851_vm1, %v11076_v12  ;;  %v2820_v12 = vsel %vm2629_vm4, %v2817_v3, %v2819_v6  ;;  %v3512_v3 = vld [vmem:[%s15147_s3 + $0x10] sm:$0xff] }
 0x30d   : > { %8111 = vmatmul.msk.f32.gmra.mxu0 %vm851_vm1, %v850_v61 }
 0x30e   : > { %8303 = vmatmul.msk.f32.gmra.mxu2 %vm851_vm1, %v2036_v54  ;;  %8399 = vmatmul.msk.f32.gmra.mxu3 %vm851_vm1, %v2818_v57  ;;  %v1790_v57 = vadd.f32 %v1789_v28, %v1294_v11  ;;  %v1784_v28 = vadd.f32 %v11123_v36, %v11129_v34  ;;  %v3518_v11 = vld [vmem:[%s15147_s3 + $0x40] sm:$0xff] }
 0x30f   : > { %v11203_v36 = vld [vmem:[%s15321_s2] ss:$0 sm:$0xff]  ;;  %s9130_s2 = scalar_lea.hbm %s9129_s22, 1 }
 0x310   : > { %v1792_v18 = vpop.f32.mrf.mxu1  ;;  %v2478_v59 = vpop.f32.mrf.mxu2  ;;  %p9131_p11 = scmp.ne.s32.totalorder %s9129_s22, %s9130_s2  ;;  %p9136_p1 = scmp.lt.s32.totalorder %s9134_s21, %s9130_s2 }
 0x311   : > { %v3262_v60 = vpop.f32.mrf.mxu3  ;;  %v2609_v1 = vadd.f32 %v2478_v59, %v1790_v57 }
 0x312   : > { %v1297_v0 = vpop.f32.mrf.mxu0  ;;  %p9132_p12 = pnand %p9131_p11, %p9291_p5  ;;  %p9137_p2 = por %p9136_p1, %p9135_p0 }
 0x313   : > { %8208 = vmatmul.msk.f32.gmra.mxu1 %vm851_vm1, %v11097_v4  ;;  %v3510_v4 = vld [vmem:[%s15147_s3] sm:$0xff] }
 0x314   : > { %p9133_p13 = pneg %p9132_p12 }
 0x315   : > { %8112 = vmatmul.msk.f32.gmra.mxu0 %vm851_vm1, %v849_v41  ;;  %v1793_v41 = vadd.f32 %v1792_v18, %v1297_v0  ;;  %v3516_v0 = vld [vmem:[%s15147_s3 + $0x30] sm:$0xff]  ;;  %v2608_v18 = vadd.f32 %v2475_v20, %v1787_v16 }
 0x316   : > { %8304 = vmatmul.msk.f32.gmra.mxu2 %vm851_vm1, %v2035_v8  ;;  %8400 = vmatmul.msk.f32.gmra.mxu3 %vm851_vm1, %v2820_v12  ;;  %v3513_v8 = vld [vmem:[%s15147_s3 + $0x18] sm:$0xff]  ;;  %p9138_p3 = pnand %p9137_p2, %p9133_p13 }
 0x317   : > { %v3392_v20 = vadd.f32 %v11155_v33, %v2608_v18  ;;  %v3524_v33 = vld [vmem:[%s15147_s3 + $0x70] sm:$0xff] }
 0x318   : > { %v1795_v13 = vpop.f32.mrf.mxu1  ;;  %v2481_v32 = vpop.f32.mrf.mxu2 }
 0x319   : > { %v3265_v61 = vpop.f32.mrf.mxu3  ;;  %v2610_v6 = vadd.f32 %v2481_v32, %v1793_v41 }
 0x31a   : > { %v1300_v54 = vpop.f32.mrf.mxu0 }
 0x31b   : > { %3811 = vmatmul.f32.vlgmr.msrb.gmra.mxu1 %v3511_v50  ;;  %v1796_v5 = vadd.f32 %v1795_v13, %v1300_v54  ;;  %v3517_v50 = vld [vmem:[%s15147_s3 + $0x38] sm:$0xff]  ;;  %v3394_v39 = vadd.f32 %v3265_v61, %v2610_v6  ;;  %v3393_v13 = vadd.f32 %v3262_v60, %v2609_v1  ;;  %v3523_v60 = vld [vmem:[%s15147_s3 + $0x68] sm:$0xff]  ;;  %v3522_v61 = vld [vmem:[%s15147_s3 + $0x60] sm:$0xff] }
 0x31d   : > { %3728 = vmatmul.f32.vlgmr.msrb.gmra.mxu0 %v3510_v4  ;;  %v11212_v16 = vadd.f32 %v11203_v36, %v3394_v39  ;;  %v3525_v4 = vld [vmem:[%s15147_s3 + $0x78] sm:$0xff] }
 0x31e   : > { %3894 = vmatmul.f32.vlgmr.msrb.gmra.mxu2 %v3512_v3  ;;  %3977 = vmatmul.f32.vlgmr.msrb.gmra.mxu3 %v3513_v8 }
 0x31f   : > { %15405 = vst [vmem:[#allocation66_spill] sm:$0xff] %v11212_v16 }
 0x320   : > { %v1798_v12 = vpop.f32.mrf.mxu1  ;;  %v2484_v52 = vpop.f32.mrf.mxu2 }
 0x321   : > { %v3268_v31 = vpop.f32.mrf.mxu3  ;;  %v2611_v25 = vadd.f32 %v2484_v52, %v1796_v5  ;;  %v1781_v52 = vadd.f32 %v11105_v9, %v11111_v10 }
 0x322   : > { %v1303_v14 = vpop.f32.mrf.mxu0 }
 0x323   : > { %3814 = vmatmul.f32.gmra.mxu1 %v3517_v50  ;;  %v3395_v59 = vadd.f32 %v3268_v31, %v2611_v25  ;;  %v1799_v32 = vadd.f32 %v1798_v12, %v1303_v14  ;;  %v1778_v25 = vadd.f32 %v11085_v23, %v11087_v44  ;;  %v2607_v31 = vadd.f32 %v11141_v38, %v1784_v28 }
 0x324   : > { %v2606_v14 = vadd.f32 %v11125_v40, %v1781_v52  ;;  %v11222_v38 = vadd.f32 %v11203_v36, %v3393_v13  ;;  %v11277_v52 = vadd.f32 %v11203_v36, %v11094_v24  ;;  %v11282_v13 = vadd.f32 %v11203_v36, %v11073_v35 }
 0x325   : > { %3731 = vmatmul.f32.gmra.mxu0 %v3516_v0  ;;  %v11206_v34 = vadd.f32 %v11203_v36, %v3395_v59  ;;  %v2605_v54 = vadd.f32 %v11107_v26, %v1778_v25  ;;  %v3391_v40 = vadd.f32 %v11143_v30, %v2607_v31  ;;  %v11243_v26 = vadd.f32 %v11203_v36, %v3392_v20  ;;  %v3531_v59 = vld [vmem:[%s15147_s3 + $0xa8] sm:$0xff]  ;;  %v3536_v20 = vld [vmem:[%s15147_s3 + $0xd0] sm:$0xff] }
 0x326   : > { %3897 = vmatmul.f32.gmra.mxu2 %v3518_v11  ;;  %3980 = vmatmul.f32.gmra.mxu3 %v3519_v55  ;;  %15406 = vst [vmem:[#allocation67_spill] sm:$0xff] %v11222_v38  ;;  %v3390_v8 = vadd.f32 %v11127_v21, %v2606_v14  ;;  %v3529_v21 = vld [vmem:[%s15147_s3 + $0x98] sm:$0xff]  ;;  %v3528_v11 = vld [vmem:[%s15147_s3 + $0x90] sm:$0xff]  ;;  %v3530_v55 = vld [vmem:[%s15147_s3 + $0xa0] sm:$0xff]  ;;  %v11291_v24 = vadd.f32 %v11203_v36, %v11053_v63 }
 0x327   : > { %15404 = vst [vmem:[#allocation65_spill] sm:$0xff] %v11206_v34  ;;  %4044 = vmatpush.msra.mxu0 %v11206_v34  ;;  %4741 = vmatpush.msrb.mxu2 %v11206_v34  ;;  %v3389_v41 = vadd.f32 %v11109_v45, %v2605_v54  ;;  %v11247_v57 = vadd.f32 %v11203_v36, %v3391_v40  ;;  %v3535_v25 = vld [vmem:[%s15147_s3 + $0xc8] sm:$0xff]  ;;  %v3534_v63 = vld [vmem:[%s15147_s3 + $0xc0] sm:$0xff]  ;;  %v3541_v54 = vld [vmem:[%s15147_s3 + $0xf8] sm:$0xff] }
 0x328   : > { %v1801_v1 = vpop.f32.mrf.mxu1  ;;  %v2487_v9 = vpop.f32.mrf.mxu2  ;;  %15407 = vst [vmem:[#allocation68_spill] sm:$0xff] %v11243_v26  ;;  %v11255_v6 = vadd.f32 %v11203_v36, %v3390_v8  ;;  %v11297_v14 = vadd.f32 %v11203_v36, %v11033_v58  ;;  %v11314_v58 = vadd.f32 %v11203_v36, %v11008_v56  ;;  %v11328_v56 = vadd.f32 %v11203_v36, %v10952_v7  ;;  %v3540_v7 = vld [vmem:[%s15147_s3 + $0xf0] sm:$0xff] }
 0x329   : > { %v3271_v23 = vpop.f32.mrf.mxu3  ;;  %v2612_v44 = vadd.f32 %v2487_v9, %v1799_v32  ;;  %4045 = vmatpush.msra.mxu0 %v11212_v16  ;;  %4742 = vmatpush.msrb.mxu2 %v11212_v16  ;;  %15408 = vst [vmem:[#allocation69_spill] sm:$0xff] %v11247_v57  ;;  %v11260_v28 = vadd.f32 %v11203_v36, %v3389_v41 }
 0x32a   : > { %v1306_v10 = vpop.f32.mrf.mxu0  ;;  %15409 = vst [vmem:[#allocation70_spill] sm:$0xff] %v11255_v6  ;;  %v11334_v8 = vadd.f32 %v11203_v36, %v10916_v48  ;;  %v11351_v48 = vadd.f32 %v11203_v36, %v10882_v47 }
 0x32b   : > { %3817 = vmatmul.f32.gmra.mxu1 %v3523_v60  ;;  %v11237_v3 = vadd.f32 %v3271_v23, %v2612_v44  ;;  %4046 = vmatpush.msra.mxu0 %v11222_v38  ;;  %v1802_v30 = vadd.f32 %v1801_v1, %v1306_v10  ;;  %15410 = vst [vmem:[#allocation71_spill] sm:$0xff] %v11260_v28  ;;  %v3537_v23 = vld [vmem:[%s15147_s3 + $0xd8] sm:$0xff] }
 0x32c   : > { %4743 = vmatpush.msrb.mxu2 %v11222_v38  ;;  %15411 = vst [vmem:[#allocation72_spill] sm:$0xff] %v11277_v52  ;;  %v11319_v10 = vadd.f32 %v11203_v36, %v10988_v37  ;;  %v3602_v38 = vld [vmem:[%s15147_s3 + $0x2e0] sm:$0xff] }
 0x32d   : > { %3734 = vmatmul.f32.gmra.mxu0 %v3522_v61  ;;  %15412 = vst [vmem:[#allocation73_spill] sm:$0xff] %v11282_v13 }
 0x32e   : > { %3900 = vmatmul.f32.gmra.mxu2 %v3524_v33  ;;  %3983 = vmatmul.f32.gmra.mxu3 %v3525_v4  ;;  %15413 = vst [vmem:[#allocation74_spill] sm:$0xff] %v11291_v24 }
 0x32f   : > { %4047 = vmatpush.msra.mxu0 %v11243_v26  ;;  %4744 = vmatpush.msrb.mxu2 %v11243_v26  ;;  %15414 = vst [vmem:[#allocation75_spill] sm:$0xff] %v11297_v14 }
 0x330   : > { %v1804_v5 = vpop.f32.mrf.mxu1  ;;  %15415 = vst [vmem:[#allocation76_spill] sm:$0xff] %v11314_v58 }
 0x331   : > { %4048 = vmatpush.msra.mxu0 %v11247_v57  ;;  %v2490_v12 = vpop.f32.mrf.mxu2  ;;  %v3274_v50 = vpop.f32.mrf.mxu3  ;;  %4745 = vmatpush.msrb.mxu2 %v11247_v57  ;;  %15416 = vst [vmem:[#allocation77_spill] sm:$0xff] %v11319_v10 }
 0x332   : > { %v2613_v45 = vadd.f32 %v2490_v12, %v1802_v30  ;;  %v1309_v0 = vpop.f32.mrf.mxu0  ;;  %15417 = vst [vmem:[#allocation78_spill] sm:$0xff] %v11328_v56  ;;  %v3542_v30 = vld [vmem:[%s15147_s3 + $0x100] sm:$0xff] }
 0x333   : > { %4049 = vmatpush.msra.mxu0 %v11255_v6  ;;  %3820 = vmatmul.f32.gmra.mxu1 %v3529_v21  ;;  %v1805_v18 = vadd.f32 %v1804_v5, %v1309_v0  ;;  %15418 = vst [vmem:[#allocation79_spill] sm:$0xff] %v11334_v8  ;;  %v3543_v5 = vld [vmem:[%s15147_s3 + $0x108] sm:$0xff] }
 0x334   : > { %v11269_v39 = vadd.f32 %v3274_v50, %v2613_v45  ;;  %4746 = vmatpush.msrb.mxu2 %v11255_v6  ;;  %15419 = vst [vmem:[#allocation80_spill] sm:$0xff] %v11351_v48  ;;  %v3547_v50 = vld [vmem:[%s15147_s3 + $0x128] sm:$0xff]  ;;  %v3594_v6 = vld [vmem:[%s15147_s3 + $0x2a0] sm:$0xff] }
 0x335   : > { %4050 = vmatpush.msra.mxu0 %v11260_v28 }
 0x336   : > { %3737 = vmatmul.f32.gmra.mxu0 %v3528_v11  ;;  %3903 = vmatmul.f32.gmra.mxu2 %v3530_v55  ;;  %v3548_v55 = vld [vmem:[%s15147_s3 + $0x130] sm:$0xff] }
 0x337   : > { %3986 = vmatmul.f32.gmra.mxu3 %v3531_v59  ;;  %4051 = vmatpush.msra.mxu0 %v11277_v52 }
 0x338   : > { %v1807_v32 = vpop.f32.mrf.mxu1  ;;  %4747 = vmatpush.msrb.mxu2 %v11260_v28  ;;  %v3596_v28 = vld [vmem:[%s15147_s3 + $0x2b0] sm:$0xff] }
 0x339   : > { %4052 = vmatpush.msra.mxu0 %v11282_v13  ;;  %v2493_v31 = vpop.f32.mrf.mxu2  ;;  %v3277_v1 = vpop.f32.mrf.mxu3 }
 0x33a   : > { %v2614_v35 = vadd.f32 %v2493_v31, %v1805_v18  ;;  %v1312_v60 = vpop.f32.mrf.mxu0  ;;  %4748 = vmatpush.msrb.mxu2 %v11277_v52  ;;  %v3546_v18 = vld [vmem:[%s15147_s3 + $0x120] sm:$0xff] }
 0x33b   : > { %4053 = vmatpush.msra.mxu0 %v11291_v24  ;;  %3823 = vmatmul.f32.gmra.mxu1 %v3535_v25  ;;  %v1808_v44 = vadd.f32 %v1807_v32, %v1312_v60  ;;  %v3549_v32 = vld [vmem:[%s15147_s3 + $0x138] sm:$0xff] }
 0x33c   : > { %v11306_v9 = vadd.f32 %v3277_v1, %v2614_v35  ;;  %4749 = vmatpush.msrb.mxu2 %v11282_v13  ;;  %v3553_v1 = vld [vmem:[%s15147_s3 + $0x158] sm:$0xff] }
 0x33d   : > { %4054 = vmatpush.msra.mxu0 %v11297_v14 }
 0x33e   : > { %3740 = vmatmul.f32.gmra.mxu0 %v3534_v63  ;;  %3906 = vmatmul.f32.gmra.mxu2 %v3536_v20 }
 0x33f   : > { %3989 = vmatmul.f32.gmra.mxu3 %v3537_v23  ;;  %4055 = vmatpush.msra.mxu0 %v11314_v58  ;;  %v3554_v23 = vld [vmem:[%s15147_s3 + $0x160] sm:$0xff] }
 0x340   : > { %v1810_v61 = vpop.f32.mrf.mxu1  ;;  %4750 = vmatpush.msrb.mxu2 %v11291_v24  ;;  %v3588_v24 = vld [vmem:[%s15147_s3 + $0x270] sm:$0xff] }
 0x341   : > { %4056 = vmatpush.msra.mxu0 %v11319_v10  ;;  %v2496_v40 = vpop.f32.mrf.mxu2  ;;  %v3280_v33 = vpop.f32.mrf.mxu3 }
 0x342   : > { %v2615_v37 = vadd.f32 %v2496_v40, %v1808_v44  ;;  %v1315_v4 = vpop.f32.mrf.mxu0  ;;  %4751 = vmatpush.msrb.mxu2 %v11297_v14  ;;  %v3590_v14 = vld [vmem:[%s15147_s3 + $0x280] sm:$0xff] }
 0x343   : > { %4057 = vmatpush.msra.mxu0 %v11328_v56  ;;  %3826 = vmatmul.f32.gmra.mxu1 %v3541_v54  ;;  %v1811_v21 = vadd.f32 %v1810_v61, %v1315_v4  ;;  %v3552_v61 = vld [vmem:[%s15147_s3 + $0x150] sm:$0xff]  ;;  %v3555_v54 = vld [vmem:[%s15147_s3 + $0x168] sm:$0xff] }
 0x344   : > { %v11343_v41 = vadd.f32 %v3280_v33, %v2615_v37  ;;  %4752 = vmatpush.msrb.mxu2 %v11314_v58  ;;  %v15420_v33 = vld [vmem:[#allocation45_spill] sm:$0xff]  ;;  %v3559_v4 = vld [vmem:[%s15147_s3 + $0x188] sm:$0xff] }
 0x345   : > { %4058 = vmatpush.msra.mxu0 %v11334_v8 }
 0x346   : > { %3743 = vmatmul.f32.gmra.mxu0 %v3540_v7  ;;  %3909 = vmatmul.f32.gmra.mxu2 %v3542_v30 }
 0x347   : > { %3992 = vmatmul.f32.gmra.mxu3 %v3543_v5  ;;  %4059 = vmatpush.msra.mxu0 %v11351_v48 }
 0x348   : > { %v1813_v12 = vpop.f32.mrf.mxu1  ;;  %4753 = vmatpush.msrb.mxu2 %v11319_v10 }
 0x349   : > { %4575 = vmatpush.msrb.mxu0 %v10484_v43  ;;  %v2499_v45 = vpop.f32.mrf.mxu2  ;;  %v3283_v47 = vpop.f32.mrf.mxu3 }
 0x34a   : > { %v2616_v0 = vadd.f32 %v2499_v45, %v1811_v21  ;;  %v1318_v11 = vpop.f32.mrf.mxu0  ;;  %4754 = vmatpush.msrb.mxu2 %v11328_v56  ;;  %v15421_v21 = vld [vmem:[#allocation46_spill] sm:$0xff]  ;;  %v3560_v45 = vld [vmem:[%s15147_s3 + $0x190] sm:$0xff] }
 0x34b   : > { %4576 = vmatpush.msrb.mxu0 %v10495_v42  ;;  %3829 = vmatmul.f32.gmra.mxu1 %v3547_v50  ;;  %v1814_v25 = vadd.f32 %v1813_v12, %v1318_v11  ;;  %v3558_v11 = vld [vmem:[%s15147_s3 + $0x180] sm:$0xff] }
 0x34c   : > { %v11365_v59 = vadd.f32 %v3283_v47, %v2616_v0  ;;  %4755 = vmatpush.msrb.mxu2 %v11334_v8  ;;  %v15422_v0 = vld [vmem:[#allocation47_spill] sm:$0xff]  ;;  %v3584_v8 = vld [vmem:[%s15147_s3 + $0x250] sm:$0xff] }
 0x34d   : > { %4577 = vmatpush.msrb.mxu0 %v10502_v49 }
 0x34e   : > { %3912 = vmatmul.f32.gmra.mxu2 %v3548_v55  ;;  %3746 = vmatmul.f32.gmra.mxu0 %v3546_v18  ;;  %v3561_v55 = vld [vmem:[%s15147_s3 + $0x198] sm:$0xff]  ;;  %v15423_v18 = vld [vmem:[#allocation48_spill] sm:$0xff] }
 0x34f   : > { %4578 = vmatpush.msrb.mxu0 %v10520_v22  ;;  %3995 = vmatmul.f32.gmra.mxu3 %v3549_v32  ;;  %v15424_v32 = vld [vmem:[#allocation49_spill] sm:$0xff] }
 0x350   : > { %v1816_v31 = vpop.f32.mrf.mxu1  ;;  %4756 = vmatpush.msrb.mxu2 %v11351_v48 }
 0x351   : > { %4579 = vmatpush.msrb.mxu0 %v10526_v29  ;;  %v2502_v35 = vpop.f32.mrf.mxu2  ;;  %v3286_v60 = vpop.f32.mrf.mxu3 }
 0x352   : > { %v2617_v63 = vadd.f32 %v2502_v35, %v1814_v25  ;;  %v1321_v20 = vpop.f32.mrf.mxu0 }
 0x353   : > { %4580 = vmatpush.msrb.mxu0 %v10534_v17  ;;  %3832 = vmatmul.f32.gmra.mxu1 %v3553_v1  ;;  %v1817_v40 = vadd.f32 %v1816_v31, %v1321_v20  ;;  %v3565_v31 = vld [vmem:[%s15147_s3 + $0x1b8] sm:$0xff] }
 0x354   : > { %v11385_v44 = vadd.f32 %v3286_v60, %v2617_v63  ;;  %v15425_v63 = vld [vmem:[#allocation50_spill] sm:$0xff] }
 0x355   : > { %4581 = vmatpush.msrb.mxu0 %v10538_v51 }
 0x356   : > { %3915 = vmatmul.f32.gmra.mxu2 %v3554_v23  ;;  %3749 = vmatmul.f32.gmra.mxu0 %v3552_v61  ;;  %v3566_v23 = vld [vmem:[%s15147_s3 + $0x1c0] sm:$0xff] }
 0x357   : > { %4582 = vmatpush.msrb.mxu0 %v10553_v27  ;;  %3998 = vmatmul.f32.gmra.mxu3 %v3555_v54  ;;  %v15426_v54 = vld [vmem:[#allocation51_spill] sm:$0xff] }
 0x358   : > { %v1819_v37 = vpop.f32.mrf.mxu1 }
 0x359   : > { %4583 = vmatpush.msrb.mxu0 %v15420_v33  ;;  %v2505_v7 = vpop.f32.mrf.mxu2  ;;  %v3289_v30 = vpop.f32.mrf.mxu3 }
 0x35a   : > { %v2618_v5 = vadd.f32 %v2505_v7, %v1817_v40  ;;  %v1324_v12 = vpop.f32.mrf.mxu0  ;;  %v3564_v40 = vld [vmem:[%s15147_s3 + $0x1b0] sm:$0xff] }
 0x35b   : > { %4584 = vmatpush.msrb.mxu0 %v15421_v21  ;;  %v1820_v50 = vadd.f32 %v1819_v37, %v1324_v12  ;;  %3835 = vmatmul.f32.gmra.mxu1 %v3559_v4  ;;  %v3567_v37 = vld [vmem:[%s15147_s3 + $0x1c8] sm:$0xff] }
 0x35c   : > { %v11403_v47 = vadd.f32 %v3289_v30, %v2618_v5  ;;  %v15427_v4 = vld [vmem:[#allocation52_spill] sm:$0xff] }
 0x35d   : > { %4585 = vmatpush.msrb.mxu0 %v15422_v0  ;;  %v3571_v30 = vld [vmem:[%s15147_s3 + $0x1e8] sm:$0xff] }
 0x35e   : > { %3918 = vmatmul.f32.gmra.mxu2 %v3560_v45  ;;  %3752 = vmatmul.f32.gmra.mxu0 %v3558_v11  ;;  %v3572_v45 = vld [vmem:[%s15147_s3 + $0x1f0] sm:$0xff]  ;;  %v3570_v11 = vld [vmem:[%s15147_s3 + $0x1e0] sm:$0xff] }
 0x35f   : > { %4586 = vmatpush.msrb.mxu0 %v15423_v18  ;;  %4001 = vmatmul.f32.gmra.mxu3 %v3561_v55  ;;  %v3573_v55 = vld [vmem:[%s15147_s3 + $0x1f8] sm:$0xff] }
 0x360   : > { %v11414_v25 = vpop.f32.mrf.mxu1 }
 0x361   : > { %4587 = vmatpush.msrb.mxu0 %v15424_v32  ;;  %v2508_v1 = vpop.f32.mrf.mxu2  ;;  %v3292_v35 = vpop.f32.mrf.mxu3 }
 0x362   : > { %v2619_v60 = vadd.f32 %v2508_v1, %v1820_v50  ;;  %v11420_v20 = vpop.f32.mrf.mxu0  ;;  %v3577_v1 = vld [vmem:[%s15147_s3 + $0x218] sm:$0xff] }
 0x363   : > { %4588 = vmatpush.msrb.mxu0 %v15425_v63  ;;  %3838 = vmatmul.f32.gmra.mxu1 %v3565_v31 }
 0x364   : > { %v11425_v61 = vadd.f32 %v3292_v35, %v2619_v60 }
 0x365   : > { %4589 = vmatpush.msrb.mxu0 %v15426_v54 }
 0x366   : > { %3921 = vmatmul.f32.gmra.mxu2 %v3566_v23  ;;  %3755 = vmatmul.f32.gmra.mxu0 %v3564_v40  ;;  %v3578_v40 = vld [vmem:[%s15147_s3 + $0x220] sm:$0xff] }
 0x367   : > { %4590 = vmatpush.msrb.mxu0 %v15427_v4  ;;  %4004 = vmatmul.f32.gmra.mxu3 %v3567_v37  ;;  %v3576_v37 = vld [vmem:[%s15147_s3 + $0x210] sm:$0xff] }
 0x368   : > { %v11435_v7 = vpop.f32.mrf.mxu1 }
 0x369   : > { %v11440_v5 = vpop.f32.mrf.mxu2  ;;  %v11442_v12 = vpop.f32.mrf.mxu3 }
 0x36a   : > { %v11444_v50 = vpop.f32.mrf.mxu0 }
 0x36b   : > { %3841 = vmatmul.f32.gmra.mxu1 %v3571_v30  ;;  %v3579_v30 = vld [vmem:[%s15147_s3 + $0x228] sm:$0xff] }
 0x36e   : > { %3924 = vmatmul.f32.gmra.mxu2 %v3572_v45  ;;  %3758 = vmatmul.f32.gmra.mxu0 %v3570_v11  ;;  %v3583_v11 = vld [vmem:[%s15147_s3 + $0x248] sm:$0xff] }
 0x36f   : > { %4007 = vmatmul.f32.gmra.mxu3 %v3573_v55 }
 0x370   : > { %v11455_v31 = vpop.f32.mrf.mxu1 }
 0x371   : > { %v11460_v35 = vpop.f32.mrf.mxu2  ;;  %v11462_v60 = vpop.f32.mrf.mxu3 }
 0x372   : > { %v11464_v23 = vpop.f32.mrf.mxu0 }
 0x373   : > { %3844 = vmatmul.f32.gmra.mxu1 %v3577_v1  ;;  %v1829_v32 = vadd.f32 %v11455_v31, %v11464_v23  ;;  %v1823_v31 = vadd.f32 %v11414_v25, %v11420_v20 }
 0x376   : > { %3927 = vmatmul.f32.gmra.mxu2 %v3578_v40  ;;  %3761 = vmatmul.f32.gmra.mxu0 %v3576_v37  ;;  %v3582_v40 = vld [vmem:[%s15147_s3 + $0x240] sm:$0xff]  ;;  %v3585_v37 = vld [vmem:[%s15147_s3 + $0x258] sm:$0xff] }
 0x377   : > { %4010 = vmatmul.f32.gmra.mxu3 %v3579_v30 }
 0x378   : > { %v1831_v45 = vpop.f32.mrf.mxu1 }
 0x379   : > { %v11478_v55 = vpop.f32.mrf.mxu2  ;;  %v11480_v1 = vpop.f32.mrf.mxu3 }
 0x37a   : > { %v1336_v48 = vpop.f32.mrf.mxu0  ;;  %v2622_v23 = vadd.f32 %v11478_v55, %v1829_v32  ;;  %v3615_v55 = vld [vmem:[%s15147_s3 + $0x348] sm:$0xff] }
 0x37b   : > { %3847 = vmatmul.f32.gmra.mxu1 %v3583_v11  ;;  %v3589_v11 = vld [vmem:[%s15147_s3 + $0x278] sm:$0xff]  ;;  %v1832_v4 = vadd.f32 %v1831_v45, %v1336_v48 }
 0x37c   : > { %v3406_v25 = vadd.f32 %v11480_v1, %v2622_v23  ;;  %v3626_v23 = vld [vmem:[%s15147_s3 + $0x3a0] sm:$0xff] }
 0x37e   : > { %3930 = vmatmul.f32.gmra.mxu2 %v3584_v8  ;;  %3764 = vmatmul.f32.gmra.mxu0 %v3582_v40  ;;  %v3591_v8 = vld [vmem:[%s15147_s3 + $0x288] sm:$0xff] }
 0x37f   : > { %4013 = vmatmul.f32.gmra.mxu3 %v3585_v37  ;;  %v3595_v37 = vld [vmem:[%s15147_s3 + $0x2a8] sm:$0xff] }
 0x380   : > { %v1834_v30 = vpop.f32.mrf.mxu1 }
 0x381   : > { %v2520_v56 = vpop.f32.mrf.mxu2  ;;  %v3304_v10 = vpop.f32.mrf.mxu3 }
 0x382   : > { %v1339_v58 = vpop.f32.mrf.mxu0 }
 0x383   : > { %3850 = vmatmul.f32.gmra.mxu1 %v3589_v11 }
 0x386   : > { %3933 = vmatmul.f32.gmra.mxu2 %v3590_v14  ;;  %3767 = vmatmul.f32.gmra.mxu0 %v3588_v24  ;;  %v3597_v24 = vld [vmem:[%s15147_s3 + $0x2b8] sm:$0xff] }
 0x387   : > { %4016 = vmatmul.f32.gmra.mxu3 %v3591_v8  ;;  %v3601_v8 = vld [vmem:[%s15147_s3 + $0x2d8] sm:$0xff] }
 0x388   : > { %v1837_v40 = vpop.f32.mrf.mxu1 }
 0x389   : > { %v2523_v11 = vpop.f32.mrf.mxu2  ;;  %v3307_v13 = vpop.f32.mrf.mxu3 }
 0x38a   : > { %v1342_v52 = vpop.f32.mrf.mxu0 }
 0x38b   : > { %3853 = vmatmul.f32.gmra.mxu1 %v3595_v37  ;;  %v1838_v16 = vadd.f32 %v1837_v40, %v1342_v52  ;;  %v3607_v52 = vld [vmem:[%s15147_s3 + $0x308] sm:$0xff] }
 0x38e   : > { %3936 = vmatmul.f32.gmra.mxu2 %v3596_v28  ;;  %3770 = vmatmul.f32.gmra.mxu0 %v3594_v6  ;;  %v3600_v28 = vld [vmem:[%s15147_s3 + $0x2d0] sm:$0xff]  ;;  %v3603_v6 = vld [vmem:[%s15147_s3 + $0x2e8] sm:$0xff] }
 0x38f   : > { %4019 = vmatmul.f32.gmra.mxu3 %v3597_v24  ;;  %v1835_v24 = vadd.f32 %v1834_v30, %v1339_v58  ;;  %v3606_v30 = vld [vmem:[%s15147_s3 + $0x300] sm:$0xff] }
 0x390   : > { %v1840_v14 = vpop.f32.mrf.mxu1 }
 0x391   : > { %v2526_v37 = vpop.f32.mrf.mxu2  ;;  %v3310_v57 = vpop.f32.mrf.mxu3  ;;  %v2624_v18 = vadd.f32 %v2523_v11, %v1835_v24 }
 0x392   : > { %v1345_v26 = vpop.f32.mrf.mxu0 }
 0x393   : > { %3856 = vmatmul.f32.gmra.mxu1 %v3601_v8  ;;  %v1841_v34 = vadd.f32 %v1840_v14, %v1345_v26  ;;  %v2625_v8 = vadd.f32 %v2526_v37, %v1838_v16  ;;  %v3608_v16 = vld [vmem:[%s15147_s3 + $0x310] sm:$0xff]  ;;  %v2623_v26 = vadd.f32 %v2520_v56, %v1832_v4  ;;  %v3408_v11 = vadd.f32 %v3307_v13, %v2624_v18  ;;  %v3613_v13 = vld [vmem:[%s15147_s3 + $0x338] sm:$0xff] }
 0x394   : > { %v11596_v37 = vadd.f32 %v11203_v36, %v3406_v25  ;;  %v11698_v25 = vadd.f32 %v11203_v36, %v11237_v3  ;;  %v3633_v3 = vld [vmem:[%s15147_s3 + $0x3d8] sm:$0xff] }
 0x395   : > { %v3409_v48 = vadd.f32 %v3310_v57, %v2625_v8  ;;  %v3407_v56 = vadd.f32 %v3304_v10, %v2623_v26  ;;  %v2620_v10 = vadd.f32 %v11440_v5, %v1823_v31  ;;  %v11573_v20 = vadd.f32 %v11203_v36, %v3408_v11  ;;  %v3621_v26 = vld [vmem:[%s15147_s3 + $0x378] sm:$0xff] }
 0x396   : > { %3939 = vmatmul.f32.gmra.mxu2 %v3602_v38  ;;  %3773 = vmatmul.f32.gmra.mxu0 %v3600_v28  ;;  %v1826_v38 = vadd.f32 %v11435_v7, %v11444_v50  ;;  %v3614_v7 = vld [vmem:[%s15147_s3 + $0x340] sm:$0xff]  ;;  %v11657_v31 = vadd.f32 %v11203_v36, %v11365_v59  ;;  %v11668_v11 = vadd.f32 %v11203_v36, %v11343_v41  ;;  %v3624_v59 = vld [vmem:[%s15147_s3 + $0x390] sm:$0xff] }
 0x397   : > { %4022 = vmatmul.f32.gmra.mxu3 %v3603_v6  ;;  %v11584_v5 = vadd.f32 %v11203_v36, %v3407_v56  ;;  %v3404_v1 = vadd.f32 %v11442_v12, %v2620_v10  ;;  %v3619_v6 = vld [vmem:[%s15147_s3 + $0x368] sm:$0xff]  ;;  %v11680_v56 = vadd.f32 %v11203_v36, %v11306_v9  ;;  %v11685_v41 = vadd.f32 %v11203_v36, %v11269_v39 }
 0x398   : > { %v11527_v54 = vpop.f32.mrf.mxu1  ;;  %v2621_v57 = vadd.f32 %v11460_v35, %v1826_v38  ;;  %v3612_v35 = vld [vmem:[%s15147_s3 + $0x330] sm:$0xff]  ;;  %v3618_v38 = vld [vmem:[%s15147_s3 + $0x360] sm:$0xff]  ;;  %v3631_v10 = vld [vmem:[%s15147_s3 + $0x3c8] sm:$0xff] }
 0x399   : > { %15428 = vst [vmem:[#allocation81_spill] sm:$0xff] %v11527_v54  ;;  %v2529_v40 = vpop.f32.mrf.mxu2  ;;  %v3313_v63 = vpop.f32.mrf.mxu3  ;;  %v11614_v8 = vadd.f32 %v11203_v36, %v3404_v1  ;;  %v8442_v54 = vld [vmem:[%s15147_s3 + $0x4b0] sm:$0xff] }
 0x39a   : > { %v2626_v0 = vadd.f32 %v2529_v40, %v1841_v34  ;;  %v11534_v58 = vpop.f32.mrf.mxu0  ;;  %v3609_v34 = vld [vmem:[%s15147_s3 + $0x318] sm:$0xff]  ;;  %v3405_v50 = vadd.f32 %v11462_v60, %v2621_v57  ;;  %v3620_v40 = vld [vmem:[%s15147_s3 + $0x370] sm:$0xff]  ;;  %v3627_v57 = vld [vmem:[%s15147_s3 + $0x3a8] sm:$0xff] }
 0x39b   : > { %15429 = vst [vmem:[#allocation82_spill] sm:$0xff] %v11534_v58  ;;  %3859 = vmatmul.f32.gmra.mxu1 %v3607_v52 }
 0x39c   : > { %v3410_v45 = vadd.f32 %v3313_v63, %v2626_v0  ;;  %v11555_v0 = vadd.f32 %v11203_v36, %v3409_v48  ;;  %v11600_v60 = vadd.f32 %v11203_v36, %v3405_v50  ;;  %v11637_v48 = vadd.f32 %v11203_v36, %v11403_v47  ;;  %v3632_v50 = vld [vmem:[%s15147_s3 + $0x3d0] sm:$0xff] }
 0x39e   : > { %v11551_v14 = vadd.f32 %v11203_v36, %v3410_v45  ;;  %3942 = vmatmul.f32.gmra.mxu2 %v3608_v16  ;;  %3776 = vmatmul.f32.gmra.mxu0 %v3606_v30  ;;  %v11625_v16 = vadd.f32 %v11203_v36, %v11425_v61  ;;  %v11642_v61 = vadd.f32 %v11203_v36, %v11385_v44  ;;  %v3625_v30 = vld [vmem:[%s15147_s3 + $0x398] sm:$0xff]  ;;  %v3630_v36 = vld [vmem:[%s15147_s3 + $0x3c0] sm:$0xff] }
 0x39f   : > { %4025 = vmatmul.f32.gmra.mxu3 %v3609_v34 }
 0x3a0   : > { %v11557_v63 = vpop.f32.mrf.mxu1  ;;  %8401 = vmatpush.msk.msra.mxu1 %vm1847_vm3, %v11551_v14  ;;  %8556 = vmatpush.msk.msrb.mxu3 %vm1847_vm3, %v11551_v14 }
 0x3a1   : > { %15430 = vst [vmem:[#allocation83_spill] sm:$0xff] %v11557_v63  ;;  %v11566_v18 = vpop.f32.mrf.mxu2  ;;  %v11568_v32 = vpop.f32.mrf.mxu3  ;;  %v8431_v63 = vld [vmem:[%s15147_s3 + $0x458] sm:$0xff] }
 0x3a2   : > { %15431 = vst [vmem:[#allocation84_spill] sm:$0xff] %v11566_v18  ;;  %4129 = vmatpush.msra.mxu1 %v11555_v0  ;;  %v11576_v4 = vpop.f32.mrf.mxu0  ;;  %4826 = vmatpush.msrb.mxu3 %v11555_v0  ;;  %v15494_v18 = vld [vmem:[#allocation18_spill] sm:$0xff] }
 0x3a3   : > { %15432 = vst [vmem:[#allocation85_spill] sm:$0xff] %v11568_v32  ;;  %3862 = vmatmul.f32.gmra.mxu1 %v3613_v13 }
 0x3a4   : > { %15433 = vst [vmem:[#allocation86_spill] sm:$0xff] %v11576_v4  ;;  %4130 = vmatpush.msra.mxu1 %v11573_v20  ;;  %4827 = vmatpush.msrb.mxu3 %v11573_v20 }
 0x3a6   : > { %3945 = vmatmul.f32.gmra.mxu2 %v3614_v7  ;;  %4131 = vmatpush.msra.mxu1 %v11584_v5 }
 0x3a7   : > { %3779 = vmatmul.f32.gmra.mxu0 %v3612_v35  ;;  %4028 = vmatmul.f32.gmra.mxu3 %v3615_v55  ;;  %v3637_v55 = vld [vmem:[%s15147_s3 + $0x3f8] sm:$0x3] }
 0x3a8   : > { %v11602_v28 = vpop.f32.mrf.mxu1  ;;  %4132 = vmatpush.msra.mxu1 %v11596_v37  ;;  %4828 = vmatpush.msrb.mxu3 %v11584_v5 }
 0x3a9   : > { %15434 = vst [vmem:[#allocation87_spill] sm:$0xff] %v11602_v28  ;;  %v11609_v12 = vpop.f32.mrf.mxu2  ;;  %v11611_v24 = vpop.f32.mrf.mxu3  ;;  %v15466_v28 = vld [vmem:[#allocation60_spill] sm:$0xff] }
 0x3aa   : > { %15435 = vst [vmem:[#allocation88_spill] sm:$0xff] %v11609_v12  ;;  %4133 = vmatpush.msra.mxu1 %v11600_v60  ;;  %v11617_v52 = vpop.f32.mrf.mxu0  ;;  %4829 = vmatpush.msrb.mxu3 %v11596_v37  ;;  %v8430_v12 = vld [vmem:[%s15147_s3 + $0x450] sm:$0xff] }
 0x3ab   : > { %15436 = vst [vmem:[#allocation89_spill] sm:$0xff] %v11611_v24  ;;  %3865 = vmatmul.f32.gmra.mxu1 %v3619_v6  ;;  %v3520_v24 = vld [vmem:[%s15147_s3 + $0x50] sm:$0xff] }
 0x3ac   : > { %15437 = vst [vmem:[#allocation90_spill] sm:$0xff] %v11617_v52  ;;  %4134 = vmatpush.msra.mxu1 %v11614_v8  ;;  %4830 = vmatpush.msrb.mxu3 %v11600_v60  ;;  %v15467_v52 = vld [vmem:[#allocation10_spill] sm:$0xff] }
 0x3ae   : > { %3948 = vmatmul.f32.gmra.mxu2 %v3620_v40  ;;  %4135 = vmatpush.msra.mxu1 %v11625_v16 }
 0x3af   : > { %3782 = vmatmul.f32.gmra.mxu0 %v3618_v38  ;;  %4031 = vmatmul.f32.gmra.mxu3 %v3621_v26  ;;  %v3638_v38 = vld [vmem:[%s15147_s3 + $0x400] sm:$0x3]  ;;  %v3636_v26 = vld [vmem:[%s15147_s3 + $0x3f0] sm:$0x3] }
 0x3b0   : > { %v11644_v45 = vpop.f32.mrf.mxu1  ;;  %4136 = vmatpush.msra.mxu1 %v11637_v48  ;;  %4831 = vmatpush.msrb.mxu3 %v11614_v8 }
 0x3b1   : > { %15438 = vst [vmem:[#allocation91_spill] sm:$0xff] %v11644_v45  ;;  %v11651_v47 = vpop.f32.mrf.mxu2  ;;  %v11653_v34 = vpop.f32.mrf.mxu3 }
 0x3b2   : > { %15439 = vst [vmem:[#allocation92_spill] sm:$0xff] %v11651_v47  ;;  %4137 = vmatpush.msra.mxu1 %v11642_v61  ;;  %4832 = vmatpush.msrb.mxu3 %v11625_v16 }
 0x3b3   : > { %15440 = vst [vmem:[#allocation93_spill] sm:$0xff] %v11653_v34  ;;  %v11661_v44 = vpop.f32.mrf.mxu0  ;;  %3868 = vmatmul.f32.gmra.mxu1 %v3625_v30  ;;  %v3639_v30 = vld [vmem:[%s15147_s3 + $0x408] sm:$0x3] }
 0x3b4   : > { %15441 = vst [vmem:[#allocation94_spill] sm:$0xff] %v11661_v44  ;;  %4138 = vmatpush.msra.mxu1 %v11657_v31  ;;  %4833 = vmatpush.msrb.mxu3 %v11637_v48  ;;  %v15461_v44 = vld [vmem:[#allocation8_spill] sm:$0xff] }
 0x3b6   : > { %3951 = vmatmul.f32.gmra.mxu2 %v3626_v23  ;;  %4139 = vmatpush.msra.mxu1 %v11668_v11 }
 0x3b7   : > { %3785 = vmatmul.f32.gmra.mxu0 %v3624_v59  ;;  %4034 = vmatmul.f32.gmra.mxu3 %v3627_v57  ;;  %v3515_v59 = vld [vmem:[%s15147_s3 + $0x28] sm:$0xff] }
 0x3b8   : > { %v11687_v13 = vpop.f32.mrf.mxu1  ;;  %4140 = vmatpush.msra.mxu1 %v11680_v56  ;;  %4834 = vmatpush.msrb.mxu3 %v11642_v61 }
 0x3b9   : > { %15442 = vst [vmem:[#allocation95_spill] sm:$0xff] %v11687_v13  ;;  %v11694_v9 = vpop.f32.mrf.mxu2 }
 0x3ba   : > { %15443 = vst [vmem:[#allocation96_spill] sm:$0xff] %v11694_v9  ;;  %v11700_v7 = vpop.f32.mrf.mxu3  ;;  %4141 = vmatpush.msra.mxu1 %v11685_v41  ;;  %4835 = vmatpush.msrb.mxu3 %v11657_v31  ;;  %v15459_v9 = vld [vmem:[#allocation58_spill] sm:$0xff] }
 0x3bb   : > { %15444 = vst [vmem:[#allocation97_spill] sm:$0xff] %v11700_v7  ;;  %v11704_v39 = vpop.f32.mrf.mxu0  ;;  %3871 = vmatmul.f32.gmra.mxu1 %v3631_v10 }
 0x3bc   : > { %15445 = vst [vmem:[#allocation98_spill] sm:$0xff] %v11704_v39  ;;  %4142 = vmatpush.msra.mxu1 %v11698_v25  ;;  %4836 = vmatpush.msrb.mxu3 %v11668_v11  ;;  %v3532_v39 = vld [vmem:[%s15147_s3 + $0xb0] sm:$0xff] }
 0x3be   : > { %4658 = vmatpush.msrb.mxu1 %v10857_v62  ;;  %3954 = vmatmul.f32.gmra.mxu2 %v3632_v50  ;;  %v15453_v50 = vld [vmem:[#allocation55_spill] sm:$0xff] }
 0x3bf   : > { %4837 = vmatpush.msrb.mxu3 %v11680_v56  ;;  %3788 = vmatmul.f32.gmra.mxu0 %v3630_v36  ;;  %v8424_v36 = vld [vmem:[%s15147_s3 + $0x420] sm:$0xff] }
 0x3c0   : > { %4037 = vmatmul.f32.gmra.mxu3 %v3633_v3  ;;  %4659 = vmatpush.msrb.mxu1 %v10866_v2  ;;  %v11720_v35 = vpop.f32.mrf.mxu1 }
 0x3c1   : > { %15446 = vst [vmem:[#allocation99_spill] sm:$0xff] %v11720_v35  ;;  %4838 = vmatpush.msrb.mxu3 %v11685_v41  ;;  %v11726_v1 = vpop.f32.mrf.mxu2 }
 0x3c2   : > { %15447 = vst [vmem:[#allocation100_spill] sm:$0xff] %v11726_v1  ;;  %v11728_v6 = vpop.f32.mrf.mxu3  ;;  %4660 = vmatpush.msrb.mxu1 %v10874_v53  ;;  %v15485_v1 = vld [vmem:[#allocation24_spill] sm:$0xff] }
 0x3c3   : > { %15448 = vst [vmem:[#allocation101_spill] sm:$0xff] %v11728_v6  ;;  %4839 = vmatpush.msrb.mxu3 %v11698_v25  ;;  %v11732_v40 = vpop.f32.mrf.mxu0  ;;  %3874 = vmatmul.f32.gmra.mxu1 %v3637_v55  ;;  %v15455_v55 = vld [vmem:[#allocation56_spill] sm:$0xff]  ;;  %v15481_v6 = vld [vmem:[#allocation23_spill] sm:$0xff] }
 0x3c4   : > { %15449 = vst [vmem:[#allocation102_spill] sm:$0xff] %v11732_v40  ;;  %4661 = vmatpush.msrb.mxu1 %v10879_v46  ;;  %v15484_v40 = vld [vmem:[#allocation15_spill] sm:$0xff] }
 0x3c6   : > { %4662 = vmatpush.msrb.mxu1 %v10894_v15  ;;  %3957 = vmatmul.f32.gmra.mxu2 %v3638_v38  ;;  %v3514_v38 = vld [vmem:[%s15147_s3 + $0x20] sm:$0xff] }
 0x3c7   : > { %3791 = vmatmul.f32.gmra.mxu0 %v3636_v26  ;;  %v8425_v26 = vld [vmem:[%s15147_s3 + $0x428] sm:$0xff] }
 0x3c8   : > { %4040 = vmatmul.f32.gmra.mxu3 %v3639_v30  ;;  %4663 = vmatpush.msrb.mxu1 %v10902_v19  ;;  %v11746_v23 = vpop.f32.mrf.mxu1  ;;  %v15456_v30 = vld [vmem:[#allocation57_spill] sm:$0xff] }
 0x3c9   : > { %15450 = vst [vmem:[#allocation103_spill] sm:$0xff] %v11746_v23  ;;  %v11751_v57 = vpop.f32.mrf.mxu2  ;;  %v15474_v23 = vld [vmem:[#allocation12_spill] sm:$0xff] }
 0x3ca   : > { %15451 = vst [vmem:[#allocation104_spill] sm:$0xff] %v11751_v57  ;;  %v11753_v10 = vpop.f32.mrf.mxu3  ;;  %4664 = vmatpush.msrb.mxu1 %v15453_v50 }
 0x3cb   : > { %15452 = vst [vmem:[#allocation105_spill] sm:$0xff] %v11753_v10  ;;  %8402 = vmatmul.msk.f32.vlgmr.msra.gmra.mxu1 %vm3642_vm5, %v3515_v59  ;;  %v11760_v3 = vpop.f32.mrf.mxu0  ;;  %v15457_v59 = vld [vmem:[#allocation7_spill] sm:$0xff] }
 0x3cc   : > { %15454 = vst [vmem:[#allocation106_spill] sm:$0xff] %v11760_v3  ;;  %4665 = vmatpush.msrb.mxu1 %v15455_v55  ;;  %v8436_v3 = vld [vmem:[%s15147_s3 + $0x480] sm:$0xff]  ;;  %v8437_v10 = vld [vmem:[%s15147_s3 + $0x488] sm:$0xff] }
 0x3ce   : > { %4666 = vmatpush.msrb.mxu1 %v15456_v30  ;;  %4425 = vmatmul.f32.vlgmr.msra.gmra.mxu2 %v8424_v36  ;;  %v3521_v36 = vld [vmem:[%s15147_s3 + $0x58] sm:$0xff] }
 0x3cf   : > { %4060 = vmatmul.f32.vlgmr.msra.gmra.mxu0 %v3514_v38  ;;  %5294 = vmatpush.msra.mxu2 %v10484_v43  ;;  %v15463_v38 = vld [vmem:[#allocation59_spill] sm:$0xff] }
 0x3d0   : > { %4508 = vmatmul.f32.vlgmr.msra.gmra.mxu3 %v8425_v26  ;;  %5128 = vmatpush.msra.mxu0 %v15457_v59  ;;  %v11772_v7 = vpop.f32.mrf.mxu1  ;;  %v15464_v26 = vld [vmem:[#allocation9_spill] sm:$0xff] }
 0x3d1   : > { %15458 = vst [vmem:[#allocation7_spill] sm:$0xff] %v11772_v7  ;;  %5377 = vmatpush.msra.mxu3 %v10857_v62  ;;  %4667 = vmatpush.msrb.mxu1 %v15459_v9  ;;  %v11776_v45 = vpop.f32.mrf.mxu2  ;;  %v15471_v7 = vld [vmem:[#allocation11_spill] sm:$0xff] }
 0x3d2   : > { %15460 = vst [vmem:[#allocation107_spill] sm:$0xff] %v11776_v45  ;;  %5129 = vmatpush.msra.mxu0 %v15461_v44  ;;  %5295 = vmatpush.msra.mxu2 %v10495_v42  ;;  %v11780_v34 = vpop.f32.mrf.mxu3  ;;  %v15473_v45 = vld [vmem:[#allocation62_spill] sm:$0xff] }
 0x3d3   : > { %15462 = vst [vmem:[#allocation8_spill] sm:$0xff] %v11780_v34  ;;  %5378 = vmatpush.msra.mxu3 %v10866_v2  ;;  %4668 = vmatpush.msrb.mxu1 %v15463_v38  ;;  %v11789_v47 = vpop.f32.mrf.mxu0 }
 0x3d4   : > { %5130 = vmatpush.msra.mxu0 %v15464_v26  ;;  %5296 = vmatpush.msra.mxu2 %v10502_v49  ;;  %15465 = vst [vmem:[#allocation9_spill] sm:$0xff] %v11789_v47 }
 0x3d5   : > { %5379 = vmatpush.msra.mxu3 %v10874_v53  ;;  %8403 = vmatmul.msk.f32.gmra.mxu1 %vm3642_vm5, %v3521_v36  ;;  %v15468_v36 = vld [vmem:[#allocation61_spill] sm:$0xff] }
 0x3d6   : > { %4669 = vmatpush.msrb.mxu1 %v15466_v28  ;;  %5131 = vmatpush.msra.mxu0 %v15467_v52 }
 0x3d7   : > { %5297 = vmatpush.msra.mxu2 %v10520_v22  ;;  %5380 = vmatpush.msra.mxu3 %v10879_v46  ;;  %v3556_v22 = vld [vmem:[%s15147_s3 + $0x170] sm:$0xff] }
 0x3d8   : > { %4670 = vmatpush.msrb.mxu1 %v15468_v36  ;;  %4063 = vmatmul.f32.gmra.mxu0 %v3520_v24  ;;  %v11807_v4 = vpop.f32.mrf.mxu1 }
 0x3d9   : > { %15469 = vst [vmem:[#allocation10_spill] sm:$0xff] %v11807_v4  ;;  %4428 = vmatmul.f32.gmra.mxu2 %v8430_v12  ;;  %4511 = vmatmul.f32.gmra.mxu3 %v8431_v63  ;;  %v11809_v34 = vpop.f32.mrf.mxu2  ;;  %v3527_v63 = vld [vmem:[%s15147_s3 + $0x88] sm:$0xff]  ;;  %v15477_v4 = vld [vmem:[#allocation13_spill] sm:$0xff] }
 0x3da   : > { %15470 = vst [vmem:[#allocation108_spill] sm:$0xff] %v11809_v34  ;;  %5132 = vmatpush.msra.mxu0 %v15471_v7  ;;  %5298 = vmatpush.msra.mxu2 %v10526_v29  ;;  %v11813_v47 = vpop.f32.mrf.mxu3  ;;  %v15476_v12 = vld [vmem:[#allocation63_spill] sm:$0xff]  ;;  %v15479_v34 = vld [vmem:[#allocation14_spill] sm:$0xff] }
 0x3db   : > { %15472 = vst [vmem:[#allocation11_spill] sm:$0xff] %v11813_v47  ;;  %5381 = vmatpush.msra.mxu3 %v10894_v15  ;;  %4671 = vmatpush.msrb.mxu1 %v15473_v45  ;;  %v11819_v24 = vpop.f32.mrf.mxu0  ;;  %v15478_v47 = vld [vmem:[#allocation64_spill] sm:$0xff] }
 0x3dc   : > { %5133 = vmatpush.msra.mxu0 %v15474_v23  ;;  %5299 = vmatpush.msra.mxu2 %v10534_v17  ;;  %15475 = vst [vmem:[#allocation12_spill] sm:$0xff] %v11819_v24  ;;  %v3526_v24 = vld [vmem:[%s15147_s3 + $0x80] sm:$0xff]  ;;  %v3551_v29 = vld [vmem:[%s15147_s3 + $0x148] sm:$0xff] }
 0x3dd   : > { %5382 = vmatpush.msra.mxu3 %v10902_v19  ;;  %4672 = vmatpush.msrb.mxu1 %v15476_v12  ;;  %v3557_v19 = vld [vmem:[%s15147_s3 + $0x178] sm:$0xff] }
 0x3de   : > { %5134 = vmatpush.msra.mxu0 %v15477_v4  ;;  %5300 = vmatpush.msra.mxu2 %v10538_v51  ;;  %v15518_v51 = vld [vmem:[#allocation33_spill] sm:$0xff] }
 0x3df   : > { %5383 = vmatpush.msra.mxu3 %v15453_v50  ;;  %8404 = vmatmul.msk.f32.gmra.mxu1 %vm3642_vm5, %v3527_v63  ;;  %v15526_v50 = vld [vmem:[#allocation37_spill] sm:$0xff] }
 0x3e0   : > { %4673 = vmatpush.msrb.mxu1 %v15478_v47  ;;  %5135 = vmatpush.msra.mxu0 %v15479_v34  ;;  %v11841_v57 = vpop.f32.mrf.mxu1 }
 0x3e1   : > { %15480 = vst [vmem:[#allocation13_spill] sm:$0xff] %v11841_v57  ;;  %5301 = vmatpush.msra.mxu2 %v10553_v27  ;;  %v11845_v63 = vpop.f32.mrf.mxu2  ;;  %5384 = vmatpush.msra.mxu3 %v15455_v55  ;;  %v15487_v57 = vld [vmem:[#allocation16_spill] sm:$0xff] }
 0x3e2   : > { %5211 = vmatpush.msra.mxu1 %v15481_v6  ;;  %15482 = vst [vmem:[#allocation14_spill] sm:$0xff] %v11845_v63  ;;  %4066 = vmatmul.f32.gmra.mxu0 %v3526_v24  ;;  %v11848_v35 = vpop.f32.mrf.mxu3  ;;  %v15488_v63 = vld [vmem:[#allocation25_spill] sm:$0xff]  ;;  %v15490_v24 = vld [vmem:[#allocation26_spill] sm:$0xff] }
 0x3e3   : > { %15483 = vst [vmem:[#allocation23_spill] sm:$0xff] %v11848_v35  ;;  %4431 = vmatmul.f32.gmra.mxu2 %v8436_v3  ;;  %4514 = vmatmul.f32.gmra.mxu3 %v8437_v10  ;;  %v11852_v13 = vpop.f32.mrf.mxu0  ;;  %v3533_v10 = vld [vmem:[%s15147_s3 + $0xb8] sm:$0xff] }
 0x3e4   : > { %5136 = vmatpush.msra.mxu0 %v15484_v40  ;;  %5212 = vmatpush.msra.mxu1 %v15485_v1  ;;  %15486 = vst [vmem:[#allocation15_spill] sm:$0xff] %v11852_v13  ;;  %v15489_v3 = vld [vmem:[#allocation17_spill] sm:$0xff]  ;;  %v15492_v13 = vld [vmem:[#allocation47_spill] sm:$0xff] }
 0x3e5   : > { %5302 = vmatpush.msra.mxu2 %v15420_v33  ;;  %5385 = vmatpush.msra.mxu3 %v15456_v30  ;;  %v15501_v33 = vld [vmem:[#allocation49_spill] sm:$0xff] }
 0x3e6   : > { %5137 = vmatpush.msra.mxu0 %v15487_v57  ;;  %5213 = vmatpush.msra.mxu1 %v15488_v63 }
 0x3e7   : > { %5303 = vmatpush.msra.mxu2 %v15421_v21  ;;  %5386 = vmatpush.msra.mxu3 %v15459_v9  ;;  %v15497_v21 = vld [vmem:[#allocation48_spill] sm:$0xff]  ;;  %v15503_v9 = vld [vmem:[#allocation29_spill] sm:$0xff] }
 0x3e8   : > { %5138 = vmatpush.msra.mxu0 %v15489_v3  ;;  %5214 = vmatpush.msra.mxu1 %v15490_v24  ;;  %v11865_v35 = vpop.f32.mrf.mxu1 }
 0x3e9   : > { %15491 = vst [vmem:[#allocation24_spill] sm:$0xff] %v11865_v35  ;;  %5304 = vmatpush.msra.mxu2 %v15492_v13  ;;  %5387 = vmatpush.msra.mxu3 %v15463_v38  ;;  %v11872_v32 = vpop.f32.mrf.mxu2  ;;  %v8443_v35 = vld [vmem:[%s15147_s3 + $0x4b8] sm:$0xff]  ;;  %v15496_v13 = vld [vmem:[#allocation27_spill] sm:$0xff]  ;;  %v15500_v38 = vld [vmem:[#allocation28_spill] sm:$0xff] }
 0x3ea   : > { %15493 = vst [vmem:[#allocation16_spill] sm:$0xff] %v11872_v32  ;;  %8405 = vmatmul.msk.f32.gmra.mxu1 %vm3642_vm5, %v3533_v10  ;;  %5139 = vmatpush.msra.mxu0 %v15494_v18  ;;  %v11882_v58 = vpop.f32.mrf.mxu3  ;;  %v15499_v32 = vld [vmem:[#allocation19_spill] sm:$0xff] }
 0x3eb   : > { %15495 = vst [vmem:[#allocation25_spill] sm:$0xff] %v11882_v58  ;;  %5215 = vmatpush.msra.mxu1 %v15496_v13  ;;  %5305 = vmatpush.msra.mxu2 %v15497_v21  ;;  %v11887_v10 = vpop.f32.mrf.mxu0  ;;  %v15502_v58 = vld [vmem:[#allocation20_spill] sm:$0xff] }
 0x3ec   : > { %5388 = vmatpush.msra.mxu3 %v15466_v28  ;;  %4069 = vmatmul.f32.gmra.mxu0 %v3532_v39  ;;  %15498 = vst [vmem:[#allocation17_spill] sm:$0xff] %v11887_v10  ;;  %v15505_v28 = vld [vmem:[#allocation50_spill] sm:$0xff] }
 0x3ed   : > { %4434 = vmatmul.f32.gmra.mxu2 %v8442_v54  ;;  %4517 = vmatmul.f32.gmra.mxu3 %v8443_v35  ;;  %v3539_v54 = vld [vmem:[%s15147_s3 + $0xe8] sm:$0xff]  ;;  %v15507_v35 = vld [vmem:[#allocation21_spill] sm:$0xff]  ;;  %v15508_v10 = vld [vmem:[#allocation30_spill] sm:$0xff] }
 0x3ee   : > { %5140 = vmatpush.msra.mxu0 %v15499_v32  ;;  %5216 = vmatpush.msra.mxu1 %v15500_v38 }
 0x3ef   : > { %5306 = vmatpush.msra.mxu2 %v15501_v33  ;;  %5389 = vmatpush.msra.mxu3 %v15468_v36  ;;  %v15510_v36 = vld [vmem:[#allocation51_spill] sm:$0xff] }
 0x3f0   : > { %5141 = vmatpush.msra.mxu0 %v15502_v58  ;;  %5217 = vmatpush.msra.mxu1 %v15503_v9  ;;  %v11895_v21 = vpop.f32.mrf.mxu1 }
 0x3f1   : > { %15504 = vst [vmem:[#allocation26_spill] sm:$0xff] %v11895_v21  ;;  %5307 = vmatpush.msra.mxu2 %v15505_v28  ;;  %5390 = vmatpush.msra.mxu3 %v15473_v45  ;;  %v11902_v39 = vpop.f32.mrf.mxu2  ;;  %v3538_v21 = vld [vmem:[%s15147_s3 + $0xe0] sm:$0xff] }
 0x3f2   : > { %15506 = vst [vmem:[#allocation18_spill] sm:$0xff] %v11902_v39  ;;  %5142 = vmatpush.msra.mxu0 %v15507_v35  ;;  %5218 = vmatpush.msra.mxu1 %v15508_v10  ;;  %v11906_v33 = vpop.f32.mrf.mxu3  ;;  %v15511_v28 = vld [vmem:[#allocation22_spill] sm:$0xff] }
 0x3f3   : > { %15509 = vst [vmem:[#allocation27_spill] sm:$0xff] %v11906_v33  ;;  %5308 = vmatpush.msra.mxu2 %v15510_v36  ;;  %5391 = vmatpush.msra.mxu3 %v15476_v12  ;;  %v8448_v39 = vld [vmem:[%s15147_s3 + $0x4e0] sm:$0xff]  ;;  %v8449_v33 = vld [vmem:[%s15147_s3 + $0x4e8] sm:$0xff]  ;;  %v11921_v45 = vpop.f32.mrf.mxu0 }
 0x3f4   : > { %8406 = vmatmul.msk.f32.gmra.mxu1 %vm3642_vm5, %v3539_v54  ;;  %5143 = vmatpush.msra.mxu0 %v15511_v28  ;;  %15512 = vst [vmem:[#allocation19_spill] sm:$0xff] %v11921_v45  ;;  %v15513_v36 = vld [vmem:[#allocation31_spill] sm:$0xff]  ;;  %v15514_v12 = vld [vmem:[#allocation52_spill] sm:$0xff]  ;;  %v3545_v45 = vld [vmem:[%s15147_s3 + $0x118] sm:$0xff] }
 0x3f5   : > { %5219 = vmatpush.msra.mxu1 %v15513_v36  ;;  %5309 = vmatpush.msra.mxu2 %v15514_v12  ;;  %v15515_v54 = vld [vmem:[#allocation32_spill] sm:$0xff]  ;;  %v15522_v12 = vld [vmem:[#allocation35_spill] sm:$0xff] }
 0x3f6   : > { %5392 = vmatpush.msra.mxu3 %v15478_v47  ;;  %4072 = vmatmul.f32.gmra.mxu0 %v3538_v21  ;;  %v3544_v21 = vld [vmem:[%s15147_s3 + $0x110] sm:$0xff] }
 0x3f7   : > { %4437 = vmatmul.f32.gmra.mxu2 %v8448_v39  ;;  %4520 = vmatmul.f32.gmra.mxu3 %v8449_v33  ;;  %v15520_v39 = vld [vmem:[#allocation34_spill] sm:$0xff]  ;;  %v8454_v33 = vld [vmem:[%s15147_s3 + $0x510] sm:$0xff] }
 0x3f8   : > { %5220 = vmatpush.msra.mxu1 %v15515_v54  ;;  %v11927_v30 = vpop.f32.mrf.mxu1 }
 0x3f9   : > { %15516 = vst [vmem:[#allocation28_spill] sm:$0xff] %v11927_v30  ;;  %v11929_v27 = vpop.f32.mrf.mxu2  ;;  %v8455_v30 = vld [vmem:[%s15147_s3 + $0x518] sm:$0xff] }
 0x3fa   : > { %15517 = vst [vmem:[#allocation20_spill] sm:$0xff] %v11929_v27  ;;  %5221 = vmatpush.msra.mxu1 %v15518_v51  ;;  %v11935_v55 = vpop.f32.mrf.mxu3 }
 0x3fb   : > { %15519 = vst [vmem:[#allocation29_spill] sm:$0xff] %v11935_v55  ;;  %v11947_v27 = vpop.f32.mrf.mxu0  ;;  %v15523_v55 = vld [vmem:[#allocation36_spill] sm:$0xff] }
 0x3fc   : > { %5222 = vmatpush.msra.mxu1 %v15520_v39  ;;  %15521 = vst [vmem:[#allocation21_spill] sm:$0xff] %v11947_v27 }
 0x3fd   : > { %8407 = vmatmul.msk.f32.gmra.mxu1 %vm3642_vm5, %v3545_v45  ;;  %v3550_v45 = vld [vmem:[%s15147_s3 + $0x140] sm:$0xff] }
 0x3fe   : > { %5223 = vmatpush.msra.mxu1 %v15522_v12  ;;  %4075 = vmatmul.f32.gmra.mxu0 %v3544_v21  ;;  %v15528_v21 = vld [vmem:[#allocation38_spill] sm:$0xff] }
 0x3ff   : > { %4440 = vmatmul.f32.gmra.mxu2 %v8454_v33  ;;  %4523 = vmatmul.f32.gmra.mxu3 %v8455_v30  ;;  %v8460_v30 = vld [vmem:[%s15147_s3 + $0x540] sm:$0xff]  ;;  %v8461_v33 = vld [vmem:[%s15147_s3 + $0x548] sm:$0xff] }
 0x400   : > { %5224 = vmatpush.msra.mxu1 %v15523_v55  ;;  %v11952_v47 = vpop.f32.mrf.mxu1 }
 0x401   : > { %15524 = vst [vmem:[#allocation30_spill] sm:$0xff] %v11952_v47  ;;  %v11954_v17 = vpop.f32.mrf.mxu2 }
 0x402   : > { %15525 = vst [vmem:[#allocation22_spill] sm:$0xff] %v11954_v17  ;;  %5225 = vmatpush.msra.mxu1 %v15526_v50  ;;  %v11960_v27 = vpop.f32.mrf.mxu3 }
 0x403   : > { %15527 = vst [vmem:[#allocation31_spill] sm:$0xff] %v11960_v27  ;;  %v11972_v47 = vpop.f32.mrf.mxu0 }
 0x404   : > { %5226 = vmatpush.msra.mxu1 %v15528_v21  ;;  %15529 = vst [vmem:[#allocation32_spill] sm:$0xff] %v11972_v47  ;;  %v3562_v47 = vld [vmem:[%s15147_s3 + $0x1a0] sm:$0xff] }
 0x405   : > { %8408 = vmatmul.msk.f32.gmra.mxu1 %vm3642_vm5, %v3551_v29  ;;  %v8466_v29 = vld [vmem:[%s15147_s3 + $0x570] sm:$0xff] }
 0x406   : > { %4078 = vmatmul.f32.gmra.mxu0 %v3550_v45  ;;  %v8467_v45 = vld [vmem:[%s15147_s3 + $0x578] sm:$0xff] }
 0x407   : > { %4443 = vmatmul.f32.gmra.mxu2 %v8460_v30  ;;  %4526 = vmatmul.f32.gmra.mxu3 %v8461_v33 }
 0x408   : > { %v11975_v27 = vpop.f32.mrf.mxu1 }
 0x409   : > { %15530 = vst [vmem:[#allocation33_spill] sm:$0xff] %v11975_v27  ;;  %v11977_v17 = vpop.f32.mrf.mxu2 }
 0x40a   : > { %15531 = vst [vmem:[#allocation34_spill] sm:$0xff] %v11977_v17  ;;  %v11982_v15 = vpop.f32.mrf.mxu3 }
 0x40b   : > { %15532 = vst [vmem:[#allocation35_spill] sm:$0xff] %v11982_v15  ;;  %v11993_v30 = vpop.f32.mrf.mxu0  ;;  %v3563_v15 = vld [vmem:[%s15147_s3 + $0x1a8] sm:$0xff] }
 0x40c   : > { %15533 = vst [vmem:[#allocation36_spill] sm:$0xff] %v11993_v30  ;;  %v3568_v30 = vld [vmem:[%s15147_s3 + $0x1d0] sm:$0xff] }
 0x40d   : > { %8409 = vmatmul.msk.f32.gmra.mxu1 %vm3642_vm5, %v3557_v19  ;;  %v8473_v19 = vld [vmem:[%s15147_s3 + $0x5a8] sm:$0xff] }
 0x40e   : > { %4081 = vmatmul.f32.gmra.mxu0 %v3556_v22  ;;  %v8472_v22 = vld [vmem:[%s15147_s3 + $0x5a0] sm:$0xff] }
 0x40f   : > { %4446 = vmatmul.f32.gmra.mxu2 %v8466_v29  ;;  %4529 = vmatmul.f32.gmra.mxu3 %v8467_v45 }
 0x410   : > { %v11996_v33 = vpop.f32.mrf.mxu1 }
 0x411   : > { %15534 = vst [vmem:[#allocation37_spill] sm:$0xff] %v11996_v33  ;;  %v11998_v27 = vpop.f32.mrf.mxu2  ;;  %v3569_v33 = vld [vmem:[%s15147_s3 + $0x1d8] sm:$0xff] }
 0x412   : > { %15535 = vst [vmem:[#allocation38_spill] sm:$0xff] %v11998_v27  ;;  %v12003_v17 = vpop.f32.mrf.mxu3 }
 0x413   : > { %15536 = vst [vmem:[#allocation109_spill] sm:$0xff] %v12003_v17  ;;  %v12014_v29 = vpop.f32.mrf.mxu0 }
 0x414   : > { %15537 = vst [vmem:[#allocation110_spill] sm:$0xff] %v12014_v29  ;;  %v3574_v29 = vld [vmem:[%s15147_s3 + $0x200] sm:$0xff] }
 0x415   : > { %8410 = vmatmul.msk.f32.gmra.mxu1 %vm3642_vm5, %v3563_v15  ;;  %v8478_v15 = vld [vmem:[%s15147_s3 + $0x5d0] sm:$0xff] }
 0x416   : > { %4084 = vmatmul.f32.gmra.mxu0 %v3562_v47  ;;  %v8479_v47 = vld [vmem:[%s15147_s3 + $0x5d8] sm:$0xff] }
 0x417   : > { %4449 = vmatmul.f32.gmra.mxu2 %v8472_v22  ;;  %4532 = vmatmul.f32.gmra.mxu3 %v8473_v19 }
 0x418   : > { %v12017_v45 = vpop.f32.mrf.mxu1 }
 0x419   : > { %15538 = vst [vmem:[#allocation111_spill] sm:$0xff] %v12017_v45  ;;  %v12019_v17 = vpop.f32.mrf.mxu2 }
 0x41a   : > { %15539 = vst [vmem:[#allocation112_spill] sm:$0xff] %v12019_v17  ;;  %v12024_v27 = vpop.f32.mrf.mxu3 }
 0x41b   : > { %15540 = vst [vmem:[#allocation113_spill] sm:$0xff] %v12024_v27  ;;  %v12035_v22 = vpop.f32.mrf.mxu0  ;;  %v3575_v27 = vld [vmem:[%s15147_s3 + $0x208] sm:$0xff] }
 0x41c   : > { %15541 = vst [vmem:[#allocation114_spill] sm:$0xff] %v12035_v22  ;;  %v3580_v22 = vld [vmem:[%s15147_s3 + $0x230] sm:$0xff] }
 0x41d   : > { %8411 = vmatmul.msk.f32.gmra.mxu1 %vm3642_vm5, %v3569_v33  ;;  %v8485_v33 = vld [vmem:[%s15147_s3 + $0x608] sm:$0xff] }
 0x41e   : > { %4087 = vmatmul.f32.gmra.mxu0 %v3568_v30  ;;  %v8484_v30 = vld [vmem:[%s15147_s3 + $0x600] sm:$0xff] }
 0x41f   : > { %4452 = vmatmul.f32.gmra.mxu2 %v8478_v15  ;;  %4535 = vmatmul.f32.gmra.mxu3 %v8479_v47 }
 0x420   : > { %v12038_v19 = vpop.f32.mrf.mxu1 }
 0x421   : > { %15542 = vst [vmem:[#allocation115_spill] sm:$0xff] %v12038_v19  ;;  %v12040_v45 = vpop.f32.mrf.mxu2  ;;  %v3581_v19 = vld [vmem:[%s15147_s3 + $0x238] sm:$0xff] }
 0x422   : > { %15543 = vst [vmem:[#allocation116_spill] sm:$0xff] %v12040_v45  ;;  %v12045_v17 = vpop.f32.mrf.mxu3 }
 0x423   : > { %15544 = vst [vmem:[#allocation117_spill] sm:$0xff] %v12045_v17 }
 0x424   : > { %v12056_v15 = vpop.f32.mrf.mxu0 }
 0x425   : > { %15545 = vst [vmem:[#allocation118_spill] sm:$0xff] %v12056_v15  ;;  %8412 = vmatmul.msk.f32.gmra.mxu1 %vm3642_vm5, %v3575_v27  ;;  %v8490_v27 = vld [vmem:[%s15147_s3 + $0x630] sm:$0xff]  ;;  %v3586_v15 = vld [vmem:[%s15147_s3 + $0x260] sm:$0xff] }
 0x426   : > { %4090 = vmatmul.f32.gmra.mxu0 %v3574_v29  ;;  %v8491_v29 = vld [vmem:[%s15147_s3 + $0x638] sm:$0xff] }
 0x427   : > { %4455 = vmatmul.f32.gmra.mxu2 %v8484_v30  ;;  %4538 = vmatmul.f32.gmra.mxu3 %v8485_v33 }
 0x428   : > { %v12059_v47 = vpop.f32.mrf.mxu1 }
 0x429   : > { %15546 = vst [vmem:[#allocation119_spill] sm:$0xff] %v12059_v47  ;;  %v12061_v17 = vpop.f32.mrf.mxu2 }
 0x42a   : > { %15547 = vst [vmem:[#allocation120_spill] sm:$0xff] %v12061_v17  ;;  %v12066_v45 = vpop.f32.mrf.mxu3 }
 0x42b   : > { %15548 = vst [vmem:[#allocation121_spill] sm:$0xff] %v12066_v45  ;;  %v3587_v45 = vld [vmem:[%s15147_s3 + $0x268] sm:$0xff] }
 0x42c   : > { %v12077_v30 = vpop.f32.mrf.mxu0 }
 0x42d   : > { %15549 = vst [vmem:[#allocation122_spill] sm:$0xff] %v12077_v30  ;;  %8413 = vmatmul.msk.f32.gmra.mxu1 %vm3642_vm5, %v3581_v19  ;;  %v8497_v19 = vld [vmem:[%s15147_s3 + $0x668] sm:$0xff]  ;;  %v3592_v30 = vld [vmem:[%s15147_s3 + $0x290] sm:$0xff] }
 0x42e   : > { %4093 = vmatmul.f32.gmra.mxu0 %v3580_v22  ;;  %v8496_v22 = vld [vmem:[%s15147_s3 + $0x660] sm:$0xff] }
 0x42f   : > { %4458 = vmatmul.f32.gmra.mxu2 %v8490_v27  ;;  %4541 = vmatmul.f32.gmra.mxu3 %v8491_v29 }
 0x430   : > { %v12080_v33 = vpop.f32.mrf.mxu1 }
 0x431   : > { %15550 = vst [vmem:[#allocation123_spill] sm:$0xff] %v12080_v33  ;;  %v12082_v47 = vpop.f32.mrf.mxu2  ;;  %v3593_v33 = vld [vmem:[%s15147_s3 + $0x298] sm:$0xff] }
 0x432   : > { %15551 = vst [vmem:[#allocation124_spill] sm:$0xff] %v12082_v47  ;;  %v12087_v17 = vpop.f32.mrf.mxu3 }
 0x433   : > { %15552 = vst [vmem:[#allocation125_spill] sm:$0xff] %v12087_v17 }
 0x434   : > { %v12098_v27 = vpop.f32.mrf.mxu0 }
 0x435   : > { %15553 = vst [vmem:[#allocation126_spill] sm:$0xff] %v12098_v27  ;;  %8414 = vmatmul.msk.f32.gmra.mxu1 %vm3642_vm5, %v3587_v45  ;;  %v8502_v45 = vld [vmem:[%s15147_s3 + $0x690] sm:$0xff]  ;;  %v3598_v27 = vld [vmem:[%s15147_s3 + $0x2c0] sm:$0xff] }
 0x436   : > { %4096 = vmatmul.f32.gmra.mxu0 %v3586_v15  ;;  %v8503_v15 = vld [vmem:[%s15147_s3 + $0x698] sm:$0xff] }
 0x437   : > { %4461 = vmatmul.f32.gmra.mxu2 %v8496_v22  ;;  %4544 = vmatmul.f32.gmra.mxu3 %v8497_v19 }
 0x438   : > { %v12101_v29 = vpop.f32.mrf.mxu1 }
 0x439   : > { %15554 = vst [vmem:[#allocation127_spill] sm:$0xff] %v12101_v29  ;;  %v12103_v17 = vpop.f32.mrf.mxu2 }
 0x43a   : > { %15555 = vst [vmem:[#allocation128_spill] sm:$0xff] %v12103_v17  ;;  %v12108_v47 = vpop.f32.mrf.mxu3 }
 0x43b   : > { %15556 = vst [vmem:[#allocation129_spill] sm:$0xff] %v12108_v47  ;;  %v3599_v47 = vld [vmem:[%s15147_s3 + $0x2c8] sm:$0xff] }
 0x43c   : > { %v12119_v22 = vpop.f32.mrf.mxu0 }
 0x43d   : > { %15557 = vst [vmem:[#allocation130_spill] sm:$0xff] %v12119_v22  ;;  %8415 = vmatmul.msk.f32.gmra.mxu1 %vm3642_vm5, %v3593_v33  ;;  %v8509_v33 = vld [vmem:[%s15147_s3 + $0x6c8] sm:$0xff]  ;;  %v3604_v22 = vld [vmem:[%s15147_s3 + $0x2f0] sm:$0xff] }
 0x43e   : > { %4099 = vmatmul.f32.gmra.mxu0 %v3592_v30  ;;  %v8508_v30 = vld [vmem:[%s15147_s3 + $0x6c0] sm:$0xff] }
 0x43f   : > { %4464 = vmatmul.f32.gmra.mxu2 %v8502_v45  ;;  %4547 = vmatmul.f32.gmra.mxu3 %v8503_v15 }
 0x440   : > { %v12122_v19 = vpop.f32.mrf.mxu1 }
 0x441   : > { %15558 = vst [vmem:[#allocation131_spill] sm:$0xff] %v12122_v19  ;;  %v12124_v29 = vpop.f32.mrf.mxu2 }
 0x442   : > { %15559 = vst [vmem:[#allocation132_spill] sm:$0xff] %v12124_v29 }
 0x443   : > { %v12129_v17 = vpop.f32.mrf.mxu3 }
 0x444   : > { %15560 = vst [vmem:[#allocation133_spill] sm:$0xff] %v12129_v17  ;;  %v12140_v45 = vpop.f32.mrf.mxu0  ;;  %v3605_v17 = vld [vmem:[%s15147_s3 + $0x2f8] sm:$0xff] }
 0x445   : > { %15561 = vst [vmem:[#allocation134_spill] sm:$0xff] %v12140_v45  ;;  %8416 = vmatmul.msk.f32.gmra.mxu1 %vm3642_vm5, %v3599_v47  ;;  %v8514_v47 = vld [vmem:[%s15147_s3 + $0x6f0] sm:$0xff] }
 0x446   : > { %4102 = vmatmul.f32.gmra.mxu0 %v3598_v27  ;;  %v8515_v27 = vld [vmem:[%s15147_s3 + $0x6f8] sm:$0xff] }
 0x447   : > { %4467 = vmatmul.f32.gmra.mxu2 %v8508_v30  ;;  %4550 = vmatmul.f32.gmra.mxu3 %v8509_v33  ;;  %v3611_v33 = vld [vmem:[%s15147_s3 + $0x328] sm:$0xff] }
 0x448   : > { %v12143_v15 = vpop.f32.mrf.mxu1 }
 0x449   : > { %15562 = vst [vmem:[#allocation135_spill] sm:$0xff] %v12143_v15  ;;  %v12145_v19 = vpop.f32.mrf.mxu2 }
 0x44a   : > { %15563 = vst [vmem:[#allocation136_spill] sm:$0xff] %v12145_v19  ;;  %v3610_v19 = vld [vmem:[%s15147_s3 + $0x320] sm:$0xff] }
 0x44b   : > { %v12150_v29 = vpop.f32.mrf.mxu3 }
 0x44c   : > { %15564 = vst [vmem:[#allocation137_spill] sm:$0xff] %v12150_v29  ;;  %v12161_v30 = vpop.f32.mrf.mxu0 }
 0x44d   : > { %15565 = vst [vmem:[#allocation138_spill] sm:$0xff] %v12161_v30  ;;  %8417 = vmatmul.msk.f32.gmra.mxu1 %vm3642_vm5, %v3605_v17  ;;  %v8520_v17 = vld [vmem:[%s15147_s3 + $0x720] sm:$0xff]  ;;  %v8526_v30 = vld [vmem:[%s15147_s3 + $0x750] sm:$0xff] }
 0x44e   : > { %4105 = vmatmul.f32.gmra.mxu0 %v3604_v22  ;;  %v8521_v22 = vld [vmem:[%s15147_s3 + $0x728] sm:$0xff] }
 0x44f   : > { %4470 = vmatmul.f32.gmra.mxu2 %v8514_v47  ;;  %4553 = vmatmul.f32.gmra.mxu3 %v8515_v27  ;;  %v3617_v27 = vld [vmem:[%s15147_s3 + $0x358] sm:$0xff] }
 0x451   : > { %v12167_v29 = vpop.f32.mrf.mxu2 }
 0x452   : > { %15566 = vst [vmem:[#allocation139_spill] sm:$0xff] %v12167_v29  ;;  %v12172_v45 = vpop.f32.mrf.mxu1  ;;  %v3622_v29 = vld [vmem:[%s15147_s3 + $0x380] sm:$0xff] }
 0x453   : > { %15567 = vst [vmem:[#allocation140_spill] sm:$0xff] %v12172_v45  ;;  %v12174_v15 = vpop.f32.mrf.mxu3  ;;  %v3616_v45 = vld [vmem:[%s15147_s3 + $0x350] sm:$0xff] }
 0x454   : > { %15568 = vst [vmem:[#allocation141_spill] sm:$0xff] %v12174_v15  ;;  %v3623_v15 = vld [vmem:[%s15147_s3 + $0x388] sm:$0xff] }
 0x455   : > { %8418 = vmatmul.msk.f32.gmra.mxu1 %vm3642_vm5, %v3611_v33  ;;  %v12183_v47 = vpop.f32.mrf.mxu0  ;;  %v8527_v33 = vld [vmem:[%s15147_s3 + $0x758] sm:$0xff] }
 0x456   : > { %15569 = vst [vmem:[#allocation142_spill] sm:$0xff] %v12183_v47  ;;  %4108 = vmatmul.f32.gmra.mxu0 %v3610_v19 }
 0x457   : > { %4473 = vmatmul.f32.gmra.mxu2 %v8520_v17  ;;  %4556 = vmatmul.f32.gmra.mxu3 %v8521_v22 }
 0x45c   : > { %v12197_v47 = vpop.f32.mrf.mxu2  ;;  %v12200_v19 = vpop.f32.mrf.mxu1 }
 0x45d   : > { %15570 = vst [vmem:[#allocation143_spill] sm:$0xff] %v12197_v47  ;;  %8419 = vmatmul.msk.f32.gmra.mxu1 %vm3642_vm5, %v3617_v27  ;;  %v12202_v17 = vpop.f32.mrf.mxu3  ;;  %v8532_v27 = vld [vmem:[%s15147_s3 + $0x780] sm:$0xff]  ;;  %v3628_v47 = vld [vmem:[%s15147_s3 + $0x3b0] sm:$0xff] }
 0x45e   : > { %15571 = vst [vmem:[#allocation144_spill] sm:$0xff] %v12200_v19  ;;  %4111 = vmatmul.f32.gmra.mxu0 %v3616_v45  ;;  %v8533_v45 = vld [vmem:[%s15147_s3 + $0x788] sm:$0xff] }
 0x45f   : > { %15572 = vst [vmem:[#allocation145_spill] sm:$0xff] %v12202_v17  ;;  %4476 = vmatmul.f32.gmra.mxu2 %v8526_v30  ;;  %4559 = vmatmul.f32.gmra.mxu3 %v8527_v33  ;;  %v12204_v22 = vpop.f32.mrf.mxu0  ;;  %v3629_v17 = vld [vmem:[%s15147_s3 + $0x3b8] sm:$0xff] }
 0x460   : > { %15573 = vst [vmem:[#allocation146_spill] sm:$0xff] %v12204_v22 }
 0x465   : > { %8420 = vmatmul.msk.f32.gmra.mxu1 %vm3642_vm5, %v3623_v15  ;;  %v8539_v15 = vld [vmem:[%s15147_s3 + $0x7b8] sm:$0xff] }
 0x466   : > { %4114 = vmatmul.f32.gmra.mxu0 %v3622_v29  ;;  %v12219_v30 = vpop.f32.mrf.mxu2  ;;  %v12223_v19 = vpop.f32.mrf.mxu3  ;;  %v8538_v29 = vld [vmem:[%s15147_s3 + $0x7b0] sm:$0xff] }
 0x467   : > { %15574 = vst [vmem:[#allocation147_spill] sm:$0xff] %v12219_v30  ;;  %4479 = vmatmul.f32.gmra.mxu2 %v8532_v27  ;;  %4562 = vmatmul.f32.gmra.mxu3 %v8533_v45  ;;  %v12221_v33 = vpop.f32.mrf.mxu1  ;;  %v3634_v30 = vld [vmem:[%s15147_s3 + $0x3e0] sm:$0xff] }
 0x468   : > { %15575 = vst [vmem:[#allocation148_spill] sm:$0xff] %v12221_v33 }
 0x469   : > { %15576 = vst [vmem:[#allocation149_spill] sm:$0xff] %v12223_v19  ;;  %v12225_v22 = vpop.f32.mrf.mxu0 }
 0x46a   : > { %15577 = vst [vmem:[#allocation150_spill] sm:$0xff] %v12225_v22  ;;  %v3635_v22 = vld [vmem:[%s15147_s3 + $0x3e8] sm:$0xff] }
 0x46d   : > { %8421 = vmatmul.msk.f32.gmra.mxu1 %vm3642_vm5, %v3629_v17  ;;  %v8545_v17 = vld [vmem:[%s15147_s3 + $0x7e8] sm:$0xff] }
 0x46e   : > { %4117 = vmatmul.f32.gmra.mxu0 %v3628_v47  ;;  %v8544_v47 = vld [vmem:[%s15147_s3 + $0x7e0] sm:$0xff] }
 0x46f   : > { %4482 = vmatmul.f32.gmra.mxu2 %v8538_v29  ;;  %4565 = vmatmul.f32.gmra.mxu3 %v8539_v15 }
 0x470   : > { %v12240_v27 = vpop.f32.mrf.mxu2  ;;  %v12244_v33 = vpop.f32.mrf.mxu3 }
 0x471   : > { %15578 = vst [vmem:[#allocation151_spill] sm:$0xff] %v12240_v27  ;;  %v12242_v45 = vpop.f32.mrf.mxu1 }
 0x472   : > { %15579 = vst [vmem:[#allocation152_spill] sm:$0xff] %v12242_v45 }
 0x473   : > { %15580 = vst [vmem:[#allocation153_spill] sm:$0xff] %v12244_v33  ;;  %v12249_v19 = vpop.f32.mrf.mxu0  ;;  %v3641_v33 = vld [vmem:[%s15147_s3 + $0x418] sm:$0x3] }
 0x474   : > { %15581 = vst [vmem:[#allocation154_spill] sm:$0xff] %v12249_v19  ;;  %v3640_v19 = vld [vmem:[%s15147_s3 + $0x410] sm:$0x3] }
 0x475   : > { %8422 = vmatmul.msk.f32.gmra.mxu1 %vm3642_vm5, %v3635_v22  ;;  %v8550_v22 = vld [vmem:[%s15147_s3 + $0x810] sm:$0x3] }
 0x476   : > { %4120 = vmatmul.f32.gmra.mxu0 %v3634_v30  ;;  %v8551_v30 = vld [vmem:[%s15147_s3 + $0x818] sm:$0x3] }
 0x477   : > { %4485 = vmatmul.f32.gmra.mxu2 %v8544_v47  ;;  %4568 = vmatmul.f32.gmra.mxu3 %v8545_v17 }
 0x47a   : > { %v12261_v29 = vpop.f32.mrf.mxu1  ;;  %v4438_v15 = vpop.f32.mrf.mxu2 }
 0x47b   : > { %15582 = vst [vmem:[#allocation155_spill] sm:$0xff] %v12261_v29  ;;  %v4521_v27 = vpop.f32.mrf.mxu3  ;;  %v12266_v45 = vpop.f32.mrf.mxu0 }
 0x47c   : > { %15583 = vst [vmem:[#allocation156_spill] sm:$0xff] %v12266_v45  ;;  %v12271_v49 = vadd.f32 %v4521_v27, %v4438_v15  ;;  %v8427_v27 = vld [vmem:[%s15147_s3 + $0x438] sm:$0xff]  ;;  %v8426_v45 = vld [vmem:[%s15147_s3 + $0x430] sm:$0xff] }
 0x47d   : > { %8423 = vmatmul.msk.f32.gmra.mxu1 %vm3642_vm5, %v3641_v33  ;;  %v8429_v33 = vld [vmem:[%s15147_s3 + $0x448] sm:$0xff] }
 0x47e   : > { %15584 = vst [vmem:[#allocation157_spill] sm:$0xff] %v12271_v49  ;;  %4123 = vmatmul.f32.gmra.mxu0 %v3640_v19  ;;  %v8428_v19 = vld [vmem:[%s15147_s3 + $0x440] sm:$0xff] }
 0x47f   : > { %4488 = vmatmul.f32.gmra.mxu2 %v8550_v22  ;;  %4571 = vmatmul.f32.gmra.mxu3 %v8551_v30  ;;  %v15585_v22 = vld [vmem:[#allocation65_spill] sm:$0xff] }
 0x482   : > { %v12280_v47 = vpop.f32.mrf.mxu1  ;;  %v4441_v17 = vpop.f32.mrf.mxu2 }
 0x483   : > { %v4524_v15 = vpop.f32.mrf.mxu3  ;;  %v12285_v29 = vpop.f32.mrf.mxu0 }
 0x484   : > { %v12290_v49 = vadd.f32 %v4524_v15, %v4441_v17  ;;  %v15586_v17 = vld [vmem:[#allocation66_spill] sm:$0xff] }
 0x485   : > { %4674 = vmatmul.f32.vlgmr.msrb.gmra.mxu1 %v8427_v27  ;;  %v8433_v27 = vld [vmem:[%s15147_s3 + $0x468] sm:$0xff] }
 0x486   : > { %4591 = vmatmul.f32.vlgmr.msrb.gmra.mxu0 %v8426_v45  ;;  %8711 = vmatpush.msk.msrb.mxu1 %vm1847_vm3, %v11551_v14 }
 0x487   : > { %4757 = vmatmul.f32.vlgmr.msrb.gmra.mxu2 %v8428_v19  ;;  %8557 = vmatmul.msk.f32.vlgmr.msrb.gmra.mxu3 %vm3642_vm5, %v8429_v33  ;;  %v8435_v33 = vld [vmem:[%s15147_s3 + $0x478] sm:$0xff] }
 0x488   : > { %5460 = vmatpush.msrb.mxu0 %v15585_v22  ;;  %5847 = vmatpush.msrb.mxu2 %v15457_v59  ;;  %v15587_v59 = vld [vmem:[#allocation67_spill] sm:$0xff] }
 0x489   : > { %5930 = vmatpush.msrb.mxu3 %v15481_v6  ;;  %5545 = vmatpush.msrb.mxu1 %v11555_v0 }
 0x48a   : > { %v12305_v30 = vpop.f32.mrf.mxu1  ;;  %5461 = vmatpush.msrb.mxu0 %v15586_v17  ;;  %5848 = vmatpush.msrb.mxu2 %v15461_v44  ;;  %v4444_v45 = vpop.f32.mrf.mxu2  ;;  %v8432_v44 = vld [vmem:[%s15147_s3 + $0x460] sm:$0xff] }
 0x48b   : > { %5931 = vmatpush.msrb.mxu3 %v15485_v1  ;;  %v4527_v15 = vpop.f32.mrf.mxu3  ;;  %v12313_v19 = vpop.f32.mrf.mxu0  ;;  %5546 = vmatpush.msrb.mxu1 %v11573_v20  ;;  %v8434_v1 = vld [vmem:[%s15147_s3 + $0x470] sm:$0xff] }
 0x48c   : > { %v12316_v6 = vadd.f32 %v4527_v15, %v4444_v45  ;;  %5462 = vmatpush.msrb.mxu0 %v15587_v59  ;;  %5849 = vmatpush.msrb.mxu2 %v15464_v26  ;;  %v15588_v45 = vld [vmem:[#allocation68_spill] sm:$0xff]  ;;  %v15589_v26 = vld [vmem:[#allocation69_spill] sm:$0xff]  ;;  %v15591_v15 = vld [vmem:[#allocation70_spill] sm:$0xff] }
 0x48d   : > { %5932 = vmatpush.msrb.mxu3 %v15488_v63  ;;  %4677 = vmatmul.f32.gmra.mxu1 %v8433_v27 }
 0x48e   : > { %5463 = vmatpush.msrb.mxu0 %v15588_v45  ;;  %5850 = vmatpush.msrb.mxu2 %v15467_v52 }
 0x48f   : > { %5933 = vmatpush.msrb.mxu3 %v15490_v24  ;;  %4594 = vmatmul.f32.gmra.mxu0 %v8432_v44  ;;  %v8439_v44 = vld [vmem:[%s15147_s3 + $0x498] sm:$0xff] }
 0x490   : > { %4760 = vmatmul.f32.gmra.mxu2 %v8434_v1  ;;  %8558 = vmatmul.msk.f32.gmra.mxu3 %vm3642_vm5, %v8435_v33  ;;  %v8440_v1 = vld [vmem:[%s15147_s3 + $0x4a0] sm:$0xff]  ;;  %v15594_v33 = vld [vmem:[#allocation72_spill] sm:$0xff] }
 0x491   : > { %5464 = vmatpush.msrb.mxu0 %v15589_v26  ;;  %5851 = vmatpush.msrb.mxu2 %v15471_v7 }
 0x492   : > { %5934 = vmatpush.msrb.mxu3 %v15496_v13  ;;  %v12337_v63 = vpop.f32.mrf.mxu1  ;;  %v4447_v27 = vpop.f32.mrf.mxu2  ;;  %5547 = vmatpush.msrb.mxu1 %v11584_v5  ;;  %v15593_v13 = vld [vmem:[#allocation71_spill] sm:$0xff] }
 0x493   : > { %15590 = vst [vmem:[#allocation65_spill] sm:$0xff] %v12337_v63  ;;  %5465 = vmatpush.msrb.mxu0 %v15591_v15  ;;  %5852 = vmatpush.msrb.mxu2 %v15474_v23  ;;  %v4530_v52 = vpop.f32.mrf.mxu3  ;;  %v12342_v24 = vpop.f32.mrf.mxu0  ;;  %v8438_v23 = vld [vmem:[%s15147_s3 + $0x490] sm:$0xff] }
 0x494   : > { %15592 = vst [vmem:[#allocation66_spill] sm:$0xff] %v12342_v24  ;;  %5935 = vmatpush.msrb.mxu3 %v15500_v38  ;;  %v12348_v7 = vadd.f32 %v4530_v52, %v4447_v27  ;;  %5548 = vmatpush.msrb.mxu1 %v11596_v37  ;;  %v8441_v38 = vld [vmem:[%s15147_s3 + $0x4a8] sm:$0xff]  ;;  %v8579_v24 = vld [vmem:[%s15147_s3 + $0x840] sm:$0xff] }
 0x495   : > { %5466 = vmatpush.msrb.mxu0 %v15593_v13  ;;  %5853 = vmatpush.msrb.mxu2 %v15477_v4  ;;  %v15595_v4 = vld [vmem:[#allocation73_spill] sm:$0xff] }
 0x496   : > { %5936 = vmatpush.msrb.mxu3 %v15503_v9  ;;  %4680 = vmatmul.f32.gmra.mxu1 %v8439_v44 }
 0x497   : > { %5467 = vmatpush.msrb.mxu0 %v15594_v33  ;;  %5854 = vmatpush.msrb.mxu2 %v15479_v34  ;;  %v15598_v34 = vld [vmem:[#allocation74_spill] sm:$0xff] }
 0x498   : > { %5937 = vmatpush.msrb.mxu3 %v15508_v10  ;;  %4597 = vmatmul.f32.gmra.mxu0 %v8438_v23  ;;  %v8444_v23 = vld [vmem:[%s15147_s3 + $0x4c0] sm:$0xff] }
 0x499   : > { %4763 = vmatmul.f32.gmra.mxu2 %v8440_v1  ;;  %8559 = vmatmul.msk.f32.gmra.mxu3 %vm3642_vm5, %v8441_v38  ;;  %v15600_v1 = vld [vmem:[#allocation76_spill] sm:$0xff]  ;;  %v15602_v38 = vld [vmem:[#allocation77_spill] sm:$0xff] }
 0x49a   : > { %5468 = vmatpush.msrb.mxu0 %v15595_v4  ;;  %5855 = vmatpush.msrb.mxu2 %v15484_v40  ;;  %v12369_v9 = vpop.f32.mrf.mxu1  ;;  %v4450_v27 = vpop.f32.mrf.mxu2  ;;  %v8445_v40 = vld [vmem:[%s15147_s3 + $0x4c8] sm:$0xff] }
 0x49b   : > { %15596 = vst [vmem:[#allocation67_spill] sm:$0xff] %v12369_v9  ;;  %5938 = vmatpush.msrb.mxu3 %v15513_v36  ;;  %v4533_v52 = vpop.f32.mrf.mxu3  ;;  %v12372_v44 = vpop.f32.mrf.mxu0  ;;  %5549 = vmatpush.msrb.mxu1 %v11600_v60  ;;  %v15599_v36 = vld [vmem:[#allocation75_spill] sm:$0xff] }
 0x49c   : > { %15597 = vst [vmem:[#allocation68_spill] sm:$0xff] %v12372_v44  ;;  %5469 = vmatpush.msrb.mxu0 %v15598_v34  ;;  %5856 = vmatpush.msrb.mxu2 %v15487_v57  ;;  %v12377_v10 = vadd.f32 %v4533_v52, %v4450_v27  ;;  %v8446_v57 = vld [vmem:[%s15147_s3 + $0x4d0] sm:$0xff]  ;;  %v8580_v44 = vld [vmem:[%s15147_s3 + $0x848] sm:$0xff] }
 0x49d   : > { %5939 = vmatpush.msrb.mxu3 %v15515_v54  ;;  %5550 = vmatpush.msrb.mxu1 %v11614_v8  ;;  %v8447_v54 = vld [vmem:[%s15147_s3 + $0x4d8] sm:$0xff] }
 0x49e   : > { %5470 = vmatpush.msrb.mxu0 %v15599_v36  ;;  %5857 = vmatpush.msrb.mxu2 %v15489_v3 }
 0x49f   : > { %5940 = vmatpush.msrb.mxu3 %v15518_v51  ;;  %4683 = vmatmul.f32.gmra.mxu1 %v8445_v40 }
 0x4a0   : > { %5471 = vmatpush.msrb.mxu0 %v15600_v1  ;;  %5858 = vmatpush.msrb.mxu2 %v15494_v18  ;;  %v15605_v18 = vld [vmem:[#allocation78_spill] sm:$0xff] }
 0x4a1   : > { %5941 = vmatpush.msrb.mxu3 %v15520_v39  ;;  %4600 = vmatmul.f32.gmra.mxu0 %v8444_v23  ;;  %v8451_v39 = vld [vmem:[%s15147_s3 + $0x4f8] sm:$0xff]  ;;  %v15607_v23 = vld [vmem:[#allocation80_spill] sm:$0xff] }
 0x4a2   : > { %4766 = vmatmul.f32.gmra.mxu2 %v8446_v57  ;;  %8560 = vmatmul.msk.f32.gmra.mxu3 %vm3642_vm5, %v8447_v54  ;;  %v12400_v51 = vpop.f32.mrf.mxu1  ;;  %v4453_v3 = vpop.f32.mrf.mxu2 }
 0x4a3   : > { %15601 = vst [vmem:[#allocation69_spill] sm:$0xff] %v12400_v51  ;;  %5472 = vmatpush.msrb.mxu0 %v15602_v38  ;;  %5859 = vmatpush.msrb.mxu2 %v15499_v32  ;;  %v4536_v27 = vpop.f32.mrf.mxu3  ;;  %v12404_v52 = vpop.f32.mrf.mxu0  ;;  %v15606_v32 = vld [vmem:[#allocation79_spill] sm:$0xff] }
 0x4a4   : > { %15603 = vst [vmem:[#allocation70_spill] sm:$0xff] %v12404_v52  ;;  %5942 = vmatpush.msrb.mxu3 %v15522_v12  ;;  %v12407_v40 = vadd.f32 %v4536_v27, %v4453_v3  ;;  %5551 = vmatpush.msrb.mxu1 %v11625_v16  ;;  %v8450_v12 = vld [vmem:[%s15147_s3 + $0x4f0] sm:$0xff]  ;;  %v8528_v51 = vld [vmem:[%s15147_s3 + $0x760] sm:$0xff] }
 0x4a5   : > { %5473 = vmatpush.msrb.mxu0 %v15605_v18  ;;  %5860 = vmatpush.msrb.mxu2 %v15502_v58  ;;  %v8452_v58 = vld [vmem:[%s15147_s3 + $0x500] sm:$0xff]  ;;  %v8458_v27 = vld [vmem:[%s15147_s3 + $0x530] sm:$0xff] }
 0x4a6   : > { %15604 = vst [vmem:[#allocation71_spill] sm:$0xff] %v12407_v40  ;;  %5943 = vmatpush.msrb.mxu3 %v15523_v55  ;;  %5552 = vmatpush.msrb.mxu1 %v11637_v48  ;;  %v8453_v55 = vld [vmem:[%s15147_s3 + $0x508] sm:$0xff]  ;;  %v8534_v52 = vld [vmem:[%s15147_s3 + $0x790] sm:$0xff] }
 0x4a7   : > { %5474 = vmatpush.msrb.mxu0 %v15606_v32  ;;  %5861 = vmatpush.msrb.mxu2 %v15507_v35 }
 0x4a8   : > { %5944 = vmatpush.msrb.mxu3 %v15526_v50  ;;  %4686 = vmatmul.f32.gmra.mxu1 %v8451_v39  ;;  %v8459_v39 = vld [vmem:[%s15147_s3 + $0x538] sm:$0xff] }
 0x4a9   : > { %5475 = vmatpush.msrb.mxu0 %v15607_v23  ;;  %5862 = vmatpush.msrb.mxu2 %v15511_v28  ;;  %v8457_v28 = vld [vmem:[%s15147_s3 + $0x528] sm:$0xff] }
 0x4aa   : > { %5945 = vmatpush.msrb.mxu3 %v15528_v21  ;;  %4603 = vmatmul.f32.gmra.mxu0 %v8450_v12  ;;  %v12432_v35 = vpop.f32.mrf.mxu1  ;;  %v4456_v57 = vpop.f32.mrf.mxu2  ;;  %v8456_v21 = vld [vmem:[%s15147_s3 + $0x520] sm:$0xff] }
 0x4ab   : > { %15608 = vst [vmem:[#allocation72_spill] sm:$0xff] %v12432_v35  ;;  %4769 = vmatmul.f32.gmra.mxu2 %v8452_v58  ;;  %8561 = vmatmul.msk.f32.gmra.mxu3 %vm3642_vm5, %v8453_v55  ;;  %v4539_v50 = vpop.f32.mrf.mxu3  ;;  %v12435_v54 = vpop.f32.mrf.mxu0  ;;  %v8469_v35 = vld [vmem:[%s15147_s3 + $0x588] sm:$0xff] }
 0x4ac   : > { %15609 = vst [vmem:[#allocation73_spill] sm:$0xff] %v12435_v54  ;;  %v12437_v3 = vadd.f32 %v4539_v50, %v4456_v57  ;;  %5553 = vmatpush.msrb.mxu1 %v11642_v61  ;;  %v8468_v54 = vld [vmem:[%s15147_s3 + $0x580] sm:$0xff] }
 0x4ae   : > { %15610 = vst [vmem:[#allocation74_spill] sm:$0xff] %v12437_v3  ;;  %5554 = vmatpush.msrb.mxu1 %v11657_v31  ;;  %v8552_v3 = vld [vmem:[%s15147_s3 + $0x820] sm:$0x3] }
 0x4b0   : > { %4689 = vmatmul.f32.gmra.mxu1 %v8457_v28  ;;  %v8463_v28 = vld [vmem:[%s15147_s3 + $0x558] sm:$0xff] }
 0x4b1   : > { %5555 = vmatpush.msrb.mxu1 %v11668_v11 }
 0x4b2   : > { %4606 = vmatmul.f32.gmra.mxu0 %v8456_v21  ;;  %v12454_v12 = vpop.f32.mrf.mxu1  ;;  %v4459_v58 = vpop.f32.mrf.mxu2  ;;  %v8462_v21 = vld [vmem:[%s15147_s3 + $0x550] sm:$0xff] }
 0x4b3   : > { %15611 = vst [vmem:[#allocation75_spill] sm:$0xff] %v12454_v12  ;;  %4772 = vmatmul.f32.gmra.mxu2 %v8458_v27  ;;  %8562 = vmatmul.msk.f32.gmra.mxu3 %vm3642_vm5, %v8459_v39  ;;  %v4542_v55 = vpop.f32.mrf.mxu3  ;;  %v12457_v57 = vpop.f32.mrf.mxu0  ;;  %v8464_v27 = vld [vmem:[%s15147_s3 + $0x560] sm:$0xff]  ;;  %v8465_v39 = vld [vmem:[%s15147_s3 + $0x568] sm:$0xff] }
 0x4b4   : > { %15612 = vst [vmem:[#allocation76_spill] sm:$0xff] %v12457_v57  ;;  %v12459_v50 = vadd.f32 %v4542_v55, %v4459_v58  ;;  %5556 = vmatpush.msrb.mxu1 %v11680_v56 }
 0x4b6   : > { %15613 = vst [vmem:[#allocation77_spill] sm:$0xff] %v12459_v50  ;;  %5557 = vmatpush.msrb.mxu1 %v11685_v41 }
 0x4b8   : > { %4692 = vmatmul.f32.gmra.mxu1 %v8463_v28 }
 0x4b9   : > { %5558 = vmatpush.msrb.mxu1 %v11698_v25 }
 0x4ba   : > { %4609 = vmatmul.f32.gmra.mxu0 %v8462_v21  ;;  %v12476_v58 = vpop.f32.mrf.mxu1  ;;  %v4462_v55 = vpop.f32.mrf.mxu2  ;;  %v8470_v21 = vld [vmem:[%s15147_s3 + $0x590] sm:$0xff] }
 0x4bb   : > { %15614 = vst [vmem:[#allocation78_spill] sm:$0xff] %v12476_v58  ;;  %4775 = vmatmul.f32.gmra.mxu2 %v8464_v27  ;;  %8563 = vmatmul.msk.f32.gmra.mxu3 %vm3642_vm5, %v8465_v39  ;;  %v4545_v12 = vpop.f32.mrf.mxu3  ;;  %v12479_v57 = vpop.f32.mrf.mxu0  ;;  %v8471_v27 = vld [vmem:[%s15147_s3 + $0x598] sm:$0xff] }
 0x4bc   : > { %15615 = vst [vmem:[#allocation79_spill] sm:$0xff] %v12479_v57  ;;  %v12481_v28 = vadd.f32 %v4545_v12, %v4462_v55 }
 0x4be   : > { %15616 = vst [vmem:[#allocation80_spill] sm:$0xff] %v12481_v28  ;;  %v8474_v28 = vld [vmem:[%s15147_s3 + $0x5b0] sm:$0xff] }
 0x4c0   : > { %4695 = vmatmul.f32.gmra.mxu1 %v8469_v35  ;;  %v8475_v35 = vld [vmem:[%s15147_s3 + $0x5b8] sm:$0xff] }
 0x4c2   : > { %4612 = vmatmul.f32.gmra.mxu0 %v8468_v54  ;;  %v12495_v12 = vpop.f32.mrf.mxu1  ;;  %v4465_v39 = vpop.f32.mrf.mxu2  ;;  %v8476_v54 = vld [vmem:[%s15147_s3 + $0x5c0] sm:$0xff] }
 0x4c3   : > { %15617 = vst [vmem:[#allocation158_spill] sm:$0xff] %v12495_v12  ;;  %4778 = vmatmul.f32.gmra.mxu2 %v8470_v21  ;;  %8564 = vmatmul.msk.f32.gmra.mxu3 %vm3642_vm5, %v8471_v27  ;;  %v4548_v55 = vpop.f32.mrf.mxu3  ;;  %v12498_v58 = vpop.f32.mrf.mxu0  ;;  %v8477_v21 = vld [vmem:[%s15147_s3 + $0x5c8] sm:$0xff] }
 0x4c4   : > { %15618 = vst [vmem:[#allocation159_spill] sm:$0xff] %v12498_v58  ;;  %v12500_v57 = vadd.f32 %v4548_v55, %v4465_v39 }
 0x4c6   : > { %15619 = vst [vmem:[#allocation160_spill] sm:$0xff] %v12500_v57  ;;  %v8480_v57 = vld [vmem:[%s15147_s3 + $0x5e0] sm:$0xff] }
 0x4c8   : > { %4698 = vmatmul.f32.gmra.mxu1 %v8475_v35  ;;  %v8481_v35 = vld [vmem:[%s15147_s3 + $0x5e8] sm:$0xff] }
 0x4ca   : > { %4615 = vmatmul.f32.gmra.mxu0 %v8474_v28  ;;  %v12514_v27 = vpop.f32.mrf.mxu1  ;;  %v4468_v39 = vpop.f32.mrf.mxu2  ;;  %v8482_v28 = vld [vmem:[%s15147_s3 + $0x5f0] sm:$0xff] }
 0x4cb   : > { %15620 = vst [vmem:[#allocation161_spill] sm:$0xff] %v12514_v27  ;;  %4781 = vmatmul.f32.gmra.mxu2 %v8476_v54  ;;  %8565 = vmatmul.msk.f32.gmra.mxu3 %vm3642_vm5, %v8477_v21  ;;  %v4551_v55 = vpop.f32.mrf.mxu3  ;;  %v12517_v12 = vpop.f32.mrf.mxu0  ;;  %v8483_v54 = vld [vmem:[%s15147_s3 + $0x5f8] sm:$0xff] }
 0x4cc   : > { %15621 = vst [vmem:[#allocation162_spill] sm:$0xff] %v12517_v12  ;;  %v12519_v58 = vadd.f32 %v4551_v55, %v4468_v39 }
 0x4ce   : > { %15622 = vst [vmem:[#allocation163_spill] sm:$0xff] %v12519_v58  ;;  %v8486_v58 = vld [vmem:[%s15147_s3 + $0x610] sm:$0xff] }
 0x4d0   : > { %4701 = vmatmul.f32.gmra.mxu1 %v8481_v35  ;;  %v8487_v35 = vld [vmem:[%s15147_s3 + $0x618] sm:$0xff] }
 0x4d2   : > { %4618 = vmatmul.f32.gmra.mxu0 %v8480_v57  ;;  %v12533_v21 = vpop.f32.mrf.mxu1  ;;  %v4471_v39 = vpop.f32.mrf.mxu2  ;;  %v8488_v57 = vld [vmem:[%s15147_s3 + $0x620] sm:$0xff] }
 0x4d3   : > { %15623 = vst [vmem:[#allocation164_spill] sm:$0xff] %v12533_v21  ;;  %4784 = vmatmul.f32.gmra.mxu2 %v8482_v28  ;;  %8566 = vmatmul.msk.f32.gmra.mxu3 %vm3642_vm5, %v8483_v54  ;;  %v4554_v55 = vpop.f32.mrf.mxu3  ;;  %v12536_v27 = vpop.f32.mrf.mxu0  ;;  %v8489_v28 = vld [vmem:[%s15147_s3 + $0x628] sm:$0xff] }
 0x4d4   : > { %15624 = vst [vmem:[#allocation165_spill] sm:$0xff] %v12536_v27  ;;  %v12538_v12 = vadd.f32 %v4554_v55, %v4471_v39 }
 0x4d6   : > { %15625 = vst [vmem:[#allocation166_spill] sm:$0xff] %v12538_v12  ;;  %v8492_v12 = vld [vmem:[%s15147_s3 + $0x640] sm:$0xff] }
 0x4d8   : > { %4704 = vmatmul.f32.gmra.mxu1 %v8487_v35  ;;  %v8493_v35 = vld [vmem:[%s15147_s3 + $0x648] sm:$0xff] }
 0x4da   : > { %4621 = vmatmul.f32.gmra.mxu0 %v8486_v58  ;;  %v12552_v54 = vpop.f32.mrf.mxu1  ;;  %v4474_v39 = vpop.f32.mrf.mxu2  ;;  %v8494_v58 = vld [vmem:[%s15147_s3 + $0x650] sm:$0xff] }
 0x4db   : > { %15626 = vst [vmem:[#allocation167_spill] sm:$0xff] %v12552_v54  ;;  %4787 = vmatmul.f32.gmra.mxu2 %v8488_v57  ;;  %8567 = vmatmul.msk.f32.gmra.mxu3 %vm3642_vm5, %v8489_v28  ;;  %v4557_v55 = vpop.f32.mrf.mxu3  ;;  %v12555_v21 = vpop.f32.mrf.mxu0  ;;  %v8495_v57 = vld [vmem:[%s15147_s3 + $0x658] sm:$0xff] }
 0x4dc   : > { %15627 = vst [vmem:[#allocation168_spill] sm:$0xff] %v12555_v21  ;;  %v12557_v27 = vadd.f32 %v4557_v55, %v4474_v39 }
 0x4de   : > { %15628 = vst [vmem:[#allocation169_spill] sm:$0xff] %v12557_v27  ;;  %v8498_v27 = vld [vmem:[%s15147_s3 + $0x670] sm:$0xff] }
 0x4e0   : > { %4707 = vmatmul.f32.gmra.mxu1 %v8493_v35  ;;  %v8499_v35 = vld [vmem:[%s15147_s3 + $0x678] sm:$0xff] }
 0x4e2   : > { %4624 = vmatmul.f32.gmra.mxu0 %v8492_v12  ;;  %v12571_v28 = vpop.f32.mrf.mxu1  ;;  %v4477_v39 = vpop.f32.mrf.mxu2  ;;  %v8500_v12 = vld [vmem:[%s15147_s3 + $0x680] sm:$0xff] }
 0x4e3   : > { %15629 = vst [vmem:[#allocation170_spill] sm:$0xff] %v12571_v28  ;;  %4790 = vmatmul.f32.gmra.mxu2 %v8494_v58  ;;  %8568 = vmatmul.msk.f32.gmra.mxu3 %vm3642_vm5, %v8495_v57  ;;  %v4560_v55 = vpop.f32.mrf.mxu3  ;;  %v12574_v54 = vpop.f32.mrf.mxu0  ;;  %v8501_v58 = vld [vmem:[%s15147_s3 + $0x688] sm:$0xff] }
 0x4e4   : > { %15630 = vst [vmem:[#allocation171_spill] sm:$0xff] %v12574_v54  ;;  %v12576_v21 = vadd.f32 %v4560_v55, %v4477_v39 }
 0x4e6   : > { %15631 = vst [vmem:[#allocation172_spill] sm:$0xff] %v12576_v21  ;;  %v8504_v21 = vld [vmem:[%s15147_s3 + $0x6a0] sm:$0xff] }
 0x4e8   : > { %4710 = vmatmul.f32.gmra.mxu1 %v8499_v35  ;;  %v8505_v35 = vld [vmem:[%s15147_s3 + $0x6a8] sm:$0xff] }
 0x4ea   : > { %4627 = vmatmul.f32.gmra.mxu0 %v8498_v27  ;;  %v12590_v57 = vpop.f32.mrf.mxu1  ;;  %v4480_v39 = vpop.f32.mrf.mxu2  ;;  %v8506_v27 = vld [vmem:[%s15147_s3 + $0x6b0] sm:$0xff] }
 0x4eb   : > { %15632 = vst [vmem:[#allocation173_spill] sm:$0xff] %v12590_v57  ;;  %4793 = vmatmul.f32.gmra.mxu2 %v8500_v12  ;;  %8569 = vmatmul.msk.f32.gmra.mxu3 %vm3642_vm5, %v8501_v58  ;;  %v4563_v55 = vpop.f32.mrf.mxu3  ;;  %v12593_v28 = vpop.f32.mrf.mxu0  ;;  %v8507_v12 = vld [vmem:[%s15147_s3 + $0x6b8] sm:$0xff] }
 0x4ec   : > { %15633 = vst [vmem:[#allocation174_spill] sm:$0xff] %v12593_v28  ;;  %v12595_v54 = vadd.f32 %v4563_v55, %v4480_v39 }
 0x4ee   : > { %15634 = vst [vmem:[#allocation175_spill] sm:$0xff] %v12595_v54  ;;  %v8510_v54 = vld [vmem:[%s15147_s3 + $0x6d0] sm:$0xff] }
 0x4f0   : > { %4713 = vmatmul.f32.gmra.mxu1 %v8505_v35  ;;  %v8511_v35 = vld [vmem:[%s15147_s3 + $0x6d8] sm:$0xff] }
 0x4f2   : > { %4630 = vmatmul.f32.gmra.mxu0 %v8504_v21  ;;  %v12609_v58 = vpop.f32.mrf.mxu1  ;;  %v4483_v39 = vpop.f32.mrf.mxu2  ;;  %v8512_v21 = vld [vmem:[%s15147_s3 + $0x6e0] sm:$0xff] }
 0x4f3   : > { %15635 = vst [vmem:[#allocation176_spill] sm:$0xff] %v12609_v58  ;;  %4796 = vmatmul.f32.gmra.mxu2 %v8506_v27  ;;  %8570 = vmatmul.msk.f32.gmra.mxu3 %vm3642_vm5, %v8507_v12  ;;  %v4566_v55 = vpop.f32.mrf.mxu3  ;;  %v12612_v57 = vpop.f32.mrf.mxu0  ;;  %v8513_v27 = vld [vmem:[%s15147_s3 + $0x6e8] sm:$0xff] }
 0x4f4   : > { %15636 = vst [vmem:[#allocation177_spill] sm:$0xff] %v12612_v57  ;;  %v12614_v28 = vadd.f32 %v4566_v55, %v4483_v39 }
 0x4f6   : > { %15637 = vst [vmem:[#allocation178_spill] sm:$0xff] %v12614_v28  ;;  %v8516_v28 = vld [vmem:[%s15147_s3 + $0x700] sm:$0xff] }
 0x4f8   : > { %4716 = vmatmul.f32.gmra.mxu1 %v8511_v35  ;;  %v8517_v35 = vld [vmem:[%s15147_s3 + $0x708] sm:$0xff] }
 0x4fa   : > { %4633 = vmatmul.f32.gmra.mxu0 %v8510_v54  ;;  %v12628_v12 = vpop.f32.mrf.mxu1  ;;  %v4486_v39 = vpop.f32.mrf.mxu2  ;;  %v8518_v54 = vld [vmem:[%s15147_s3 + $0x710] sm:$0xff] }
 0x4fb   : > { %15638 = vst [vmem:[#allocation179_spill] sm:$0xff] %v12628_v12  ;;  %4799 = vmatmul.f32.gmra.mxu2 %v8512_v21  ;;  %8571 = vmatmul.msk.f32.gmra.mxu3 %vm3642_vm5, %v8513_v27  ;;  %v4569_v55 = vpop.f32.mrf.mxu3  ;;  %v12631_v58 = vpop.f32.mrf.mxu0  ;;  %v8519_v21 = vld [vmem:[%s15147_s3 + $0x718] sm:$0xff] }
 0x4fc   : > { %15639 = vst [vmem:[#allocation180_spill] sm:$0xff] %v12631_v58  ;;  %v12633_v57 = vadd.f32 %v4569_v55, %v4486_v39  ;;  %v8522_v58 = vld [vmem:[%s15147_s3 + $0x730] sm:$0xff] }
 0x4fe   : > { %15640 = vst [vmem:[#allocation181_spill] sm:$0xff] %v12633_v57 }
 0x500   : > { %4719 = vmatmul.f32.gmra.mxu1 %v8517_v35  ;;  %v8523_v35 = vld [vmem:[%s15147_s3 + $0x738] sm:$0xff] }
 0x502   : > { %4636 = vmatmul.f32.gmra.mxu0 %v8516_v28  ;;  %v12647_v27 = vpop.f32.mrf.mxu1  ;;  %v12649_v39 = vpop.f32.mrf.mxu2  ;;  %v8524_v28 = vld [vmem:[%s15147_s3 + $0x740] sm:$0xff] }
 0x503   : > { %15641 = vst [vmem:[#allocation182_spill] sm:$0xff] %v12649_v39  ;;  %4802 = vmatmul.f32.gmra.mxu2 %v8518_v54  ;;  %8572 = vmatmul.msk.f32.gmra.mxu3 %vm3642_vm5, %v8519_v21  ;;  %v12652_v55 = vpop.f32.mrf.mxu3  ;;  %v12654_v12 = vpop.f32.mrf.mxu0  ;;  %v8525_v54 = vld [vmem:[%s15147_s3 + $0x748] sm:$0xff] }
 0x504   : > { %15642 = vst [vmem:[#allocation183_spill] sm:$0xff] %v12652_v55 }
 0x508   : > { %4722 = vmatmul.f32.gmra.mxu1 %v8523_v35  ;;  %v8529_v35 = vld [vmem:[%s15147_s3 + $0x768] sm:$0xff] }
 0x50a   : > { %4639 = vmatmul.f32.gmra.mxu0 %v8522_v58  ;;  %v12668_v21 = vpop.f32.mrf.mxu1  ;;  %v12670_v55 = vpop.f32.mrf.mxu2  ;;  %v8530_v58 = vld [vmem:[%s15147_s3 + $0x770] sm:$0xff] }
 0x50b   : > { %15643 = vst [vmem:[#allocation184_spill] sm:$0xff] %v12668_v21  ;;  %4805 = vmatmul.f32.gmra.mxu2 %v8524_v28  ;;  %8573 = vmatmul.msk.f32.gmra.mxu3 %vm3642_vm5, %v8525_v54  ;;  %v12673_v39 = vpop.f32.mrf.mxu3  ;;  %v8531_v28 = vld [vmem:[%s15147_s3 + $0x778] sm:$0xff] }
 0x50c   : > { %v12675_v57 = vpop.f32.mrf.mxu0 }
 0x50d   : > { %15644 = vst [vmem:[#allocation185_spill] sm:$0xff] %v12675_v57 }
 0x510   : > { %4725 = vmatmul.f32.gmra.mxu1 %v8529_v35  ;;  %v8535_v35 = vld [vmem:[%s15147_s3 + $0x798] sm:$0xff] }
 0x512   : > { %4642 = vmatmul.f32.gmra.mxu0 %v8528_v51  ;;  %v8536_v51 = vld [vmem:[%s15147_s3 + $0x7a0] sm:$0xff] }
 0x513   : > { %4808 = vmatmul.f32.gmra.mxu2 %v8530_v58  ;;  %8574 = vmatmul.msk.f32.gmra.mxu3 %vm3642_vm5, %v8531_v28  ;;  %v12690_v54 = vpop.f32.mrf.mxu1  ;;  %v12692_v21 = vpop.f32.mrf.mxu2  ;;  %v8537_v58 = vld [vmem:[%s15147_s3 + $0x7a8] sm:$0xff] }
 0x514   : > { %15645 = vst [vmem:[#allocation186_spill] sm:$0xff] %v12690_v54  ;;  %v12694_v57 = vpop.f32.mrf.mxu3 }
 0x515   : > { %15646 = vst [vmem:[#allocation187_spill] sm:$0xff] %v12692_v21  ;;  %v12696_v50 = vpop.f32.mrf.mxu0  ;;  %v8540_v21 = vld [vmem:[%s15147_s3 + $0x7c0] sm:$0xff] }
 0x516   : > { %15647 = vst [vmem:[#allocation188_spill] sm:$0xff] %v12694_v57 }
 0x517   : > { %15648 = vst [vmem:[#allocation189_spill] sm:$0xff] %v12696_v50 }
 0x518   : > { %4728 = vmatmul.f32.gmra.mxu1 %v8535_v35  ;;  %v8541_v35 = vld [vmem:[%s15147_s3 + $0x7c8] sm:$0xff] }
 0x51a   : > { %4645 = vmatmul.f32.gmra.mxu0 %v8534_v52  ;;  %v8542_v52 = vld [vmem:[%s15147_s3 + $0x7d0] sm:$0xff] }
 0x51b   : > { %4811 = vmatmul.f32.gmra.mxu2 %v8536_v51  ;;  %8575 = vmatmul.msk.f32.gmra.mxu3 %vm3642_vm5, %v8537_v58  ;;  %v8543_v51 = vld [vmem:[%s15147_s3 + $0x7d8] sm:$0xff] }
 0x51c   : > { %v12711_v28 = vpop.f32.mrf.mxu1  ;;  %v12713_v54 = vpop.f32.mrf.mxu2 }
 0x51d   : > { %15649 = vst [vmem:[#allocation190_spill] sm:$0xff] %v12711_v28  ;;  %v12715_v57 = vpop.f32.mrf.mxu3 }
 0x51e   : > { %15650 = vst [vmem:[#allocation191_spill] sm:$0xff] %v12713_v54  ;;  %v12720_v50 = vpop.f32.mrf.mxu0  ;;  %v8546_v54 = vld [vmem:[%s15147_s3 + $0x7f0] sm:$0xff] }
 0x51f   : > { %15651 = vst [vmem:[#allocation192_spill] sm:$0xff] %v12715_v57 }
 0x520   : > { %15652 = vst [vmem:[#allocation193_spill] sm:$0xff] %v12720_v50  ;;  %4731 = vmatmul.f32.gmra.mxu1 %v8541_v35  ;;  %v8547_v35 = vld [vmem:[%s15147_s3 + $0x7f8] sm:$0xff] }
 0x522   : > { %4648 = vmatmul.f32.gmra.mxu0 %v8540_v21  ;;  %v8548_v21 = vld [vmem:[%s15147_s3 + $0x800] sm:$0xff] }
 0x523   : > { %4814 = vmatmul.f32.gmra.mxu2 %v8542_v52  ;;  %8576 = vmatmul.msk.f32.gmra.mxu3 %vm3642_vm5, %v8543_v51  ;;  %v8549_v52 = vld [vmem:[%s15147_s3 + $0x808] sm:$0xff] }
 0x525   : > { %v12732_v58 = vpop.f32.mrf.mxu1  ;;  %v12734_v28 = vpop.f32.mrf.mxu2 }
 0x526   : > { %15653 = vst [vmem:[#allocation194_spill] sm:$0xff] %v12734_v28  ;;  %v12739_v57 = vpop.f32.mrf.mxu3 }
 0x527   : > { %15654 = vst [vmem:[#allocation195_spill] sm:$0xff] %v12739_v57  ;;  %v12741_v50 = vpop.f32.mrf.mxu0  ;;  %v8553_v57 = vld [vmem:[%s15147_s3 + $0x828] sm:$0x3] }
 0x528   : > { %4734 = vmatmul.f32.gmra.mxu1 %v8547_v35 }
 0x52a   : > { %4651 = vmatmul.f32.gmra.mxu0 %v8546_v54  ;;  %v8554_v54 = vld [vmem:[%s15147_s3 + $0x830] sm:$0x3] }
 0x52b   : > { %4817 = vmatmul.f32.gmra.mxu2 %v8548_v21  ;;  %8577 = vmatmul.msk.f32.gmra.mxu3 %vm3642_vm5, %v8549_v52  ;;  %v8555_v21 = vld [vmem:[%s15147_s3 + $0x838] sm:$0x3] }
 0x52d   : > { %v12753_v51 = vpop.f32.mrf.mxu1 }
 0x52e   : > { %v12758_v28 = vpop.f32.mrf.mxu2  ;;  %v12760_v35 = vpop.f32.mrf.mxu3 }
 0x52f   : > { %v12762_v9 = vpop.f32.mrf.mxu0 }
 0x530   : > { %4737 = vmatmul.f32.gmra.mxu1 %v8553_v57 }
 0x532   : > { %4654 = vmatmul.f32.gmra.mxu0 %v8552_v3  ;;  %v8581_v3 = vld [vmem:[%s15147_s3 + $0x850] sm:$0xff] }
 0x533   : > { %4820 = vmatmul.f32.gmra.mxu2 %v8554_v54  ;;  %8578 = vmatmul.msk.f32.gmra.mxu3 %vm3642_vm5, %v8555_v21  ;;  %v8582_v54 = vld [vmem:[%s15147_s3 + $0x858] sm:$0xff] }
 0x535   : > { %v12774_v52 = vpop.f32.mrf.mxu1 }
 0x536   : > { %v12779_v63 = vpop.f32.mrf.mxu2  ;;  %v12781_v57 = vpop.f32.mrf.mxu3 }
 0x537   : > { %v12783_v40 = vpop.f32.mrf.mxu0 }
 0x538   : > { %5227 = vmatmul.f32.vlgmr.msra.gmra.mxu1 %v8580_v44 }
 0x539   : > { %6096 = vmatpush.msra.mxu1 %v10857_v62 }
 0x53a   : > { %5144 = vmatmul.f32.vlgmr.msra.gmra.mxu0 %v8579_v24 }
 0x53b   : > { %6097 = vmatpush.msra.mxu1 %v10866_v2  ;;  %5310 = vmatmul.f32.vlgmr.msra.gmra.mxu2 %v8581_v3  ;;  %v8586_v2 = vld [vmem:[%s15147_s3 + $0x878] sm:$0xff] }
 0x53c   : > { %5393 = vmatmul.f32.vlgmr.msra.gmra.mxu3 %v8582_v54  ;;  %6013 = vmatpush.msra.mxu0 %v10484_v43  ;;  %v15661_v54 = vld [vmem:[#allocation42_spill] sm:$0xff] }
 0x53d   : > { %6179 = vmatpush.msra.mxu2 %v15585_v22  ;;  %8866 = vmatpush.msk.msra.mxu3 %vm1847_vm3, %v11551_v14  ;;  %v12800_v44 = vpop.f32.mrf.mxu1  ;;  %v15655_v14 = vld [vmem:[#allocation39_spill] sm:$0xff]  ;;  %v15657_v22 = vld [vmem:[#allocation53_spill] sm:$0xff] }
 0x53e   : > { %6098 = vmatpush.msra.mxu1 %v10874_v53  ;;  %6014 = vmatpush.msra.mxu0 %v10495_v42  ;;  %v12804_v62 = vpop.f32.mrf.mxu2  ;;  %v12806_v24 = vpop.f32.mrf.mxu3  ;;  %v8585_v42 = vld [vmem:[%s15147_s3 + $0x870] sm:$0xff] }
 0x53f   : > { %6180 = vmatpush.msra.mxu2 %v15586_v17  ;;  %6264 = vmatpush.msra.mxu3 %v11555_v0  ;;  %v12810_v43 = vpop.f32.mrf.mxu0  ;;  %v15656_v53 = vld [vmem:[#allocation40_spill] sm:$0xff]  ;;  %v8587_v0 = vld [vmem:[%s15147_s3 + $0x880] sm:$0xff] }
 0x540   : > { %6099 = vmatpush.msra.mxu1 %v10879_v46  ;;  %6015 = vmatpush.msra.mxu0 %v15655_v14  ;;  %v8588_v46 = vld [vmem:[%s15147_s3 + $0x888] sm:$0xff] }
 0x541   : > { %6181 = vmatpush.msra.mxu2 %v15587_v59  ;;  %6265 = vmatpush.msra.mxu3 %v11573_v20  ;;  %v15658_v20 = vld [vmem:[#allocation54_spill] sm:$0xff]  ;;  %v15659_v59 = vld [vmem:[#allocation41_spill] sm:$0xff]  ;;  %v15662_v14 = vld [vmem:[#allocation56_spill] sm:$0xff] }
 0x542   : > { %5230 = vmatmul.f32.gmra.mxu1 %v8586_v2  ;;  %6016 = vmatpush.msra.mxu0 %v15656_v53  ;;  %v8592_v2 = vld [vmem:[%s15147_s3 + $0x8a8] sm:$0xff] }
 0x543   : > { %6100 = vmatpush.msra.mxu1 %v15657_v22  ;;  %6182 = vmatpush.msra.mxu2 %v15588_v45  ;;  %v15668_v22 = vld [vmem:[#allocation58_spill] sm:$0xff] }
 0x544   : > { %6266 = vmatpush.msra.mxu3 %v11584_v5  ;;  %5147 = vmatmul.f32.gmra.mxu0 %v8585_v42  ;;  %v15660_v5 = vld [vmem:[#allocation55_spill] sm:$0xff] }
 0x545   : > { %6101 = vmatpush.msra.mxu1 %v15658_v20  ;;  %5313 = vmatmul.f32.gmra.mxu2 %v8587_v0  ;;  %v12833_v17 = vpop.f32.mrf.mxu1  ;;  %v15663_v42 = vld [vmem:[#allocation43_spill] sm:$0xff] }
 0x546   : > { %5396 = vmatmul.f32.gmra.mxu3 %v8588_v46  ;;  %6017 = vmatpush.msra.mxu0 %v15659_v59  ;;  %v12836_v21 = vpop.f32.mrf.mxu2  ;;  %v12838_v3 = vpop.f32.mrf.mxu3  ;;  %v15671_v20 = vld [vmem:[#allocation59_spill] sm:$0xff]  ;;  %v8598_v59 = vld [vmem:[%s15147_s3 + $0x8d8] sm:$0xff] }
 0x547   : > { %6183 = vmatpush.msra.mxu2 %v15589_v26  ;;  %6267 = vmatpush.msra.mxu3 %v11596_v37  ;;  %v12842_v45 = vpop.f32.mrf.mxu0  ;;  %v8591_v37 = vld [vmem:[%s15147_s3 + $0x8a0] sm:$0xff]  ;;  %v15664_v26 = vld [vmem:[#allocation44_spill] sm:$0xff] }
 0x548   : > { %6102 = vmatpush.msra.mxu1 %v15660_v5  ;;  %6018 = vmatpush.msra.mxu0 %v15661_v54  ;;  %v15673_v5 = vld [vmem:[#allocation60_spill] sm:$0xff]  ;;  %v15674_v54 = vld [vmem:[#allocation47_spill] sm:$0xff] }
 0x549   : > { %6184 = vmatpush.msra.mxu2 %v15591_v15  ;;  %6268 = vmatpush.msra.mxu3 %v11600_v60  ;;  %v8593_v60 = vld [vmem:[%s15147_s3 + $0x8b0] sm:$0xff] }
 0x54a   : > { %6103 = vmatpush.msra.mxu1 %v15662_v14  ;;  %6019 = vmatpush.msra.mxu0 %v15663_v42  ;;  %v15665_v15 = vld [vmem:[#allocation57_spill] sm:$0xff] }
 0x54b   : > { %6185 = vmatpush.msra.mxu2 %v15593_v13  ;;  %6269 = vmatpush.msra.mxu3 %v11614_v8  ;;  %v8594_v13 = vld [vmem:[%s15147_s3 + $0x8b8] sm:$0xff] }
 0x54c   : > { %5233 = vmatmul.f32.gmra.mxu1 %v8592_v2  ;;  %6020 = vmatpush.msra.mxu0 %v15664_v26  ;;  %v15682_v26 = vld [vmem:[#allocation49_spill] sm:$0xff] }
 0x54d   : > { %6104 = vmatpush.msra.mxu1 %v15665_v15  ;;  %6186 = vmatpush.msra.mxu2 %v15594_v33  ;;  %v12867_v8 = vpop.f32.mrf.mxu1  ;;  %v15670_v33 = vld [vmem:[#allocation45_spill] sm:$0xff] }
 0x54e   : > { %15666 = vst [vmem:[#allocation39_spill] sm:$0xff] %v12867_v8  ;;  %6270 = vmatpush.msra.mxu3 %v11625_v16  ;;  %5150 = vmatmul.f32.gmra.mxu0 %v8591_v37  ;;  %v12870_v53 = vpop.f32.mrf.mxu2  ;;  %v12872_v0 = vpop.f32.mrf.mxu3  ;;  %v15672_v16 = vld [vmem:[#allocation46_spill] sm:$0xff] }
 0x54f   : > { %15667 = vst [vmem:[#allocation40_spill] sm:$0xff] %v12872_v0  ;;  %6105 = vmatpush.msra.mxu1 %v15668_v22  ;;  %5316 = vmatmul.f32.gmra.mxu2 %v8593_v60  ;;  %v12875_v46 = vpop.f32.mrf.mxu0  ;;  %v15681_v37 = vld [vmem:[#allocation62_spill] sm:$0xff]  ;;  %v15687_v22 = vld [vmem:[#allocation51_spill] sm:$0xff]  ;;  %v15750_v0 = vld [vmem:[#allocation84_spill] sm:$0xff] }
 0x550   : > { %15669 = vst [vmem:[#allocation53_spill] sm:$0xff] %v12875_v46  ;;  %5399 = vmatmul.f32.gmra.mxu3 %v8594_v13  ;;  %6021 = vmatpush.msra.mxu0 %v15670_v33  ;;  %v15684_v60 = vld [vmem:[#allocation50_spill] sm:$0xff]  ;;  %v15686_v13 = vld [vmem:[#allocation64_spill] sm:$0xff] }
 0x551   : > { %6187 = vmatpush.msra.mxu2 %v15595_v4  ;;  %6271 = vmatpush.msra.mxu3 %v11637_v48  ;;  %v8597_v48 = vld [vmem:[%s15147_s3 + $0x8d0] sm:$0xff] }
 0x552   : > { %6106 = vmatpush.msra.mxu1 %v15671_v20  ;;  %6022 = vmatpush.msra.mxu0 %v15672_v16  ;;  %v15691_v16 = vld [vmem:[#allocation52_spill] sm:$0xff] }
 0x553   : > { %6188 = vmatpush.msra.mxu2 %v15598_v34  ;;  %6272 = vmatpush.msra.mxu3 %v11642_v61  ;;  %v15676_v61 = vld [vmem:[#allocation48_spill] sm:$0xff]  ;;  %v8599_v34 = vld [vmem:[%s15147_s3 + $0x8e0] sm:$0xff] }
 0x554   : > { %6107 = vmatpush.msra.mxu1 %v15673_v5  ;;  %6023 = vmatpush.msra.mxu0 %v15674_v54 }
 0x555   : > { %6189 = vmatpush.msra.mxu2 %v15599_v36  ;;  %6273 = vmatpush.msra.mxu3 %v11657_v31  ;;  %v12894_v4 = vpop.f32.mrf.mxu1  ;;  %v15679_v36 = vld [vmem:[#allocation61_spill] sm:$0xff]  ;;  %v8600_v31 = vld [vmem:[%s15147_s3 + $0x8e8] sm:$0xff] }
 0x556   : > { %15675 = vst [vmem:[#allocation54_spill] sm:$0xff] %v12894_v4  ;;  %5236 = vmatmul.f32.gmra.mxu1 %v8598_v59  ;;  %6024 = vmatpush.msra.mxu0 %v15676_v61  ;;  %v12900_v2 = vpop.f32.mrf.mxu2  ;;  %v12902_v14 = vpop.f32.mrf.mxu3  ;;  %v8609_v59 = vld [vmem:[%s15147_s3 + $0x930] sm:$0xff]  ;;  %v8583_v4 = vld [vmem:[%s15147_s3 + $0x860] sm:$0xff] }
 0x557   : > { %15677 = vst [vmem:[#allocation41_spill] sm:$0xff] %v12900_v2  ;;  %6108 = vmatpush.msra.mxu1 %v15679_v36  ;;  %6190 = vmatpush.msra.mxu2 %v15600_v1  ;;  %v12909_v42 = vpop.f32.mrf.mxu0  ;;  %v15683_v1 = vld [vmem:[#allocation63_spill] sm:$0xff] }
 0x558   : > { %15678 = vst [vmem:[#allocation55_spill] sm:$0xff] %v12902_v14  ;;  %6274 = vmatpush.msra.mxu3 %v11668_v11  ;;  %5153 = vmatmul.f32.gmra.mxu0 %v8597_v48  ;;  %v8604_v11 = vld [vmem:[%s15147_s3 + $0x908] sm:$0xff] }
 0x559   : > { %15680 = vst [vmem:[#allocation42_spill] sm:$0xff] %v12909_v42  ;;  %6109 = vmatpush.msra.mxu1 %v15681_v37  ;;  %5319 = vmatmul.f32.gmra.mxu2 %v8599_v34  ;;  %v8612_v48 = vld [vmem:[%s15147_s3 + $0x948] sm:$0xff] }
 0x55a   : > { %5402 = vmatmul.f32.gmra.mxu3 %v8600_v31  ;;  %6025 = vmatpush.msra.mxu0 %v15682_v26  ;;  %v8616_v34 = vld [vmem:[%s15147_s3 + $0x968] sm:$0xff]  ;;  %v8615_v31 = vld [vmem:[%s15147_s3 + $0x960] sm:$0xff] }
 0x55b   : > { %6191 = vmatpush.msra.mxu2 %v15602_v38  ;;  %6275 = vmatpush.msra.mxu3 %v11680_v56  ;;  %v8603_v56 = vld [vmem:[%s15147_s3 + $0x900] sm:$0xff] }
 0x55c   : > { %6110 = vmatpush.msra.mxu1 %v15683_v1  ;;  %6026 = vmatpush.msra.mxu0 %v15684_v60  ;;  %v8617_v1 = vld [vmem:[%s15147_s3 + $0x970] sm:$0xff]  ;;  %v8618_v60 = vld [vmem:[%s15147_s3 + $0x978] sm:$0xff] }
 0x55d   : > { %6192 = vmatpush.msra.mxu2 %v15605_v18  ;;  %6276 = vmatpush.msra.mxu3 %v11685_v41  ;;  %v12923_v15 = vpop.f32.mrf.mxu1  ;;  %v8605_v41 = vld [vmem:[%s15147_s3 + $0x910] sm:$0xff]  ;;  %v8606_v18 = vld [vmem:[%s15147_s3 + $0x918] sm:$0xff] }
 0x55e   : > { %15685 = vst [vmem:[#allocation56_spill] sm:$0xff] %v12923_v15  ;;  %6111 = vmatpush.msra.mxu1 %v15686_v13  ;;  %6027 = vmatpush.msra.mxu0 %v15687_v22  ;;  %v12930_v38 = vpop.f32.mrf.mxu2  ;;  %v12932_v33 = vpop.f32.mrf.mxu3  ;;  %v8622_v13 = vld [vmem:[%s15147_s3 + $0x998] sm:$0xff]  ;;  %v8699_v15 = vld [vmem:[%s15147_s3 + $0xc00] sm:$0xff] }
 0x55f   : > { %15688 = vst [vmem:[#allocation43_spill] sm:$0xff] %v12930_v38  ;;  %6193 = vmatpush.msra.mxu2 %v15606_v32  ;;  %6277 = vmatpush.msra.mxu3 %v11698_v25  ;;  %v12942_v20 = vpop.f32.mrf.mxu0  ;;  %v8610_v25 = vld [vmem:[%s15147_s3 + $0x938] sm:$0xff] }
 0x560   : > { %15689 = vst [vmem:[#allocation44_spill] sm:$0xff] %v12932_v33  ;;  %5239 = vmatmul.f32.gmra.mxu1 %v8604_v11  ;;  %6028 = vmatpush.msra.mxu0 %v15691_v16  ;;  %v8623_v16 = vld [vmem:[%s15147_s3 + $0x9a0] sm:$0xff] }
 0x561   : > { %15690 = vst [vmem:[#allocation57_spill] sm:$0xff] %v12942_v20  ;;  %6194 = vmatpush.msra.mxu2 %v15607_v23  ;;  %5156 = vmatmul.f32.gmra.mxu0 %v8603_v56  ;;  %v8611_v23 = vld [vmem:[%s15147_s3 + $0x940] sm:$0xff]  ;;  %v8621_v56 = vld [vmem:[%s15147_s3 + $0x990] sm:$0xff] }
 0x562   : > { %5322 = vmatmul.f32.gmra.mxu2 %v8605_v41  ;;  %5405 = vmatmul.f32.gmra.mxu3 %v8606_v18 }
 0x565   : > { %v12949_v32 = vpop.f32.mrf.mxu1 }
 0x566   : > { %15692 = vst [vmem:[#allocation58_spill] sm:$0xff] %v12949_v32  ;;  %v12954_v5 = vpop.f32.mrf.mxu2  ;;  %v12956_v54 = vpop.f32.mrf.mxu3 }
 0x567   : > { %15693 = vst [vmem:[#allocation45_spill] sm:$0xff] %v12954_v5  ;;  %v12964_v61 = vpop.f32.mrf.mxu0 }
 0x568   : > { %15694 = vst [vmem:[#allocation59_spill] sm:$0xff] %v12956_v54  ;;  %5242 = vmatmul.f32.gmra.mxu1 %v8610_v25  ;;  %v8624_v25 = vld [vmem:[%s15147_s3 + $0x9a8] sm:$0xff] }
 0x569   : > { %15695 = vst [vmem:[#allocation46_spill] sm:$0xff] %v12964_v61  ;;  %5159 = vmatmul.f32.gmra.mxu0 %v8609_v59 }
 0x56a   : > { %5325 = vmatmul.f32.gmra.mxu2 %v8611_v23  ;;  %5408 = vmatmul.f32.gmra.mxu3 %v8612_v48  ;;  %v8628_v23 = vld [vmem:[%s15147_s3 + $0x9c8] sm:$0xff] }
 0x56d   : > { %v12969_v36 = vpop.f32.mrf.mxu1 }
 0x56e   : > { %15696 = vst [vmem:[#allocation60_spill] sm:$0xff] %v12969_v36  ;;  %v12974_v37 = vpop.f32.mrf.mxu2  ;;  %v12976_v26 = vpop.f32.mrf.mxu3  ;;  %v8688_v36 = vld [vmem:[%s15147_s3 + $0xba8] sm:$0xff] }
 0x56f   : > { %15697 = vst [vmem:[#allocation47_spill] sm:$0xff] %v12974_v37  ;;  %v12984_v11 = vpop.f32.mrf.mxu0 }
 0x570   : > { %15698 = vst [vmem:[#allocation48_spill] sm:$0xff] %v12976_v26  ;;  %5245 = vmatmul.f32.gmra.mxu1 %v8616_v34  ;;  %v8627_v34 = vld [vmem:[%s15147_s3 + $0x9c0] sm:$0xff] }
 0x571   : > { %15699 = vst [vmem:[#allocation61_spill] sm:$0xff] %v12984_v11  ;;  %5162 = vmatmul.f32.gmra.mxu0 %v8615_v31  ;;  %v8687_v26 = vld [vmem:[%s15147_s3 + $0xba0] sm:$0xff] }
 0x572   : > { %5328 = vmatmul.f32.gmra.mxu2 %v8617_v1  ;;  %5411 = vmatmul.f32.gmra.mxu3 %v8618_v60  ;;  %v8629_v60 = vld [vmem:[%s15147_s3 + $0x9d0] sm:$0xff] }
 0x575   : > { %v12989_v22 = vpop.f32.mrf.mxu1 }
 0x576   : > { %15700 = vst [vmem:[#allocation62_spill] sm:$0xff] %v12989_v22  ;;  %v12994_v41 = vpop.f32.mrf.mxu2  ;;  %v12996_v18 = vpop.f32.mrf.mxu3  ;;  %v8682_v22 = vld [vmem:[%s15147_s3 + $0xb78] sm:$0xff] }
 0x577   : > { %15701 = vst [vmem:[#allocation49_spill] sm:$0xff] %v12994_v41  ;;  %v13004_v59 = vpop.f32.mrf.mxu0 }
 0x578   : > { %15702 = vst [vmem:[#allocation63_spill] sm:$0xff] %v12996_v18  ;;  %5248 = vmatmul.f32.gmra.mxu1 %v8622_v13  ;;  %v8630_v13 = vld [vmem:[%s15147_s3 + $0x9d8] sm:$0xff]  ;;  %v8681_v18 = vld [vmem:[%s15147_s3 + $0xb70] sm:$0xff] }
 0x579   : > { %15703 = vst [vmem:[#allocation50_spill] sm:$0xff] %v13004_v59  ;;  %5165 = vmatmul.f32.gmra.mxu0 %v8621_v56  ;;  %v8683_v59 = vld [vmem:[%s15147_s3 + $0xb80] sm:$0xff] }
 0x57a   : > { %5331 = vmatmul.f32.gmra.mxu2 %v8623_v16  ;;  %5414 = vmatmul.f32.gmra.mxu3 %v8624_v25  ;;  %v8634_v16 = vld [vmem:[%s15147_s3 + $0x9f8] sm:$0xff] }
 0x57d   : > { %v13009_v48 = vpop.f32.mrf.mxu1 }
 0x57e   : > { %15704 = vst [vmem:[#allocation64_spill] sm:$0xff] %v13009_v48  ;;  %v13014_v31 = vpop.f32.mrf.mxu2  ;;  %v13016_v1 = vpop.f32.mrf.mxu3  ;;  %v8633_v48 = vld [vmem:[%s15147_s3 + $0x9f0] sm:$0xff] }
 0x57f   : > { %15705 = vst [vmem:[#allocation51_spill] sm:$0xff] %v13014_v31  ;;  %v13024_v56 = vpop.f32.mrf.mxu0 }
 0x580   : > { %15706 = vst [vmem:[#allocation52_spill] sm:$0xff] %v13016_v1  ;;  %5251 = vmatmul.f32.gmra.mxu1 %v8628_v23  ;;  %v8635_v23 = vld [vmem:[%s15147_s3 + $0xa00] sm:$0xff] }
 0x581   : > { %15707 = vst [vmem:[#allocation196_spill] sm:$0xff] %v13024_v56  ;;  %5168 = vmatmul.f32.gmra.mxu0 %v8627_v34  ;;  %v8636_v34 = vld [vmem:[%s15147_s3 + $0xa08] sm:$0xff] }
 0x582   : > { %5334 = vmatmul.f32.gmra.mxu2 %v8629_v60  ;;  %5417 = vmatmul.f32.gmra.mxu3 %v8630_v13  ;;  %v8640_v13 = vld [vmem:[%s15147_s3 + $0xa28] sm:$0xff] }
 0x585   : > { %v13029_v25 = vpop.f32.mrf.mxu1 }
 0x586   : > { %15708 = vst [vmem:[#allocation197_spill] sm:$0xff] %v13029_v25  ;;  %v13034_v1 = vpop.f32.mrf.mxu2  ;;  %v13036_v31 = vpop.f32.mrf.mxu3 }
 0x587   : > { %15709 = vst [vmem:[#allocation198_spill] sm:$0xff] %v13034_v1  ;;  %v13044_v60 = vpop.f32.mrf.mxu0 }
 0x588   : > { %15710 = vst [vmem:[#allocation199_spill] sm:$0xff] %v13036_v31  ;;  %5254 = vmatmul.f32.gmra.mxu1 %v8634_v16  ;;  %v8639_v31 = vld [vmem:[%s15147_s3 + $0xa20] sm:$0xff]  ;;  %v8642_v16 = vld [vmem:[%s15147_s3 + $0xa38] sm:$0xff] }
 0x589   : > { %15711 = vst [vmem:[#allocation200_spill] sm:$0xff] %v13044_v60  ;;  %5171 = vmatmul.f32.gmra.mxu0 %v8633_v48  ;;  %v8641_v48 = vld [vmem:[%s15147_s3 + $0xa30] sm:$0xff] }
 0x58a   : > { %5337 = vmatmul.f32.gmra.mxu2 %v8635_v23  ;;  %5420 = vmatmul.f32.gmra.mxu3 %v8636_v34  ;;  %v8646_v34 = vld [vmem:[%s15147_s3 + $0xa58] sm:$0xff] }
 0x58d   : > { %v13049_v25 = vpop.f32.mrf.mxu1 }
 0x58e   : > { %15712 = vst [vmem:[#allocation201_spill] sm:$0xff] %v13049_v25  ;;  %v13054_v1 = vpop.f32.mrf.mxu2  ;;  %v13056_v56 = vpop.f32.mrf.mxu3 }
 0x58f   : > { %15713 = vst [vmem:[#allocation202_spill] sm:$0xff] %v13054_v1  ;;  %v13064_v23 = vpop.f32.mrf.mxu0 }
 0x590   : > { %15714 = vst [vmem:[#allocation203_spill] sm:$0xff] %v13056_v56  ;;  %5257 = vmatmul.f32.gmra.mxu1 %v8640_v13  ;;  %v8645_v56 = vld [vmem:[%s15147_s3 + $0xa50] sm:$0xff]  ;;  %v8648_v13 = vld [vmem:[%s15147_s3 + $0xa68] sm:$0xff] }
 0x591   : > { %15715 = vst [vmem:[#allocation204_spill] sm:$0xff] %v13064_v23  ;;  %5174 = vmatmul.f32.gmra.mxu0 %v8639_v31  ;;  %v8647_v31 = vld [vmem:[%s15147_s3 + $0xa60] sm:$0xff] }
 0x592   : > { %5340 = vmatmul.f32.gmra.mxu2 %v8641_v48  ;;  %5423 = vmatmul.f32.gmra.mxu3 %v8642_v16  ;;  %v8652_v16 = vld [vmem:[%s15147_s3 + $0xa88] sm:$0xff] }
 0x595   : > { %v13069_v25 = vpop.f32.mrf.mxu1 }
 0x596   : > { %15716 = vst [vmem:[#allocation205_spill] sm:$0xff] %v13069_v25  ;;  %v13074_v1 = vpop.f32.mrf.mxu2  ;;  %v13076_v60 = vpop.f32.mrf.mxu3 }
 0x597   : > { %15717 = vst [vmem:[#allocation206_spill] sm:$0xff] %v13074_v1  ;;  %v13084_v48 = vpop.f32.mrf.mxu0 }
 0x598   : > { %15718 = vst [vmem:[#allocation207_spill] sm:$0xff] %v13076_v60  ;;  %5260 = vmatmul.f32.gmra.mxu1 %v8646_v34  ;;  %v8651_v60 = vld [vmem:[%s15147_s3 + $0xa80] sm:$0xff]  ;;  %v8654_v34 = vld [vmem:[%s15147_s3 + $0xa98] sm:$0xff] }
 0x599   : > { %15719 = vst [vmem:[#allocation208_spill] sm:$0xff] %v13084_v48  ;;  %5177 = vmatmul.f32.gmra.mxu0 %v8645_v56  ;;  %v8653_v56 = vld [vmem:[%s15147_s3 + $0xa90] sm:$0xff] }
 0x59a   : > { %5343 = vmatmul.f32.gmra.mxu2 %v8647_v31  ;;  %5426 = vmatmul.f32.gmra.mxu3 %v8648_v13  ;;  %v8658_v13 = vld [vmem:[%s15147_s3 + $0xab8] sm:$0xff] }
 0x59d   : > { %v13089_v25 = vpop.f32.mrf.mxu1 }
 0x59e   : > { %15720 = vst [vmem:[#allocation209_spill] sm:$0xff] %v13089_v25  ;;  %v13094_v1 = vpop.f32.mrf.mxu2  ;;  %v13096_v23 = vpop.f32.mrf.mxu3 }
 0x59f   : > { %15721 = vst [vmem:[#allocation210_spill] sm:$0xff] %v13094_v1  ;;  %v13104_v31 = vpop.f32.mrf.mxu0 }
 0x5a0   : > { %15722 = vst [vmem:[#allocation211_spill] sm:$0xff] %v13096_v23  ;;  %5263 = vmatmul.f32.gmra.mxu1 %v8652_v16  ;;  %v8657_v23 = vld [vmem:[%s15147_s3 + $0xab0] sm:$0xff]  ;;  %v8660_v16 = vld [vmem:[%s15147_s3 + $0xac8] sm:$0xff] }
 0x5a1   : > { %15723 = vst [vmem:[#allocation212_spill] sm:$0xff] %v13104_v31  ;;  %5180 = vmatmul.f32.gmra.mxu0 %v8651_v60  ;;  %v8659_v60 = vld [vmem:[%s15147_s3 + $0xac0] sm:$0xff] }
 0x5a2   : > { %5346 = vmatmul.f32.gmra.mxu2 %v8653_v56  ;;  %5429 = vmatmul.f32.gmra.mxu3 %v8654_v34  ;;  %v8664_v34 = vld [vmem:[%s15147_s3 + $0xae8] sm:$0xff] }
 0x5a5   : > { %v13109_v25 = vpop.f32.mrf.mxu1 }
 0x5a6   : > { %15724 = vst [vmem:[#allocation213_spill] sm:$0xff] %v13109_v25  ;;  %v13114_v1 = vpop.f32.mrf.mxu2  ;;  %v13116_v48 = vpop.f32.mrf.mxu3 }
 0x5a7   : > { %15725 = vst [vmem:[#allocation214_spill] sm:$0xff] %v13114_v1  ;;  %v13124_v56 = vpop.f32.mrf.mxu0 }
 0x5a8   : > { %15726 = vst [vmem:[#allocation215_spill] sm:$0xff] %v13116_v48  ;;  %5266 = vmatmul.f32.gmra.mxu1 %v8658_v13  ;;  %v8663_v48 = vld [vmem:[%s15147_s3 + $0xae0] sm:$0xff]  ;;  %v8666_v13 = vld [vmem:[%s15147_s3 + $0xaf8] sm:$0xff] }
 0x5a9   : > { %15727 = vst [vmem:[#allocation216_spill] sm:$0xff] %v13124_v56  ;;  %5183 = vmatmul.f32.gmra.mxu0 %v8657_v23  ;;  %v8665_v23 = vld [vmem:[%s15147_s3 + $0xaf0] sm:$0xff] }
 0x5aa   : > { %5349 = vmatmul.f32.gmra.mxu2 %v8659_v60  ;;  %5432 = vmatmul.f32.gmra.mxu3 %v8660_v16  ;;  %v8670_v16 = vld [vmem:[%s15147_s3 + $0xb18] sm:$0xff] }
 0x5ad   : > { %v13129_v25 = vpop.f32.mrf.mxu1 }
 0x5ae   : > { %15728 = vst [vmem:[#allocation217_spill] sm:$0xff] %v13129_v25  ;;  %v13134_v1 = vpop.f32.mrf.mxu2  ;;  %v13136_v31 = vpop.f32.mrf.mxu3 }
 0x5af   : > { %15729 = vst [vmem:[#allocation218_spill] sm:$0xff] %v13134_v1  ;;  %v13144_v60 = vpop.f32.mrf.mxu0 }
 0x5b0   : > { %15730 = vst [vmem:[#allocation219_spill] sm:$0xff] %v13136_v31  ;;  %5269 = vmatmul.f32.gmra.mxu1 %v8664_v34  ;;  %v8669_v31 = vld [vmem:[%s15147_s3 + $0xb10] sm:$0xff]  ;;  %v8672_v34 = vld [vmem:[%s15147_s3 + $0xb28] sm:$0xff] }
 0x5b1   : > { %15731 = vst [vmem:[#allocation220_spill] sm:$0xff] %v13144_v60  ;;  %5186 = vmatmul.f32.gmra.mxu0 %v8663_v48  ;;  %v8671_v48 = vld [vmem:[%s15147_s3 + $0xb20] sm:$0xff]  ;;  %v8677_v60 = vld [vmem:[%s15147_s3 + $0xb50] sm:$0xff] }
 0x5b2   : > { %5352 = vmatmul.f32.gmra.mxu2 %v8665_v23  ;;  %5435 = vmatmul.f32.gmra.mxu3 %v8666_v13  ;;  %v8676_v13 = vld [vmem:[%s15147_s3 + $0xb48] sm:$0xff] }
 0x5b5   : > { %v13149_v25 = vpop.f32.mrf.mxu1 }
 0x5b6   : > { %v13154_v1 = vpop.f32.mrf.mxu2  ;;  %v13156_v56 = vpop.f32.mrf.mxu3 }
 0x5b7   : > { %15732 = vst [vmem:[#allocation221_spill] sm:$0xff] %v13154_v1  ;;  %v13164_v23 = vpop.f32.mrf.mxu0 }
 0x5b8   : > { %15733 = vst [vmem:[#allocation222_spill] sm:$0xff] %v13156_v56  ;;  %5272 = vmatmul.f32.gmra.mxu1 %v8670_v16  ;;  %v8675_v56 = vld [vmem:[%s15147_s3 + $0xb40] sm:$0xff] }
 0x5b9   : > { %5189 = vmatmul.f32.gmra.mxu0 %v8669_v31  ;;  %v8678_v31 = vld [vmem:[%s15147_s3 + $0xb58] sm:$0xff] }
 0x5ba   : > { %5355 = vmatmul.f32.gmra.mxu2 %v8671_v48  ;;  %5438 = vmatmul.f32.gmra.mxu3 %v8672_v34 }
 0x5be   : > { %v13172_v1 = vpop.f32.mrf.mxu2 }
 0x5bf   : > { %v13180_v16 = vpop.f32.mrf.mxu1  ;;  %v13182_v48 = vpop.f32.mrf.mxu3 }
 0x5c0   : > { %5275 = vmatmul.f32.gmra.mxu1 %v8676_v13 }
 0x5c1   : > { %5192 = vmatmul.f32.gmra.mxu0 %v8675_v56  ;;  %v13184_v34 = vpop.f32.mrf.mxu0  ;;  %v8684_v56 = vld [vmem:[%s15147_s3 + $0xb88] sm:$0xff] }
 0x5c2   : > { %5358 = vmatmul.f32.gmra.mxu2 %v8677_v60  ;;  %5441 = vmatmul.f32.gmra.mxu3 %v8678_v31 }
 0x5c8   : > { %5278 = vmatmul.f32.gmra.mxu1 %v8682_v22  ;;  %v13198_v13 = vpop.f32.mrf.mxu2  ;;  %v8689_v22 = vld [vmem:[%s15147_s3 + $0xbb0] sm:$0xff] }
 0x5c9   : > { %5195 = vmatmul.f32.gmra.mxu0 %v8681_v18  ;;  %v5234_v60 = vpop.f32.mrf.mxu1  ;;  %v13200_v31 = vpop.f32.mrf.mxu3  ;;  %v8690_v18 = vld [vmem:[%s15147_s3 + $0xbb8] sm:$0xff] }
 0x5ca   : > { %5361 = vmatmul.f32.gmra.mxu2 %v8683_v59  ;;  %5444 = vmatmul.f32.gmra.mxu3 %v8684_v56 }
 0x5cb   : > { %v5151_v41 = vpop.f32.mrf.mxu0 }
 0x5cc   : > { %v5235_v11 = vadd.f32 %v5234_v60, %v5151_v41  ;;  %v8694_v41 = vld [vmem:[%s15147_s3 + $0xbd8] sm:$0xff]  ;;  %v8693_v60 = vld [vmem:[%s15147_s3 + $0xbd0] sm:$0xff] }
 0x5d0   : > { %5281 = vmatmul.f32.gmra.mxu1 %v8688_v36  ;;  %v8695_v36 = vld [vmem:[%s15147_s3 + $0xbe0] sm:$0xff] }
 0x5d1   : > { %5198 = vmatmul.f32.gmra.mxu0 %v8687_v26  ;;  %v8696_v26 = vld [vmem:[%s15147_s3 + $0xbe8] sm:$0xff] }
 0x5d2   : > { %5364 = vmatmul.f32.gmra.mxu2 %v8689_v22  ;;  %5447 = vmatmul.f32.gmra.mxu3 %v8690_v18  ;;  %v5317_v59 = vpop.f32.mrf.mxu2 }
 0x5d3   : > { %v5237_v56 = vpop.f32.mrf.mxu1  ;;  %v5318_v37 = vadd.f32 %v5317_v59, %v5235_v11  ;;  %v5400_v32 = vpop.f32.mrf.mxu3  ;;  %v8700_v59 = vld [vmem:[%s15147_s3 + $0xc08] sm:$0xff] }
 0x5d5   : > { %v13214_v54 = vadd.f32 %v5400_v32, %v5318_v37  ;;  %v5154_v61 = vpop.f32.mrf.mxu0 }
 0x5d6   : > { %v5238_v32 = vadd.f32 %v5237_v56, %v5154_v61  ;;  %v8701_v61 = vld [vmem:[%s15147_s3 + $0xc10] sm:$0xff]  ;;  %v8702_v56 = vld [vmem:[%s15147_s3 + $0xc18] sm:$0xff] }
 0x5d8   : > { %5284 = vmatmul.f32.gmra.mxu1 %v8694_v41 }
 0x5d9   : > { %5201 = vmatmul.f32.gmra.mxu0 %v8693_v60 }
 0x5da   : > { %5367 = vmatmul.f32.gmra.mxu2 %v8695_v36  ;;  %5450 = vmatmul.f32.gmra.mxu3 %v8696_v26  ;;  %v8706_v26 = vld [vmem:[%s15147_s3 + $0xc38] sm:$0x3] }
 0x5dc   : > { %v5320_v37 = vpop.f32.mrf.mxu2 }
 0x5dd   : > { %v5240_v11 = vpop.f32.mrf.mxu1  ;;  %v5321_v22 = vadd.f32 %v5320_v37, %v5238_v32  ;;  %v5403_v18 = vpop.f32.mrf.mxu3 }
 0x5de   : > { %v5157_v5 = vpop.f32.mrf.mxu0 }
 0x5df   : > { %v13234_v33 = vadd.f32 %v5403_v18, %v5321_v22  ;;  %v5241_v41 = vadd.f32 %v5240_v11, %v5157_v5  ;;  %v8705_v18 = vld [vmem:[%s15147_s3 + $0xc30] sm:$0x3]  ;;  %v8708_v5 = vld [vmem:[%s15147_s3 + $0xc48] sm:$0x3] }
 0x5e0   : > { %5287 = vmatmul.f32.gmra.mxu1 %v8700_v59 }
 0x5e1   : > { %5204 = vmatmul.f32.gmra.mxu0 %v8699_v15  ;;  %v8707_v15 = vld [vmem:[%s15147_s3 + $0xc40] sm:$0x3] }
 0x5e2   : > { %5370 = vmatmul.f32.gmra.mxu2 %v8701_v61  ;;  %5453 = vmatmul.f32.gmra.mxu3 %v8702_v56 }
 0x5e5   : > { %v5243_v60 = vpop.f32.mrf.mxu1  ;;  %v5323_v36 = vpop.f32.mrf.mxu2 }
 0x5e6   : > { %v5324_v32 = vadd.f32 %v5323_v36, %v5241_v41  ;;  %v5406_v37 = vpop.f32.mrf.mxu3  ;;  %v5160_v22 = vpop.f32.mrf.mxu0  ;;  %v8584_v41 = vld [vmem:[%s15147_s3 + $0x868] sm:$0xff] }
 0x5e7   : > { %v5244_v59 = vadd.f32 %v5243_v60, %v5160_v22  ;;  %v8735_v60 = vld [vmem:[%s15147_s3 + $0xc68] sm:$0xff] }
 0x5e8   : > { %v13254_v11 = vadd.f32 %v5406_v37, %v5324_v32  ;;  %5290 = vmatmul.f32.gmra.mxu1 %v8706_v26  ;;  %v8734_v26 = vld [vmem:[%s15147_s3 + $0xc60] sm:$0xff] }
 0x5e9   : > { %5207 = vmatmul.f32.gmra.mxu0 %v8705_v18 }
 0x5ea   : > { %5373 = vmatmul.f32.gmra.mxu2 %v8707_v15  ;;  %5456 = vmatmul.f32.gmra.mxu3 %v8708_v5  ;;  %v8590_v15 = vld [vmem:[%s15147_s3 + $0x898] sm:$0xff] }
 0x5ed   : > { %v5246_v61 = vpop.f32.mrf.mxu1  ;;  %v5326_v56 = vpop.f32.mrf.mxu2 }
 0x5ee   : > { %v5327_v36 = vadd.f32 %v5326_v56, %v5244_v59  ;;  %v5409_v20 = vpop.f32.mrf.mxu3  ;;  %v5163_v38 = vpop.f32.mrf.mxu0 }
 0x5ef   : > { %v5247_v37 = vadd.f32 %v5246_v61, %v5163_v38  ;;  %v8741_v38 = vld [vmem:[%s15147_s3 + $0xc98] sm:$0xff] }
 0x5f0   : > { %v13268_v32 = vadd.f32 %v5409_v20, %v5327_v36  ;;  %8712 = vmatmul.msk.f32.vlgmr.msrb.gmra.mxu1 %vm3642_vm5, %v8584_v41  ;;  %v8589_v20 = vld [vmem:[%s15147_s3 + $0x890] sm:$0xff] }
 0x5f1   : > { %5476 = vmatmul.f32.vlgmr.msrb.gmra.mxu0 %v8583_v4  ;;  %v8740_v4 = vld [vmem:[%s15147_s3 + $0xc90] sm:$0xff] }
 0x5f2   : > { %5863 = vmatmul.f32.vlgmr.msrb.gmra.mxu2 %v8734_v26  ;;  %5946 = vmatmul.f32.vlgmr.msrb.gmra.mxu3 %v8735_v60  ;;  %v8596_v60 = vld [vmem:[%s15147_s3 + $0x8c8] sm:$0xff] }
 0x5f5   : > { %v5249_v22 = vpop.f32.mrf.mxu1  ;;  %v5329_v18 = vpop.f32.mrf.mxu2 }
 0x5f6   : > { %v5330_v5 = vadd.f32 %v5329_v18, %v5247_v37  ;;  %v5412_v59 = vpop.f32.mrf.mxu3  ;;  %v5166_v56 = vpop.f32.mrf.mxu0 }
 0x5f7   : > { %v5250_v41 = vadd.f32 %v5249_v22, %v5166_v56  ;;  %v8747_v22 = vld [vmem:[%s15147_s3 + $0xcc8] sm:$0xff] }
 0x5f8   : > { %v13283_v61 = vadd.f32 %v5412_v59, %v5330_v5  ;;  %8713 = vmatmul.msk.f32.gmra.mxu1 %vm3642_vm5, %v8590_v15  ;;  %v8595_v5 = vld [vmem:[%s15147_s3 + $0x8c0] sm:$0xff] }
 0x5f9   : > { %5479 = vmatmul.f32.gmra.mxu0 %v8589_v20  ;;  %v8746_v15 = vld [vmem:[%s15147_s3 + $0xcc0] sm:$0xff] }
 0x5fa   : > { %5866 = vmatmul.f32.gmra.mxu2 %v8740_v4  ;;  %5949 = vmatmul.f32.gmra.mxu3 %v8741_v38  ;;  %v8602_v38 = vld [vmem:[%s15147_s3 + $0x8f8] sm:$0xff] }
 0x5fd   : > { %v5252_v36 = vpop.f32.mrf.mxu1  ;;  %v5332_v26 = vpop.f32.mrf.mxu2 }
 0x5fe   : > { %v5333_v37 = vadd.f32 %v5332_v26, %v5250_v41  ;;  %v5415_v18 = vpop.f32.mrf.mxu3  ;;  %v5169_v14 = vpop.f32.mrf.mxu0 }
 0x5ff   : > { %v5253_v56 = vadd.f32 %v5252_v36, %v5169_v14  ;;  %v8753_v14 = vld [vmem:[%s15147_s3 + $0xcf8] sm:$0xff] }
 0x600   : > { %v13298_v59 = vadd.f32 %v5415_v18, %v5333_v37  ;;  %8714 = vmatmul.msk.f32.gmra.mxu1 %vm3642_vm5, %v8596_v60  ;;  %v8601_v37 = vld [vmem:[%s15147_s3 + $0x8f0] sm:$0xff] }
 0x601   : > { %5482 = vmatmul.f32.gmra.mxu0 %v8595_v5  ;;  %v8752_v60 = vld [vmem:[%s15147_s3 + $0xcf0] sm:$0xff] }
 0x602   : > { %5869 = vmatmul.f32.gmra.mxu2 %v8746_v15  ;;  %5952 = vmatmul.f32.gmra.mxu3 %v8747_v22  ;;  %v8608_v22 = vld [vmem:[%s15147_s3 + $0x928] sm:$0xff] }
 0x605   : > { %v5255_v20 = vpop.f32.mrf.mxu1  ;;  %v5335_v4 = vpop.f32.mrf.mxu2 }
 0x606   : > { %v5336_v41 = vadd.f32 %v5335_v4, %v5253_v56  ;;  %v5418_v26 = vpop.f32.mrf.mxu3  ;;  %v5172_v42 = vpop.f32.mrf.mxu0 }
 0x607   : > { %v5256_v18 = vadd.f32 %v5255_v20, %v5172_v42  ;;  %v8759_v42 = vld [vmem:[%s15147_s3 + $0xd28] sm:$0xff] }
 0x608   : > { %v13313_v36 = vadd.f32 %v5418_v26, %v5336_v41  ;;  %8715 = vmatmul.msk.f32.gmra.mxu1 %vm3642_vm5, %v8602_v38  ;;  %v8607_v41 = vld [vmem:[%s15147_s3 + $0x920] sm:$0xff] }
 0x609   : > { %5485 = vmatmul.f32.gmra.mxu0 %v8601_v37  ;;  %v8758_v38 = vld [vmem:[%s15147_s3 + $0xd20] sm:$0xff] }
 0x60a   : > { %15734 = vst [vmem:[#allocation223_spill] sm:$0xff] %v13313_v36  ;;  %5872 = vmatmul.f32.gmra.mxu2 %v8752_v60  ;;  %5955 = vmatmul.f32.gmra.mxu3 %v8753_v14  ;;  %v8614_v14 = vld [vmem:[%s15147_s3 + $0x958] sm:$0xff] }
 0x60d   : > { %v5258_v5 = vpop.f32.mrf.mxu1  ;;  %v5338_v15 = vpop.f32.mrf.mxu2 }
 0x60e   : > { %v5339_v56 = vadd.f32 %v5338_v15, %v5256_v18  ;;  %v5421_v4 = vpop.f32.mrf.mxu3  ;;  %v5175_v2 = vpop.f32.mrf.mxu0 }
 0x60f   : > { %v5259_v26 = vadd.f32 %v5258_v5, %v5175_v2  ;;  %v8765_v2 = vld [vmem:[%s15147_s3 + $0xd58] sm:$0xff] }
 0x610   : > { %v13328_v20 = vadd.f32 %v5421_v4, %v5339_v56  ;;  %8716 = vmatmul.msk.f32.gmra.mxu1 %vm3642_vm5, %v8608_v22  ;;  %v8613_v56 = vld [vmem:[%s15147_s3 + $0x950] sm:$0xff] }
 0x611   : > { %5488 = vmatmul.f32.gmra.mxu0 %v8607_v41  ;;  %v8764_v22 = vld [vmem:[%s15147_s3 + $0xd50] sm:$0xff] }
 0x612   : > { %15735 = vst [vmem:[#allocation224_spill] sm:$0xff] %v13328_v20  ;;  %5875 = vmatmul.f32.gmra.mxu2 %v8758_v38  ;;  %5958 = vmatmul.f32.gmra.mxu3 %v8759_v42  ;;  %v8620_v42 = vld [vmem:[%s15147_s3 + $0x988] sm:$0xff] }
 0x615   : > { %v5261_v37 = vpop.f32.mrf.mxu1  ;;  %v5341_v60 = vpop.f32.mrf.mxu2 }
 0x616   : > { %v5342_v18 = vadd.f32 %v5341_v60, %v5259_v26  ;;  %v5424_v15 = vpop.f32.mrf.mxu3  ;;  %v5178_v36 = vpop.f32.mrf.mxu0 }
 0x617   : > { %v5262_v4 = vadd.f32 %v5261_v37, %v5178_v36  ;;  %v8771_v36 = vld [vmem:[%s15147_s3 + $0xd88] sm:$0xff] }
 0x618   : > { %v13343_v5 = vadd.f32 %v5424_v15, %v5342_v18  ;;  %8717 = vmatmul.msk.f32.gmra.mxu1 %vm3642_vm5, %v8614_v14  ;;  %v8619_v18 = vld [vmem:[%s15147_s3 + $0x980] sm:$0xff] }
 0x619   : > { %5491 = vmatmul.f32.gmra.mxu0 %v8613_v56  ;;  %v8770_v14 = vld [vmem:[%s15147_s3 + $0xd80] sm:$0xff] }
 0x61a   : > { %15736 = vst [vmem:[#allocation225_spill] sm:$0xff] %v13343_v5  ;;  %5878 = vmatmul.f32.gmra.mxu2 %v8764_v22  ;;  %5961 = vmatmul.f32.gmra.mxu3 %v8765_v2  ;;  %v8626_v2 = vld [vmem:[%s15147_s3 + $0x9b8] sm:$0xff] }
 0x61d   : > { %v5264_v41 = vpop.f32.mrf.mxu1  ;;  %v5344_v38 = vpop.f32.mrf.mxu2 }
 0x61e   : > { %v5345_v26 = vadd.f32 %v5344_v38, %v5262_v4  ;;  %v5427_v60 = vpop.f32.mrf.mxu3  ;;  %v5181_v20 = vpop.f32.mrf.mxu0 }
 0x61f   : > { %v5265_v15 = vadd.f32 %v5264_v41, %v5181_v20  ;;  %v8777_v20 = vld [vmem:[%s15147_s3 + $0xdb8] sm:$0xff] }
 0x620   : > { %v13358_v37 = vadd.f32 %v5427_v60, %v5345_v26  ;;  %8718 = vmatmul.msk.f32.gmra.mxu1 %vm3642_vm5, %v8620_v42  ;;  %v8625_v26 = vld [vmem:[%s15147_s3 + $0x9b0] sm:$0xff] }
 0x621   : > { %5494 = vmatmul.f32.gmra.mxu0 %v8619_v18  ;;  %v8776_v42 = vld [vmem:[%s15147_s3 + $0xdb0] sm:$0xff] }
 0x622   : > { %15737 = vst [vmem:[#allocation226_spill] sm:$0xff] %v13358_v37  ;;  %5881 = vmatmul.f32.gmra.mxu2 %v8770_v14  ;;  %5964 = vmatmul.f32.gmra.mxu3 %v8771_v36  ;;  %v8632_v36 = vld [vmem:[%s15147_s3 + $0x9e8] sm:$0xff] }
 0x625   : > { %v5267_v56 = vpop.f32.mrf.mxu1  ;;  %v5347_v22 = vpop.f32.mrf.mxu2 }
 0x626   : > { %v5348_v4 = vadd.f32 %v5347_v22, %v5265_v15  ;;  %v5430_v38 = vpop.f32.mrf.mxu3  ;;  %v5184_v5 = vpop.f32.mrf.mxu0 }
 0x627   : > { %v5268_v60 = vadd.f32 %v5267_v56, %v5184_v5  ;;  %v8783_v5 = vld [vmem:[%s15147_s3 + $0xde8] sm:$0xff] }
 0x628   : > { %v13373_v41 = vadd.f32 %v5430_v38, %v5348_v4  ;;  %8719 = vmatmul.msk.f32.gmra.mxu1 %vm3642_vm5, %v8626_v2  ;;  %v8631_v4 = vld [vmem:[%s15147_s3 + $0x9e0] sm:$0xff] }
 0x629   : > { %5497 = vmatmul.f32.gmra.mxu0 %v8625_v26  ;;  %v8782_v2 = vld [vmem:[%s15147_s3 + $0xde0] sm:$0xff] }
 0x62a   : > { %15738 = vst [vmem:[#allocation227_spill] sm:$0xff] %v13373_v41  ;;  %5884 = vmatmul.f32.gmra.mxu2 %v8776_v42  ;;  %5967 = vmatmul.f32.gmra.mxu3 %v8777_v20  ;;  %v8638_v20 = vld [vmem:[%s15147_s3 + $0xa18] sm:$0xff] }
 0x62d   : > { %v5270_v18 = vpop.f32.mrf.mxu1  ;;  %v5350_v14 = vpop.f32.mrf.mxu2 }
 0x62e   : > { %v5351_v15 = vadd.f32 %v5350_v14, %v5268_v60  ;;  %v5433_v22 = vpop.f32.mrf.mxu3  ;;  %v5187_v37 = vpop.f32.mrf.mxu0 }
 0x62f   : > { %v5271_v38 = vadd.f32 %v5270_v18, %v5187_v37  ;;  %v8789_v37 = vld [vmem:[%s15147_s3 + $0xe18] sm:$0xff] }
 0x630   : > { %v13388_v56 = vadd.f32 %v5433_v22, %v5351_v15  ;;  %8720 = vmatmul.msk.f32.gmra.mxu1 %vm3642_vm5, %v8632_v36  ;;  %v8637_v15 = vld [vmem:[%s15147_s3 + $0xa10] sm:$0xff] }
 0x631   : > { %5500 = vmatmul.f32.gmra.mxu0 %v8631_v4  ;;  %v8788_v36 = vld [vmem:[%s15147_s3 + $0xe10] sm:$0xff] }
 0x632   : > { %15739 = vst [vmem:[#allocation228_spill] sm:$0xff] %v13388_v56  ;;  %5887 = vmatmul.f32.gmra.mxu2 %v8782_v2  ;;  %5970 = vmatmul.f32.gmra.mxu3 %v8783_v5  ;;  %v8644_v5 = vld [vmem:[%s15147_s3 + $0xa48] sm:$0xff] }
 0x635   : > { %v5273_v26 = vpop.f32.mrf.mxu1  ;;  %v5353_v42 = vpop.f32.mrf.mxu2 }
 0x636   : > { %v5354_v60 = vadd.f32 %v5353_v42, %v5271_v38  ;;  %v5436_v14 = vpop.f32.mrf.mxu3  ;;  %v5190_v41 = vpop.f32.mrf.mxu0 }
 0x637   : > { %v5274_v22 = vadd.f32 %v5273_v26, %v5190_v41  ;;  %v8795_v41 = vld [vmem:[%s15147_s3 + $0xe48] sm:$0xff] }
 0x638   : > { %v13403_v18 = vadd.f32 %v5436_v14, %v5354_v60  ;;  %8721 = vmatmul.msk.f32.gmra.mxu1 %vm3642_vm5, %v8638_v20  ;;  %v8643_v60 = vld [vmem:[%s15147_s3 + $0xa40] sm:$0xff] }
 0x639   : > { %5503 = vmatmul.f32.gmra.mxu0 %v8637_v15  ;;  %v8794_v20 = vld [vmem:[%s15147_s3 + $0xe40] sm:$0xff] }
 0x63a   : > { %15740 = vst [vmem:[#allocation229_spill] sm:$0xff] %v13403_v18  ;;  %5890 = vmatmul.f32.gmra.mxu2 %v8788_v36  ;;  %5973 = vmatmul.f32.gmra.mxu3 %v8789_v37  ;;  %v8650_v37 = vld [vmem:[%s15147_s3 + $0xa78] sm:$0xff] }
 0x63d   : > { %v5276_v4 = vpop.f32.mrf.mxu1  ;;  %v5356_v2 = vpop.f32.mrf.mxu2 }
 0x63e   : > { %v5357_v38 = vadd.f32 %v5356_v2, %v5274_v22  ;;  %v5439_v42 = vpop.f32.mrf.mxu3  ;;  %v5193_v56 = vpop.f32.mrf.mxu0 }
 0x63f   : > { %v5277_v14 = vadd.f32 %v5276_v4, %v5193_v56  ;;  %v8801_v56 = vld [vmem:[%s15147_s3 + $0xe78] sm:$0xff] }
 0x640   : > { %v13418_v26 = vadd.f32 %v5439_v42, %v5357_v38  ;;  %8722 = vmatmul.msk.f32.gmra.mxu1 %vm3642_vm5, %v8644_v5  ;;  %v8649_v38 = vld [vmem:[%s15147_s3 + $0xa70] sm:$0xff] }
 0x641   : > { %5506 = vmatmul.f32.gmra.mxu0 %v8643_v60  ;;  %v8800_v5 = vld [vmem:[%s15147_s3 + $0xe70] sm:$0xff] }
 0x642   : > { %15741 = vst [vmem:[#allocation230_spill] sm:$0xff] %v13418_v26  ;;  %5893 = vmatmul.f32.gmra.mxu2 %v8794_v20  ;;  %5976 = vmatmul.f32.gmra.mxu3 %v8795_v41  ;;  %v8656_v41 = vld [vmem:[%s15147_s3 + $0xaa8] sm:$0xff] }
 0x645   : > { %v5279_v15 = vpop.f32.mrf.mxu1  ;;  %v5359_v36 = vpop.f32.mrf.mxu2 }
 0x646   : > { %v5360_v22 = vadd.f32 %v5359_v36, %v5277_v14  ;;  %v5442_v2 = vpop.f32.mrf.mxu3  ;;  %v5196_v18 = vpop.f32.mrf.mxu0 }
 0x647   : > { %v5280_v42 = vadd.f32 %v5279_v15, %v5196_v18  ;;  %v8807_v18 = vld [vmem:[%s15147_s3 + $0xea8] sm:$0xff] }
 0x648   : > { %v13433_v4 = vadd.f32 %v5442_v2, %v5360_v22  ;;  %8723 = vmatmul.msk.f32.gmra.mxu1 %vm3642_vm5, %v8650_v37  ;;  %v8655_v22 = vld [vmem:[%s15147_s3 + $0xaa0] sm:$0xff] }
 0x649   : > { %5509 = vmatmul.f32.gmra.mxu0 %v8649_v38  ;;  %v8806_v37 = vld [vmem:[%s15147_s3 + $0xea0] sm:$0xff] }
 0x64a   : > { %15742 = vst [vmem:[#allocation231_spill] sm:$0xff] %v13433_v4  ;;  %5896 = vmatmul.f32.gmra.mxu2 %v8800_v5  ;;  %5979 = vmatmul.f32.gmra.mxu3 %v8801_v56  ;;  %v8662_v56 = vld [vmem:[%s15147_s3 + $0xad8] sm:$0xff] }
 0x64d   : > { %v5282_v60 = vpop.f32.mrf.mxu1  ;;  %v5362_v20 = vpop.f32.mrf.mxu2 }
 0x64e   : > { %v5363_v14 = vadd.f32 %v5362_v20, %v5280_v42  ;;  %v5445_v36 = vpop.f32.mrf.mxu3  ;;  %v5199_v26 = vpop.f32.mrf.mxu0 }
 0x64f   : > { %v5283_v2 = vadd.f32 %v5282_v60, %v5199_v26  ;;  %v8813_v26 = vld [vmem:[%s15147_s3 + $0xed8] sm:$0xff] }
 0x650   : > { %v13448_v15 = vadd.f32 %v5445_v36, %v5363_v14  ;;  %8724 = vmatmul.msk.f32.gmra.mxu1 %vm3642_vm5, %v8656_v41  ;;  %v8661_v14 = vld [vmem:[%s15147_s3 + $0xad0] sm:$0xff] }
 0x651   : > { %5512 = vmatmul.f32.gmra.mxu0 %v8655_v22  ;;  %v8812_v41 = vld [vmem:[%s15147_s3 + $0xed0] sm:$0xff] }
 0x652   : > { %15743 = vst [vmem:[#allocation232_spill] sm:$0xff] %v13448_v15  ;;  %5899 = vmatmul.f32.gmra.mxu2 %v8806_v37  ;;  %5982 = vmatmul.f32.gmra.mxu3 %v8807_v18  ;;  %v8668_v18 = vld [vmem:[%s15147_s3 + $0xb08] sm:$0xff] }
 0x655   : > { %v5285_v38 = vpop.f32.mrf.mxu1  ;;  %v5365_v5 = vpop.f32.mrf.mxu2 }
 0x656   : > { %v5366_v42 = vadd.f32 %v5365_v5, %v5283_v2  ;;  %v5448_v20 = vpop.f32.mrf.mxu3  ;;  %v5202_v4 = vpop.f32.mrf.mxu0 }
 0x657   : > { %v5286_v36 = vadd.f32 %v5285_v38, %v5202_v4  ;;  %v8819_v4 = vld [vmem:[%s15147_s3 + $0xf08] sm:$0xff] }
 0x658   : > { %v13463_v60 = vadd.f32 %v5448_v20, %v5366_v42  ;;  %8725 = vmatmul.msk.f32.gmra.mxu1 %vm3642_vm5, %v8662_v56  ;;  %v8667_v42 = vld [vmem:[%s15147_s3 + $0xb00] sm:$0xff] }
 0x659   : > { %5515 = vmatmul.f32.gmra.mxu0 %v8661_v14  ;;  %v8818_v56 = vld [vmem:[%s15147_s3 + $0xf00] sm:$0xff]  ;;  %v15747_v14 = vld [vmem:[#allocation81_spill] sm:$0xff] }
 0x65a   : > { %15744 = vst [vmem:[#allocation233_spill] sm:$0xff] %v13463_v60  ;;  %5902 = vmatmul.f32.gmra.mxu2 %v8812_v41  ;;  %5985 = vmatmul.f32.gmra.mxu3 %v8813_v26  ;;  %v15746_v20 = vld [vmem:[#allocation82_spill] sm:$0xff]  ;;  %v15748_v26 = vld [vmem:[#allocation139_spill] sm:$0xff] }
 0x65b   : > { %v3813_v41 = vadd.f32 %v15747_v14, %v15746_v20 }
 0x65d   : > { %v5288_v22 = vpop.f32.mrf.mxu1  ;;  %v5368_v37 = vpop.f32.mrf.mxu2  ;;  %v3896_v46 = vadd.f32 %v15750_v0, %v3813_v41  ;;  %v8824_v0 = vld [vmem:[%s15147_s3 + $0xf30] sm:$0xff] }
 0x65e   : > { %v5369_v2 = vadd.f32 %v5368_v37, %v5286_v36  ;;  %v5451_v5 = vpop.f32.mrf.mxu3  ;;  %v5205_v15 = vpop.f32.mrf.mxu0  ;;  %v15749_v36 = vld [vmem:[#allocation141_spill] sm:$0xff] }
 0x65f   : > { %v4510_v37 = vadd.f32 %v15749_v36, %v15748_v26  ;;  %v5289_v60 = vadd.f32 %v5288_v22, %v5205_v15  ;;  %v8673_v15 = vld [vmem:[%s15147_s3 + $0xb30] sm:$0xff]  ;;  %v5232_v36 = vadd.f32 %v13180_v16, %v13184_v34  ;;  %v8830_v16 = vld [vmem:[%s15147_s3 + $0xf60] sm:$0xff] }
 0x660   : > { %v13478_v38 = vadd.f32 %v5451_v5, %v5369_v2  ;;  %8726 = vmatmul.msk.f32.gmra.mxu1 %vm3642_vm5, %v8668_v18  ;;  %v5229_v2 = vadd.f32 %v13149_v25, %v13164_v23  ;;  %v8674_v18 = vld [vmem:[%s15147_s3 + $0xb38] sm:$0xff] }
 0x661   : > { %5518 = vmatmul.f32.gmra.mxu0 %v8667_v42  ;;  %v4593_v8 = vadd.f32 %v12654_v12, %v4510_v37  ;;  %v8825_v25 = vld [vmem:[%s15147_s3 + $0xf38] sm:$0xff] }
 0x662   : > { %15745 = vst [vmem:[#allocation234_spill] sm:$0xff] %v13478_v38  ;;  %5905 = vmatmul.f32.gmra.mxu2 %v8818_v56  ;;  %5988 = vmatmul.f32.gmra.mxu3 %v8819_v4  ;;  %v5312_v56 = vadd.f32 %v13172_v1, %v5229_v2 }
 0x663   : > { %v4676_v12 = vadd.f32 %v12647_v27, %v4593_v8  ;;  %v15752_v8 = vld [vmem:[#allocation138_spill] sm:$0xff] }
 0x664   : > { %v5395_v41 = vadd.f32 %v13182_v48, %v5312_v56  ;;  %v8831_v48 = vld [vmem:[%s15147_s3 + $0xf68] sm:$0xff] }
 0x665   : > { %v5291_v5 = vpop.f32.mrf.mxu1  ;;  %v5371_v38 = vpop.f32.mrf.mxu2  ;;  %v4759_v42 = vadd.f32 %v12670_v55, %v4676_v12  ;;  %v8680_v55 = vld [vmem:[%s15147_s3 + $0xb68] sm:$0xff] }
 0x666   : > { %v5372_v20 = vadd.f32 %v5371_v38, %v5289_v60  ;;  %v5454_v14 = vpop.f32.mrf.mxu3  ;;  %v5208_v26 = vpop.f32.mrf.mxu0  ;;  %v15751_v60 = vld [vmem:[#allocation85_spill] sm:$0xff] }
 0x667   : > { %v3979_v22 = vadd.f32 %v15751_v60, %v3896_v46  ;;  %v5292_v27 = vadd.f32 %v5291_v5, %v5208_v26  ;;  %v4842_v38 = vadd.f32 %v12673_v39, %v4759_v42  ;;  %v8679_v5 = vld [vmem:[%s15147_s3 + $0xb60] sm:$0xff]  ;;  %v8686_v42 = vld [vmem:[%s15147_s3 + $0xb98] sm:$0xff] }
 0x668   : > { %v13502_v23 = vadd.f32 %v5454_v14, %v5372_v20  ;;  %8727 = vmatmul.msk.f32.gmra.mxu1 %vm3642_vm5, %v8674_v18  ;;  %v15753_v20 = vld [vmem:[#allocation135_spill] sm:$0xff] }
 0x669   : > { %5521 = vmatmul.f32.gmra.mxu0 %v8673_v15  ;;  %v4062_v4 = vadd.f32 %v15752_v8, %v3979_v22  ;;  %v5315_v15 = vadd.f32 %v13198_v13, %v5232_v36  ;;  %v8685_v13 = vld [vmem:[%s15147_s3 + $0xb90] sm:$0xff] }
 0x66a   : > { %5908 = vmatmul.f32.gmra.mxu2 %v8824_v0  ;;  %5991 = vmatmul.f32.gmra.mxu3 %v8825_v25 }
 0x66b   : > { %v4145_v39 = vadd.f32 %v15753_v20, %v4062_v4  ;;  %v5398_v25 = vadd.f32 %v13200_v31, %v5315_v15  ;;  %v8837_v31 = vld [vmem:[%s15147_s3 + $0xf98] sm:$0xff]  ;;  %v8842_v20 = vld [vmem:[%s15147_s3 + $0xfc0] sm:$0xff] }
 0x66c   : > { %v15756_v15 = vld [vmem:[#allocation157_spill] sm:$0xff] }
 0x66d   : > { %v5560_v37 = vpop.f32.mrf.mxu1  ;;  %v5374_v18 = vpop.f32.mrf.mxu2  ;;  %v4907_v26 = vmax.f32 %v4145_v39, %v4842_v38  ;;  %v8836_v38 = vld [vmem:[%s15147_s3 + $0xf90] sm:$0xff]  ;;  %v8843_v39 = vld [vmem:[%s15147_s3 + $0xfc8] sm:$0xff] }
 0x66e   : > { %v5375_v46 = vadd.f32 %v5374_v18, %v5292_v27  ;;  %v5457_v1 = vpop.f32.mrf.mxu3  ;;  %v5477_v2 = vpop.f32.mrf.mxu0  ;;  %v8692_v18 = vld [vmem:[%s15147_s3 + $0xbc8] sm:$0xff] }
 0x66f   : > { %v5478_v14 = vadd.f32 %v5477_v2, %v5395_v41 }
 0x670   : > { %v13526_v34 = vadd.f32 %v5457_v1, %v5375_v46  ;;  %8728 = vmatmul.msk.f32.gmra.mxu1 %vm3642_vm5, %v8680_v55  ;;  %v8691_v1 = vld [vmem:[%s15147_s3 + $0xbc0] sm:$0xff] }
 0x671   : > { %v5561_v12 = vadd.f32 %v5560_v37, %v5478_v14  ;;  %5524 = vmatmul.f32.gmra.mxu0 %v8679_v5  ;;  %v15754_v14 = vld [vmem:[#allocation98_spill] sm:$0xff] }
 0x672   : > { %5911 = vmatmul.f32.gmra.mxu2 %v8830_v16  ;;  %5994 = vmatmul.f32.gmra.mxu3 %v8831_v48  ;;  %v15755_v16 = vld [vmem:[#allocation95_spill] sm:$0xff] }
 0x673   : > { %v13530_v0 = vmax.f32 %v4907_v26, %v5561_v12  ;;  %v3825_v48 = vadd.f32 %v15755_v16, %v15754_v14  ;;  %v15757_v12 = vld [vmem:[#allocation100_spill] sm:$0xff] }
 0x674   : > { %v15762_v14 = vld [vmem:[#allocation104_spill] sm:$0xff] }
 0x675   : > { %v5563_v60 = vpop.f32.mrf.mxu1  ;;  %v5864_v22 = vpop.f32.mrf.mxu2 }
 0x676   : > { %v5947_v56 = vpop.f32.mrf.mxu3  ;;  %v5480_v27 = vpop.f32.mrf.mxu0 }
 0x677   : > { %v13539_v8 = vadd.f32 %v5947_v56, %v5864_v22  ;;  %v5481_v4 = vadd.f32 %v5480_v27, %v5398_v25  ;;  %v3908_v25 = vadd.f32 %v15757_v12, %v3825_v48 }
 0x678   : > { %8729 = vmatmul.msk.f32.gmra.mxu1 %vm3642_vm5, %v8686_v42  ;;  %v8698_v42 = vld [vmem:[%s15147_s3 + $0xbf8] sm:$0xff] }
 0x679   : > { %v13548_v41 = vadd.f32 %v5563_v60, %v5481_v4  ;;  %5527 = vmatmul.f32.gmra.mxu0 %v8685_v13  ;;  %v8697_v13 = vld [vmem:[%s15147_s3 + $0xbf0] sm:$0xff] }
 0x67a   : > { %5914 = vmatmul.f32.gmra.mxu2 %v8836_v38  ;;  %5997 = vmatmul.f32.gmra.mxu3 %v8837_v31  ;;  %v8848_v31 = vld [vmem:[%s15147_s3 + $0xff0] sm:$0xff] }
 0x67d   : > { %v5566_v36 = vpop.f32.mrf.mxu1  ;;  %v5867_v37 = vpop.f32.mrf.mxu2 }
 0x67e   : > { %v5950_v55 = vpop.f32.mrf.mxu3  ;;  %v5483_v46 = vpop.f32.mrf.mxu0 }
 0x67f   : > { %v13556_v2 = vadd.f32 %v5950_v55, %v5867_v37  ;;  %v5484_v5 = vadd.f32 %v5483_v46, %v13214_v54  ;;  %v4605_v54 = vadd.f32 %v12741_v50, %v15756_v15  ;;  %v15758_v37 = vld [vmem:[#allocation102_spill] sm:$0xff]  ;;  %v15760_v46 = vld [vmem:[#allocation101_spill] sm:$0xff] }
 0x680   : > { %8730 = vmatmul.msk.f32.gmra.mxu1 %vm3642_vm5, %v8692_v18  ;;  %v15759_v18 = vld [vmem:[#allocation99_spill] sm:$0xff] }
 0x681   : > { %v13568_v26 = vadd.f32 %v5566_v36, %v5484_v5  ;;  %5530 = vmatmul.f32.gmra.mxu0 %v8691_v1  ;;  %v4688_v4 = vadd.f32 %v12732_v58, %v4605_v54  ;;  %v8849_v36 = vld [vmem:[%s15147_s3 + $0xff8] sm:$0xff]  ;;  %v3828_v55 = vadd.f32 %v15759_v18, %v15758_v37  ;;  %v3991_v1 = vadd.f32 %v15760_v46, %v3908_v25 }
 0x682   : > { %5917 = vmatmul.f32.gmra.mxu2 %v8842_v20  ;;  %6000 = vmatmul.f32.gmra.mxu3 %v8843_v39  ;;  %v4608_v39 = vadd.f32 %v12762_v9, %v12290_v49  ;;  %v4611_v46 = vadd.f32 %v12783_v40, %v12316_v6 }
 0x683   : > { %v4771_v58 = vadd.f32 %v12758_v28, %v4688_v4  ;;  %v3911_v16 = vadd.f32 %v15762_v14, %v3828_v55  ;;  %v8704_v28 = vld [vmem:[%s15147_s3 + $0xc28] sm:$0xff] }
 0x684   : > { %v4691_v49 = vadd.f32 %v12753_v51, %v4608_v39  ;;  %v4694_v40 = vadd.f32 %v12774_v52, %v4611_v46  ;;  %v8738_v46 = vld [vmem:[%s15147_s3 + $0xc80] sm:$0xff] }
 0x685   : > { %v5569_v60 = vpop.f32.mrf.mxu1  ;;  %v5870_v22 = vpop.f32.mrf.mxu2  ;;  %v4854_v48 = vadd.f32 %v12760_v35, %v4771_v58  ;;  %v15768_v58 = vld [vmem:[#allocation107_spill] sm:$0xff] }
 0x686   : > { %v5953_v56 = vpop.f32.mrf.mxu3  ;;  %v5486_v27 = vpop.f32.mrf.mxu0  ;;  %v4774_v37 = vadd.f32 %v12779_v63, %v4691_v49  ;;  %v8710_v63 = vld [vmem:[%s15147_s3 + $0xc58] sm:$0x3]  ;;  %v15772_v49 = vld [vmem:[#allocation8_spill] sm:$0xff] }
 0x687   : > { %v13580_v38 = vadd.f32 %v5953_v56, %v5870_v22  ;;  %v5487_v50 = vadd.f32 %v5486_v27, %v13234_v33  ;;  %v15761_v33 = vld [vmem:[#allocation154_spill] sm:$0xff]  ;;  %v15763_v22 = vld [vmem:[#allocation152_spill] sm:$0xff] }
 0x688   : > { %8731 = vmatmul.msk.f32.gmra.mxu1 %vm3642_vm5, %v8698_v42  ;;  %v4074_v20 = vadd.f32 %v15761_v33, %v3991_v1  ;;  %v8854_v56 = vld [vmem:[%s15147_s3 + $0x1020] sm:$0xff]  ;;  %v8855_v27 = vld [vmem:[%s15147_s3 + $0x1028] sm:$0xff] }
 0x689   : > { %v13594_v5 = vadd.f32 %v5569_v60, %v5487_v50  ;;  %5533 = vmatmul.f32.gmra.mxu0 %v8697_v13  ;;  %v8703_v60 = vld [vmem:[%s15147_s3 + $0xc20] sm:$0xff]  ;;  %v15764_v13 = vld [vmem:[#allocation105_spill] sm:$0xff] }
 0x68a   : > { %5920 = vmatmul.f32.gmra.mxu2 %v8848_v31  ;;  %6003 = vmatmul.f32.gmra.mxu3 %v8849_v36  ;;  %v4157_v42 = vadd.f32 %v15763_v22, %v4074_v20  ;;  %v3994_v4 = vadd.f32 %v15764_v13, %v3911_v16  ;;  %v15765_v50 = vld [vmem:[#allocation106_spill] sm:$0xff]  ;;  %v15766_v31 = vld [vmem:[#allocation103_spill] sm:$0xff]  ;;  %v4857_v20 = vadd.f32 %v12781_v57, %v4774_v37 }
 0x68b   : > { %v3831_v36 = vadd.f32 %v15766_v31, %v15765_v50  ;;  %v15771_v22 = vld [vmem:[#allocation7_spill] sm:$0xff]  ;;  %v4614_v13 = vadd.f32 %v12810_v43, %v12348_v7  ;;  %v15773_v50 = vld [vmem:[#allocation108_spill] sm:$0xff] }
 0x68c   : > { %v4911_v51 = vmax.f32 %v4157_v42, %v4854_v48 }
 0x68d   : > { %v5572_v15 = vpop.f32.mrf.mxu1  ;;  %v5873_v54 = vpop.f32.mrf.mxu2  ;;  %v3914_v33 = vadd.f32 %v15768_v58, %v3831_v36  ;;  %v4697_v43 = vadd.f32 %v12800_v44, %v4614_v13  ;;  %v8739_v58 = vld [vmem:[%s15147_s3 + $0xc88] sm:$0xff] }
 0x68e   : > { %v5956_v12 = vpop.f32.mrf.mxu3  ;;  %v5489_v25 = vpop.f32.mrf.mxu0 }
 0x68f   : > { %v13609_v9 = vadd.f32 %v5956_v12, %v5873_v54  ;;  %v5490_v35 = vadd.f32 %v5489_v25, %v13254_v11  ;;  %v15767_v11 = vld [vmem:[#allocation156_spill] sm:$0xff]  ;;  %v15769_v54 = vld [vmem:[#allocation155_spill] sm:$0xff]  ;;  %v8861_v25 = vld [vmem:[%s15147_s3 + $0x1058] sm:$0x3]  ;;  %v4780_v44 = vadd.f32 %v12836_v21, %v4697_v43 }
 0x690   : > { %8732 = vmatmul.msk.f32.gmra.mxu1 %vm3642_vm5, %v8704_v28  ;;  %v4077_v55 = vadd.f32 %v15767_v11, %v3994_v4  ;;  %v8860_v12 = vld [vmem:[%s15147_s3 + $0x1050] sm:$0x3]  ;;  %v8743_v21 = vld [vmem:[%s15147_s3 + $0xca8] sm:$0xff] }
 0x691   : > { %v5573_v18 = vadd.f32 %v5572_v15, %v5490_v35  ;;  %5536 = vmatmul.f32.gmra.mxu0 %v8703_v60  ;;  %v8709_v15 = vld [vmem:[%s15147_s3 + $0xc50] sm:$0x3]  ;;  %v15770_v60 = vld [vmem:[#allocation9_spill] sm:$0xff]  ;;  %v3997_v35 = vadd.f32 %v15772_v49, %v3914_v33  ;;  %v15774_v33 = vld [vmem:[#allocation11_spill] sm:$0xff] }
 0x692   : > { %5923 = vmatmul.f32.gmra.mxu2 %v8854_v56  ;;  %6006 = vmatmul.f32.gmra.mxu3 %v8855_v27  ;;  %v4160_v6 = vadd.f32 %v15769_v54, %v4077_v55  ;;  %v3834_v42 = vadd.f32 %v15771_v22, %v15770_v60  ;;  %v4777_v56 = vadd.f32 %v12804_v62, %v4694_v40  ;;  %v8737_v62 = vld [vmem:[%s15147_s3 + $0xc78] sm:$0xff] }
 0x693   : > { %v13626_v1 = vmax.f32 %v4911_v51, %v5573_v18  ;;  %v15777_v54 = vld [vmem:[#allocation14_spill] sm:$0xff]  ;;  %v4863_v40 = vadd.f32 %v12838_v3, %v4780_v44 }
 0x694   : > { %v4912_v52 = vmax.f32 %v4160_v6, %v4857_v20  ;;  %v3917_v31 = vadd.f32 %v15773_v50, %v3834_v42  ;;  %v4860_v36 = vadd.f32 %v12806_v24, %v4777_v56  ;;  %v8744_v42 = vld [vmem:[%s15147_s3 + $0xcb0] sm:$0xff]  ;;  %v8745_v49 = vld [vmem:[%s15147_s3 + $0xcb8] sm:$0xff] }
 0x695   : > { %v5575_v39 = vpop.f32.mrf.mxu1  ;;  %v5876_v14 = vpop.f32.mrf.mxu2 }
 0x696   : > { %v5959_v16 = vpop.f32.mrf.mxu3  ;;  %v5492_v48 = vpop.f32.mrf.mxu0  ;;  %v4000_v20 = vadd.f32 %v15774_v33, %v3917_v31  ;;  %v15782_v31 = vld [vmem:[#allocation71_spill] sm:$0xff]  ;;  %v15786_v33 = vld [vmem:[#allocation65_spill] sm:$0xff] }
 0x697   : > { %v13638_v28 = vadd.f32 %v5959_v16, %v5876_v14  ;;  %v5493_v57 = vadd.f32 %v5492_v48, %v13268_v32  ;;  %v4080_v32 = vadd.f32 %v12285_v29, %v3997_v35  ;;  %v8736_v29 = vld [vmem:[%s15147_s3 + $0xc70] sm:$0xff]  ;;  %v15776_v14 = vld [vmem:[#allocation10_spill] sm:$0xff]  ;;  %v4617_v48 = vadd.f32 %v12842_v45, %v12377_v10  ;;  %v15778_v35 = vld [vmem:[#allocation15_spill] sm:$0xff] }
 0x698   : > { %8733 = vmatmul.msk.f32.gmra.mxu1 %vm3642_vm5, %v8710_v63 }
 0x699   : > { %v5576_v27 = vadd.f32 %v5575_v39, %v5493_v57  ;;  %5539 = vmatmul.f32.gmra.mxu0 %v8709_v15  ;;  %v4163_v7 = vadd.f32 %v12280_v47, %v4080_v32  ;;  %v15775_v39 = vld [vmem:[#allocation12_spill] sm:$0xff]  ;;  %v4700_v45 = vadd.f32 %v12833_v17, %v4617_v48  ;;  %v15789_v48 = vld [vmem:[#allocation25_spill] sm:$0xff] }
 0x69a   : > { %5926 = vmatmul.f32.gmra.mxu2 %v8860_v12  ;;  %6009 = vmatmul.f32.gmra.mxu3 %v8861_v25  ;;  %v3837_v47 = vadd.f32 %v15776_v14, %v15775_v39  ;;  %v15787_v39 = vld [vmem:[#allocation39_spill] sm:$0xff] }
 0x69b   : > { %v13655_v4 = vmax.f32 %v4912_v52, %v5576_v27  ;;  %v4913_v63 = vmax.f32 %v4163_v7, %v4860_v36  ;;  %v15779_v52 = vld [vmem:[#allocation13_spill] sm:$0xff]  ;;  %v15780_v27 = vld [vmem:[#allocation23_spill] sm:$0xff]  ;;  %v4783_v17 = vadd.f32 %v12870_v53, %v4700_v45  ;;  %v15794_v45 = vld [vmem:[#allocation74_spill] sm:$0xff] }
 0x69c   : > { %v3920_v6 = vadd.f32 %v15777_v54, %v3837_v47  ;;  %v3840_v56 = vadd.f32 %v15779_v52, %v15778_v35  ;;  %v15783_v36 = vld [vmem:[#allocation53_spill] sm:$0xff]  ;;  %v15796_v35 = vld [vmem:[#allocation18_spill] sm:$0xff] }
 0x69d   : > { %v5578_v51 = vpop.f32.mrf.mxu1  ;;  %v5879_v37 = vpop.f32.mrf.mxu2  ;;  %v8749_v53 = vld [vmem:[%s15147_s3 + $0xcd8] sm:$0xff] }
 0x69e   : > { %v5962_v18 = vpop.f32.mrf.mxu3  ;;  %v5495_v11 = vpop.f32.mrf.mxu0 }
 0x69f   : > { %v13667_v55 = vadd.f32 %v5962_v18, %v5879_v37  ;;  %v5496_v24 = vadd.f32 %v5495_v11, %v13283_v61  ;;  %v4083_v61 = vadd.f32 %v12313_v19, %v4000_v20  ;;  %v8742_v19 = vld [vmem:[%s15147_s3 + $0xca0] sm:$0xff]  ;;  %v15785_v11 = vld [vmem:[#allocation40_spill] sm:$0xff] }
 0x6a0   : > { %6112 = vmatmul.f32.vlgmr.msra.gmra.mxu1 %v8737_v62  ;;  %v15784_v62 = vld [vmem:[#allocation16_spill] sm:$0xff] }
 0x6a1   : > { %v5579_v16 = vadd.f32 %v5578_v51, %v5496_v24  ;;  %6029 = vmatmul.f32.vlgmr.msra.gmra.mxu0 %v8736_v29  ;;  %v4166_v10 = vadd.f32 %v12305_v30, %v4083_v61  ;;  %v4003_v30 = vadd.f32 %v15780_v27, %v3920_v6  ;;  %v4620_v51 = vadd.f32 %v15783_v36, %v15782_v31  ;;  %v8751_v61 = vld [vmem:[%s15147_s3 + $0xce8] sm:$0xff]  ;;  %v15790_v6 = vld [vmem:[#allocation17_spill] sm:$0xff] }
 0x6a2   : > { %6195 = vmatmul.f32.vlgmr.msra.gmra.mxu2 %v8738_v46  ;;  %8867 = vmatmul.msk.f32.vlgmr.msra.gmra.mxu3 %vm3642_vm5, %v8739_v58  ;;  %v3923_v18 = vadd.f32 %v15784_v62, %v3840_v56  ;;  %v4866_v29 = vadd.f32 %v15785_v11, %v4783_v17  ;;  %v8748_v58 = vld [vmem:[%s15147_s3 + $0xcd0] sm:$0xff]  ;;  %v15797_v56 = vld [vmem:[#allocation55_spill] sm:$0xff] }
 0x6a3   : > { %v13684_v15 = vmax.f32 %v4913_v63, %v5579_v16  ;;  %v4914_v32 = vmax.f32 %v4166_v10, %v4863_v40  ;;  %v4703_v14 = vadd.f32 %v15787_v39, %v4620_v51  ;;  %v15788_v63 = vld [vmem:[#allocation223_spill] sm:$0xff]  ;;  %v15791_v40 = vld [vmem:[#allocation24_spill] sm:$0xff]  ;;  %v15799_v51 = vld [vmem:[#allocation54_spill] sm:$0xff] }
 0x6a4   : > { %v8750_v16 = vld [vmem:[%s15147_s3 + $0xce0] sm:$0xff]  ;;  %v4006_v54 = vadd.f32 %v15789_v48, %v3923_v18  ;;  %v8755_v17 = vld [vmem:[%s15147_s3 + $0xd08] sm:$0xff]  ;;  %v15807_v48 = vld [vmem:[#allocation57_spill] sm:$0xff] }
 0x6a5   : > { %v5581_v57 = vpop.f32.mrf.mxu1  ;;  %v5882_v12 = vpop.f32.mrf.mxu2  ;;  %v15798_v31 = vld [vmem:[#allocation67_spill] sm:$0xff]  ;;  %v15800_v11 = vld [vmem:[#allocation224_spill] sm:$0xff] }
 0x6a6   : > { %v5965_v25 = vpop.f32.mrf.mxu3  ;;  %v5498_v60 = vpop.f32.mrf.mxu0  ;;  %v15804_v39 = vld [vmem:[#allocation43_spill] sm:$0xff] }
 0x6a7   : > { %v13696_v22 = vadd.f32 %v5965_v25, %v5882_v12  ;;  %v5499_v3 = vadd.f32 %v5498_v60, %v13298_v59  ;;  %v15781_v59 = vld [vmem:[#allocation66_spill] sm:$0xff] }
 0x6a8   : > { %6115 = vmatmul.f32.gmra.mxu1 %v8743_v21  ;;  %v4086_v50 = vadd.f32 %v15781_v59, %v4003_v30  ;;  %v15792_v21 = vld [vmem:[#allocation41_spill] sm:$0xff] }
 0x6a9   : > { %v5582_v13 = vadd.f32 %v5581_v57, %v5499_v3  ;;  %6032 = vmatmul.f32.gmra.mxu0 %v8742_v19  ;;  %v3843_v57 = vadd.f32 %v15791_v40, %v15790_v6  ;;  %v4786_v25 = vadd.f32 %v15792_v21, %v4703_v14  ;;  %v15793_v19 = vld [vmem:[#allocation68_spill] sm:$0xff]  ;;  %v15795_v3 = vld [vmem:[#allocation42_spill] sm:$0xff] }
 0x6aa   : > { %6198 = vmatmul.f32.gmra.mxu2 %v8744_v42  ;;  %8868 = vmatmul.msk.f32.gmra.mxu3 %vm3642_vm5, %v8745_v49  ;;  %v4169_v20 = vadd.f32 %v15786_v33, %v4086_v50  ;;  %v4089_v10 = vadd.f32 %v15793_v19, %v4006_v54  ;;  %v4623_v42 = vadd.f32 %v15795_v3, %v15794_v45  ;;  %v8754_v50 = vld [vmem:[%s15147_s3 + $0xd00] sm:$0xff]  ;;  %v15808_v40 = vld [vmem:[#allocation20_spill] sm:$0xff]  ;;  %v8761_v19 = vld [vmem:[%s15147_s3 + $0xd38] sm:$0xff] }
 0x6ab   : > { %v13713_v37 = vmax.f32 %v4914_v32, %v5582_v13  ;;  %v3926_v52 = vadd.f32 %v15796_v35, %v3843_v57  ;;  %v4869_v27 = vadd.f32 %v15797_v56, %v4786_v25  ;;  %v8760_v3 = vld [vmem:[%s15147_s3 + $0xd30] sm:$0xff] }
 0x6ac   : > { %v4915_v12 = vmax.f32 %v4169_v20, %v4866_v29  ;;  %v4172_v36 = vadd.f32 %v15798_v31, %v4089_v10  ;;  %v4706_v62 = vadd.f32 %v15799_v51, %v4623_v42  ;;  %v15810_v42 = vld [vmem:[#allocation69_spill] sm:$0xff] }
 0x6ad   : > { %v5584_v7 = vpop.f32.mrf.mxu1  ;;  %v5885_v43 = vpop.f32.mrf.mxu2  ;;  %v15814_v31 = vld [vmem:[#allocation21_spill] sm:$0xff] }
 0x6ae   : > { %v5968_v24 = vpop.f32.mrf.mxu3  ;;  %v5501_v46 = vpop.f32.mrf.mxu0  ;;  %v4916_v20 = vmax.f32 %v4172_v36, %v4869_v27  ;;  %v4789_v14 = vadd.f32 %v15804_v39, %v4706_v62  ;;  %v15815_v36 = vld [vmem:[#allocation28_spill] sm:$0xff] }
 0x6af   : > { %v13725_v47 = vadd.f32 %v5968_v24, %v5885_v43  ;;  %v5502_v44 = vadd.f32 %v5501_v46, %v15788_v63  ;;  %v8757_v43 = vld [vmem:[%s15147_s3 + $0xd18] sm:$0xff]  ;;  %v3849_v51 = vadd.f32 %v15815_v36, %v15814_v31  ;;  %v15830_v36 = vld [vmem:[#allocation160_spill] sm:$0xff] }
 0x6b0   : > { %6118 = vmatmul.f32.gmra.mxu1 %v8749_v53  ;;  %v15801_v53 = vld [vmem:[#allocation19_spill] sm:$0xff]  ;;  %v15802_v24 = vld [vmem:[#allocation26_spill] sm:$0xff] }
 0x6b1   : > { %v5585_v60 = vadd.f32 %v5584_v7, %v5502_v44  ;;  %6035 = vmatmul.f32.gmra.mxu0 %v8748_v58  ;;  %v8756_v7 = vld [vmem:[%s15147_s3 + $0xd10] sm:$0xff]  ;;  %v3846_v46 = vadd.f32 %v15802_v24, %v15801_v53  ;;  %v15803_v58 = vld [vmem:[#allocation27_spill] sm:$0xff]  ;;  %v15805_v44 = vld [vmem:[#allocation70_spill] sm:$0xff] }
 0x6b2   : > { %6201 = vmatmul.f32.gmra.mxu2 %v8750_v16  ;;  %8869 = vmatmul.msk.f32.gmra.mxu3 %vm3642_vm5, %v8751_v61  ;;  %v4009_v33 = vadd.f32 %v15803_v58, %v3926_v52  ;;  %v15806_v61 = vld [vmem:[#allocation77_spill] sm:$0xff]  ;;  %v15811_v52 = vld [vmem:[#allocation56_spill] sm:$0xff] }
 0x6b3   : > { %v13742_v49 = vmax.f32 %v4915_v12, %v5585_v60  ;;  %v4626_v54 = vadd.f32 %v15807_v48, %v15806_v61  ;;  %v3929_v57 = vadd.f32 %v15808_v40, %v3846_v46  ;;  %v15809_v12 = vld [vmem:[#allocation44_spill] sm:$0xff]  ;;  %v15819_v46 = vld [vmem:[#allocation46_spill] sm:$0xff] }
 0x6b4   : > { %v4092_v16 = vadd.f32 %v15805_v44, %v4009_v33  ;;  %v4872_v21 = vadd.f32 %v15809_v12, %v4789_v14  ;;  %v15818_v24 = vld [vmem:[#allocation80_spill] sm:$0xff]  ;;  %v15821_v14 = vld [vmem:[#allocation59_spill] sm:$0xff] }
 0x6b5   : > { %v5587_v30 = vpop.f32.mrf.mxu1  ;;  %v5888_v32 = vpop.f32.mrf.mxu2  ;;  %v4709_v56 = vadd.f32 %v15811_v52, %v4626_v54  ;;  %v4629_v58 = vadd.f32 %v15819_v46, %v15818_v24  ;;  %v8767_v61 = vld [vmem:[%s15147_s3 + $0xd68] sm:$0xff]  ;;  %v8766_v40 = vld [vmem:[%s15147_s3 + $0xd60] sm:$0xff] }
 0x6b6   : > { %v5971_v13 = vpop.f32.mrf.mxu3  ;;  %v5504_v59 = vpop.f32.mrf.mxu0  ;;  %v4175_v35 = vadd.f32 %v15810_v42, %v4092_v16  ;;  %v15825_v42 = vld [vmem:[#allocation32_spill] sm:$0xff] }
 0x6b7   : > { %v13754_v18 = vadd.f32 %v5971_v13, %v5888_v32  ;;  %v5505_v29 = vadd.f32 %v5504_v59, %v15800_v11  ;;  %v8763_v13 = vld [vmem:[%s15147_s3 + $0xd48] sm:$0xff]  ;;  %v15813_v59 = vld [vmem:[#allocation29_spill] sm:$0xff] }
 0x6b8   : > { %6121 = vmatmul.f32.gmra.mxu1 %v8755_v17  ;;  %v8762_v17 = vld [vmem:[%s15147_s3 + $0xd40] sm:$0xff]  ;;  %v4917_v62 = vmax.f32 %v4175_v35, %v4872_v21  ;;  %v15816_v11 = vld [vmem:[#allocation45_spill] sm:$0xff] }
 0x6b9   : > { %v5588_v63 = vadd.f32 %v5587_v30, %v5505_v29  ;;  %6038 = vmatmul.f32.gmra.mxu0 %v8754_v50  ;;  %v15812_v30 = vld [vmem:[#allocation225_spill] sm:$0xff]  ;;  %v4012_v50 = vadd.f32 %v15813_v59, %v3929_v57  ;;  %v4792_v29 = vadd.f32 %v15816_v11, %v4709_v56  ;;  %v15822_v57 = vld [vmem:[#allocation72_spill] sm:$0xff]  ;;  %v15823_v21 = vld [vmem:[#allocation58_spill] sm:$0xff] }
 0x6ba   : > { %6204 = vmatmul.f32.gmra.mxu2 %v8756_v7  ;;  %8870 = vmatmul.msk.f32.gmra.mxu3 %vm3642_vm5, %v8757_v43  ;;  %v15817_v43 = vld [vmem:[#allocation73_spill] sm:$0xff]  ;;  %v15826_v35 = vld [vmem:[#allocation30_spill] sm:$0xff]  ;;  %v15827_v56 = vld [vmem:[#allocation31_spill] sm:$0xff] }
 0x6bb   : > { %v13771_v6 = vmax.f32 %v4916_v20, %v5588_v63  ;;  %v4095_v53 = vadd.f32 %v15817_v43, %v4012_v50  ;;  %v15820_v20 = vld [vmem:[#allocation22_spill] sm:$0xff]  ;;  %v4875_v63 = vadd.f32 %v15821_v14, %v4792_v29  ;;  %v3852_v52 = vadd.f32 %v15826_v35, %v15825_v42  ;;  %v15829_v50 = vld [vmem:[#allocation76_spill] sm:$0xff]  ;;  %v15840_v42 = vld [vmem:[#allocation49_spill] sm:$0xff] }
 0x6bc   : > { %v3932_v39 = vadd.f32 %v15820_v20, %v3849_v51  ;;  %v15831_v51 = vld [vmem:[#allocation61_spill] sm:$0xff]  ;;  %v15832_v29 = vld [vmem:[#allocation34_spill] sm:$0xff]  ;;  %v15833_v43 = vld [vmem:[#allocation48_spill] sm:$0xff] }
 0x6bd   : > { %v5590_v25 = vpop.f32.mrf.mxu1  ;;  %v5891_v60 = vpop.f32.mrf.mxu2  ;;  %v4178_v12 = vadd.f32 %v15822_v57, %v4095_v53  ;;  %v8772_v14 = vld [vmem:[%s15147_s3 + $0xd90] sm:$0xff]  ;;  %v8774_v57 = vld [vmem:[%s15147_s3 + $0xda0] sm:$0xff] }
 0x6be   : > { %v5974_v10 = vpop.f32.mrf.mxu3  ;;  %v5507_v45 = vpop.f32.mrf.mxu0 }
 0x6bf   : > { %v13783_v27 = vadd.f32 %v5974_v10, %v5891_v60  ;;  %v5508_v32 = vadd.f32 %v5507_v45, %v15812_v30  ;;  %v8768_v45 = vld [vmem:[%s15147_s3 + $0xd70] sm:$0xff]  ;;  %v4015_v30 = vadd.f32 %v15827_v56, %v3932_v39  ;;  %v15841_v56 = vld [vmem:[#allocation79_spill] sm:$0xff] }
 0x6c0   : > { %6124 = vmatmul.f32.gmra.mxu1 %v8761_v19  ;;  %v15824_v19 = vld [vmem:[#allocation226_spill] sm:$0xff] }
 0x6c1   : > { %v5591_v7 = vadd.f32 %v5590_v25, %v5508_v32  ;;  %6041 = vmatmul.f32.gmra.mxu0 %v8760_v3  ;;  %v4712_v25 = vadd.f32 %v15823_v21, %v4629_v58  ;;  %v8769_v3 = vld [vmem:[%s15147_s3 + $0xd78] sm:$0xff]  ;;  %v4918_v32 = vmax.f32 %v4178_v12, %v4875_v63  ;;  %v4098_v31 = vadd.f32 %v15829_v50, %v4015_v30  ;;  %v15834_v63 = vld [vmem:[#allocation75_spill] sm:$0xff] }
 0x6c2   : > { %6207 = vmatmul.f32.gmra.mxu2 %v8762_v17  ;;  %8871 = vmatmul.msk.f32.gmra.mxu3 %vm3642_vm5, %v8763_v13  ;;  %v15828_v17 = vld [vmem:[#allocation47_spill] sm:$0xff]  ;;  %v8773_v58 = vld [vmem:[%s15147_s3 + $0xd98] sm:$0xff] }
 0x6c3   : > { %v13800_v33 = vmax.f32 %v4917_v62, %v5591_v7  ;;  %v4795_v13 = vadd.f32 %v15828_v17, %v4712_v25  ;;  %v4632_v62 = vadd.f32 %v15831_v51, %v15830_v36  ;;  %v3935_v7 = vadd.f32 %v15832_v29, %v3852_v52  ;;  %v8775_v12 = vld [vmem:[%s15147_s3 + $0xda8] sm:$0xff]  ;;  %v15843_v17 = vld [vmem:[#allocation50_spill] sm:$0xff] }
 0x6c4   : > { %v15837_v21 = vld [vmem:[#allocation35_spill] sm:$0xff]  ;;  %v15844_v50 = vld [vmem:[#allocation38_spill] sm:$0xff] }
 0x6c5   : > { %v5593_v44 = vpop.f32.mrf.mxu1  ;;  %v5894_v16 = vpop.f32.mrf.mxu2  ;;  %v4878_v53 = vadd.f32 %v15833_v43, %v4795_v13  ;;  %v4018_v25 = vadd.f32 %v15837_v21, %v3935_v7  ;;  %v15845_v36 = vld [vmem:[#allocation63_spill] sm:$0xff] }
 0x6c6   : > { %v5977_v48 = vpop.f32.mrf.mxu3  ;;  %v5510_v54 = vpop.f32.mrf.mxu0  ;;  %v8779_v7 = vld [vmem:[%s15147_s3 + $0xdc8] sm:$0xff] }
 0x6c7   : > { %v13812_v60 = vadd.f32 %v5977_v48, %v5894_v16  ;;  %v5511_v10 = vadd.f32 %v5510_v54, %v15824_v19  ;;  %v15835_v16 = vld [vmem:[#allocation60_spill] sm:$0xff]  ;;  %v15836_v54 = vld [vmem:[#allocation227_spill] sm:$0xff]  ;;  %v4101_v30 = vadd.f32 %v15841_v56, %v4018_v25 }
 0x6c8   : > { %6127 = vmatmul.f32.gmra.mxu1 %v8767_v61  ;;  %v4715_v61 = vadd.f32 %v15835_v16, %v4632_v62  ;;  %v15838_v19 = vld [vmem:[#allocation36_spill] sm:$0xff] }
 0x6c9   : > { %v5594_v59 = vadd.f32 %v5593_v44, %v5511_v10  ;;  %6044 = vmatmul.f32.gmra.mxu0 %v8766_v40  ;;  %v4181_v44 = vadd.f32 %v15834_v63, %v4098_v31  ;;  %v15839_v10 = vld [vmem:[#allocation33_spill] sm:$0xff]  ;;  %v15848_v63 = vld [vmem:[#allocation228_spill] sm:$0xff] }
 0x6ca   : > { %6210 = vmatmul.f32.gmra.mxu2 %v8768_v45  ;;  %8872 = vmatmul.msk.f32.gmra.mxu3 %vm3642_vm5, %v8769_v3  ;;  %v3855_v45 = vadd.f32 %v15839_v10, %v15838_v19  ;;  %v4798_v35 = vadd.f32 %v15840_v42, %v4715_v61  ;;  %v8780_v16 = vld [vmem:[%s15147_s3 + $0xdd0] sm:$0xff]  ;;  %v8781_v61 = vld [vmem:[%s15147_s3 + $0xdd8] sm:$0xff]  ;;  %v15852_v19 = vld [vmem:[#allocation51_spill] sm:$0xff] }
 0x6cb   : > { %v13829_v11 = vmax.f32 %v4918_v32, %v5594_v59  ;;  %v4919_v3 = vmax.f32 %v4181_v44, %v4878_v53  ;;  %v15842_v32 = vld [vmem:[#allocation163_spill] sm:$0xff] }
 0x6cc   : > { %v4635_v13 = vadd.f32 %v15843_v17, %v15842_v32  ;;  %v3938_v31 = vadd.f32 %v15844_v50, %v3855_v45  ;;  %v4881_v51 = vadd.f32 %v15845_v36, %v4798_v35  ;;  %v15854_v35 = vld [vmem:[#allocation166_spill] sm:$0xff]  ;;  %v15856_v32 = vld [vmem:[#allocation112_spill] sm:$0xff] }
 0x6cd   : > { %v5596_v24 = vpop.f32.mrf.mxu1  ;;  %v5897_v46 = vpop.f32.mrf.mxu2 }
 0x6ce   : > { %v5980_v20 = vpop.f32.mrf.mxu3  ;;  %v5513_v39 = vpop.f32.mrf.mxu0 }
 0x6cf   : > { %v13841_v48 = vadd.f32 %v5980_v20, %v5897_v46  ;;  %v5514_v40 = vadd.f32 %v5513_v39, %v15836_v54  ;;  %v15846_v46 = vld [vmem:[#allocation78_spill] sm:$0xff] }
 0x6d0   : > { %6130 = vmatmul.f32.gmra.mxu1 %v8773_v58  ;;  %v4184_v58 = vadd.f32 %v15846_v46, %v4101_v30  ;;  %v15847_v20 = vld [vmem:[#allocation62_spill] sm:$0xff] }
 0x6d1   : > { %v5597_v52 = vadd.f32 %v5596_v24, %v5514_v40  ;;  %6047 = vmatmul.f32.gmra.mxu0 %v8772_v14  ;;  %v8778_v24 = vld [vmem:[%s15147_s3 + $0xdc0] sm:$0xff]  ;;  %v4718_v39 = vadd.f32 %v15847_v20, %v4635_v13  ;;  %v15850_v40 = vld [vmem:[#allocation37_spill] sm:$0xff]  ;;  %v15857_v13 = vld [vmem:[#allocation52_spill] sm:$0xff] }
 0x6d2   : > { %6213 = vmatmul.f32.gmra.mxu2 %v8774_v57  ;;  %8873 = vmatmul.msk.f32.gmra.mxu3 %vm3642_vm5, %v8775_v12  ;;  %v15849_v54 = vld [vmem:[#allocation110_spill] sm:$0xff]  ;;  %v15851_v12 = vld [vmem:[#allocation109_spill] sm:$0xff]  ;;  %v4920_v25 = vmax.f32 %v4184_v58, %v4881_v51 }
 0x6d3   : > { %v13858_v59 = vmax.f32 %v4919_v3, %v5597_v52  ;;  %v3858_v57 = vadd.f32 %v15850_v40, %v15849_v54  ;;  %v4021_v21 = vadd.f32 %v15851_v12, %v3938_v31  ;;  %v4801_v10 = vadd.f32 %v15852_v19, %v4718_v39  ;;  %v15853_v3 = vld [vmem:[#allocation159_spill] sm:$0xff]  ;;  %v15855_v52 = vld [vmem:[#allocation196_spill] sm:$0xff]  ;;  %v8785_v51 = vld [vmem:[%s15147_s3 + $0xdf8] sm:$0xff] }
 0x6d4   : > { %v4638_v56 = vadd.f32 %v15855_v52, %v15854_v35  ;;  %v15860_v20 = vld [vmem:[#allocation229_spill] sm:$0xff]  ;;  %v15862_v54 = vld [vmem:[#allocation114_spill] sm:$0xff]  ;;  %v15863_v40 = vld [vmem:[#allocation111_spill] sm:$0xff] }
 0x6d5   : > { %v5599_v62 = vpop.f32.mrf.mxu1  ;;  %v5900_v29 = vpop.f32.mrf.mxu2  ;;  %v4104_v42 = vadd.f32 %v15853_v3, %v4021_v21  ;;  %v3941_v17 = vadd.f32 %v15856_v32, %v3858_v57  ;;  %v4884_v50 = vadd.f32 %v15857_v13, %v4801_v10  ;;  %v3861_v57 = vadd.f32 %v15863_v40, %v15862_v54  ;;  %v15864_v21 = vld [vmem:[#allocation198_spill] sm:$0xff]  ;;  %v15866_v3 = vld [vmem:[#allocation169_spill] sm:$0xff] }
 0x6d6   : > { %v5983_v43 = vpop.f32.mrf.mxu3  ;;  %v5516_v53 = vpop.f32.mrf.mxu0  ;;  %v15865_v10 = vld [vmem:[#allocation162_spill] sm:$0xff]  ;;  %v15875_v40 = vld [vmem:[#allocation117_spill] sm:$0xff] }
 0x6d7   : > { %v13870_v14 = vadd.f32 %v5983_v43, %v5900_v29  ;;  %v5517_v44 = vadd.f32 %v5516_v53, %v15848_v63  ;;  %v15858_v43 = vld [vmem:[#allocation158_spill] sm:$0xff] }
 0x6d8   : > { %6133 = vmatmul.f32.gmra.mxu1 %v8779_v7  ;;  %v8784_v7 = vld [vmem:[%s15147_s3 + $0xdf0] sm:$0xff]  ;;  %v4187_v53 = vadd.f32 %v15858_v43, %v4104_v42  ;;  %v8786_v63 = vld [vmem:[%s15147_s3 + $0xe00] sm:$0xff] }
 0x6d9   : > { %v5600_v45 = vadd.f32 %v5599_v62, %v5517_v44  ;;  %6050 = vmatmul.f32.gmra.mxu0 %v8778_v24  ;;  %v15859_v24 = vld [vmem:[#allocation64_spill] sm:$0xff] }
 0x6da   : > { %6216 = vmatmul.f32.gmra.mxu2 %v8780_v16  ;;  %8874 = vmatmul.msk.f32.gmra.mxu3 %vm3642_vm5, %v8781_v61  ;;  %v4721_v46 = vadd.f32 %v15859_v24, %v4638_v56  ;;  %v8787_v44 = vld [vmem:[%s15147_s3 + $0xe08] sm:$0xff]  ;;  %v15861_v16 = vld [vmem:[#allocation113_spill] sm:$0xff]  ;;  %v4921_v12 = vmax.f32 %v4187_v53, %v4884_v50 }
 0x6db   : > { %v13887_v30 = vmax.f32 %v4920_v25, %v5600_v45  ;;  %v4024_v61 = vadd.f32 %v15861_v16, %v3941_v17  ;;  %v15867_v42 = vld [vmem:[#allocation200_spill] sm:$0xff]  ;;  %v15869_v17 = vld [vmem:[#allocation199_spill] sm:$0xff]  ;;  %v15871_v53 = vld [vmem:[#allocation197_spill] sm:$0xff] }
 0x6dc   : > { %v4804_v25 = vadd.f32 %v15864_v21, %v4721_v46  ;;  %v4641_v35 = vadd.f32 %v15867_v42, %v15866_v3  ;;  %v15868_v56 = vld [vmem:[#allocation116_spill] sm:$0xff]  ;;  %v15873_v16 = vld [vmem:[#allocation118_spill] sm:$0xff] }
 0x6dd   : > { %v5602_v31 = vpop.f32.mrf.mxu1  ;;  %v5903_v36 = vpop.f32.mrf.mxu2  ;;  %v4107_v45 = vadd.f32 %v15865_v10, %v4024_v61  ;;  %v3944_v32 = vadd.f32 %v15868_v56, %v3861_v57  ;;  %v15874_v61 = vld [vmem:[#allocation115_spill] sm:$0xff]  ;;  %v15876_v21 = vld [vmem:[#allocation202_spill] sm:$0xff]  ;;  %v15877_v10 = vld [vmem:[#allocation165_spill] sm:$0xff] }
 0x6de   : > { %v5986_v62 = vpop.f32.mrf.mxu3  ;;  %v5519_v29 = vpop.f32.mrf.mxu0  ;;  %v4887_v13 = vadd.f32 %v15869_v17, %v4804_v25  ;;  %v4724_v24 = vadd.f32 %v15871_v53, %v4641_v35  ;;  %v3864_v54 = vadd.f32 %v15874_v61, %v15873_v16  ;;  %v15878_v3 = vld [vmem:[#allocation172_spill] sm:$0xff]  ;;  %v8798_v16 = vld [vmem:[%s15147_s3 + $0xe60] sm:$0xff] }
 0x6df   : > { %v13899_v58 = vadd.f32 %v5986_v62, %v5903_v36  ;;  %v5520_v39 = vadd.f32 %v5519_v29, %v15860_v20  ;;  %v8790_v29 = vld [vmem:[%s15147_s3 + $0xe20] sm:$0xff]  ;;  %v4027_v57 = vadd.f32 %v15875_v40, %v3944_v32  ;;  %v15879_v42 = vld [vmem:[#allocation204_spill] sm:$0xff] }
 0x6e0   : > { %6136 = vmatmul.f32.gmra.mxu1 %v8785_v51  ;;  %v15872_v20 = vld [vmem:[#allocation230_spill] sm:$0xff]  ;;  %v4807_v25 = vadd.f32 %v15876_v21, %v4724_v24  ;;  %v4644_v35 = vadd.f32 %v15879_v42, %v15878_v3  ;;  %v15880_v17 = vld [vmem:[#allocation120_spill] sm:$0xff]  ;;  %v15883_v24 = vld [vmem:[#allocation201_spill] sm:$0xff] }
 0x6e1   : > { %v5603_v19 = vadd.f32 %v5602_v31, %v5520_v39  ;;  %6053 = vmatmul.f32.gmra.mxu0 %v8784_v7  ;;  %v8791_v31 = vld [vmem:[%s15147_s3 + $0xe28] sm:$0xff]  ;;  %v15870_v7 = vld [vmem:[#allocation161_spill] sm:$0xff] }
 0x6e2   : > { %6219 = vmatmul.f32.gmra.mxu2 %v8786_v63  ;;  %8875 = vmatmul.msk.f32.gmra.mxu3 %vm3642_vm5, %v8787_v44  ;;  %v4190_v43 = vadd.f32 %v15870_v7, %v4107_v45  ;;  %v8792_v63 = vld [vmem:[%s15147_s3 + $0xe30] sm:$0xff]  ;;  %v8793_v44 = vld [vmem:[%s15147_s3 + $0xe38] sm:$0xff]  ;;  %v4110_v45 = vadd.f32 %v15877_v10, %v4027_v57  ;;  %v8799_v61 = vld [vmem:[%s15147_s3 + $0xe68] sm:$0xff] }
 0x6e3   : > { %v13916_v52 = vmax.f32 %v4921_v12, %v5603_v19  ;;  %v8796_v7 = vld [vmem:[%s15147_s3 + $0xe50] sm:$0xff]  ;;  %v15886_v57 = vld [vmem:[#allocation122_spill] sm:$0xff] }
 0x6e4   : > { %v4922_v12 = vmax.f32 %v4190_v43, %v4887_v13  ;;  %v15882_v43 = vld [vmem:[#allocation164_spill] sm:$0xff] }
 0x6e5   : > { %v5605_v36 = vpop.f32.mrf.mxu1  ;;  %v5906_v50 = vpop.f32.mrf.mxu2  ;;  %v4193_v53 = vadd.f32 %v15882_v43, %v4110_v45  ;;  %v15889_v3 = vld [vmem:[#allocation168_spill] sm:$0xff] }
 0x6e6   : > { %v5989_v51 = vpop.f32.mrf.mxu3  ;;  %v5522_v62 = vpop.f32.mrf.mxu0 }
 0x6e7   : > { %v13928_v46 = vadd.f32 %v5989_v51, %v5906_v50  ;;  %v5523_v39 = vadd.f32 %v5522_v62, %v15872_v20  ;;  %v3947_v50 = vadd.f32 %v15880_v17, %v3864_v54  ;;  %v4727_v20 = vadd.f32 %v15883_v24, %v4644_v35  ;;  %v15885_v54 = vld [vmem:[#allocation121_spill] sm:$0xff]  ;;  %v15890_v35 = vld [vmem:[#allocation175_spill] sm:$0xff]  ;;  %v15891_v17 = vld [vmem:[#allocation208_spill] sm:$0xff] }
 0x6e8   : > { %6139 = vmatmul.f32.gmra.mxu1 %v8791_v31  ;;  %v15881_v31 = vld [vmem:[#allocation203_spill] sm:$0xff] }
 0x6e9   : > { %v5606_v19 = vadd.f32 %v5605_v36, %v5523_v39  ;;  %6056 = vmatmul.f32.gmra.mxu0 %v8790_v29  ;;  %v4890_v51 = vadd.f32 %v15881_v31, %v4807_v25  ;;  %v8797_v36 = vld [vmem:[%s15147_s3 + $0xe58] sm:$0xff]  ;;  %v4030_v40 = vadd.f32 %v15885_v54, %v3947_v50  ;;  %v4647_v31 = vadd.f32 %v15891_v17, %v15890_v35  ;;  %v15892_v50 = vld [vmem:[#allocation124_spill] sm:$0xff]  ;;  %v8802_v24 = vld [vmem:[%s15147_s3 + $0xe80] sm:$0xff] }
 0x6ea   : > { %6222 = vmatmul.f32.gmra.mxu2 %v8792_v63  ;;  %8876 = vmatmul.msk.f32.gmra.mxu3 %vm3642_vm5, %v8793_v44  ;;  %v15884_v63 = vld [vmem:[#allocation231_spill] sm:$0xff]  ;;  %v15896_v54 = vld [vmem:[#allocation232_spill] sm:$0xff] }
 0x6eb   : > { %v13945_v56 = vmax.f32 %v4922_v12, %v5606_v19  ;;  %v15887_v12 = vld [vmem:[#allocation119_spill] sm:$0xff]  ;;  %v4923_v25 = vmax.f32 %v4193_v53, %v4890_v51  ;;  %v15888_v19 = vld [vmem:[#allocation206_spill] sm:$0xff]  ;;  %v4113_v42 = vadd.f32 %v15889_v3, %v4030_v40 }
 0x6ec   : > { %v3867_v21 = vadd.f32 %v15887_v12, %v15886_v57  ;;  %v4810_v10 = vadd.f32 %v15888_v19, %v4727_v20  ;;  %v15894_v20 = vld [vmem:[#allocation167_spill] sm:$0xff]  ;;  %v8804_v57 = vld [vmem:[%s15147_s3 + $0xe90] sm:$0xff]  ;;  %v8805_v12 = vld [vmem:[%s15147_s3 + $0xe98] sm:$0xff] }
 0x6ed   : > { %v5608_v32 = vpop.f32.mrf.mxu1  ;;  %v5909_v13 = vpop.f32.mrf.mxu2 }
 0x6ee   : > { %v5992_v62 = vpop.f32.mrf.mxu3  ;;  %v5525_v29 = vpop.f32.mrf.mxu0 }
 0x6ef   : > { %v13957_v39 = vadd.f32 %v5992_v62, %v5909_v13  ;;  %v5526_v44 = vadd.f32 %v5525_v29, %v15884_v63  ;;  %v15893_v62 = vld [vmem:[#allocation207_spill] sm:$0xff]  ;;  %v4196_v63 = vadd.f32 %v15894_v20, %v4113_v42  ;;  %v15900_v42 = vld [vmem:[#allocation210_spill] sm:$0xff]  ;;  %v15904_v20 = vld [vmem:[#allocation128_spill] sm:$0xff] }
 0x6f0   : > { %6142 = vmatmul.f32.gmra.mxu1 %v8797_v36  ;;  %v3950_v36 = vadd.f32 %v15892_v50, %v3867_v21  ;;  %v4893_v29 = vadd.f32 %v15893_v62, %v4810_v10  ;;  %v15897_v21 = vld [vmem:[#allocation126_spill] sm:$0xff]  ;;  %v15899_v10 = vld [vmem:[#allocation125_spill] sm:$0xff] }
 0x6f1   : > { %v5609_v45 = vadd.f32 %v5608_v32, %v5526_v44  ;;  %6059 = vmatmul.f32.gmra.mxu0 %v8796_v7  ;;  %v8803_v32 = vld [vmem:[%s15147_s3 + $0xe88] sm:$0xff]  ;;  %v15895_v44 = vld [vmem:[#allocation205_spill] sm:$0xff]  ;;  %v15902_v62 = vld [vmem:[#allocation178_spill] sm:$0xff] }
 0x6f2   : > { %6225 = vmatmul.f32.gmra.mxu2 %v8798_v16  ;;  %8877 = vmatmul.msk.f32.gmra.mxu3 %vm3642_vm5, %v8799_v61  ;;  %v4730_v16 = vadd.f32 %v15895_v44, %v4647_v31  ;;  %v4924_v3 = vmax.f32 %v4196_v63, %v4893_v29  ;;  %v15901_v31 = vld [vmem:[#allocation171_spill] sm:$0xff] }
 0x6f3   : > { %v13974_v13 = vmax.f32 %v4923_v25, %v5609_v45  ;;  %v15898_v25 = vld [vmem:[#allocation123_spill] sm:$0xff]  ;;  %v4033_v45 = vadd.f32 %v15899_v10, %v3950_v36 }
 0x6f4   : > { %v3870_v19 = vadd.f32 %v15898_v25, %v15897_v21  ;;  %v4813_v35 = vadd.f32 %v15900_v42, %v4730_v16  ;;  %v8808_v16 = vld [vmem:[%s15147_s3 + $0xeb0] sm:$0xff] }
 0x6f5   : > { %v5611_v43 = vpop.f32.mrf.mxu1  ;;  %v5912_v51 = vpop.f32.mrf.mxu2  ;;  %v4116_v50 = vadd.f32 %v15901_v31, %v4033_v45  ;;  %v8810_v45 = vld [vmem:[%s15147_s3 + $0xec0] sm:$0xff]  ;;  %v15909_v42 = vld [vmem:[#allocation129_spill] sm:$0xff] }
 0x6f6   : > { %v5995_v7 = vpop.f32.mrf.mxu3  ;;  %v5528_v53 = vpop.f32.mrf.mxu0  ;;  %v3953_v44 = vadd.f32 %v15904_v20, %v3870_v19  ;;  %v15908_v19 = vld [vmem:[#allocation233_spill] sm:$0xff]  ;;  %v15911_v31 = vld [vmem:[#allocation127_spill] sm:$0xff] }
 0x6f7   : > { %v13986_v61 = vadd.f32 %v5995_v7, %v5912_v51  ;;  %v5529_v40 = vadd.f32 %v5528_v53, %v15896_v54  ;;  %v15903_v51 = vld [vmem:[#allocation212_spill] sm:$0xff] }
 0x6f8   : > { %6145 = vmatmul.f32.gmra.mxu1 %v8803_v32  ;;  %v4650_v7 = vadd.f32 %v15903_v51, %v15902_v62  ;;  %v15905_v32 = vld [vmem:[#allocation211_spill] sm:$0xff]  ;;  %v15912_v51 = vld [vmem:[#allocation214_spill] sm:$0xff] }
 0x6f9   : > { %v5612_v17 = vadd.f32 %v5611_v43, %v5529_v40  ;;  %6062 = vmatmul.f32.gmra.mxu0 %v8802_v24  ;;  %v4896_v54 = vadd.f32 %v15905_v32, %v4813_v35  ;;  %v8809_v43 = vld [vmem:[%s15147_s3 + $0xeb8] sm:$0xff]  ;;  %v4036_v35 = vadd.f32 %v15909_v42, %v3953_v44  ;;  %v15916_v44 = vld [vmem:[#allocation132_spill] sm:$0xff] }
 0x6fa   : > { %6228 = vmatmul.f32.gmra.mxu2 %v8804_v57  ;;  %8878 = vmatmul.msk.f32.gmra.mxu3 %vm3642_vm5, %v8805_v12  ;;  %v15906_v40 = vld [vmem:[#allocation170_spill] sm:$0xff]  ;;  %v15907_v12 = vld [vmem:[#allocation209_spill] sm:$0xff] }
 0x6fb   : > { %v14003_v53 = vmax.f32 %v4924_v3, %v5612_v17  ;;  %v4199_v57 = vadd.f32 %v15906_v40, %v4116_v50  ;;  %v4733_v21 = vadd.f32 %v15907_v12, %v4650_v7  ;;  %v8811_v3 = vld [vmem:[%s15147_s3 + $0xec8] sm:$0xff]  ;;  %v15910_v17 = vld [vmem:[#allocation130_spill] sm:$0xff] }
 0x6fc   : > { %v3873_v50 = vadd.f32 %v15911_v31, %v15910_v17  ;;  %v15913_v32 = vld [vmem:[#allocation174_spill] sm:$0xff] }
 0x6fd   : > { %v5614_v36 = vpop.f32.mrf.mxu1  ;;  %v5915_v29 = vpop.f32.mrf.mxu2  ;;  %v4925_v62 = vmax.f32 %v4199_v57, %v4896_v54  ;;  %v4816_v7 = vadd.f32 %v15912_v51, %v4733_v21  ;;  %v8814_v21 = vld [vmem:[%s15147_s3 + $0xee0] sm:$0xff]  ;;  %v8816_v51 = vld [vmem:[%s15147_s3 + $0xef0] sm:$0xff] }
 0x6fe   : > { %v5998_v24 = vpop.f32.mrf.mxu3  ;;  %v5531_v63 = vpop.f32.mrf.mxu0 }
 0x6ff   : > { %v14015_v25 = vadd.f32 %v5998_v24, %v5915_v29  ;;  %v5532_v10 = vadd.f32 %v5531_v63, %v15908_v19  ;;  %v4119_v29 = vadd.f32 %v15913_v32, %v4036_v35  ;;  %v15914_v24 = vld [vmem:[#allocation181_spill] sm:$0xff]  ;;  %v15915_v63 = vld [vmem:[#allocation216_spill] sm:$0xff]  ;;  %v15917_v19 = vld [vmem:[#allocation215_spill] sm:$0xff] }
 0x700   : > { %6148 = vmatmul.f32.gmra.mxu1 %v8809_v43  ;;  %v4653_v40 = vadd.f32 %v15915_v63, %v15914_v24  ;;  %v3956_v43 = vadd.f32 %v15916_v44, %v3873_v50  ;;  %v4899_v42 = vadd.f32 %v15917_v19, %v4816_v7  ;;  %v15920_v50 = vld [vmem:[#allocation234_spill] sm:$0xff] }
 0x701   : > { %v5615_v20 = vadd.f32 %v5614_v36, %v5532_v10  ;;  %6065 = vmatmul.f32.gmra.mxu0 %v8808_v16  ;;  %v8815_v36 = vld [vmem:[%s15147_s3 + $0xee8] sm:$0xff]  ;;  %v15918_v10 = vld [vmem:[#allocation173_spill] sm:$0xff]  ;;  %v15922_v63 = vld [vmem:[#allocation218_spill] sm:$0xff] }
 0x702   : > { %6231 = vmatmul.f32.gmra.mxu2 %v8810_v45  ;;  %8879 = vmatmul.msk.f32.gmra.mxu3 %vm3642_vm5, %v8811_v3  ;;  %v4202_v45 = vadd.f32 %v15918_v10, %v4119_v29  ;;  %v15919_v3 = vld [vmem:[#allocation213_spill] sm:$0xff] }
 0x703   : > { %v14032_v12 = vmax.f32 %v4925_v62, %v5615_v20  ;;  %v4736_v35 = vadd.f32 %v15919_v3, %v4653_v40  ;;  %v8817_v7 = vld [vmem:[%s15147_s3 + $0xef8] sm:$0xff] }
 0x704   : > { %v15921_v20 = vld [vmem:[#allocation133_spill] sm:$0xff]  ;;  %v4926_v24 = vmax.f32 %v4202_v45, %v4899_v42 }
 0x705   : > { %v5617_v17 = vpop.f32.mrf.mxu1  ;;  %v5918_v54 = vpop.f32.mrf.mxu2  ;;  %v4039_v32 = vadd.f32 %v15921_v20, %v3956_v43  ;;  %v4819_v29 = vadd.f32 %v15922_v63, %v4736_v35  ;;  %v15923_v40 = vld [vmem:[#allocation177_spill] sm:$0xff] }
 0x706   : > { %v6001_v16 = vpop.f32.mrf.mxu3  ;;  %v5534_v57 = vpop.f32.mrf.mxu0  ;;  %v8821_v43 = vld [vmem:[%s15147_s3 + $0xf18] sm:$0xff] }
 0x707   : > { %v14044_v31 = vadd.f32 %v6001_v16, %v5918_v54  ;;  %v5535_v62 = vadd.f32 %v5534_v57, %v15920_v50  ;;  %v4122_v19 = vadd.f32 %v15923_v40, %v4039_v32  ;;  %v15925_v16 = vld [vmem:[#allocation219_spill] sm:$0xff] }
 0x708   : > { %6151 = vmatmul.f32.gmra.mxu1 %v8815_v36  ;;  %v4902_v57 = vadd.f32 %v15925_v16, %v4819_v29  ;;  %v8826_v40 = vld [vmem:[%s15147_s3 + $0xf40] sm:$0xff] }
 0x709   : > { %v5618_v44 = vadd.f32 %v5617_v17, %v5535_v62  ;;  %6068 = vmatmul.f32.gmra.mxu0 %v8814_v21  ;;  %v8820_v17 = vld [vmem:[%s15147_s3 + $0xf10] sm:$0xff]  ;;  %v8822_v62 = vld [vmem:[%s15147_s3 + $0xf20] sm:$0xff] }
 0x70a   : > { %6234 = vmatmul.f32.gmra.mxu2 %v8816_v51  ;;  %8880 = vmatmul.msk.f32.gmra.mxu3 %vm3642_vm5, %v8817_v7  ;;  %v15926_v21 = vld [vmem:[#allocation176_spill] sm:$0xff] }
 0x70b   : > { %v14057_v54 = vmax.f32 %v4926_v24, %v5618_v44  ;;  %v4205_v45 = vadd.f32 %v15926_v21, %v4122_v19  ;;  %v8823_v51 = vld [vmem:[%s15147_s3 + $0xf28] sm:$0xff] }
 0x70d   : > { %15924 = vst [vmem:[#allocation82_spill] sm:$0xff] %v14057_v54  ;;  %v5620_v10 = vpop.f32.mrf.mxu1  ;;  %v5921_v3 = vpop.f32.mrf.mxu2  ;;  %v4927_v7 = vmax.f32 %v4205_v45, %v4902_v57  ;;  %v8828_v57 = vld [vmem:[%s15147_s3 + $0xf50] sm:$0xff]  ;;  %v15932_v45 = vld [vmem:[#allocation143_spill] sm:$0xff] }
 0x70e   : > { %v6004_v42 = vpop.f32.mrf.mxu3  ;;  %v5537_v36 = vpop.f32.mrf.mxu0 }
 0x70f   : > { %v14067_v35 = vadd.f32 %v6004_v42, %v5921_v3  ;;  %v5538_v50 = vadd.f32 %v5537_v36, %v13502_v23  ;;  %v8827_v23 = vld [vmem:[%s15147_s3 + $0xf48] sm:$0xff]  ;;  %v15930_v36 = vld [vmem:[#allocation86_spill] sm:$0xff] }
 0x710   : > { %6154 = vmatmul.f32.gmra.mxu1 %v8821_v43 }
 0x711   : > { %v5621_v20 = vadd.f32 %v5620_v10, %v5538_v50  ;;  %6071 = vmatmul.f32.gmra.mxu0 %v8820_v17  ;;  %v8829_v10 = vld [vmem:[%s15147_s3 + $0xf58] sm:$0xff]  ;;  %v15931_v17 = vld [vmem:[#allocation83_spill] sm:$0xff] }
 0x712   : > { %6237 = vmatmul.f32.gmra.mxu2 %v8822_v62  ;;  %8881 = vmatmul.msk.f32.gmra.mxu3 %vm3642_vm5, %v8823_v51  ;;  %v3816_v21 = vadd.f32 %v15931_v17, %v15930_v36  ;;  %v15933_v50 = vld [vmem:[#allocation145_spill] sm:$0xff]  ;;  %v15938_v17 = vld [vmem:[#allocation90_spill] sm:$0xff] }
 0x713   : > { %v14077_v32 = vmax.f32 %v4927_v7, %v5621_v20  ;;  %v4513_v62 = vadd.f32 %v15933_v50, %v15932_v45  ;;  %v8832_v20 = vld [vmem:[%s15147_s3 + $0xf70] sm:$0xff]  ;;  %v15939_v45 = vld [vmem:[#allocation87_spill] sm:$0xff] }
 0x714   : > { %v3819_v50 = vadd.f32 %v15939_v45, %v15938_v17  ;;  %v15946_v17 = vld [vmem:[#allocation92_spill] sm:$0xff] }
 0x715   : > { %15927 = vst [vmem:[#allocation81_spill] sm:$0xff] %v14077_v32  ;;  %v5623_v24 = vpop.f32.mrf.mxu1  ;;  %v5924_v63 = vpop.f32.mrf.mxu2 }
 0x716   : > { %v6007_v29 = vpop.f32.mrf.mxu3  ;;  %v5540_v44 = vpop.f32.mrf.mxu0  ;;  %v3902_v45 = vadd.f32 %v15946_v17, %v3819_v50  ;;  %v15954_v50 = vld [vmem:[#allocation153_spill] sm:$0xff] }
 0x717   : > { %v14085_v19 = vadd.f32 %v6007_v29, %v5924_v63  ;;  %v5541_v16 = vadd.f32 %v5540_v44, %v13526_v34  ;;  %v8833_v34 = vld [vmem:[%s15147_s3 + $0xf78] sm:$0xff]  ;;  %v8834_v63 = vld [vmem:[%s15147_s3 + $0xf80] sm:$0xff] }
 0x718   : > { %6157 = vmatmul.f32.gmra.mxu1 %v8827_v23  ;;  %v8835_v23 = vld [vmem:[%s15147_s3 + $0xf88] sm:$0xff]  ;;  %v15935_v29 = vld [vmem:[#allocation185_spill] sm:$0xff] }
 0x719   : > { %15928 = vst [vmem:[#allocation139_spill] sm:$0xff] %v14085_v19  ;;  %v14094_v3 = vadd.f32 %v5623_v24, %v5541_v16  ;;  %6074 = vmatmul.f32.gmra.mxu0 %v8826_v40  ;;  %v4596_v44 = vadd.f32 %v15935_v29, %v4513_v62  ;;  %v15936_v16 = vld [vmem:[#allocation88_spill] sm:$0xff] }
 0x71a   : > { %6240 = vmatmul.f32.gmra.mxu2 %v8828_v57  ;;  %8882 = vmatmul.msk.f32.gmra.mxu3 %vm3642_vm5, %v8829_v10  ;;  %v3899_v57 = vadd.f32 %v15936_v16, %v3816_v21  ;;  %v15937_v10 = vld [vmem:[#allocation184_spill] sm:$0xff]  ;;  %v8841_v16 = vld [vmem:[%s15147_s3 + $0xfb8] sm:$0xff] }
 0x71b   : > { %15929 = vst [vmem:[#allocation141_spill] sm:$0xff] %v14094_v3  ;;  %v15941_v3 = vld [vmem:[#allocation149_spill] sm:$0xff] }
 0x71d   : > { %v6113_v43 = vpop.f32.mrf.mxu1  ;;  %v5927_v42 = vpop.f32.mrf.mxu2 }
 0x71e   : > { %v6010_v51 = vpop.f32.mrf.mxu3  ;;  %v6030_v7 = vpop.f32.mrf.mxu0 }
 0x71f   : > { %v14107_v24 = vadd.f32 %v6010_v51, %v5927_v42  ;;  %v6031_v40 = vadd.f32 %v6030_v7, %v13539_v8  ;;  %v4679_v42 = vadd.f32 %v15937_v10, %v4596_v44  ;;  %v15940_v51 = vld [vmem:[#allocation147_spill] sm:$0xff]  ;;  %v15944_v44 = vld [vmem:[#allocation189_spill] sm:$0xff] }
 0x720   : > { %6160 = vmatmul.f32.gmra.mxu1 %v8833_v34  ;;  %v4516_v32 = vadd.f32 %v15941_v3, %v15940_v51  ;;  %v8839_v8 = vld [vmem:[%s15147_s3 + $0xfa8] sm:$0xff]  ;;  %v15942_v34 = vld [vmem:[#allocation89_spill] sm:$0xff] }
 0x721   : > { %15934 = vst [vmem:[#allocation84_spill] sm:$0xff] %v14107_v24  ;;  %6077 = vmatmul.f32.gmra.mxu0 %v8832_v20  ;;  %v6114_v36 = vadd.f32 %v6113_v43, %v6031_v40  ;;  %v3982_v21 = vadd.f32 %v15942_v34, %v3899_v57  ;;  %v15943_v7 = vld [vmem:[#allocation187_spill] sm:$0xff]  ;;  %v8840_v3 = vld [vmem:[%s15147_s3 + $0xfb0] sm:$0xff]  ;;  %v15945_v57 = vld [vmem:[#allocation142_spill] sm:$0xff] }
 0x722   : > { %6243 = vmatmul.f32.gmra.mxu2 %v8834_v63  ;;  %8883 = vmatmul.msk.f32.gmra.mxu3 %vm3642_vm5, %v8835_v23  ;;  %v4762_v20 = vadd.f32 %v15943_v7, %v4679_v42  ;;  %v8838_v43 = vld [vmem:[%s15147_s3 + $0xfa0] sm:$0xff]  ;;  %v4599_v40 = vadd.f32 %v15944_v44, %v4516_v32  ;;  %v15947_v51 = vld [vmem:[#allocation188_spill] sm:$0xff] }
 0x723   : > { %v4065_v10 = vadd.f32 %v15945_v57, %v3982_v21  ;;  %v15948_v34 = vld [vmem:[#allocation186_spill] sm:$0xff]  ;;  %v15949_v44 = vld [vmem:[#allocation140_spill] sm:$0xff]  ;;  %v15950_v21 = vld [vmem:[#allocation93_spill] sm:$0xff] }
 0x724   : > { %v4682_v7 = vadd.f32 %v15948_v34, %v4599_v40  ;;  %v15955_v57 = vld [vmem:[#allocation191_spill] sm:$0xff]  ;;  %v15957_v34 = vld [vmem:[#allocation193_spill] sm:$0xff] }
 0x725   : > { %v6116_v24 = vpop.f32.mrf.mxu1  ;;  %v6196_v62 = vpop.f32.mrf.mxu2  ;;  %v4148_v54 = vadd.f32 %v15949_v44, %v4065_v10  ;;  %v8846_v44 = vld [vmem:[%s15147_s3 + $0xfe0] sm:$0xff] }
 0x726   : > { %v6197_v63 = vadd.f32 %v6196_v62, %v6114_v36  ;;  %v6279_v23 = vpop.f32.mrf.mxu3  ;;  %v6033_v29 = vpop.f32.mrf.mxu0  ;;  %v4845_v62 = vadd.f32 %v15947_v51, %v4762_v20  ;;  %v4765_v20 = vadd.f32 %v15955_v57, %v4682_v7  ;;  %v15960_v57 = vld [vmem:[#allocation144_spill] sm:$0xff] }
 0x727   : > { %v6034_v36 = vadd.f32 %v6033_v29, %v13556_v2  ;;  %v15952_v2 = vld [vmem:[#allocation91_spill] sm:$0xff] }
 0x728   : > { %v6280_v42 = vadd.f32 %v6279_v23, %v6197_v63  ;;  %6163 = vmatmul.f32.gmra.mxu1 %v8839_v8  ;;  %v3985_v63 = vadd.f32 %v15950_v21, %v3902_v45  ;;  %v15951_v23 = vld [vmem:[#allocation94_spill] sm:$0xff]  ;;  %v15953_v29 = vld [vmem:[#allocation151_spill] sm:$0xff]  ;;  %v4908_v40 = vmax.f32 %v4148_v54, %v4845_v62 }
 0x729   : > { %6080 = vmatmul.f32.gmra.mxu0 %v8838_v43  ;;  %v6117_v19 = vadd.f32 %v6116_v24, %v6034_v36  ;;  %v3822_v8 = vadd.f32 %v15952_v2, %v15951_v23  ;;  %v4519_v43 = vadd.f32 %v15954_v50, %v15953_v29  ;;  %v6390_v24 = vld [vmem:[%s15148_s4 + $0x8] sm:$0x3]  ;;  %v8844_v36 = vld [vmem:[%s15147_s3 + $0xfd0] sm:$0xff]  ;;  %v15956_v45 = vld [vmem:[#allocation146_spill] sm:$0xff] }
 0x72a   : > { %v6345_v32 = vmax.f32 %v13530_v0, %v6280_v42  ;;  %6246 = vmatmul.f32.gmra.mxu2 %v8840_v3  ;;  %8884 = vmatmul.msk.f32.gmra.mxu3 %vm3642_vm5, %v8841_v16  ;;  %v8845_v3 = vld [vmem:[%s15147_s3 + $0xfd8] sm:$0xff]  ;;  %v4068_v51 = vadd.f32 %v15956_v45, %v3985_v63  ;;  %v8847_v54 = vld [vmem:[%s15147_s3 + $0xfe8] sm:$0xff] }
 0x72b   : > { %v4602_v7 = vadd.f32 %v15957_v34, %v4519_v43  ;;  %8910 = vmatpush.msk.msrb.mxu1 %vm6493_vm6, %v6390_v24  ;;  %v15958_v23 = vld [vmem:[#allocation96_spill] sm:$0xff]  ;;  %v15961_v24 = vld [vmem:[#allocation190_spill] sm:$0xff] }
 0x72c   : > { %v3905_v63 = vadd.f32 %v15958_v23, %v3822_v8  ;;  %v15959_v2 = vld [vmem:[#allocation192_spill] sm:$0xff]  ;;  %v14175_v50 = vmax.f32 %v6345_v32, 0.0  ;;  %v6389_v32 = vld [vmem:[%s15148_s4] sm:$0xff] }
 0x72d   : > { %v6119_v17 = vpop.f32.mrf.mxu1  ;;  %v6199_v0 = vpop.f32.mrf.mxu2  ;;  %v4848_v29 = vadd.f32 %v15959_v2, %v4765_v20  ;;  %v4685_v45 = vadd.f32 %v15961_v24, %v4602_v7  ;;  %v6392_v20 = vld [vmem:[%s15148_s4 + $0x12] sm:$0x3]  ;;  %6632 = vmatpush.msrb.mxu1 %v6389_v32  ;;  %v6880_v7 = vld [vmem:[%s15148_s4 + $0x26] sm:$0x3]  ;;  %v6879_v2 = vld [vmem:[%s15148_s4 + $0x1e] sm:$0xff] }
 0x72e   : > { %v6200_v16 = vadd.f32 %v6199_v0, %v6117_v19  ;;  %v6282_v10 = vpop.f32.mrf.mxu3  ;;  %v6036_v42 = vpop.f32.mrf.mxu0  ;;  %v5627_v19 = vmax.f32 %v4908_v40, %v13548_v41  ;;  %v4151_v0 = vadd.f32 %v15960_v57, %v4068_v51  ;;  %v8851_v41 = vld [vmem:[%s15147_s3 + $0x1008] sm:$0xff]  ;;  %v15962_v40 = vld [vmem:[#allocation97_spill] sm:$0xff]  ;;  %8889 = vmatpush.msk.msrb.mxu0 %vm6493_vm6, %v6392_v20  ;;  %8952 = vmatpush.msk.msrb.mxu3 %vm6493_vm6, %v6880_v7 }
 0x72f   : > { %v6037_v21 = vadd.f32 %v6036_v42, %v13580_v38  ;;  %v15963_v42 = vld [vmem:[#allocation194_spill] sm:$0xff]  ;;  %v15965_v20 = vld [vmem:[#allocation195_spill] sm:$0xff] }
 0x730   : > { %v6283_v62 = vadd.f32 %v6282_v10, %v6200_v16  ;;  %6166 = vmatmul.f32.gmra.mxu1 %v8845_v3  ;;  %v6391_v3 = vld [vmem:[%s15148_s4 + $0xa] sm:$0xff]  ;;  %v3988_v16 = vadd.f32 %v15962_v40, %v3905_v63  ;;  %v4909_v10 = vmax.f32 %v4151_v0, %v4848_v29  ;;  %v8850_v63 = vld [vmem:[%s15147_s3 + $0x1000] sm:$0xff]  ;;  %v8853_v24 = vld [vmem:[%s15147_s3 + $0x1018] sm:$0xff]  ;;  %6980 = vmatpush.msrb.mxu3 %v6879_v2 }
 0x731   : > { %6083 = vmatmul.f32.gmra.mxu0 %v8844_v36  ;;  %v6120_v8 = vadd.f32 %v6119_v17, %v6037_v21  ;;  %v4768_v36 = vadd.f32 %v15963_v42, %v4685_v45  ;;  %v6695_v17 = vld [vmem:[%s15148_s4 + $0x1c] sm:$0x3]  ;;  %v8852_v0 = vld [vmem:[%s15147_s3 + $0x1010] sm:$0xff] }
 0x732   : > { %v6346_v43 = vmax.f32 %v5627_v19, %v6283_v62  ;;  %6249 = vmatmul.f32.gmra.mxu2 %v8846_v44  ;;  %8885 = vmatmul.msk.f32.gmra.mxu3 %vm3642_vm5, %v8847_v54  ;;  %v6694_v44 = vld [vmem:[%s15148_s4 + $0x14] sm:$0xff]  ;;  %v6413_v54 = vrot.slane %v14175_v50, 1  ;;  %v5628_v57 = vmax.f32 %v4909_v10, %v13568_v26 }
 0x733   : > { %8931 = vmatpush.msk.msrb.mxu2 %vm6493_vm6, %v6695_v17  ;;  %v15964_v29 = vld [vmem:[#allocation150_spill] sm:$0xff]  ;;  %6512 = vmatpush.msrb.mxu0 %v6391_v3  ;;  %v4851_v40 = vadd.f32 %v15965_v20, %v4768_v36 }
 0x734   : > { %v14183_v38 = vmax.f32 %v6346_v43, 0.0  ;;  %v4071_v43 = vadd.f32 %v15964_v29, %v3988_v16  ;;  %v15966_v16 = vld [vmem:[#allocation148_spill] sm:$0xff]  ;;  %v8857_v36 = vld [vmem:[%s15147_s3 + $0x1038] sm:$0xff] }
 0x735   : > { %v6122_v51 = vpop.f32.mrf.mxu1  ;;  %v6202_v34 = vpop.f32.mrf.mxu2  ;;  %6797 = vmatpush.msrb.mxu2 %v6694_v44 }
 0x736   : > { %v6414_v19 = vrot.slane %v14183_v38, 1  ;;  %v6203_v62 = vadd.f32 %v6202_v34, %v6120_v8  ;;  %v6285_v21 = vpop.f32.mrf.mxu3  ;;  %v6039_v23 = vpop.f32.mrf.mxu0  ;;  %v4154_v10 = vadd.f32 %v15966_v16, %v4071_v43  ;;  %v8858_v43 = vld [vmem:[%s15147_s3 + $0x1040] sm:$0xff]  ;;  %v8863_v16 = vld [vmem:[%s15147_s3 + $0x1068] sm:$0x3] }
 0x737   : > { %v6040_v8 = vadd.f32 %v6039_v23, %v13609_v9  ;;  %v6698_v9 = vrot.slane %v14183_v38, 5 }
 0x738   : > { %v6286_v45 = vadd.f32 %v6285_v21, %v6203_v62  ;;  %6169 = vmatmul.f32.gmra.mxu1 %v8851_v41  ;;  %v14226_v32 = vsel %vm661_vm2, %v6413_v54, %v6414_v19  ;;  %v4910_v34 = vmax.f32 %v4154_v10, %v4851_v40  ;;  %v6881_v41 = vrot.slane %v14183_v38, 6 }
 0x739   : > { %6086 = vmatmul.f32.gmra.mxu0 %v8850_v63  ;;  %v6123_v3 = vadd.f32 %v6122_v51, %v6040_v8  ;;  %v8856_v51 = vld [vmem:[%s15147_s3 + $0x1030] sm:$0xff] }
 0x73a   : > { %v6347_v26 = vmax.f32 %v5628_v57, %v6286_v45  ;;  %6252 = vmatmul.f32.gmra.mxu2 %v8852_v0  ;;  %8886 = vmatmul.msk.f32.gmra.mxu3 %vm3642_vm5, %v8853_v24  ;;  %v5629_v2 = vmax.f32 %v4910_v34, %v13594_v5  ;;  %v8859_v57 = vld [vmem:[%s15147_s3 + $0x1048] sm:$0xff] }
 0x73c   : > { %v14231_v42 = vmax.f32 %v6347_v26, 0.0 }
 0x73d   : > { %v6125_v17 = vpop.f32.mrf.mxu1  ;;  %v6205_v7 = vpop.f32.mrf.mxu2 }
 0x73e   : > { %v6699_v44 = vrot.slane %v14231_v42, 5  ;;  %v6882_v54 = vrot.slane %v14231_v42, 6  ;;  %v6206_v62 = vadd.f32 %v6205_v7, %v6123_v3  ;;  %v6288_v21 = vpop.f32.mrf.mxu3  ;;  %v6042_v23 = vpop.f32.mrf.mxu0  ;;  %v6416_v63 = vrot.slane %v14231_v42, 1 }
 0x73f   : > { %v6043_v29 = vadd.f32 %v6042_v23, %v13638_v28 }
 0x740   : > { %v6289_v0 = vadd.f32 %v6288_v21, %v6206_v62  ;;  %6172 = vmatmul.f32.gmra.mxu1 %v8857_v36  ;;  %v6700_v24 = vsel %vm2629_vm4, %v6698_v9, %v6699_v44  ;;  %v6883_v45 = vsel %vm6493_vm6, %v6881_v41, %v6882_v54  ;;  %v14255_v8 = vsel %vm661_vm2, %v6414_v19, %v6416_v63  ;;  %v8862_v19 = vld [vmem:[%s15147_s3 + $0x1060] sm:$0x3]  ;;  %v8864_v36 = vld [vmem:[%s15147_s3 + $0x1070] sm:$0x3]  ;;  %v8865_v62 = vld [vmem:[%s15147_s3 + $0x1078] sm:$0x3] }
 0x741   : > { %6089 = vmatmul.f32.gmra.mxu0 %v8856_v51  ;;  %v6126_v20 = vadd.f32 %v6125_v17, %v6043_v29 }
 0x742   : > { %v6348_v5 = vmax.f32 %v5629_v2, %v6289_v0  ;;  %6255 = vmatmul.f32.gmra.mxu2 %v8858_v43  ;;  %8887 = vmatmul.msk.f32.gmra.mxu3 %vm3642_vm5, %v8859_v57 }
 0x744   : > { %v14258_v28 = vmax.f32 %v6348_v5, 0.0 }
 0x745   : > { %v6128_v40 = vpop.f32.mrf.mxu1  ;;  %v6208_v26 = vpop.f32.mrf.mxu2 }
 0x746   : > { %v6209_v10 = vadd.f32 %v6208_v26, %v6126_v20  ;;  %v6291_v3 = vpop.f32.mrf.mxu3  ;;  %v6045_v34 = vpop.f32.mrf.mxu0  ;;  %v6701_v9 = vrot.slane %v14258_v28, 5  ;;  %v6884_v41 = vrot.slane %v14258_v28, 6  ;;  %v6418_v7 = vrot.slane %v14258_v28, 1 }
 0x747   : > { %v6046_v17 = vadd.f32 %v6045_v34, %v13667_v55 }
 0x748   : > { %v6292_v21 = vadd.f32 %v6291_v3, %v6209_v10  ;;  %6175 = vmatmul.f32.gmra.mxu1 %v8863_v16  ;;  %v6702_v23 = vsel %vm2629_vm4, %v6699_v44, %v6701_v9  ;;  %v6885_v51 = vsel %vm6493_vm6, %v6882_v54, %v6884_v41  ;;  %v14279_v2 = vsel %vm661_vm2, %v6416_v63, %v6418_v7 }
 0x749   : > { %6092 = vmatmul.f32.gmra.mxu0 %v8862_v19  ;;  %v6129_v43 = vadd.f32 %v6128_v40, %v6046_v17 }
 0x74a   : > { %v6349_v55 = vmax.f32 %v13626_v1, %v6292_v21  ;;  %6258 = vmatmul.f32.gmra.mxu2 %v8864_v36  ;;  %8888 = vmatmul.msk.f32.gmra.mxu3 %vm3642_vm5, %v8865_v62 }
 0x74c   : > { %v14283_v29 = vmax.f32 %v6349_v55, 0.0 }
 0x74d   : > { %v6131_v57 = vpop.f32.mrf.mxu1  ;;  %v6211_v0 = vpop.f32.mrf.mxu2 }
 0x74e   : > { %v6212_v5 = vadd.f32 %v6211_v0, %v6129_v43  ;;  %v6294_v20 = vpop.f32.mrf.mxu3  ;;  %v6048_v44 = vpop.f32.mrf.mxu0  ;;  %v6703_v54 = vrot.slane %v14283_v29, 5  ;;  %v6886_v63 = vrot.slane %v14283_v29, 6  ;;  %v6420_v26 = vrot.slane %v14283_v29, 1 }
 0x74f   : > { %v6049_v1 = vadd.f32 %v6048_v44, %v13696_v22 }
 0x750   : > { %v6295_v16 = vadd.f32 %v6294_v20, %v6212_v5  ;;  %8911 = vmatmul.msk.f32.vlgmr.msrb.gmra.mxu1 %vm6452_vm7, %v14175_v50  ;;  %v6704_v40 = vsel %vm2629_vm4, %v6701_v9, %v6703_v54  ;;  %v6887_v10 = vsel %vm6493_vm6, %v6884_v41, %v6886_v63  ;;  %v6421_v3 = vsel %vm661_vm2, %v6418_v7, %v6420_v26 }
 0x751   : > { %8890 = vmatmul.msk.f32.vlgmr.msrb.gmra.mxu0 %vm6452_vm7, %v14226_v32  ;;  %v6132_v19 = vadd.f32 %v6131_v57, %v6049_v1 }
 0x752   : > { %v6350_v34 = vmax.f32 %v13655_v4, %v6295_v16  ;;  %8932 = vmatmul.msk.f32.vlgmr.msrb.gmra.mxu2 %vm6452_vm7, %v6700_v24  ;;  %8953 = vmatmul.msk.f32.vlgmr.msrb.gmra.mxu3 %vm6452_vm7, %v6883_v45 }
 0x754   : > { %v14299_v22 = vmax.f32 %v6350_v34, 0.0 }
 0x755   : > { %v6134_v17 = vpop.f32.mrf.mxu1  ;;  %v6214_v50 = vpop.f32.mrf.mxu2 }
 0x756   : > { %v6215_v36 = vadd.f32 %v6214_v50, %v6132_v19  ;;  %v6297_v9 = vpop.f32.mrf.mxu3  ;;  %v6051_v62 = vpop.f32.mrf.mxu0  ;;  %v6705_v41 = vrot.slane %v14299_v22, 5  ;;  %v6888_v7 = vrot.slane %v14299_v22, 6  ;;  %v6422_v32 = vrot.slane %v14299_v22, 1 }
 0x757   : > { %v6052_v4 = vadd.f32 %v6051_v62, %v13725_v47 }
 0x758   : > { %v6298_v21 = vadd.f32 %v6297_v9, %v6215_v36  ;;  %8912 = vmatmul.msk.f32.gmra.mxu1 %vm6452_vm7, %v14183_v38  ;;  %v6706_v24 = vsel %vm2629_vm4, %v6703_v54, %v6705_v41  ;;  %v6889_v45 = vsel %vm6493_vm6, %v6886_v63, %v6888_v7  ;;  %v6423_v55 = vsel %vm661_vm2, %v6420_v26, %v6422_v32 }
 0x759   : > { %8891 = vmatmul.msk.f32.gmra.mxu0 %vm6452_vm7, %v14255_v8  ;;  %v6135_v57 = vadd.f32 %v6134_v17, %v6052_v4 }
 0x75a   : > { %v6351_v43 = vmax.f32 %v13684_v15, %v6298_v21  ;;  %8933 = vmatmul.msk.f32.gmra.mxu2 %vm6452_vm7, %v6702_v23  ;;  %8954 = vmatmul.msk.f32.gmra.mxu3 %vm6452_vm7, %v6885_v51 }
 0x75c   : > { %v14315_v47 = vmax.f32 %v6351_v43, 0.0 }
 0x75d   : > { %v6137_v0 = vpop.f32.mrf.mxu1  ;;  %v6217_v38 = vpop.f32.mrf.mxu2 }
 0x75e   : > { %v6218_v5 = vadd.f32 %v6217_v38, %v6135_v57  ;;  %v6300_v20 = vpop.f32.mrf.mxu3  ;;  %v6054_v44 = vpop.f32.mrf.mxu0  ;;  %v6707_v54 = vrot.slane %v14315_v47, 5  ;;  %v6890_v63 = vrot.slane %v14315_v47, 6  ;;  %v6424_v8 = vrot.slane %v14315_v47, 1 }
 0x75f   : > { %v6055_v15 = vadd.f32 %v6054_v44, %v13754_v18 }
 0x760   : > { %v6301_v26 = vadd.f32 %v6300_v20, %v6218_v5  ;;  %8913 = vmatmul.msk.f32.gmra.mxu1 %vm6452_vm7, %v14231_v42  ;;  %v6708_v23 = vsel %vm2629_vm4, %v6705_v41, %v6707_v54  ;;  %v6891_v51 = vsel %vm6493_vm6, %v6888_v7, %v6890_v63  ;;  %v6425_v1 = vsel %vm661_vm2, %v6422_v32, %v6424_v8 }
 0x761   : > { %8892 = vmatmul.msk.f32.gmra.mxu0 %vm6452_vm7, %v14279_v2  ;;  %v6138_v34 = vadd.f32 %v6137_v0, %v6055_v15 }
 0x762   : > { %v6352_v16 = vmax.f32 %v13713_v37, %v6301_v26  ;;  %8934 = vmatmul.msk.f32.gmra.mxu2 %vm6452_vm7, %v6704_v40  ;;  %8955 = vmatmul.msk.f32.gmra.mxu3 %vm6452_vm7, %v6887_v10 }
 0x764   : > { %v14331_v18 = vmax.f32 %v6352_v16, 0.0 }
 0x765   : > { %v6140_v19 = vpop.f32.mrf.mxu1  ;;  %v6220_v42 = vpop.f32.mrf.mxu2 }
 0x766   : > { %v6221_v17 = vadd.f32 %v6220_v42, %v6138_v34  ;;  %v6303_v50 = vpop.f32.mrf.mxu3  ;;  %v6057_v36 = vpop.f32.mrf.mxu0  ;;  %v6709_v9 = vrot.slane %v14331_v18, 5  ;;  %v6892_v62 = vrot.slane %v14331_v18, 6  ;;  %v6426_v2 = vrot.slane %v14331_v18, 1 }
 0x767   : > { %v6058_v37 = vadd.f32 %v6057_v36, %v13783_v27 }
 0x768   : > { %v6304_v41 = vadd.f32 %v6303_v50, %v6221_v17  ;;  %8914 = vmatmul.msk.f32.gmra.mxu1 %vm6452_vm7, %v14258_v28  ;;  %v6710_v40 = vsel %vm2629_vm4, %v6707_v54, %v6709_v9  ;;  %v6893_v10 = vsel %vm6493_vm6, %v6890_v63, %v6892_v62  ;;  %v6427_v7 = vsel %vm661_vm2, %v6424_v8, %v6426_v2 }
 0x769   : > { %8893 = vmatmul.msk.f32.gmra.mxu0 %vm6452_vm7, %v6421_v3  ;;  %v6141_v27 = vadd.f32 %v6140_v19, %v6058_v37 }
 0x76a   : > { %v6353_v32 = vmax.f32 %v13742_v49, %v6304_v41  ;;  %8935 = vmatmul.msk.f32.gmra.mxu2 %vm6452_vm7, %v6706_v24  ;;  %8956 = vmatmul.msk.f32.gmra.mxu3 %vm6452_vm7, %v6889_v45 }
 0x76c   : > { %v14346_v4 = vmax.f32 %v6353_v32, 0.0 }
 0x76d   : > { %v6143_v21 = vpop.f32.mrf.mxu1  ;;  %v6223_v43 = vpop.f32.mrf.mxu2 }
 0x76e   : > { %v6224_v28 = vadd.f32 %v6223_v43, %v6141_v27  ;;  %v6306_v57 = vpop.f32.mrf.mxu3  ;;  %v6060_v0 = vpop.f32.mrf.mxu0  ;;  %v6711_v38 = vrot.slane %v14346_v4, 5  ;;  %v6894_v5 = vrot.slane %v14346_v4, 6  ;;  %v6428_v3 = vrot.slane %v14346_v4, 1 }
 0x76f   : > { %v6061_v49 = vadd.f32 %v6060_v0, %v13812_v60 }
 0x770   : > { %v6307_v20 = vadd.f32 %v6306_v57, %v6224_v28  ;;  %8915 = vmatmul.msk.f32.gmra.mxu1 %vm6452_vm7, %v14283_v29  ;;  %v6712_v24 = vsel %vm2629_vm4, %v6709_v9, %v6711_v38  ;;  %v6895_v45 = vsel %vm6493_vm6, %v6892_v62, %v6894_v5  ;;  %v6429_v44 = vsel %vm661_vm2, %v6426_v2, %v6428_v3 }
 0x771   : > { %8894 = vmatmul.msk.f32.gmra.mxu0 %vm6452_vm7, %v6423_v55  ;;  %v6144_v60 = vadd.f32 %v6143_v21, %v6061_v49 }
 0x772   : > { %v6354_v54 = vmax.f32 %v13771_v6, %v6307_v20  ;;  %8936 = vmatmul.msk.f32.gmra.mxu2 %vm6452_vm7, %v6708_v23  ;;  %8957 = vmatmul.msk.f32.gmra.mxu3 %vm6452_vm7, %v6891_v51 }
 0x774   : > { %v14361_v63 = vmax.f32 %v6354_v54, 0.0 }
 0x775   : > { %v6146_v8 = vpop.f32.mrf.mxu1  ;;  %v6226_v15 = vpop.f32.mrf.mxu2 }
 0x776   : > { %v6227_v29 = vadd.f32 %v6226_v15, %v6144_v60  ;;  %v6309_v26 = vpop.f32.mrf.mxu3  ;;  %v6063_v16 = vpop.f32.mrf.mxu0  ;;  %v6713_v34 = vrot.slane %v14361_v63, 5  ;;  %v6896_v19 = vrot.slane %v14361_v63, 6  ;;  %v6430_v55 = vrot.slane %v14361_v63, 1 }
 0x777   : > { %v6064_v6 = vadd.f32 %v6063_v16, %v13841_v48 }
 0x778   : > { %v6310_v42 = vadd.f32 %v6309_v26, %v6227_v29  ;;  %8916 = vmatmul.msk.f32.gmra.mxu1 %vm6452_vm7, %v14299_v22  ;;  %v6714_v23 = vsel %vm2629_vm4, %v6711_v38, %v6713_v34  ;;  %v6897_v51 = vsel %vm6493_vm6, %v6894_v5, %v6896_v19  ;;  %v6431_v17 = vsel %vm661_vm2, %v6428_v3, %v6430_v55 }
 0x779   : > { %8895 = vmatmul.msk.f32.gmra.mxu0 %vm6452_vm7, %v6425_v1  ;;  %v6147_v48 = vadd.f32 %v6146_v8, %v6064_v6 }
 0x77a   : > { %v6355_v50 = vmax.f32 %v13800_v33, %v6310_v42  ;;  %8937 = vmatmul.msk.f32.gmra.mxu2 %vm6452_vm7, %v6710_v40  ;;  %8958 = vmatmul.msk.f32.gmra.mxu3 %vm6452_vm7, %v6893_v10 }
 0x77c   : > { %v14376_v36 = vmax.f32 %v6355_v50, 0.0 }
 0x77d   : > { %v6149_v9 = vpop.f32.mrf.mxu1  ;;  %v6229_v62 = vpop.f32.mrf.mxu2 }
 0x77e   : > { %v6230_v22 = vadd.f32 %v6229_v62, %v6147_v48  ;;  %v6312_v2 = vpop.f32.mrf.mxu3  ;;  %v6066_v37 = vpop.f32.mrf.mxu0  ;;  %v6715_v41 = vrot.slane %v14376_v36, 5  ;;  %v6898_v32 = vrot.slane %v14376_v36, 6  ;;  %v6432_v1 = vrot.slane %v14376_v36, 1 }
 0x77f   : > { %v6067_v33 = vadd.f32 %v6066_v37, %v13870_v14 }
 0x780   : > { %v6313_v27 = vadd.f32 %v6312_v2, %v6230_v22  ;;  %8917 = vmatmul.msk.f32.gmra.mxu1 %vm6452_vm7, %v14315_v47  ;;  %v6716_v40 = vsel %vm2629_vm4, %v6713_v34, %v6715_v41  ;;  %v6899_v10 = vsel %vm6493_vm6, %v6896_v19, %v6898_v32  ;;  %v6433_v21 = vsel %vm661_vm2, %v6430_v55, %v6432_v1 }
 0x781   : > { %8896 = vmatmul.msk.f32.gmra.mxu0 %vm6452_vm7, %v6427_v7  ;;  %v6150_v14 = vadd.f32 %v6149_v9, %v6067_v33 }
 0x782   : > { %v6356_v43 = vmax.f32 %v13829_v11, %v6313_v27  ;;  %8938 = vmatmul.msk.f32.gmra.mxu2 %vm6452_vm7, %v6712_v24  ;;  %8959 = vmatmul.msk.f32.gmra.mxu3 %vm6452_vm7, %v6895_v45 }
 0x784   : > { %v14391_v28 = vmax.f32 %v6356_v43, 0.0 }
 0x785   : > { %v6152_v57 = vpop.f32.mrf.mxu1  ;;  %v6232_v0 = vpop.f32.mrf.mxu2 }
 0x786   : > { %v6233_v47 = vadd.f32 %v6232_v0, %v6150_v14  ;;  %v6315_v38 = vpop.f32.mrf.mxu3  ;;  %v6069_v5 = vpop.f32.mrf.mxu0  ;;  %v6717_v3 = vrot.slane %v14391_v28, 5  ;;  %v6900_v49 = vrot.slane %v14391_v28, 6  ;;  %v6434_v7 = vrot.slane %v14391_v28, 1 }
 0x787   : > { %v6070_v11 = vadd.f32 %v6069_v5, %v13899_v58 }
 0x788   : > { %v6316_v20 = vadd.f32 %v6315_v38, %v6233_v47  ;;  %8918 = vmatmul.msk.f32.gmra.mxu1 %vm6452_vm7, %v14331_v18  ;;  %v6718_v24 = vsel %vm2629_vm4, %v6715_v41, %v6717_v3  ;;  %v6901_v45 = vsel %vm6493_vm6, %v6898_v32, %v6900_v49  ;;  %v6435_v54 = vsel %vm661_vm2, %v6432_v1, %v6434_v7 }
 0x789   : > { %8897 = vmatmul.msk.f32.gmra.mxu0 %vm6452_vm7, %v6429_v44  ;;  %v6153_v58 = vadd.f32 %v6152_v57, %v6070_v11 }
 0x78a   : > { %v6357_v60 = vmax.f32 %v13858_v59, %v6316_v20  ;;  %8939 = vmatmul.msk.f32.gmra.mxu2 %vm6452_vm7, %v6714_v23  ;;  %8960 = vmatmul.msk.f32.gmra.mxu3 %vm6452_vm7, %v6897_v51 }
 0x78c   : > { %v14406_v8 = vmax.f32 %v6357_v60, 0.0 }
 0x78d   : > { %v6155_v15 = vpop.f32.mrf.mxu1  ;;  %v6235_v29 = vpop.f32.mrf.mxu2 }
 0x78e   : > { %v6236_v18 = vadd.f32 %v6235_v29, %v6153_v58  ;;  %v6318_v26 = vpop.f32.mrf.mxu3  ;;  %v6072_v16 = vpop.f32.mrf.mxu0  ;;  %v6719_v34 = vrot.slane %v14406_v8, 5  ;;  %v6902_v19 = vrot.slane %v14406_v8, 6  ;;  %v6436_v44 = vrot.slane %v14406_v8, 1 }
 0x78f   : > { %v6073_v59 = vadd.f32 %v6072_v16, %v13928_v46 }
 0x790   : > { %v6319_v55 = vadd.f32 %v6318_v26, %v6236_v18  ;;  %8919 = vmatmul.msk.f32.gmra.mxu1 %vm6452_vm7, %v14346_v4  ;;  %v6720_v6 = vsel %vm2629_vm4, %v6717_v3, %v6719_v34  ;;  %v6903_v42 = vsel %vm6493_vm6, %v6900_v49, %v6902_v19  ;;  %v6437_v23 = vsel %vm661_vm2, %v6434_v7, %v6436_v44 }
 0x791   : > { %8898 = vmatmul.msk.f32.gmra.mxu0 %vm6452_vm7, %v6431_v17  ;;  %v6156_v46 = vadd.f32 %v6155_v15, %v6073_v59 }
 0x792   : > { %v6358_v51 = vmax.f32 %v13887_v30, %v6319_v55  ;;  %8940 = vmatmul.msk.f32.gmra.mxu2 %vm6452_vm7, %v6716_v40  ;;  %8961 = vmatmul.msk.f32.gmra.mxu3 %vm6452_vm7, %v6899_v10 }
 0x794   : > { %v14421_v50 = vmax.f32 %v6358_v51, 0.0 }
 0x795   : > { %v6158_v48 = vpop.f32.mrf.mxu1  ;;  %v6238_v9 = vpop.f32.mrf.mxu2 }
 0x796   : > { %v6239_v4 = vadd.f32 %v6238_v9, %v6156_v46  ;;  %v6321_v62 = vpop.f32.mrf.mxu3  ;;  %v6075_v22 = vpop.f32.mrf.mxu0  ;;  %v6721_v2 = vrot.slane %v14421_v50, 5  ;;  %v6904_v37 = vrot.slane %v14421_v50, 6  ;;  %v6438_v17 = vrot.slane %v14421_v50, 1 }
 0x797   : > { %v6076_v30 = vadd.f32 %v6075_v22, %v13957_v39 }
 0x798   : > { %v6322_v41 = vadd.f32 %v6321_v62, %v6239_v4  ;;  %8920 = vmatmul.msk.f32.gmra.mxu1 %vm6452_vm7, %v14361_v63  ;;  %v6722_v32 = vsel %vm2629_vm4, %v6719_v34, %v6721_v2  ;;  %v6905_v1 = vsel %vm6493_vm6, %v6902_v19, %v6904_v37  ;;  %v6439_v33 = vsel %vm661_vm2, %v6436_v44, %v6438_v17 }
 0x799   : > { %8899 = vmatmul.msk.f32.gmra.mxu0 %vm6452_vm7, %v6433_v21  ;;  %v6159_v39 = vadd.f32 %v6158_v48, %v6076_v30 }
 0x79a   : > { %v6359_v27 = vmax.f32 %v13916_v52, %v6322_v41  ;;  %8941 = vmatmul.msk.f32.gmra.mxu2 %vm6452_vm7, %v6718_v24  ;;  %8962 = vmatmul.msk.f32.gmra.mxu3 %vm6452_vm7, %v6901_v45 }
 0x79c   : > { %v14436_v40 = vmax.f32 %v6359_v27, 0.0 }
 0x79d   : > { %v6161_v10 = vpop.f32.mrf.mxu1  ;;  %v6241_v43 = vpop.f32.mrf.mxu2 }
 0x79e   : > { %v6242_v63 = vadd.f32 %v6241_v43, %v6159_v39  ;;  %v6324_v14 = vpop.f32.mrf.mxu3  ;;  %v6078_v57 = vpop.f32.mrf.mxu0  ;;  %v6723_v0 = vrot.slane %v14436_v40, 5  ;;  %v6906_v47 = vrot.slane %v14436_v40, 6  ;;  %v6440_v21 = vrot.slane %v14436_v40, 1 }
 0x79f   : > { %v6079_v52 = vadd.f32 %v6078_v57, %v13986_v61 }
 0x7a0   : > { %v6325_v38 = vadd.f32 %v6324_v14, %v6242_v63  ;;  %8921 = vmatmul.msk.f32.gmra.mxu1 %vm6452_vm7, %v14376_v36  ;;  %v6724_v5 = vsel %vm2629_vm4, %v6721_v2, %v6723_v0  ;;  %v6907_v3 = vsel %vm6493_vm6, %v6904_v37, %v6906_v47  ;;  %v6441_v49 = vsel %vm661_vm2, %v6438_v17, %v6440_v21  ;;  %v15967_v14 = vld [vmem:[#allocation134_spill] sm:$0xff] }
 0x7a1   : > { %8900 = vmatmul.msk.f32.gmra.mxu0 %vm6452_vm7, %v6435_v54  ;;  %v6162_v61 = vadd.f32 %v6161_v10, %v6079_v52 }
 0x7a2   : > { %v6360_v7 = vmax.f32 %v13945_v56, %v6325_v38  ;;  %8942 = vmatmul.msk.f32.gmra.mxu2 %vm6452_vm7, %v6720_v6  ;;  %8963 = vmatmul.msk.f32.gmra.mxu3 %vm6452_vm7, %v6903_v42 }
 0x7a4   : > { %v14451_v11 = vmax.f32 %v6360_v7, 0.0 }
 0x7a5   : > { %v6164_v20 = vpop.f32.mrf.mxu1  ;;  %v6244_v24 = vpop.f32.mrf.mxu2 }
 0x7a6   : > { %v6245_v36 = vadd.f32 %v6244_v24, %v6162_v61  ;;  %v6327_v45 = vpop.f32.mrf.mxu3  ;;  %v6081_v60 = vpop.f32.mrf.mxu0  ;;  %v6725_v58 = vrot.slane %v14451_v11, 5  ;;  %v6908_v15 = vrot.slane %v14451_v11, 6  ;;  %v6442_v54 = vrot.slane %v14451_v11, 1 }
 0x7a7   : > { %v6082_v56 = vadd.f32 %v6081_v60, %v14015_v25 }
 0x7a8   : > { %v6328_v29 = vadd.f32 %v6327_v45, %v6245_v36  ;;  %8922 = vmatmul.msk.f32.gmra.mxu1 %vm6452_vm7, %v14391_v28  ;;  %v6726_v18 = vsel %vm2629_vm4, %v6723_v0, %v6725_v58  ;;  %v6909_v26 = vsel %vm6493_vm6, %v6906_v47, %v6908_v15  ;;  %v14462_v16 = vsel %vm661_vm2, %v6440_v21, %v6442_v54  ;;  %v15969_v0 = vld [vmem:[#allocation182_spill] sm:$0xff]  ;;  %v15970_v47 = vld [vmem:[#allocation183_spill] sm:$0xff] }
 0x7a9   : > { %8901 = vmatmul.msk.f32.gmra.mxu0 %vm6452_vm7, %v6437_v23  ;;  %v6165_v19 = vadd.f32 %v6164_v20, %v6082_v56  ;;  %v4573_v21 = vadd.f32 %v15970_v47, %v15969_v0  ;;  %v15971_v20 = vld [vmem:[#allocation220_spill] sm:$0xff]  ;;  %v15972_v36 = vld [vmem:[#allocation139_spill] sm:$0xff] }
 0x7aa   : > { %v6361_v34 = vmax.f32 %v13974_v13, %v6328_v29  ;;  %8943 = vmatmul.msk.f32.gmra.mxu2 %vm6452_vm7, %v6722_v32  ;;  %8964 = vmatmul.msk.f32.gmra.mxu3 %vm6452_vm7, %v6905_v1  ;;  %v15973_v56 = vld [vmem:[#allocation136_spill] sm:$0xff] }
 0x7ab   : > { %v4656_v24 = vadd.f32 %v15971_v20, %v4573_v21 }
 0x7ac   : > { %v14468_v25 = vmax.f32 %v6361_v34, 0.0  ;;  %v15975_v34 = vld [vmem:[#allocation217_spill] sm:$0xff] }
 0x7ad   : > { %v6167_v44 = vpop.f32.mrf.mxu1  ;;  %v6247_v28 = vpop.f32.mrf.mxu2 }
 0x7ae   : > { %v6248_v59 = vadd.f32 %v6247_v28, %v6165_v19  ;;  %v6330_v55 = vpop.f32.mrf.mxu3  ;;  %v6084_v6 = vpop.f32.mrf.mxu0  ;;  %v6727_v42 = vrot.slane %v14468_v25, 5  ;;  %v6910_v51 = vrot.slane %v14468_v25, 6  ;;  %v6444_v23 = vrot.slane %v14468_v25, 1  ;;  %v15976_v28 = vld [vmem:[#allocation137_spill] sm:$0xff] }
 0x7af   : > { %v6085_v13 = vadd.f32 %v6084_v6, %v14044_v31  ;;  %v4739_v19 = vadd.f32 %v15975_v34, %v4656_v24 }
 0x7b0   : > { %v6331_v46 = vadd.f32 %v6330_v55, %v6248_v59  ;;  %8923 = vmatmul.msk.f32.gmra.mxu1 %vm6452_vm7, %v14406_v8  ;;  %v6728_v48 = vsel %vm2629_vm4, %v6725_v58, %v6727_v42  ;;  %v6911_v9 = vsel %vm6493_vm6, %v6908_v15, %v6910_v51  ;;  %v14479_v4 = vsel %vm661_vm2, %v6442_v54, %v6444_v23  ;;  %v15977_v55 = vld [vmem:[#allocation221_spill] sm:$0xff] }
 0x7b1   : > { %8902 = vmatmul.msk.f32.gmra.mxu0 %vm6452_vm7, %v6439_v33  ;;  %v6168_v22 = vadd.f32 %v6167_v44, %v6085_v13  ;;  %v4822_v6 = vadd.f32 %v15977_v55, %v4739_v19 }
 0x7b2   : > { %v6362_v62 = vmax.f32 %v14003_v53, %v6331_v46  ;;  %8944 = vmatmul.msk.f32.gmra.mxu2 %vm6452_vm7, %v6724_v5  ;;  %8965 = vmatmul.msk.f32.gmra.mxu3 %vm6452_vm7, %v6907_v3 }
 0x7b4   : > { %v14485_v31 = vmax.f32 %v6362_v62, 0.0  ;;  %v15978_v62 = vld [vmem:[#allocation180_spill] sm:$0xff] }
 0x7b5   : > { %v6170_v2 = vpop.f32.mrf.mxu1  ;;  %v6250_v8 = vpop.f32.mrf.mxu2 }
 0x7b6   : > { %v6251_v37 = vadd.f32 %v6250_v8, %v6168_v22  ;;  %v6333_v17 = vpop.f32.mrf.mxu3  ;;  %v6087_v30 = vpop.f32.mrf.mxu0  ;;  %v6729_v41 = vrot.slane %v14485_v31, 5  ;;  %v6912_v32 = vrot.slane %v14485_v31, 6  ;;  %v6446_v1 = vrot.slane %v14485_v31, 1 }
 0x7b7   : > { %v6088_v53 = vadd.f32 %v6087_v30, %v14067_v35 }
 0x7b8   : > { %v6334_v33 = vadd.f32 %v6333_v17, %v6251_v37  ;;  %8924 = vmatmul.msk.f32.gmra.mxu1 %vm6452_vm7, %v14421_v50  ;;  %v6730_v27 = vsel %vm2629_vm4, %v6727_v42, %v6729_v41  ;;  %v6913_v39 = vsel %vm6493_vm6, %v6910_v51, %v6912_v32  ;;  %v14496_v10 = vsel %vm661_vm2, %v6444_v23, %v6446_v1  ;;  %v15968_v50 = vld [vmem:[#allocation131_spill] sm:$0xff] }
 0x7b9   : > { %8903 = vmatmul.msk.f32.gmra.mxu0 %vm6452_vm7, %v6441_v49  ;;  %v6171_v63 = vadd.f32 %v6170_v2, %v6088_v53  ;;  %v3876_v57 = vadd.f32 %v15968_v50, %v15967_v14  ;;  %v15979_v2 = vld [vmem:[#allocation84_spill] sm:$0xff]  ;;  %v15981_v53 = vld [vmem:[#allocation81_spill] sm:$0xff] }
 0x7ba   : > { %v6363_v43 = vmax.f32 %v14032_v12, %v6334_v33  ;;  %8945 = vmatmul.msk.f32.gmra.mxu2 %vm6452_vm7, %v6726_v18  ;;  %8966 = vmatmul.msk.f32.gmra.mxu3 %vm6452_vm7, %v6909_v26  ;;  %v15974_v18 = vld [vmem:[#allocation82_spill] sm:$0xff] }
 0x7bb   : > { %v3959_v29 = vadd.f32 %v15973_v56, %v3876_v57 }
 0x7bc   : > { %v14502_v35 = vmax.f32 %v6363_v43, 0.0  ;;  %v15982_v43 = vld [vmem:[#allocation179_spill] sm:$0xff] }
 0x7bd   : > { %v6173_v52 = vpop.f32.mrf.mxu1  ;;  %v6253_v38 = vpop.f32.mrf.mxu2  ;;  %v4042_v59 = vadd.f32 %v15976_v28, %v3959_v29 }
 0x7be   : > { %v6254_v5 = vadd.f32 %v6253_v38, %v6171_v63  ;;  %v6336_v3 = vpop.f32.mrf.mxu3  ;;  %v6090_v49 = vpop.f32.mrf.mxu0  ;;  %v6731_v12 = vrot.slane %v14502_v35, 5  ;;  %v6914_v7 = vrot.slane %v14502_v35, 6  ;;  %v6448_v61 = vrot.slane %v14502_v35, 1 }
 0x7bf   : > { %v6091_v45 = vadd.f32 %v6090_v49, %v15972_v36  ;;  %v4125_v22 = vadd.f32 %v15978_v62, %v4042_v59 }
 0x7c0   : > { %v6337_v60 = vadd.f32 %v6336_v3, %v6254_v5  ;;  %8925 = vmatmul.msk.f32.gmra.mxu1 %vm6452_vm7, %v14436_v40  ;;  %v6732_v58 = vsel %vm2629_vm4, %v6729_v41, %v6731_v12  ;;  %v6915_v15 = vsel %vm6493_vm6, %v6912_v32, %v6914_v7  ;;  %v6449_v54 = vsel %vm661_vm2, %v6446_v1, %v6448_v61  ;;  %v15980_v32 = vld [vmem:[#allocation222_spill] sm:$0xff]  ;;  %v15985_v5 = vld [vmem:[#allocation141_spill] sm:$0xff] }
 0x7c1   : > { %8904 = vmatmul.msk.f32.gmra.mxu0 %vm6452_vm7, %v14462_v16  ;;  %v6174_v44 = vadd.f32 %v6173_v52, %v6091_v45  ;;  %v4905_v1 = vadd.f32 %v15980_v32, %v4822_v6  ;;  %v4208_v63 = vadd.f32 %v15982_v43, %v4125_v22 }
 0x7c2   : > { %v6364_v26 = vmax.f32 %v15974_v18, %v6337_v60  ;;  %8946 = vmatmul.msk.f32.gmra.mxu2 %vm6452_vm7, %v6728_v48  ;;  %8967 = vmatmul.msk.f32.gmra.mxu3 %vm6452_vm7, %v6911_v9 }
 0x7c3   : > { %v4928_v0 = vmax.f32 %v4208_v63, %v4905_v1 }
 0x7c4   : > { %v14525_v40 = vmax.f32 %v6364_v26, 0.0 }
 0x7c5   : > { %v6176_v42 = vpop.f32.mrf.mxu1  ;;  %v6256_v51 = vpop.f32.mrf.mxu2  ;;  %v5647_v3 = vmax.f32 %v4928_v0, %v15985_v5 }
 0x7c6   : > { %v6257_v23 = vadd.f32 %v6256_v51, %v6174_v44  ;;  %v6339_v13 = vpop.f32.mrf.mxu3  ;;  %v6093_v16 = vpop.f32.mrf.mxu0  ;;  %v6733_v46 = vrot.slane %v14525_v40, 5  ;;  %v6916_v48 = vrot.slane %v14525_v40, 6  ;;  %v6450_v9 = vrot.slane %v14525_v40, 1 }
 0x7c7   : > { %v6094_v8 = vadd.f32 %v6093_v16, %v15979_v2 }
 0x7c8   : > { %v6340_v37 = vadd.f32 %v6339_v13, %v6257_v23  ;;  %8926 = vmatmul.msk.f32.gmra.mxu1 %vm6452_vm7, %v14451_v11  ;;  %v6734_v17 = vsel %vm2629_vm4, %v6731_v12, %v6733_v46  ;;  %v6917_v30 = vsel %vm6493_vm6, %v6914_v7, %v6916_v48  ;;  %v6451_v41 = vsel %vm661_vm2, %v6448_v61, %v6450_v9 }
 0x7c9   : > { %8905 = vmatmul.msk.f32.gmra.mxu0 %vm6452_vm7, %v14479_v4  ;;  %v6177_v14 = vadd.f32 %v6176_v42, %v6094_v8 }
 0x7ca   : > { %v6365_v33 = vmax.f32 %v15981_v53, %v6340_v37  ;;  %8947 = vmatmul.msk.f32.gmra.mxu2 %vm6452_vm7, %v6730_v27  ;;  %8968 = vmatmul.msk.f32.gmra.mxu3 %vm6452_vm7, %v6913_v39 }
 0x7cc   : > { %v6387_v11 = vmax.f32 %v6365_v33, 0.0 }
 0x7cd   : > { %v14546_v50 = vpop.f32.mrf.mxu1  ;;  %v6259_v57 = vpop.f32.mrf.mxu2 }
 0x7ce   : > { %15983 = vst [vmem:[#allocation85_spill] sm:$0xff] %v14546_v50  ;;  %v6735_v47 = vrot.slane %v6387_v11, 5  ;;  %v6918_v21 = vrot.slane %v6387_v11, 6  ;;  %v6260_v52 = vadd.f32 %v6259_v57, %v6177_v14  ;;  %v6342_v4 = vpop.f32.mrf.mxu3  ;;  %v14548_v38 = vpop.f32.mrf.mxu0 }
 0x7cf   : > { %15984 = vst [vmem:[#allocation138_spill] sm:$0xff] %v14548_v38 }
 0x7d0   : > { %v6343_v49 = vadd.f32 %v6342_v4, %v6260_v52  ;;  %8927 = vmatmul.msk.f32.gmra.mxu1 %vm6452_vm7, %v14468_v25  ;;  %v6736_v27 = vsel %vm2629_vm4, %v6733_v46, %v6735_v47  ;;  %v6919_v39 = vsel %vm6493_vm6, %v6916_v48, %v6918_v21 }
 0x7d1   : > { %8906 = vmatmul.msk.f32.gmra.mxu0 %vm6452_vm7, %v14496_v10 }
 0x7d2   : > { %v6366_v12 = vmax.f32 %v5647_v3, %v6343_v49  ;;  %8948 = vmatmul.msk.f32.gmra.mxu2 %vm6452_vm7, %v6732_v58  ;;  %8969 = vmatmul.msk.f32.gmra.mxu3 %vm6452_vm7, %v6915_v15 }
 0x7d4   : > { %v6388_v7 = vmax.f32 %v6366_v12, 0.0 }
 0x7d5   : > { %v14559_v61 = vpop.f32.mrf.mxu1  ;;  %v14561_v20 = vpop.f32.mrf.mxu2 }
 0x7d6   : > { %15986 = vst [vmem:[#allocation135_spill] sm:$0xff] %v14559_v61  ;;  %v6737_v24 = vrot.slane %v6388_v7, 5  ;;  %v6920_v36 = vrot.slane %v6388_v7, 6  ;;  %v14563_v25 = vpop.f32.mrf.mxu3  ;;  %v14565_v45 = vpop.f32.mrf.mxu0 }
 0x7d7   : > { %15987 = vst [vmem:[#allocation98_spill] sm:$0xff] %v14561_v20 }
 0x7d8   : > { %15988 = vst [vmem:[#allocation95_spill] sm:$0xff] %v14563_v25  ;;  %8928 = vmatmul.msk.f32.gmra.mxu1 %vm6452_vm7, %v14485_v31  ;;  %v6738_v10 = vsel %vm2629_vm4, %v6735_v47, %v6737_v24  ;;  %v6921_v60 = vsel %vm6493_vm6, %v6918_v21, %v6920_v36 }
 0x7d9   : > { %15989 = vst [vmem:[#allocation157_spill] sm:$0xff] %v14565_v45  ;;  %8907 = vmatmul.msk.f32.gmra.mxu0 %vm6452_vm7, %v6449_v54 }
 0x7da   : > { %8949 = vmatmul.msk.f32.gmra.mxu2 %vm6452_vm7, %v6734_v17  ;;  %8970 = vmatmul.msk.f32.gmra.mxu3 %vm6452_vm7, %v6917_v30 }
 0x7dd   : > { %v14574_v58 = vpop.f32.mrf.mxu1  ;;  %v14576_v15 = vpop.f32.mrf.mxu2 }
 0x7de   : > { %15990 = vst [vmem:[#allocation100_spill] sm:$0xff] %v14576_v15  ;;  %v14578_v56 = vpop.f32.mrf.mxu3  ;;  %v14580_v29 = vpop.f32.mrf.mxu0 }
 0x7df   : > { %15991 = vst [vmem:[#allocation102_spill] sm:$0xff] %v14578_v56 }
 0x7e0   : > { %8929 = vmatmul.msk.f32.gmra.mxu1 %vm6452_vm7, %v14502_v35 }
 0x7e1   : > { %8908 = vmatmul.msk.f32.gmra.mxu0 %vm6452_vm7, %v6451_v41 }
 0x7e2   : > { %8950 = vmatmul.msk.f32.gmra.mxu2 %vm6452_vm7, %v6736_v27  ;;  %8971 = vmatmul.msk.f32.gmra.mxu3 %vm6452_vm7, %v6919_v39 }
 0x7e5   : > { %v14587_v31 = vpop.f32.mrf.mxu1  ;;  %v14589_v54 = vpop.f32.mrf.mxu2 }
 0x7e6   : > { %15992 = vst [vmem:[#allocation99_spill] sm:$0xff] %v14589_v54  ;;  %v14591_v18 = vpop.f32.mrf.mxu3  ;;  %v14593_v26 = vpop.f32.mrf.mxu0  ;;  %v14649_v54 = vld [vmem:[%s15149_s5] ss:$0 sm:$0xff] }
 0x7e7   : > { %15993 = vst [vmem:[#allocation101_spill] sm:$0xff] %v14591_v18 }
 0x7e8   : > { %8930 = vmatmul.msk.f32.gmra.mxu1 %vm6452_vm7, %v14525_v40 }
 0x7e9   : > { %8909 = vmatmul.msk.f32.gmra.mxu0 %vm6452_vm7, %v6450_v9 }
 0x7ea   : > { %8951 = vmatmul.msk.f32.gmra.mxu2 %vm6452_vm7, %v6738_v10  ;;  %8972 = vmatmul.msk.f32.gmra.mxu3 %vm6452_vm7, %v6921_v60 }
 0x7ed   : > { %v14600_v35 = vpop.f32.mrf.mxu1  ;;  %v14602_v34 = vpop.f32.mrf.mxu2 }
 0x7ee   : > { %v14604_v19 = vpop.f32.mrf.mxu3  ;;  %v14606_v44 = vpop.f32.mrf.mxu0 }
 0x7ef   : > { %15994 = vst [vmem:[#allocation154_spill] sm:$0xff] %v14604_v19 }
 0x7f5   : > { %v14608_v28 = vpop.f32.mrf.mxu1  ;;  %v14610_v59 = vpop.f32.mrf.mxu2 }
 0x7f6   : > { %v14612_v55 = vpop.f32.mrf.mxu3  ;;  %v14614_v40 = vpop.f32.mrf.mxu0 }
 0x7f7   : > { %15995 = vst [vmem:[#allocation104_spill] sm:$0xff] %v14612_v55 }
 0x7fd   : > { %v14616_v6 = vpop.f32.mrf.mxu1  ;;  %v14618_v42 = vpop.f32.mrf.mxu2 }
 0x7fe   : > { %v14620_v51 = vpop.f32.mrf.mxu3  ;;  %v14622_v23 = vpop.f32.mrf.mxu0 }
 0x805   : > { %v14624_v13 = vpop.f32.mrf.mxu1  ;;  %v14626_v16 = vpop.f32.mrf.mxu2 }
 0x806   : > { %v14628_v46 = vpop.f32.mrf.mxu3  ;;  %v14630_v48 = vpop.f32.mrf.mxu0 }
 0x80d   : > { %v6658_v9 = vpop.f32.mrf.mxu1  ;;  %v14632_v62 = vpop.f32.mrf.mxu2 }
 0x80e   : > { %v14634_v22 = vpop.f32.mrf.mxu3  ;;  %v6538_v2 = vpop.f32.mrf.mxu0 }
 0x815   : > { %v6661_v8 = vpop.f32.mrf.mxu1  ;;  %v14636_v37 = vpop.f32.mrf.mxu2 }
 0x816   : > { %v14638_v17 = vpop.f32.mrf.mxu3  ;;  %v6541_v30 = vpop.f32.mrf.mxu0 }
 0x81d   : > { %v6664_v41 = vpop.f32.mrf.mxu1  ;;  %v6826_v32 = vpop.f32.mrf.mxu2 }
 0x81e   : > { %v14640_v1 = vpop.f32.mrf.mxu3  ;;  %v6544_v53 = vpop.f32.mrf.mxu0 }
 0x825   : > { %v6667_v33 = vpop.f32.mrf.mxu1  ;;  %v6829_v43 = vpop.f32.mrf.mxu2 }
 0x826   : > { %v7012_v63 = vpop.f32.mrf.mxu3  ;;  %v6547_v11 = vpop.f32.mrf.mxu0 }
 0x827   : > { %v6668_v61 = vadd.f32 %v6667_v33, %v6547_v11  ;;  %v6659_v33 = vadd.f32 %v6658_v9, %v6538_v2 }
 0x829   : > { %v6867_v9 = vadd.f32 %v14636_v37, %v6659_v33  ;;  %v16006_v33 = vld [vmem:[#allocation102_spill] sm:$0xff] }
 0x82d   : > { %v6670_v14 = vpop.f32.mrf.mxu1  ;;  %v6832_v57 = vpop.f32.mrf.mxu2 }
 0x82e   : > { %v7015_v0 = vpop.f32.mrf.mxu3  ;;  %v6550_v47 = vpop.f32.mrf.mxu0 }
 0x82f   : > { %v6671_v19 = vadd.f32 %v6670_v14, %v6550_v47  ;;  %v6662_v14 = vadd.f32 %v6661_v8, %v6541_v30 }
 0x835   : > { %v6673_v21 = vpop.f32.mrf.mxu1  ;;  %v6835_v52 = vpop.f32.mrf.mxu2 }
 0x836   : > { %v7018_v4 = vpop.f32.mrf.mxu3  ;;  %v6553_v5 = vpop.f32.mrf.mxu0  ;;  %v6871_v45 = vadd.f32 %v6835_v52, %v6671_v19  ;;  %v15998_v52 = vld [vmem:[#allocation99_spill] sm:$0xff] }
 0x837   : > { %v6674_v60 = vadd.f32 %v6673_v21, %v6553_v5  ;;  %v6665_v5 = vadd.f32 %v6664_v41, %v6544_v53  ;;  %v6653_v41 = vadd.f32 %v14616_v6, %v14622_v23  ;;  %v6647_v23 = vadd.f32 %v14600_v35, %v14606_v44 }
 0x839   : > { %v6865_v37 = vadd.f32 %v14626_v16, %v6653_v41  ;;  %v6644_v16 = vadd.f32 %v14587_v31, %v14593_v26  ;;  %v6863_v35 = vadd.f32 %v14610_v59, %v6647_v23  ;;  %v15996_v59 = vld [vmem:[#allocation157_spill] sm:$0xff] }
 0x83b   : > { %v7048_v44 = vadd.f32 %v14628_v46, %v6865_v37  ;;  %v15997_v46 = vld [vmem:[#allocation135_spill] sm:$0xff] }
 0x83d   : > { %v6676_v3 = vpop.f32.mrf.mxu1  ;;  %v6838_v49 = vpop.f32.mrf.mxu2 }
 0x83e   : > { %v7021_v27 = vpop.f32.mrf.mxu3  ;;  %v6556_v39 = vpop.f32.mrf.mxu0  ;;  %v6872_v15 = vadd.f32 %v6838_v49, %v6674_v60  ;;  %v15999_v49 = vld [vmem:[#allocation104_spill] sm:$0xff]  ;;  %v16003_v60 = vld [vmem:[#allocation154_spill] sm:$0xff] }
 0x83f   : > { %v6677_v10 = vadd.f32 %v6676_v3, %v6556_v39  ;;  %v6870_v39 = vadd.f32 %v6832_v57, %v6668_v61  ;;  %v6862_v57 = vadd.f32 %v14602_v34, %v6644_v16  ;;  %v16001_v34 = vld [vmem:[#allocation85_spill] sm:$0xff] }
 0x845   : > { %v6679_v12 = vpop.f32.mrf.mxu1  ;;  %v6841_v7 = vpop.f32.mrf.mxu2 }
 0x846   : > { %v7024_v24 = vpop.f32.mrf.mxu3  ;;  %v6559_v36 = vpop.f32.mrf.mxu0  ;;  %v6873_v25 = vadd.f32 %v6841_v7, %v6677_v10 }
 0x847   : > { %v6680_v56 = vadd.f32 %v6679_v12, %v6559_v36  ;;  %v7055_v12 = vadd.f32 %v7021_v27, %v6872_v15  ;;  %v6656_v15 = vadd.f32 %v14624_v13, %v14630_v48  ;;  %v6650_v48 = vadd.f32 %v14608_v28, %v14614_v40 }
 0x848   : > { %v7056_v3 = vadd.f32 %v7024_v24, %v6873_v25  ;;  %v7046_v27 = vadd.f32 %v15999_v49, %v6863_v35  ;;  %v16002_v24 = vld [vmem:[#allocation100_spill] sm:$0xff] }
 0x849   : > { %v14662_v61 = vadd.f32 %v14649_v54, %v7055_v12  ;;  %v7095_v49 = vld [vmem:[%s15150_s6 + $0x48] sm:$0x1f] }
 0x84a   : > { %v14655_v47 = vadd.f32 %v14649_v54, %v7056_v3  ;;  %v7045_v3 = vadd.f32 %v16003_v60, %v6862_v57  ;;  %v7091_v57 = vld [vmem:[%s15150_s6 + $0x28] sm:$0xff]  ;;  %v8997_v60 = vld [vmem:[%s15150_s6 + $0xb0] sm:$0xff] }
 0x84d   : > { %v14642_v18 = vpop.f32.mrf.mxu1  ;;  %v6844_v20 = vpop.f32.mrf.mxu2 }
 0x84e   : > { %v6874_v50 = vadd.f32 %v6844_v20, %v6680_v56  ;;  %v7027_v38 = vpop.f32.mrf.mxu3  ;;  %v14644_v55 = vpop.f32.mrf.mxu0  ;;  %v6869_v20 = vadd.f32 %v6829_v43, %v6665_v5  ;;  %v7054_v56 = vadd.f32 %v7018_v4, %v6871_v45  ;;  %v7050_v43 = vadd.f32 %v14638_v17, %v6867_v9 }
 0x850   : > { %v7057_v21 = vadd.f32 %v7027_v38, %v6874_v50  ;;  %v6868_v50 = vadd.f32 %v6826_v32, %v6662_v14  ;;  %v7053_v38 = vadd.f32 %v7015_v0, %v6870_v39  ;;  %v7052_v2 = vadd.f32 %v7012_v63, %v6869_v20  ;;  %v16004_v39 = vld [vmem:[#allocation98_spill] sm:$0xff]  ;;  %v16005_v14 = vld [vmem:[#allocation101_spill] sm:$0xff] }
 0x851   : > { %v14676_v30 = vadd.f32 %v14649_v54, %v7054_v56  ;;  %v6866_v32 = vadd.f32 %v14632_v62, %v6656_v15  ;;  %v6638_v0 = vadd.f32 %v15997_v46, %v15996_v59  ;;  %v14748_v56 = vadd.f32 %v14649_v54, %v7046_v27  ;;  %v8986_v59 = vld [vmem:[%s15150_s6 + $0x88] sm:$0xff]  ;;  %v7093_v46 = vld [vmem:[%s15150_s6 + $0x38] sm:$0xff]  ;;  %v7094_v27 = vld [vmem:[%s15150_s6 + $0x40] sm:$0x1f] }
 0x852   : > { %v14652_v7 = vadd.f32 %v14649_v54, %v7057_v21  ;;  %v7051_v53 = vadd.f32 %v14640_v1, %v6868_v50  ;;  %v14685_v13 = vadd.f32 %v14649_v54, %v7053_v38  ;;  %v14694_v6 = vadd.f32 %v14649_v54, %v7052_v2  ;;  %v16007_v2 = vld [vmem:[#allocation95_spill] sm:$0xff] }
 0x853   : > { %v6864_v1 = vadd.f32 %v14618_v42, %v6650_v48  ;;  %v7049_v63 = vadd.f32 %v14634_v22, %v6866_v32  ;;  %v14714_v42 = vadd.f32 %v14649_v54, %v7050_v43  ;;  %v6641_v22 = vadd.f32 %v14574_v58, %v14580_v29  ;;  %v16000_v29 = vld [vmem:[#allocation138_spill] sm:$0xff] }
 0x854   : > { %7115 = vmatpush.msra.mxu0 %v14652_v7  ;;  %7205 = vmatpush.msra.mxu2 %v14652_v7  ;;  %v14703_v28 = vadd.f32 %v14649_v54, %v7051_v53  ;;  %v14732_v58 = vadd.f32 %v14649_v54, %v7048_v44  ;;  %v6860_v36 = vadd.f32 %v16002_v24, %v6638_v0  ;;  %v7092_v0 = vld [vmem:[%s15150_s6 + $0x30] sm:$0xff]  ;;  %v9013_v24 = vld [vmem:[%s15150_s6 + $0x100] sm:$0xff] }
 0x855   : > { %v14659_v19 = vpop.f32.mrf.mxu2  ;;  %v14672_v8 = vpop.f32.mrf.mxu1  ;;  %v7047_v31 = vadd.f32 %v14620_v51, %v6864_v1  ;;  %v14723_v26 = vadd.f32 %v14649_v54, %v7049_v63  ;;  %v6861_v4 = vadd.f32 %v15998_v52, %v6641_v22  ;;  %v6635_v51 = vadd.f32 %v16001_v34, %v16000_v29  ;;  %v8987_v52 = vld [vmem:[%s15150_s6 + $0x90] sm:$0x1f]  ;;  %v9012_v29 = vld [vmem:[%s15150_s6 + $0xf8] sm:$0xff]  ;;  %v8996_v34 = vld [vmem:[%s15150_s6 + $0xa8] sm:$0xff] }
 0x856   : > { %v14664_v25 = vpop.f32.mrf.mxu3  ;;  %7116 = vmatpush.msra.mxu0 %v14655_v47  ;;  %7206 = vmatpush.msra.mxu2 %v14655_v47  ;;  %v14668_v45 = vpop.f32.mrf.mxu0  ;;  %v7043_v50 = vadd.f32 %v16006_v33, %v6860_v36  ;;  %v14754_v15 = vadd.f32 %v14649_v54, %v7045_v3  ;;  %v6683_v63 = vadd.f32 %v14642_v18, %v14644_v55  ;;  %v9014_v36 = vld [vmem:[%s15150_s6 + $0x108] sm:$0xff]  ;;  %v9015_v3 = vld [vmem:[%s15150_s6 + $0x110] sm:$0xff] }
 0x857   : > { %v14741_v21 = vadd.f32 %v14649_v54, %v7047_v31  ;;  %v6859_v12 = vadd.f32 %v16004_v39, %v6635_v51  ;;  %v7044_v20 = vadd.f32 %v16005_v14, %v6861_v4  ;;  %v6686_v48 = vadd.f32 %v14672_v8, %v14668_v45  ;;  %v7090_v31 = vld [vmem:[%s15150_s6 + $0x20] sm:$0xff]  ;;  %v8988_v4 = vld [vmem:[%s15150_s6 + $0x98] sm:$0x1f]  ;;  %v9018_v14 = vld [vmem:[%s15150_s6 + $0x128] sm:$0xff] }
 0x858   : > { %7117 = vmatpush.msra.mxu0 %v14662_v61  ;;  %7207 = vmatpush.msra.mxu2 %v14662_v61  ;;  %v14767_v23 = vadd.f32 %v14649_v54, %v7043_v50  ;;  %v6875_v35 = vadd.f32 %v14659_v19, %v6683_v63  ;;  %v8995_v51 = vld [vmem:[%s15150_s6 + $0xa0] sm:$0xff]  ;;  %v9019_v33 = vld [vmem:[%s15150_s6 + $0x130] sm:$0x1f]  ;;  %v9020_v50 = vld [vmem:[%s15150_s6 + $0x138] sm:$0x1f] }
 0x859   : > { %v7042_v41 = vadd.f32 %v16007_v2, %v6859_v12  ;;  %v14760_v32 = vadd.f32 %v14649_v54, %v7044_v20  ;;  %v8999_v39 = vld [vmem:[%s15150_s6 + $0xc0] sm:$0xff]  ;;  %v9002_v20 = vld [vmem:[%s15150_s6 + $0xd8] sm:$0xff] }
 0x85a   : > { %7118 = vmatpush.msra.mxu0 %v14676_v30  ;;  %7208 = vmatpush.msra.mxu2 %v14676_v30  ;;  %v7058_v19 = vadd.f32 %v14664_v25, %v6875_v35  ;;  %v7086_v25 = vld [vmem:[%s15150_s6] sm:$0xff] }
 0x85b   : > { %v14774_v45 = vadd.f32 %v14649_v54, %v7042_v41  ;;  %v9017_v12 = vld [vmem:[%s15150_s6 + $0x120] sm:$0xff] }
 0x85c   : > { %7119 = vmatpush.msra.mxu0 %v14685_v13  ;;  %7209 = vmatpush.msra.mxu2 %v14685_v13 }
 0x85d   : > { %v6850_v62 = vpop.f32.mrf.mxu2  ;;  %v6688_v11 = vpop.f32.mrf.mxu1 }
 0x85e   : > { %v14705_v40 = vpop.f32.mrf.mxu3  ;;  %7120 = vmatpush.msra.mxu0 %v14694_v6  ;;  %7210 = vmatpush.msra.mxu2 %v14694_v6  ;;  %v6568_v17 = vpop.f32.mrf.mxu0  ;;  %v6876_v16 = vadd.f32 %v6850_v62, %v6686_v48 }
 0x85f   : > { %v6689_v9 = vadd.f32 %v6688_v11, %v6568_v17  ;;  %v8984_v11 = vld [vmem:[%s15150_s6 + $0x78] sm:$0xff] }
 0x860   : > { %7121 = vmatpush.msra.mxu0 %v14703_v28  ;;  %7211 = vmatpush.msra.mxu2 %v14703_v28  ;;  %v7059_v18 = vadd.f32 %v14705_v40, %v6876_v16 }
 0x862   : > { %7122 = vmatpush.msra.mxu0 %v14714_v42  ;;  %7212 = vmatpush.msra.mxu2 %v14714_v42  ;;  %v7083_v40 = vadd.f32 %v14649_v54, %v7059_v18 }
 0x864   : > { %7123 = vmatpush.msra.mxu0 %v14723_v26  ;;  %7213 = vmatpush.msra.mxu2 %v14723_v26 }
 0x865   : > { %v6853_v10 = vpop.f32.mrf.mxu2  ;;  %v6691_v53 = vpop.f32.mrf.mxu1 }
 0x866   : > { %v7036_v5 = vpop.f32.mrf.mxu3  ;;  %7124 = vmatpush.msra.mxu0 %v14732_v58  ;;  %7214 = vmatpush.msra.mxu2 %v14732_v58  ;;  %v6571_v38 = vpop.f32.mrf.mxu0  ;;  %v6877_v37 = vadd.f32 %v6853_v10, %v6689_v9  ;;  %v8998_v10 = vld [vmem:[%s15150_s6 + $0xb8] sm:$0xff] }
 0x867   : > { %v6692_v43 = vadd.f32 %v6691_v53, %v6571_v38  ;;  %v9004_v38 = vld [vmem:[%s15150_s6 + $0xe8] sm:$0x1f] }
 0x868   : > { %7125 = vmatpush.msra.mxu0 %v14741_v21  ;;  %7215 = vmatpush.msra.mxu2 %v14741_v21  ;;  %v7060_v44 = vadd.f32 %v7036_v5, %v6877_v37  ;;  %v9000_v5 = vld [vmem:[%s15150_s6 + $0xc8] sm:$0xff] }
 0x86a   : > { %7126 = vmatpush.msra.mxu0 %v14748_v56  ;;  %7216 = vmatpush.msra.mxu2 %v14748_v56  ;;  %v7084_v62 = vadd.f32 %v14649_v54, %v7060_v44 }
 0x86c   : > { %7127 = vmatpush.msra.mxu0 %v14754_v15  ;;  %7217 = vmatpush.msra.mxu2 %v14754_v15 }
 0x86d   : > { %v6856_v1 = vpop.f32.mrf.mxu2 }
 0x86e   : > { %v6878_v17 = vadd.f32 %v6856_v1, %v6692_v43  ;;  %7128 = vmatpush.msra.mxu0 %v14760_v32  ;;  %7218 = vmatpush.msra.mxu2 %v14760_v32  ;;  %v7039_v8 = vpop.f32.mrf.mxu3 }
 0x870   : > { %v7061_v22 = vadd.f32 %v7039_v8, %v6878_v17  ;;  %7129 = vmatpush.msra.mxu0 %v14767_v23  ;;  %7219 = vmatpush.msra.mxu2 %v14767_v23  ;;  %v7470_v17 = vld [vmem:[%s15151_s7 + $0x8] sm:$0x3] }
 0x872   : > { %v7085_v55 = vadd.f32 %v14649_v54, %v7061_v22  ;;  %7130 = vmatpush.msra.mxu0 %v14774_v45  ;;  %7220 = vmatpush.msra.mxu2 %v14774_v45  ;;  %v7565_v22 = vld [vmem:[%s15151_s7 + $0x1c] sm:$0x3] }
 0x873   : > { %7131 = vmatmul.f32.vlgmr.msra.gmra.mxu0 %v7086_v25 }
 0x874   : > { %7300 = vmatpush.msrb.mxu0 %v14652_v7  ;;  %7395 = vmatpush.msrb.mxu2 %v14652_v7  ;;  %v7082_v7 = vadd.f32 %v14649_v54, %v7058_v19  ;;  %v8979_v54 = vld [vmem:[%s15150_s6 + $0x50] sm:$0xff]  ;;  %v7621_v19 = vld [vmem:[%s15151_s7 + $0x26] sm:$0x3] }
 0x875   : > { %8973 = vmatpush.msk.msra.mxu1 %vm1847_vm3, %v7085_v55  ;;  %8989 = vmatpush.msk.msra.mxu3 %vm1847_vm3, %v7085_v55 }
 0x876   : > { %7301 = vmatpush.msrb.mxu0 %v14655_v47  ;;  %7396 = vmatpush.msrb.mxu2 %v14655_v47  ;;  %v8980_v47 = vld [vmem:[%s15150_s6 + $0x58] sm:$0xff] }
 0x877   : > { %7160 = vmatpush.msra.mxu1 %v7084_v62  ;;  %7250 = vmatpush.msra.mxu3 %v7084_v62 }
 0x878   : > { %7302 = vmatpush.msrb.mxu0 %v14662_v61  ;;  %7397 = vmatpush.msrb.mxu2 %v14662_v61  ;;  %v7087_v61 = vld [vmem:[%s15150_s6 + $0x8] sm:$0xff] }
 0x879   : > { %7161 = vmatpush.msra.mxu1 %v7083_v40  ;;  %7251 = vmatpush.msra.mxu3 %v7083_v40 }
 0x87a   : > { %7303 = vmatpush.msrb.mxu0 %v14676_v30  ;;  %7398 = vmatpush.msrb.mxu2 %v14676_v30  ;;  %v8981_v30 = vld [vmem:[%s15150_s6 + $0x60] sm:$0xff] }
 0x87b   : > { %7162 = vmatpush.msra.mxu1 %v7082_v7  ;;  %7252 = vmatpush.msra.mxu3 %v7082_v7 }
 0x87c   : > { %7304 = vmatpush.msrb.mxu0 %v14685_v13  ;;  %7399 = vmatpush.msrb.mxu2 %v14685_v13  ;;  %v8982_v13 = vld [vmem:[%s15150_s6 + $0x68] sm:$0xff] }
 0x87d   : > { %9005 = vmatpush.msk.msrb.mxu1 %vm1847_vm3, %v7085_v55  ;;  %9021 = vmatpush.msk.msrb.mxu3 %vm1847_vm3, %v7085_v55 }
 0x87e   : > { %7305 = vmatpush.msrb.mxu0 %v14694_v6  ;;  %7400 = vmatpush.msrb.mxu2 %v14694_v6  ;;  %v7089_v6 = vld [vmem:[%s15150_s6 + $0x18] sm:$0xff] }
 0x87f   : > { %7345 = vmatpush.msrb.mxu1 %v7084_v62  ;;  %7440 = vmatpush.msrb.mxu3 %v7084_v62  ;;  %v7472_v62 = vld [vmem:[%s15151_s7 + $0x12] sm:$0x3] }
 0x880   : > { %7306 = vmatpush.msrb.mxu0 %v14703_v28  ;;  %7401 = vmatpush.msrb.mxu2 %v14703_v28  ;;  %v7088_v28 = vld [vmem:[%s15150_s6 + $0x10] sm:$0xff] }
 0x881   : > { %7346 = vmatpush.msrb.mxu1 %v7083_v40  ;;  %7441 = vmatpush.msrb.mxu3 %v7083_v40 }
 0x882   : > { %7307 = vmatpush.msrb.mxu0 %v14714_v42  ;;  %7402 = vmatpush.msrb.mxu2 %v14714_v42  ;;  %v8983_v42 = vld [vmem:[%s15150_s6 + $0x70] sm:$0xff] }
 0x883   : > { %7347 = vmatpush.msrb.mxu1 %v7082_v7  ;;  %7442 = vmatpush.msrb.mxu3 %v7082_v7  ;;  %v7564_v7 = vld [vmem:[%s15151_s7 + $0x14] sm:$0xff] }
 0x884   : > { %7308 = vmatpush.msrb.mxu0 %v14723_v26  ;;  %7221 = vmatmul.f32.vlgmr.msra.gmra.mxu2 %v8979_v54  ;;  %v7620_v54 = vld [vmem:[%s15151_s7 + $0x1e] sm:$0xff] }
 0x885   : > { %7403 = vmatpush.msrb.mxu2 %v14723_v26  ;;  %8990 = vmatmul.msk.f32.vlgmr.msra.gmra.mxu3 %vm7096_vm8, %v8980_v47  ;;  %v8985_v26 = vld [vmem:[%s15150_s6 + $0x80] sm:$0xff]  ;;  %v7471_v47 = vld [vmem:[%s15151_s7 + $0xa] sm:$0xff] }
 0x886   : > { %7309 = vmatpush.msrb.mxu0 %v14732_v58  ;;  %8974 = vmatmul.msk.f32.vlgmr.msra.gmra.mxu1 %vm7096_vm8, %v7087_v61 }
 0x887   : > { %7404 = vmatpush.msrb.mxu2 %v14732_v58  ;;  %7134 = vmatmul.f32.gmra.mxu0 %v7088_v28  ;;  %v9011_v58 = vld [vmem:[%s15150_s6 + $0xf0] sm:$0xff] }
 0x888   : > { %7310 = vmatpush.msrb.mxu0 %v14741_v21  ;;  %9032 = vmatpush.msk.msra.mxu1 %vm6493_vm6, %v7470_v17 }
 0x889   : > { %7405 = vmatpush.msrb.mxu2 %v14741_v21  ;;  %v9016_v21 = vld [vmem:[%s15150_s6 + $0x118] sm:$0xff]  ;;  %9042 = vmatpush.msk.msra.mxu3 %vm6493_vm6, %v7621_v19 }
 0x88a   : > { %7311 = vmatpush.msrb.mxu0 %v14748_v56 }
 0x88b   : > { %7406 = vmatpush.msrb.mxu2 %v14748_v56  ;;  %v9001_v56 = vld [vmem:[%s15150_s6 + $0xd0] sm:$0xff]  ;;  %7657 = vmatpush.msra.mxu3 %v7620_v54 }
 0x88c   : > { %7312 = vmatpush.msrb.mxu0 %v14754_v15  ;;  %7224 = vmatmul.f32.gmra.mxu2 %v8981_v30 }
 0x88d   : > { %7407 = vmatpush.msrb.mxu2 %v14754_v15  ;;  %8991 = vmatmul.msk.f32.gmra.mxu3 %vm7096_vm8, %v8982_v13  ;;  %v9003_v15 = vld [vmem:[%s15150_s6 + $0xe0] sm:$0x1f] }
 0x88e   : > { %7313 = vmatpush.msrb.mxu0 %v14760_v32  ;;  %8975 = vmatmul.msk.f32.gmra.mxu1 %vm7096_vm8, %v7089_v6 }
 0x88f   : > { %7408 = vmatpush.msrb.mxu2 %v14760_v32  ;;  %7137 = vmatmul.f32.gmra.mxu0 %v7090_v31 }
 0x890   : > { %7314 = vmatpush.msrb.mxu0 %v14767_v23 }
 0x891   : > { %7409 = vmatpush.msrb.mxu2 %v14767_v23 }
 0x892   : > { %7315 = vmatpush.msrb.mxu0 %v14774_v45 }
 0x893   : > { %7410 = vmatpush.msrb.mxu2 %v14774_v45  ;;  %v7469_v45 = vld [vmem:[%s15151_s7] sm:$0xff] }
 0x894   : > { %7227 = vmatmul.f32.gmra.mxu2 %v8983_v42  ;;  %7550 = vmatpush.msra.mxu1 %v7469_v45 }
 0x895   : > { %8992 = vmatmul.msk.f32.gmra.mxu3 %vm7096_vm8, %v8984_v11  ;;  %9037 = vmatpush.msk.msra.mxu2 %vm6493_vm6, %v7565_v22 }
 0x896   : > { %8976 = vmatmul.msk.f32.gmra.mxu1 %vm7096_vm8, %v7091_v57  ;;  %9027 = vmatpush.msk.msra.mxu0 %vm6493_vm6, %v7472_v62 }
 0x897   : > { %7140 = vmatmul.f32.gmra.mxu0 %v7092_v0  ;;  %7602 = vmatpush.msra.mxu2 %v7564_v7 }
 0x898   : > { %7510 = vmatpush.msra.mxu0 %v7471_v47 }
 0x89c   : > { %7230 = vmatmul.f32.gmra.mxu2 %v8985_v26 }
 0x89d   : > { %8993 = vmatmul.msk.f32.gmra.mxu3 %vm7096_vm8, %v8986_v59 }
 0x89e   : > { %8977 = vmatmul.msk.f32.gmra.mxu1 %vm7096_vm8, %v7093_v46 }
 0x89f   : > { %7143 = vmatmul.f32.gmra.mxu0 %v7094_v27 }
 0x8a4   : > { %7233 = vmatmul.f32.gmra.mxu2 %v8987_v52 }
 0x8a5   : > { %8994 = vmatmul.msk.f32.gmra.mxu3 %vm7096_vm8, %v8988_v4 }
 0x8a6   : > { %8978 = vmatmul.msk.f32.gmra.mxu1 %vm7096_vm8, %v7095_v49 }
 0x8a7   : > { %7316 = vmatmul.f32.vlgmr.msrb.gmra.mxu0 %v8995_v51 }
 0x8ac   : > { %7411 = vmatmul.f32.vlgmr.msrb.gmra.mxu2 %v9011_v58 }
 0x8ad   : > { %9022 = vmatmul.msk.f32.vlgmr.msrb.gmra.mxu3 %vm7096_vm8, %v9012_v29 }
 0x8ae   : > { %9006 = vmatmul.msk.f32.vlgmr.msrb.gmra.mxu1 %vm7096_vm8, %v8996_v34 }
 0x8af   : > { %7319 = vmatmul.f32.gmra.mxu0 %v8997_v60 }
 0x8b4   : > { %7414 = vmatmul.f32.gmra.mxu2 %v9013_v24 }
 0x8b5   : > { %9023 = vmatmul.msk.f32.gmra.mxu3 %vm7096_vm8, %v9014_v36 }
 0x8b6   : > { %9007 = vmatmul.msk.f32.gmra.mxu1 %vm7096_vm8, %v8998_v10 }
 0x8b7   : > { %7322 = vmatmul.f32.gmra.mxu0 %v8999_v39 }
 0x8bc   : > { %7417 = vmatmul.f32.gmra.mxu2 %v9015_v3 }
 0x8bd   : > { %9024 = vmatmul.msk.f32.gmra.mxu3 %vm7096_vm8, %v9016_v21 }
 0x8be   : > { %9008 = vmatmul.msk.f32.gmra.mxu1 %vm7096_vm8, %v9000_v5 }
 0x8bf   : > { %7325 = vmatmul.f32.gmra.mxu0 %v9001_v56 }
 0x8c4   : > { %7420 = vmatmul.f32.gmra.mxu2 %v9017_v12 }
 0x8c5   : > { %9025 = vmatmul.msk.f32.gmra.mxu3 %vm7096_vm8, %v9018_v14 }
 0x8c6   : > { %9009 = vmatmul.msk.f32.gmra.mxu1 %vm7096_vm8, %v9002_v20 }
 0x8c7   : > { %7328 = vmatmul.f32.gmra.mxu0 %v9003_v15 }
 0x8cc   : > { %7423 = vmatmul.f32.gmra.mxu2 %v9019_v33 }
 0x8cd   : > { %9026 = vmatmul.msk.f32.gmra.mxu3 %vm7096_vm8, %v9020_v50 }
 0x8ce   : > { %9010 = vmatmul.msk.f32.gmra.mxu1 %vm7096_vm8, %v9004_v38 }
 0x8f0   : > { %v7132_v2 = vpop.f32.mrf.mxu0 }
 0x903   : > { %v7164_v9 = vpop.f32.mrf.mxu1 }
 0x904   : > { %v7135_v48 = vpop.f32.mrf.mxu0  ;;  %v7165_v28 = vadd.f32 %v7164_v9, %v7132_v2 }
 0x907   : > { %v7222_v41 = vpop.f32.mrf.mxu2 }
 0x908   : > { %v7254_v32 = vpop.f32.mrf.mxu3 }
 0x909   : > { %v7255_v30 = vadd.f32 %v7254_v32, %v7222_v41 }
 0x90b   : > { %v7167_v53 = vpop.f32.mrf.mxu1  ;;  %v7269_v11 = vmax.f32 %v7165_v28, %v7255_v30 }
 0x90c   : > { %v7138_v1 = vpop.f32.mrf.mxu0  ;;  %v7168_v49 = vadd.f32 %v7167_v53, %v7135_v48 }
 0x90f   : > { %v7225_v37 = vpop.f32.mrf.mxu2 }
 0x910   : > { %v7257_v43 = vpop.f32.mrf.mxu3 }
 0x911   : > { %v7258_v46 = vadd.f32 %v7257_v43, %v7225_v37 }
 0x913   : > { %v7170_v23 = vpop.f32.mrf.mxu1  ;;  %v7270_v29 = vmax.f32 %v7168_v49, %v7258_v46 }
 0x914   : > { %v14972_v35 = vpop.f32.mrf.mxu0  ;;  %v7171_v21 = vadd.f32 %v7170_v23, %v7138_v1 }
 0x917   : > { %v7228_v63 = vpop.f32.mrf.mxu2 }
 0x918   : > { %v7260_v16 = vpop.f32.mrf.mxu3 }
 0x919   : > { %v7261_v10 = vadd.f32 %v7260_v16, %v7228_v63 }
 0x91b   : > { %v14970_v8 = vpop.f32.mrf.mxu1  ;;  %v7271_v14 = vmax.f32 %v7171_v21, %v7261_v10 }
 0x91c   : > { %v14988_v40 = vpop.f32.mrf.mxu0  ;;  %v7174_v63 = vadd.f32 %v14970_v8, %v14972_v35 }
 0x91f   : > { %v14974_v44 = vpop.f32.mrf.mxu2 }
 0x920   : > { %v7263_v18 = vpop.f32.mrf.mxu3 }
 0x921   : > { %v7264_v43 = vadd.f32 %v7263_v18, %v14974_v44 }
 0x923   : > { %v14980_v55 = vpop.f32.mrf.mxu1  ;;  %v7272_v22 = vmax.f32 %v7174_v63, %v7264_v43 }
 0x924   : > { %v7317_v6 = vpop.f32.mrf.mxu0 }
 0x927   : > { %v15001_v61 = vpop.f32.mrf.mxu2 }
 0x928   : > { %v15003_v25 = vpop.f32.mrf.mxu3 }
 0x929   : > { %v7267_v8 = vadd.f32 %v15003_v25, %v15001_v61 }
 0x92b   : > { %v7349_v13 = vpop.f32.mrf.mxu1 }
 0x92c   : > { %v7350_v42 = vadd.f32 %v7349_v13, %v7317_v6  ;;  %v7320_v4 = vpop.f32.mrf.mxu0 }
 0x92e   : > { %v7364_v26 = vmax.f32 %v7269_v11, %v7350_v42  ;;  %v7177_v42 = vadd.f32 %v14980_v55, %v14988_v40 }
 0x92f   : > { %v7412_v57 = vpop.f32.mrf.mxu2 }
 0x930   : > { %v7444_v31 = vpop.f32.mrf.mxu3 }
 0x931   : > { %v7445_v59 = vadd.f32 %v7444_v31, %v7412_v57 }
 0x933   : > { %v7459_v0 = vmax.f32 %v7364_v26, %v7445_v59  ;;  %v7352_v52 = vpop.f32.mrf.mxu1  ;;  %v7273_v26 = vmax.f32 %v7177_v42, %v7267_v8  ;;  %v7882_v8 = vld [vmem:[%s15154_s10 + $0x4c] sm:$0xf]  ;;  %v7881_v42 = vld [vmem:[%s15154_s10 + $0x44] sm:$0xff] }
 0x934   : > { %v7353_v58 = vadd.f32 %v7352_v52, %v7320_v4  ;;  %v7323_v5 = vpop.f32.mrf.mxu0 }
 0x935   : > { %v7464_v27 = vmax.f32 %v7459_v0, 0.0 }
 0x936   : > { %v7365_v24 = vmax.f32 %v7270_v29, %v7353_v58 }
 0x937   : > { %v7415_v34 = vpop.f32.mrf.mxu2  ;;  %9033 = vmatmul.msk.f32.vlgmr.msra.gmra.mxu1 %vm6452_vm7, %v7464_v27  ;;  %v7477_v20 = vrot.slane %v7464_v27, 1  ;;  %v7567_v56 = vrot.slane %v7464_v27, 6  ;;  %v7622_v33 = vrot.slane %v7464_v27, 7 }
 0x938   : > { %v7447_v51 = vpop.f32.mrf.mxu3 }
 0x939   : > { %v7448_v36 = vadd.f32 %v7447_v51, %v7415_v34 }
 0x93b   : > { %v7460_v60 = vmax.f32 %v7365_v24, %v7448_v36  ;;  %v7355_v3 = vpop.f32.mrf.mxu1 }
 0x93c   : > { %v7356_v12 = vadd.f32 %v7355_v3, %v7323_v5  ;;  %v7326_v16 = vpop.f32.mrf.mxu0 }
 0x93d   : > { %v7465_v39 = vmax.f32 %v7460_v60, 0.0 }
 0x93e   : > { %v7366_v2 = vmax.f32 %v7271_v14, %v7356_v12 }
 0x93f   : > { %v7478_v50 = vrot.slane %v7465_v39, 1  ;;  %v7568_v38 = vrot.slane %v7465_v39, 6  ;;  %v7623_v15 = vrot.slane %v7465_v39, 7  ;;  %v7418_v9 = vpop.f32.mrf.mxu2  ;;  %9034 = vmatmul.msk.f32.gmra.mxu1 %vm6452_vm7, %v7465_v39 }
 0x940   : > { %v7450_v41 = vpop.f32.mrf.mxu3 }
 0x941   : > { %v7451_v32 = vadd.f32 %v7450_v41, %v7418_v9  ;;  %v7569_v53 = vsel %vm6493_vm6, %v7567_v56, %v7568_v38  ;;  %v7624_v48 = vsel %vm1042_vm0, %v7622_v33, %v7623_v15  ;;  %v7479_v37 = vsel %vm661_vm2, %v7477_v20, %v7478_v50 }
 0x942   : > { %9038 = vmatmul.msk.f32.vlgmr.msra.gmra.mxu2 %vm6452_vm7, %v7569_v53  ;;  %9043 = vmatmul.msk.f32.vlgmr.msra.gmra.mxu3 %vm6452_vm7, %v7624_v48 }
 0x943   : > { %v7461_v23 = vmax.f32 %v7366_v2, %v7451_v32  ;;  %v7358_v1 = vpop.f32.mrf.mxu1  ;;  %9028 = vmatmul.msk.f32.vlgmr.msra.gmra.mxu0 %vm6452_vm7, %v7479_v37 }
 0x944   : > { %v7359_v45 = vadd.f32 %v7358_v1, %v7326_v16  ;;  %v7329_v11 = vpop.f32.mrf.mxu0  ;;  %v9111_v1 = vld [vmem:[%s15152_s8] ss:$0 sm:$0xff] }
 0x945   : > { %v7466_v17 = vmax.f32 %v7461_v23, 0.0 }
 0x946   : > { %v7367_v44 = vmax.f32 %v7272_v22, %v7359_v45 }
 0x947   : > { %v7421_v19 = vpop.f32.mrf.mxu2  ;;  %v7570_v62 = vrot.slane %v7466_v17, 6  ;;  %v7625_v7 = vrot.slane %v7466_v17, 7  ;;  %v7480_v54 = vrot.slane %v7466_v17, 1  ;;  %9035 = vmatmul.msk.f32.gmra.mxu1 %vm6452_vm7, %v7466_v17 }
 0x948   : > { %v7453_v18 = vpop.f32.mrf.mxu3 }
 0x949   : > { %v7454_v47 = vadd.f32 %v7453_v18, %v7421_v19  ;;  %v7571_v30 = vsel %vm6493_vm6, %v7568_v38, %v7570_v62  ;;  %v7626_v13 = vsel %vm1042_vm0, %v7623_v15, %v7625_v7  ;;  %v7481_v6 = vsel %vm661_vm2, %v7478_v50, %v7480_v54  ;;  %v7683_v18 = vld [vmem:[%s15153_s9] sm:$0xf] }
 0x94a   : > { %9039 = vmatmul.msk.f32.gmra.mxu2 %vm6452_vm7, %v7571_v30  ;;  %9044 = vmatmul.msk.f32.gmra.mxu3 %vm6452_vm7, %v7626_v13  ;;  %v7793_v30 = vld [vmem:[%s15154_s10 + $0x10] sm:$0xf]  ;;  %v7852_v13 = vld [vmem:[%s15154_s10 + $0x38] sm:$0xf] }
 0x94b   : > { %v7462_v35 = vmax.f32 %v7367_v44, %v7454_v47  ;;  %v7361_v28 = vpop.f32.mrf.mxu1  ;;  %9029 = vmatmul.msk.f32.gmra.mxu0 %vm6452_vm7, %v7481_v6  ;;  %v9055_v44 = vld [vmem:[%s15153_s9 + $0xc] sm:$0xf]  ;;  %v9049_v47 = vld [vmem:[%s15153_s9 + $0x4] sm:$0xf]  ;;  %v7851_v6 = vld [vmem:[%s15154_s10 + $0x30] sm:$0xff] }
 0x94c   : > { %v7362_v31 = vadd.f32 %v7361_v28, %v7329_v11  ;;  %v7850_v28 = vld [vmem:[%s15154_s10 + $0x28] sm:$0xff]  ;;  %v7795_v11 = vld [vmem:[%s15154_s10 + $0x1c] sm:$0xff] }
 0x94d   : > { %v7467_v57 = vmax.f32 %v7462_v35, 0.0  ;;  %v7796_v35 = vld [vmem:[%s15154_s10 + $0x24] sm:$0xf] }
 0x94e   : > { %v7368_v61 = vmax.f32 %v7273_v26, %v7362_v31  ;;  %v7880_v31 = vld [vmem:[%s15154_s10 + $0x3c] sm:$0xff]  ;;  %v7794_v26 = vld [vmem:[%s15154_s10 + $0x14] sm:$0xff] }
 0x94f   : > { %v7424_v59 = vpop.f32.mrf.mxu2  ;;  %v7572_v46 = vrot.slane %v7467_v57, 6  ;;  %v7627_v0 = vrot.slane %v7467_v57, 7  ;;  %v7482_v52 = vrot.slane %v7467_v57, 1  ;;  %9036 = vmatmul.msk.f32.gmra.mxu1 %vm6452_vm7, %v7467_v57  ;;  %v7792_v57 = vld [vmem:[%s15154_s10 + $0x8] sm:$0xff] }
 0x950   : > { %v7456_v25 = vpop.f32.mrf.mxu3 }
 0x951   : > { %v7457_v4 = vadd.f32 %v7456_v25, %v7424_v59  ;;  %v7573_v49 = vsel %vm6493_vm6, %v7570_v62, %v7572_v46  ;;  %v7628_v27 = vsel %vm1042_vm0, %v7625_v7, %v7627_v0  ;;  %v7483_v58 = vsel %vm661_vm2, %v7480_v54, %v7482_v52  ;;  %v9052_v54 = vld [vmem:[%s15153_s9 + $0x8] sm:$0xf]  ;;  %v7791_v59 = vld [vmem:[%s15154_s10] sm:$0xff] }
 0x952   : > { %9040 = vmatmul.msk.f32.gmra.mxu2 %vm6452_vm7, %v7573_v49  ;;  %9045 = vmatmul.msk.f32.gmra.mxu3 %vm6452_vm7, %v7628_v27 }
 0x953   : > { %v7463_v55 = vmax.f32 %v7368_v61, %v7457_v4  ;;  %9030 = vmatmul.msk.f32.gmra.mxu0 %vm6452_vm7, %v7483_v58 }
 0x955   : > { %v7468_v40 = vmax.f32 %v7463_v55, 0.0 }
 0x957   : > { %v7574_v29 = vrot.slane %v7468_v40, 6  ;;  %v7629_v34 = vrot.slane %v7468_v40, 7 }
 0x959   : > { %v7575_v51 = vsel %vm6493_vm6, %v7572_v46, %v7574_v29  ;;  %v7630_v24 = vsel %vm1042_vm0, %v7627_v0, %v7629_v34  ;;  %v7916_v29 = vld [vmem:[%s15156_s12 + $0x18] sm:$0xff]  ;;  %v7915_v34 = vld [vmem:[%s15156_s12 + $0x10] sm:$0xff] }
 0x95a   : > { %9041 = vmatmul.msk.f32.gmra.mxu2 %vm6452_vm7, %v7575_v51  ;;  %9046 = vmatmul.msk.f32.gmra.mxu3 %vm6452_vm7, %v7630_v24  ;;  %v7914_v51 = vld [vmem:[%s15156_s12 + $0x8] sm:$0xff]  ;;  %v7913_v24 = vld [vmem:[%s15156_s12] sm:$0xff] }
 0x95b   : > { %9031 = vmatmul.msk.f32.gmra.mxu0 %vm6452_vm7, %v7482_v52 }
 0x9b4   : > { %v7552_v36 = vpop.f32.mrf.mxu1 }
 0x9bc   : > { %v7555_v21 = vpop.f32.mrf.mxu1 }
 0x9c0   : > { %v7512_v10 = vpop.f32.mrf.mxu0 }
 0x9c1   : > { %v7553_v53 = vadd.f32 %v7552_v36, %v7512_v10 }
 0x9c4   : > { %v7558_v20 = vpop.f32.mrf.mxu1 }
 0x9c5   : > { %v7604_v60 = vpop.f32.mrf.mxu2  ;;  %v7659_v3 = vpop.f32.mrf.mxu3 }
 0x9c6   : > { %v7616_v23 = vadd.f32 %v7604_v60, %v7553_v53 }
 0x9c8   : > { %v7515_v5 = vpop.f32.mrf.mxu0  ;;  %v7671_v22 = vadd.f32 %v7659_v3, %v7616_v23 }
 0x9c9   : > { %v7556_v9 = vadd.f32 %v7555_v21, %v7515_v5 }
 0x9ca   : > { %v7679_v7 = vadd.f32 %v9111_v1, %v7671_v22 }
 0x9cc   : > { %v7561_v15 = vpop.f32.mrf.mxu1 }
 0x9cd   : > { %v7607_v39 = vpop.f32.mrf.mxu2  ;;  %v7662_v12 = vpop.f32.mrf.mxu3 }
 0x9ce   : > { %v7617_v48 = vadd.f32 %v7607_v39, %v7556_v9  ;;  %v7910_v39 = vld [vmem:[%s15155_s11] sm:$0x1] }
 0x9d0   : > { %v7518_v14 = vpop.f32.mrf.mxu0  ;;  %v7672_v17 = vadd.f32 %v7662_v12, %v7617_v48 }
 0x9d1   : > { %v7559_v38 = vadd.f32 %v7558_v20, %v7518_v14 }
 0x9d2   : > { %v7680_v62 = vadd.f32 %v9111_v1, %v7672_v17 }
 0x9d5   : > { %v7610_v56 = vpop.f32.mrf.mxu2  ;;  %v7665_v33 = vpop.f32.mrf.mxu3 }
 0x9d6   : > { %v7618_v2 = vadd.f32 %v7610_v56, %v7559_v38  ;;  %v7917_v56 = vld [vmem:[%s15157_s13] sm:$0x1] }
 0x9d8   : > { %v7521_v50 = vpop.f32.mrf.mxu0  ;;  %v7673_v63 = vadd.f32 %v7665_v33, %v7618_v2 }
 0x9d9   : > { %v7562_v41 = vadd.f32 %v7561_v15, %v7521_v50 }
 0x9da   : > { %v7681_v19 = vadd.f32 %v9111_v1, %v7673_v63 }
 0x9dd   : > { %v7613_v32 = vpop.f32.mrf.mxu2  ;;  %v7668_v43 = vpop.f32.mrf.mxu3 }
 0x9de   : > { %v7619_v37 = vadd.f32 %v7613_v32, %v7562_v41 }
 0x9e0   : > { %v7674_v16 = vadd.f32 %v7668_v43, %v7619_v37 }
 0x9e2   : > { %v7682_v45 = vadd.f32 %v9111_v1, %v7674_v16 }
 0x9e4   : > { %9047 = vmatpush.msk.msrb.mxu0 %vm7688_vm9, %v7682_v45  ;;  %9050 = vmatpush.msk.msrb.mxu1 %vm7688_vm9, %v7682_v45 }
 0x9e5   : > { %9053 = vmatpush.msk.msrb.mxu2 %vm7688_vm9, %v7682_v45  ;;  %9056 = vmatpush.msk.msrb.mxu3 %vm7688_vm9, %v7682_v45 }
 0x9e6   : > { %7705 = vmatpush.msrb.mxu0 %v7681_v19  ;;  %7730 = vmatpush.msrb.mxu1 %v7681_v19 }
 0x9e7   : > { %7756 = vmatpush.msrb.mxu2 %v7681_v19  ;;  %7782 = vmatpush.msrb.mxu3 %v7681_v19 }
 0x9e8   : > { %7706 = vmatpush.msrb.mxu0 %v7680_v62  ;;  %7731 = vmatpush.msrb.mxu1 %v7680_v62 }
 0x9e9   : > { %7757 = vmatpush.msrb.mxu2 %v7680_v62  ;;  %7783 = vmatpush.msrb.mxu3 %v7680_v62 }
 0x9ea   : > { %7707 = vmatpush.msrb.mxu0 %v7679_v7  ;;  %7732 = vmatpush.msrb.mxu1 %v7679_v7 }
 0x9eb   : > { %7758 = vmatpush.msrb.mxu2 %v7679_v7  ;;  %7784 = vmatpush.msrb.mxu3 %v7679_v7 }
 0x9ec   : > { %9054 = vmatmul.msk.f32.vlgmr.msrb.gmra.mxu2 %vm7684_vm10, %v9052_v54  ;;  %9057 = vmatmul.msk.f32.vlgmr.msrb.gmra.mxu3 %vm7684_vm10, %v9055_v44 }
 0x9ed   : > { %9048 = vmatmul.msk.f32.vlgmr.msrb.gmra.mxu0 %vm7684_vm10, %v7683_v18  ;;  %9051 = vmatmul.msk.f32.vlgmr.msrb.gmra.mxu1 %vm7684_vm10, %v9049_v47 }
 0x9ee   : > { %9060 = vmatpush.msk.msra.mxu1 %vm1847_vm3, %v7793_v30  ;;  %9062 = vmatpush.msk.msra.mxu2 %vm1847_vm3, %v7852_v13 }
 0x9ef   : > { %9064 = vmatpush.msk.msra.mxu3 %vm1847_vm3, %v7882_v8  ;;  %9058 = vmatpush.msk.msra.mxu0 %vm1847_vm3, %v7796_v35 }
 0x9f0   : > { %7873 = vmatpush.msra.mxu2 %v7851_v6  ;;  %7844 = vmatpush.msra.mxu1 %v7792_v57 }
 0x9f1   : > { %7903 = vmatpush.msra.mxu3 %v7881_v42  ;;  %7819 = vmatpush.msra.mxu0 %v7795_v11 }
 0x9f2   : > { %7874 = vmatpush.msra.mxu2 %v7850_v28  ;;  %7845 = vmatpush.msra.mxu1 %v7791_v59 }
 0x9f3   : > { %7904 = vmatpush.msra.mxu3 %v7880_v31  ;;  %7820 = vmatpush.msra.mxu0 %v7794_v26 }
 0x9f5   : > { %7934 = vmatpush.msrb.mxu0 %v7916_v29 }
 0x9f7   : > { %7935 = vmatpush.msrb.mxu0 %v7915_v34 }
 0x9f9   : > { %7936 = vmatpush.msrb.mxu0 %v7914_v51 }
 0x9fb   : > { %7937 = vmatpush.msrb.mxu0 %v7913_v24 }
 0xa6a   : > { %v7709_v46 = vpop.f32.mrf.mxu0  ;;  %v7734_v0 = vpop.f32.mrf.mxu1 }
 0xa6b   : > { %v7737_v52 = vmax.f32 %v7709_v46, %v7734_v0 }
 0xa6f   : > { %v7760_v61 = vpop.f32.mrf.mxu2  ;;  %v7786_v25 = vpop.f32.mrf.mxu3 }
 0xa70   : > { %v7763_v4 = vmax.f32 %v7737_v52, %v7760_v61 }
 0xa72   : > { %v7789_v49 = vmax.f32 %v7763_v4, %v7786_v25 }
 0xa74   : > { %v7790_v27 = vmax.f32 %v7789_v49, 0.0 }
 0xa76   : > { %v7798_v58 = vrot.slane %v7790_v27, 1  ;;  %v7853_v55 = vrot.slane %v7790_v27, 2  ;;  %v7883_v40 = vrot.slane %v7790_v27, 3  ;;  %9061 = vmatmul.msk.f32.vlgmr.msra.gmra.mxu1 %vm7799_vm11, %v7790_v27 }
 0xa78   : > { %9063 = vmatmul.msk.f32.vlgmr.msra.gmra.mxu2 %vm7799_vm11, %v7853_v55  ;;  %9065 = vmatmul.msk.f32.vlgmr.msra.gmra.mxu3 %vm7799_vm11, %v7883_v40 }
 0xa79   : > { %9059 = vmatmul.msk.f32.vlgmr.msra.gmra.mxu0 %vm7799_vm11, %v7798_v58 }
 0xaf3   : > { %v7847_v10 = vpop.f32.mrf.mxu1 }
 0xaf6   : > { %v7822_v36 = vpop.f32.mrf.mxu0 }
 0xaf7   : > { %v7848_v60 = vadd.f32 %v7847_v10, %v7822_v36 }
 0xafb   : > { %v7876_v3 = vpop.f32.mrf.mxu2  ;;  %v7906_v5 = vpop.f32.mrf.mxu3 }
 0xafc   : > { %v7879_v21 = vadd.f32 %v7876_v3, %v7848_v60 }
 0xafe   : > { %v7909_v12 = vadd.f32 %v7906_v5, %v7879_v21 }
 0xb00   : > { %v7911_v14 = vadd.f32 %v7910_v39, %v7909_v12 }
 0xb02   : > { %v7912_v20 = vmax.f32 %v7911_v14, 0.0 }
 0xb04   : > { %9066 = vmatmul.msk.f32.vlgmr.msrb.gmra.mxu0 %vm7918_vm12, %v7912_v20 }
 0xb81   : > { %v7939_v33 = vpop.f32.mrf.mxu0 }
 0xb82   : > { %v7940_v50 = vadd.f32 %v7939_v33, %v7917_v56 }
 0xb84   : > { %7943 = vst.msk [vmem:[%s459_s0] sm:$0x1] %vm7942_vm13, %v7940_v50 }
 0xb85   : > { %9141 = shalt.err (!%p9138_p3)
}
 0xb86   : > { %9070 = dma.vmem_to_hbm [thread:$0]  (%p9291_p5), %s7956_s28, 16, %s7958_s1, %s7945_s15  }
 0xb87 PF: > { %p9076_p4 = scmp.ge.s32.totalorder %s9176_s16, 2  ;;  %s7969_s18 = sand.u32 1, %s9164_s29  }
 0xb88   : > { %s7970_s27 = scalar_lea.sflag [#allocation3], %s7969_s18 }
 0xb89   : > { %p9073_p7 = pnand %p9076_p4, %p9295_p6 }
 0xb8b   : > { %p9074_p8 = pneg %p9073_p7 }
 0xb8d   : > { %9159 = dma.done.wait (%p9074_p8), %s7970_s27, 16  }
 0xb8e   : > { %9161 = vsyncadd (%p9074_p8), %s7970_s27, 4294967280  ;;  %s16008_s2 = sld [smem:[#allocation5_spill]]  ;;  %p24_p9 = scmp.ge.s32.totalorder %s9278_s19, 4  }
 0xb8f   : > { %s16009_s15 = sld [smem:[#allocation6_spill]]  ;;  %s16010_s29 = smov %s9168_s30 }
 0xb90   : > { %s16012_s16 = smov %s9278_s19  ;;  %26 = sbr.rel (!%p24_p9) target bundleno = 7 (0x7), region = 120 }
 0xb94   : > { %s16011_s30 = smov %s16008_s2 }
 0xb95   :  { %7975 = vsyncpa [#allocation3], 1 }
 0xb96   :  { %7977 = vsyncpa [#allocation3 + $0x1], 1 }

</bundles_post_ra>
